<compile_context>
chip_gen: v6e
topology: v6e:2x2x1
jax: 0.10.0
libtpu: 0.0.40
codegen_flags: <defaults>
</compile_context>

<pallas_src>
import jax
import jax.numpy as jnp
from jax.experimental import pallas as pl
from jax.experimental.pallas import tpu as pltpu

C_IN = 3  # input image channels for the synthetic backbone


def _pick_tile(m, cap):
    """Largest divisor of m that is <= cap and a multiple of 8 (else m)."""
    if m <= cap:
        return m
    t = cap - (cap % 8)
    while t >= 8:
        if m % t == 0:
            return t
        t -= 8
    return m


# ----------------------------------------------------------------------------
# Pallas kernel 1: fused pointwise conv (tiny K) + bias + ReLU on the VPU
# ----------------------------------------------------------------------------
def _pointwise_conv_relu_kernel(x_ref, w_ref, b_ref, o_ref):
    x = x_ref[...]                                    # [tm, C], C tiny (e.g. 3)
    acc = x[:, 0:1] * w_ref[0:1, :] + b_ref[...]      # lane-dense [tm, N]
    for c in range(1, x.shape[1]):                    # static, unrolled
        acc = acc + x[:, c:c + 1] * w_ref[c:c + 1, :]
    o_ref[...] = jnp.maximum(acc, 0.0).astype(o_ref.dtype)


def pointwise_conv_relu(x, w, b):
    """x: [M, C] (C small), w: [C, N], b: [N] -> relu(x @ w + b) in f32."""
    M, C = x.shape
    C2, N = w.shape
    assert C == C2
    tm = _pick_tile(M, 512)
    return pl.pallas_call(
        _pointwise_conv_relu_kernel,
        out_shape=jax.ShapeDtypeStruct((M, N), jnp.float32),
        grid_spec=pltpu.PrefetchScalarGridSpec(
            num_scalar_prefetch=0,
            grid=(M // tm,),
            in_specs=[
                pl.BlockSpec((tm, C), lambda i: (i, 0)),
                pl.BlockSpec((C, N), lambda i: (0, 0)),
                pl.BlockSpec((1, N), lambda i: (0, 0)),
            ],
            out_specs=pl.BlockSpec((tm, N), lambda i: (i, 0)),
        ),
        compiler_params=pltpu.CompilerParams(
            dimension_semantics=("parallel",)),
    )(x, w, b.reshape(1, N))


# ----------------------------------------------------------------------------
# Pallas kernel 2: M-parallel, K-tiled matmul + bias, accumulating in o_ref
# ----------------------------------------------------------------------------
def _matmul_bias_kernel(x_ref, w_ref, b_ref, o_ref):
    @pl.when(pl.program_id(1) == 0)
    def _():
        o_ref[...] = jnp.broadcast_to(b_ref[...], o_ref.shape).astype(o_ref.dtype)

    o_ref[...] += jnp.dot(x_ref[...], w_ref[...],
                          preferred_element_type=jnp.float32)


def matmul_bias(x, w, b, *, tm_cap=256, tk_cap=2048):
    """y = x @ w + b; f32 accumulation directly in the K-resident output block."""
    M, K = x.shape
    K2, N = w.shape
    assert K == K2
    tm = _pick_tile(M, tm_cap)
    tk = _pick_tile(K, tk_cap)
    return pl.pallas_call(
        _matmul_bias_kernel,
        out_shape=jax.ShapeDtypeStruct((M, N), jnp.float32),
        grid_spec=pltpu.PrefetchScalarGridSpec(
            num_scalar_prefetch=0,
            grid=(M // tm, K // tk),                  # reduction axis innermost
            in_specs=[
                pl.BlockSpec((tm, tk), lambda m, k: (m, k)),
                pl.BlockSpec((tk, N), lambda m, k: (k, 0)),
                pl.BlockSpec((1, N), lambda m, k: (0, 0)),
            ],
            out_specs=pl.BlockSpec((tm, N), lambda m, k: (m, 0)),
        ),
        compiler_params=pltpu.CompilerParams(
            dimension_semantics=("parallel", "arbitrary")),
    )(x, w, b.reshape(1, N))


# ----------------------------------------------------------------------------
# Pallas kernel 3: fused head tail = conv2 matmul + Linear + BN + ReLU + Linear
# ----------------------------------------------------------------------------
def _head_tail_kernel(cols2_ref, w2_ref, b2_ref, w1_ref, b1_ref,
                      g_ref, beta_ref, w3_ref, o_ref):
    B = o_ref.shape[0]
    S = w1_ref.shape[0]                               # conv2 spatial positions (=4)
    # conv2 (k=4, s=4, p=1) as a matmul; cols2 rows are ordered (s, b).
    h2 = jnp.dot(cols2_ref[...], w2_ref[...],
                 preferred_element_type=jnp.float32) + b2_ref[...]   # [S*B, 128]
    # Flatten + Linear(512, 256): contract over (s, c) with per-s weight slabs
    # (w1_ref[s, c, n] == l1_w[n, c*4 + s]) -> no in-kernel reshape/transpose.
    acc = jnp.dot(h2[0:B, :], w1_ref[0], preferred_element_type=jnp.float32)
    for s in range(1, S):
        acc = acc + jnp.dot(h2[s * B:(s + 1) * B, :], w1_ref[s],
                            preferred_element_type=jnp.float32)
    acc = acc + b1_ref[...]                           # [B, 256]
    # BatchNorm1d (training-mode batch statistics, biased variance) + ReLU.
    mean = jnp.mean(acc, axis=0, keepdims=True)
    var = jnp.mean(jnp.square(acc - mean), axis=0, keepdims=True)
    h = (acc - mean) * jax.lax.rsqrt(var + 1e-5) * g_ref[...] + beta_ref[...]
    h = jnp.maximum(h, 0.0)
    # Linear(256, 128, bias=False).
    o_ref[...] = jnp.dot(h, w3_ref[...],
                         preferred_element_type=jnp.float32).astype(o_ref.dtype)


def head_tail(cols2, w2, b2, w1s, b1, bn_g, bn_b, w3):
    SB, _ = cols2.shape
    S = w1s.shape[0]
    B = SB // S
    N1 = w1s.shape[2]
    N2 = w3.shape[1]
    return pl.pallas_call(
        _head_tail_kernel,
        out_shape=jax.ShapeDtypeStruct((B, N2), jnp.float32),
        grid_spec=pltpu.PrefetchScalarGridSpec(
            num_scalar_prefetch=0,
            grid=(1,),
            in_specs=[
                pl.BlockSpec(cols2.shape, lambda i: (0, 0)),
                pl.BlockSpec(w2.shape, lambda i: (0, 0)),
                pl.BlockSpec((1, w2.shape[1]), lambda i: (0, 0)),
                pl.BlockSpec(w1s.shape, lambda i: (0, 0, 0)),
                pl.BlockSpec((1, N1), lambda i: (0, 0)),
                pl.BlockSpec((1, N1), lambda i: (0, 0)),
                pl.BlockSpec((1, N1), lambda i: (0, 0)),
                pl.BlockSpec(w3.shape, lambda i: (0, 0)),
            ],
            out_specs=pl.BlockSpec((B, N2), lambda i: (0, 0)),
        ),
        compiler_params=pltpu.CompilerParams(
            dimension_semantics=("arbitrary",)),
    )(cols2, w2, b2.reshape(1, -1), w1s, b1.reshape(1, -1),
      bn_g.reshape(1, -1), bn_b.reshape(1, -1), w3)


# ----------------------------------------------------------------------------
# im2col for Conv2d(kernel=4, stride=4, padding=1) on NHWC (lane-dense)
# ----------------------------------------------------------------------------
def _im2col_k4s4p1_nhwc(x_nhwc):
    """Valid only because stride == kernel (non-overlapping windows)."""
    B, H, W, C = x_nhwc.shape
    k, s, p = 4, 4, 1
    assert k == s, "reshape-based im2col requires stride == kernel"
    oh = (H + 2 * p - k) // s + 1
    ow = (W + 2 * p - k) // s + 1
    xp = jnp.pad(x_nhwc, ((0, 0), (p, p), (p, p), (0, 0)))
    xp = xp[:, :oh * k, :ow * k, :]                  # drop unused padded tail
    patches = xp.reshape(B, oh, k, ow, k, C).transpose(0, 1, 3, 2, 4, 5)
    return patches, oh, ow                            # [B, oh, ow, kh, kw, C]


# ----------------------------------------------------------------------------
# Parameters (deterministic, PyTorch-like uniform(-1/sqrt(fan_in), ...))
# ----------------------------------------------------------------------------
def init_params(key):
    ks = jax.random.split(key, 12)

    def u(k, shape, fan_in):
        bound = 1.0 / jnp.sqrt(jnp.float32(fan_in))
        return jax.random.uniform(k, shape, jnp.float32, -bound, bound)

    p = {}
    # synthetic backbone: 1x1 conv C_IN -> 256, + ReLU
    p["bb_w"] = u(ks[0], (256, C_IN), C_IN)
    p["bb_b"] = u(ks[1], (256,), C_IN)
    # projection head
    p["c1_w"] = u(ks[2], (128, 256, 4, 4), 256 * 16)   # Conv2d(256,128,4,4,1)
    p["c1_b"] = u(ks[3], (128,), 256 * 16)
    p["c2_w"] = u(ks[4], (128, 128, 4, 4), 128 * 16)   # Conv2d(128,128,4,4,1)
    p["c2_b"] = u(ks[5], (128,), 128 * 16)
    p["l1_w"] = u(ks[6], (256, 512), 512)              # Linear(512,256)
    p["l1_b"] = u(ks[7], (256,), 512)
    p["bn_g"] = jnp.ones((256,), jnp.float32)          # BatchNorm1d(256)
    p["bn_b"] = jnp.zeros((256,), jnp.float32)
    p["l2_w"] = u(ks[8], (128, 256), 256)              # Linear(256,128, no bias)
    return p


# ----------------------------------------------------------------------------
# Forward passes
# ----------------------------------------------------------------------------
def backbone_forward(params, x_nchw):
    """Synthetic backbone: 1x1 conv C_IN -> 256 + ReLU (fused Pallas kernel)."""
    B, C, H, W = x_nchw.shape
    cols = x_nchw.transpose(0, 2, 3, 1).reshape(B * H * W, C)   # NHWC-flat rows
    feats_flat = pointwise_conv_relu(cols, params["bb_w"].T, params["bb_b"])
    feats_nhwc = feats_flat.reshape(B, H, W, 256)
    feats_nchw = feats_nhwc.transpose(0, 3, 1, 2)               # only NCHW copy
    return feats_nhwc, feats_nchw


def projection_head_forward(params, feats_nhwc):
    B = feats_nhwc.shape[0]
    # conv1: lane-dense NHWC im2col + K-tiled Pallas matmul (K = 256*16 = 4096)
    p1, oh1, ow1 = _im2col_k4s4p1_nhwc(feats_nhwc)
    cols1 = p1.reshape(B * oh1 * ow1, -1)                       # rows (b,oh,ow)
    w1mat = params["c1_w"].transpose(0, 2, 3, 1).reshape(128, -1).T
    h1 = matmul_bias(cols1, w1mat, params["c1_b"])              # [B*oh1*ow1, 128]

    # conv2 + Flatten + Linear + BN + ReLU + Linear, fused into ONE kernel.
    h1_nhwc = h1.reshape(B, oh1, ow1, 128)
    p2, oh2, ow2 = _im2col_k4s4p1_nhwc(h1_nhwc)
    assert oh2 * ow2 == 4, "Flatten -> Linear(512,...) requires a 2x2 conv2 output"
    # rows ordered (s, b) so the fused kernel can take contiguous per-s slabs
    cols2 = p2.transpose(1, 2, 0, 3, 4, 5).reshape(oh2 * ow2 * B, -1)
    w2mat = params["c2_w"].transpose(0, 2, 3, 1).reshape(128, -1).T
    # l1 weight [256, 512], PyTorch flatten index = c*4 + s  ->  slabs [s, c, n]
    w1s = params["l1_w"].reshape(256, 128, 4).transpose(2, 1, 0)
    z = head_tail(cols2, w2mat, params["c2_b"], w1s, params["l1_b"],
                  params["bn_g"], params["bn_b"], params["l2_w"].T)
    return z


def teacher_forward(params, x, bb_grad=True):
    feats_nhwc, feats_nchw = backbone_forward(params, x)
    out = {"features_mid": feats_nchw}
    feats = feats_nchw
    if not bb_grad:
        feats = jax.lax.stop_gradient(feats)        # feats.detach()
        feats_nhwc = jax.lax.stop_gradient(feats_nhwc)
    z = projection_head_forward(params, feats_nhwc)
    return out, z, feats


# ----------------------------------------------------------------------------
# Pure-XLA reference (for numerical validation of the Pallas path)
# ----------------------------------------------------------------------------
def reference_forward(params, x):
    dn = ("NCHW", "OIHW", "NCHW")
    feats = jax.lax.conv_general_dilated(
        x, params["bb_w"][:, :, None, None], (1, 1), ((0, 0), (0, 0)),
        dimension_numbers=dn)
    feats = jnp.maximum(feats + params["bb_b"][None, :, None, None], 0.0)

    def conv(h, w, b):
        y = jax.lax.conv_general_dilated(h, w, (4, 4), ((1, 1), (1, 1)),
                                         dimension_numbers=dn)
        return y + b[None, :, None, None]

    h = conv(feats, params["c1_w"], params["c1_b"])
    h = conv(h, params["c2_w"], params["c2_b"])
    h = h.reshape(h.shape[0], -1)
    h = h @ params["l1_w"].T + params["l1_b"]
    mean = jnp.mean(h, axis=0, keepdims=True)
    var = jnp.mean(jnp.square(h - mean), axis=0, keepdims=True)
    h = (h - mean) * jax.lax.rsqrt(var + 1e-5) * params["bn_g"] + params["bn_b"]
    h = jnp.maximum(h, 0.0)
    z = h @ params["l2_w"].T
    return feats, z


if __name__ == "__main__":
    key = jax.random.PRNGKey(0)
    kp, kx = jax.random.split(key)
    params = init_params(kp)
    x = jax.random.normal(kx, (2, C_IN, 32, 32), jnp.float32)

    fwd = jax.jit(teacher_forward, static_argnums=2)
    out, z, feats = fwd(params, x, True)
    jax.block_until_ready((out, z, feats))

    assert feats.shape == (2, 256, 32, 32)
    assert z.shape == (2, 128)
    assert out["features_mid"].shape == (2, 256, 32, 32)

    feats_ref, z_ref = jax.jit(reference_forward)(params, x)
    jax.block_until_ready((feats_ref, z_ref))
    assert bool(jnp.allclose(feats, feats_ref, rtol=2e-3, atol=2e-3))
    assert bool(jnp.allclose(z, z_ref, rtol=2e-3, atol=2e-3))

    # TODO(synk): BatchNorm1d running-stats update / eval-mode path not modeled
    # (training-mode batch statistics only, matching PyTorch .train() forward).
    print("KERNEL_OK")
</pallas_src>

<mosaic_0001>
module attributes {stable_mosaic.version = 11 : i64} {
  func.func @_pointwise_conv_relu_kernel(%arg0: i32, %arg1: memref<512x3xf32, #tpu.memory_space<vmem>>, %arg2: memref<3x256xf32, #tpu.memory_space<vmem>>, %arg3: memref<1x256xf32, #tpu.memory_space<vmem>>, %arg4: memref<512x256xf32, #tpu.memory_space<vmem>>) attributes {dimension_semantics = [#tpu.dimension_semantics<parallel>], iteration_bounds = array<i64: 4>, scalar_prefetch = 0 : i64, scratch_operands = 0 : i64, tpu.core_type = #tpu.core_type<tc>, window_params = [{transform_indices = @transform_0, window_bounds = array<i64: 512, 3>}, {pipeline_mode = #tpu.pipeline_mode<synchronous>, transform_indices = @transform_1, window_bounds = array<i64: 3, 256>}, {pipeline_mode = #tpu.pipeline_mode<synchronous>, transform_indices = @transform_2, window_bounds = array<i64: 1, 256>}, {transform_indices = @transform_3, window_bounds = array<i64: 512, 256>}]} {
    %c0 = arith.constant 0 : index
    %c0_0 = arith.constant 0 : index
    %0 = vector.load %arg1[%c0, %c0_0] : memref<512x3xf32, #tpu.memory_space<vmem>>, vector<512x3xf32>
    %1 = vector.extract_strided_slice %0 {offsets = [0, 0], sizes = [512, 1], strides = [1, 1]} : vector<512x3xf32> to vector<512x1xf32>
    %c0_1 = arith.constant 0 : index
    %c0_2 = arith.constant 0 : index
    %2 = vector.load %arg2[%c0_1, %c0_2] : memref<3x256xf32, #tpu.memory_space<vmem>>, vector<1x256xf32>
    %3 = vector.broadcast %1 : vector<512x1xf32> to vector<512x256xf32>
    %4 = vector.broadcast %2 : vector<1x256xf32> to vector<512x256xf32>
    %5 = arith.mulf %3, %4 : vector<512x256xf32>
    %c0_3 = arith.constant 0 : index
    %c0_4 = arith.constant 0 : index
    %6 = vector.load %arg3[%c0_3, %c0_4] : memref<1x256xf32, #tpu.memory_space<vmem>>, vector<1x256xf32>
    %7 = vector.broadcast %6 : vector<1x256xf32> to vector<512x256xf32>
    %8 = arith.addf %5, %7 : vector<512x256xf32>
    %9 = vector.extract_strided_slice %0 {offsets = [0, 1], sizes = [512, 1], strides = [1, 1]} : vector<512x3xf32> to vector<512x1xf32>
    %c1 = arith.constant 1 : index
    %c0_5 = arith.constant 0 : index
    %10 = vector.load %arg2[%c1, %c0_5] : memref<3x256xf32, #tpu.memory_space<vmem>>, vector<1x256xf32>
    %11 = vector.broadcast %9 : vector<512x1xf32> to vector<512x256xf32>
    %12 = vector.broadcast %10 : vector<1x256xf32> to vector<512x256xf32>
    %13 = arith.mulf %11, %12 : vector<512x256xf32>
    %14 = arith.addf %8, %13 : vector<512x256xf32>
    %15 = vector.extract_strided_slice %0 {offsets = [0, 2], sizes = [512, 1], strides = [1, 1]} : vector<512x3xf32> to vector<512x1xf32>
    %c2 = arith.constant 2 : index
    %c0_6 = arith.constant 0 : index
    %16 = vector.load %arg2[%c2, %c0_6] : memref<3x256xf32, #tpu.memory_space<vmem>>, vector<1x256xf32>
    %17 = vector.broadcast %15 : vector<512x1xf32> to vector<512x256xf32>
    %18 = vector.broadcast %16 : vector<1x256xf32> to vector<512x256xf32>
    %19 = arith.mulf %17, %18 : vector<512x256xf32>
    %20 = arith.addf %14, %19 : vector<512x256xf32>
    %cst = arith.constant 0.000000e+00 : f32
    %21 = vector.broadcast %cst : f32 to vector<512x256xf32>
    %22 = arith.maximumf %20, %21 : vector<512x256xf32>
    %c0_7 = arith.constant 0 : index
    %c0_8 = arith.constant 0 : index
    %23 = vector.load %arg4[%c0_7, %c0_8] : memref<512x256xf32, #tpu.memory_space<vmem>>, vector<512x256xf32>
    tpu.vector_store %arg4[%c0_7, %c0_8], %22 {strides = array<i32>} : memref<512x256xf32, #tpu.memory_space<vmem>>, vector<512x256xf32>,
    return
  }
  func.func @transform_0(%arg0: i32) -> (i32, i32) {
    %c0_i32 = arith.constant 0 : i32
    %c0_i32_0 = arith.constant 0 : i32
    return %arg0, %c0_i32 : i32, i32
  }
  func.func @transform_1(%arg0: i32) -> (i32, i32) {
    %c0_i32 = arith.constant 0 : i32
    %c0_i32_0 = arith.constant 0 : i32
    %c0_i32_1 = arith.constant 0 : i32
    return %c0_i32, %c0_i32_0 : i32, i32
  }
  func.func @transform_2(%arg0: i32) -> (i32, i32) {
    %c0_i32 = arith.constant 0 : i32
    %c0_i32_0 = arith.constant 0 : i32
    %c0_i32_1 = arith.constant 0 : i32
    return %c0_i32, %c0_i32_0 : i32, i32
  }
  func.func @transform_3(%arg0: i32) -> (i32, i32) {
    %c0_i32 = arith.constant 0 : i32
    %c0_i32_0 = arith.constant 0 : i32
    return %arg0, %c0_i32 : i32, i32
  }
}

module attributes {stable_mosaic.version = 11 : i64} {
  func.func @_matmul_bias_kernel(%arg0: i32, %arg1: i32, %arg2: memref<128x2048xf32, #tpu.memory_space<vmem>>, %arg3: memref<2048x128xf32, #tpu.memory_space<vmem>>, %arg4: memref<1x128xf32, #tpu.memory_space<vmem>>, %arg5: memref<128x128xf32, #tpu.memory_space<vmem>>) attributes {dimension_semantics = [#tpu.dimension_semantics<parallel>, #tpu.dimension_semantics<arbitrary>], iteration_bounds = array<i64: 1, 2>, scalar_prefetch = 0 : i64, scratch_operands = 0 : i64, tpu.core_type = #tpu.core_type<tc>, window_params = [{transform_indices = @transform_0, window_bounds = array<i64: 128, 2048>}, {transform_indices = @transform_1, window_bounds = array<i64: 2048, 128>}, {pipeline_mode = #tpu.pipeline_mode<synchronous>, transform_indices = @transform_2, window_bounds = array<i64: 1, 128>}, {transform_indices = @transform_3, window_bounds = array<i64: 128, 128>}]} {
    %c0_i32 = arith.constant 0 : i32
    %0 = arith.cmpi eq, %arg1, %c0_i32 : i32
    %1 = arith.extui %0 : i1 to i32
    %c0_i32_0 = arith.constant 0 : i32
    %2 = arith.cmpi ne, %1, %c0_i32_0 : i32
    scf.if %2 {
      %c0_8 = arith.constant 0 : index
      %c0_9 = arith.constant 0 : index
      %9 = vector.load %arg4[%c0_8, %c0_9] : memref<1x128xf32, #tpu.memory_space<vmem>>, vector<1x128xf32>
      %10 = vector.shape_cast %9 : vector<1x128xf32> to vector<1x128xf32>
      %11 = vector.broadcast %10 : vector<1x128xf32> to vector<128x128xf32>
      %c0_10 = arith.constant 0 : index
      %c0_11 = arith.constant 0 : index
      %12 = vector.load %arg5[%c0_10, %c0_11] : memref<128x128xf32, #tpu.memory_space<vmem>>, vector<128x128xf32>
      tpu.vector_store %arg5[%c0_10, %c0_11], %11 {strides = array<i32>} : memref<128x128xf32, #tpu.memory_space<vmem>>, vector<128x128xf32>,
    } else {
    }
    %c0 = arith.constant 0 : index
    %c0_1 = arith.constant 0 : index
    %3 = vector.load %arg5[%c0, %c0_1] : memref<128x128xf32, #tpu.memory_space<vmem>>, vector<128x128xf32>
    %c0_2 = arith.constant 0 : index
    %c0_3 = arith.constant 0 : index
    %4 = vector.load %arg2[%c0_2, %c0_3] : memref<128x2048xf32, #tpu.memory_space<vmem>>, vector<128x2048xf32>
    %c0_4 = arith.constant 0 : index
    %c0_5 = arith.constant 0 : index
    %5 = vector.load %arg3[%c0_4, %c0_5] : memref<2048x128xf32, #tpu.memory_space<vmem>>, vector<2048x128xf32>
    %cst = arith.constant dense<0.000000e+00> : vector<128x128xf32>
    %6 = tpu.matmul %4, %5, %cst {dimension_numbers = #tpu.dot_dimension_numbers<[1], [0], [0], [1], [0, 0, 1, 1], [], []>} : vector<128x2048xf32>, vector<2048x128xf32>, vector<128x128xf32> -> vector<128x128xf32>
    %7 = arith.addf %3, %6 : vector<128x128xf32>
    %c0_6 = arith.constant 0 : index
    %c0_7 = arith.constant 0 : index
    %8 = vector.load %arg5[%c0_6, %c0_7] : memref<128x128xf32, #tpu.memory_space<vmem>>, vector<128x128xf32>
    tpu.vector_store %arg5[%c0_6, %c0_7], %7 {strides = array<i32>} : memref<128x128xf32, #tpu.memory_space<vmem>>, vector<128x128xf32>,
    return
  }
  func.func @transform_0(%arg0: i32, %arg1: i32) -> (i32, i32) {
    %c0_i32 = arith.constant 0 : i32
    return %arg0, %arg1 : i32, i32
  }
  func.func @transform_1(%arg0: i32, %arg1: i32) -> (i32, i32) {
    %c0_i32 = arith.constant 0 : i32
    %c0_i32_0 = arith.constant 0 : i32
    return %arg1, %c0_i32 : i32, i32
  }
  func.func @transform_2(%arg0: i32, %arg1: i32) -> (i32, i32) {
    %c0_i32 = arith.constant 0 : i32
    %c0_i32_0 = arith.constant 0 : i32
    %c0_i32_1 = arith.constant 0 : i32
    return %c0_i32, %c0_i32_0 : i32, i32
  }
  func.func @transform_3(%arg0: i32, %arg1: i32) -> (i32, i32) {
    %c0_i32 = arith.constant 0 : i32
    %c0_i32_0 = arith.constant 0 : i32
    return %arg0, %c0_i32 : i32, i32
  }
}

module attributes {stable_mosaic.version = 11 : i64} {
  func.func @_head_tail_kernel(%arg0: i32, %arg1: memref<8x2048xf32, #tpu.memory_space<vmem>>, %arg2: memref<2048x128xf32, #tpu.memory_space<vmem>>, %arg3: memref<1x128xf32, #tpu.memory_space<vmem>>, %arg4: memref<4x128x256xf32, #tpu.memory_space<vmem>>, %arg5: memref<1x256xf32, #tpu.memory_space<vmem>>, %arg6: memref<1x256xf32, #tpu.memory_space<vmem>>, %arg7: memref<1x256xf32, #tpu.memory_space<vmem>>, %arg8: memref<256x128xf32, #tpu.memory_space<vmem>>, %arg9: memref<2x128xf32, #tpu.memory_space<vmem>>) attributes {dimension_semantics = [#tpu.dimension_semantics<arbitrary>], iteration_bounds = array<i64: 1>, scalar_prefetch = 0 : i64, scratch_operands = 0 : i64, tpu.core_type = #tpu.core_type<tc>, window_params = [{pipeline_mode = #tpu.pipeline_mode<synchronous>, transform_indices = @transform_0, window_bounds = array<i64: 8, 2048>}, {pipeline_mode = #tpu.pipeline_mode<synchronous>, transform_indices = @transform_1, window_bounds = array<i64: 2048, 128>}, {pipeline_mode = #tpu.pipeline_mode<synchronous>, transform_indices = @transform_2, window_bounds = array<i64: 1, 128>}, {pipeline_mode = #tpu.pipeline_mode<synchronous>, transform_indices = @transform_3, window_bounds = array<i64: 4, 128, 256>}, {pipeline_mode = #tpu.pipeline_mode<synchronous>, transform_indices = @transform_4, window_bounds = array<i64: 1, 256>}, {pipeline_mode = #tpu.pipeline_mode<synchronous>, transform_indices = @transform_5, window_bounds = array<i64: 1, 256>}, {pipeline_mode = #tpu.pipeline_mode<synchronous>, transform_indices = @transform_6, window_bounds = array<i64: 1, 256>}, {pipeline_mode = #tpu.pipeline_mode<synchronous>, transform_indices = @transform_7, window_bounds = array<i64: 256, 128>}, {pipeline_mode = #tpu.pipeline_mode<synchronous>, transform_indices = @transform_8, window_bounds = array<i64: 2, 128>}]} {
    %c0 = arith.constant 0 : index
    %c0_0 = arith.constant 0 : index
    %0 = vector.load %arg1[%c0, %c0_0] : memref<8x2048xf32, #tpu.memory_space<vmem>>, vector<8x2048xf32>
    %c0_1 = arith.constant 0 : index
    %c0_2 = arith.constant 0 : index
    %1 = vector.load %arg2[%c0_1, %c0_2] : memref<2048x128xf32, #tpu.memory_space<vmem>>, vector<2048x128xf32>
    %cst = arith.constant dense<0.000000e+00> : vector<8x128xf32>
    %2 = tpu.matmul %0, %1, %cst {dimension_numbers = #tpu.dot_dimension_numbers<[1], [0], [0], [1], [0, 0, 1, 1], [], []>} : vector<8x2048xf32>, vector<2048x128xf32>, vector<8x128xf32> -> vector<8x128xf32>
    %c0_3 = arith.constant 0 : index
    %c0_4 = arith.constant 0 : index
    %3 = vector.load %arg3[%c0_3, %c0_4] : memref<1x128xf32, #tpu.memory_space<vmem>>, vector<1x128xf32>
    %4 = vector.broadcast %3 : vector<1x128xf32> to vector<8x128xf32>
    %5 = arith.addf %2, %4 : vector<8x128xf32>
    %6 = vector.extract_strided_slice %5 {offsets = [0, 0], sizes = [2, 128], strides = [1, 1]} : vector<8x128xf32> to vector<2x128xf32>
    %c0_5 = arith.constant 0 : index
    %c0_6 = arith.constant 0 : index
    %c0_7 = arith.constant 0 : index
    %7 = vector.load %arg4[%c0_5, %c0_6, %c0_7] : memref<4x128x256xf32, #tpu.memory_space<vmem>>, vector<1x128x256xf32>
    %8 = vector.shape_cast %7 : vector<1x128x256xf32> to vector<128x256xf32>
    %cst_8 = arith.constant dense<0.000000e+00> : vector<2x256xf32>
    %9 = tpu.matmul %6, %8, %cst_8 {dimension_numbers = #tpu.dot_dimension_numbers<[1], [0], [0], [1], [0, 0, 1, 1], [], []>} : vector<2x128xf32>, vector<128x256xf32>, vector<2x256xf32> -> vector<2x256xf32>
    %10 = vector.extract_strided_slice %5 {offsets = [2, 0], sizes = [2, 128], strides = [1, 1]} : vector<8x128xf32> to vector<2x128xf32>
    %c1 = arith.constant 1 : index
    %c0_9 = arith.constant 0 : index
    %c0_10 = arith.constant 0 : index
    %11 = vector.load %arg4[%c1, %c0_9, %c0_10] : memref<4x128x256xf32, #tpu.memory_space<vmem>>, vector<1x128x256xf32>
    %12 = vector.shape_cast %11 : vector<1x128x256xf32> to vector<128x256xf32>
    %cst_11 = arith.constant dense<0.000000e+00> : vector<2x256xf32>
    %13 = tpu.matmul %10, %12, %cst_11 {dimension_numbers = #tpu.dot_dimension_numbers<[1], [0], [0], [1], [0, 0, 1, 1], [], []>} : vector<2x128xf32>, vector<128x256xf32>, vector<2x256xf32> -> vector<2x256xf32>
    %14 = arith.addf %9, %13 : vector<2x256xf32>
    %15 = vector.extract_strided_slice %5 {offsets = [4, 0], sizes = [2, 128], strides = [1, 1]} : vector<8x128xf32> to vector<2x128xf32>
    %c2 = arith.constant 2 : index
    %c0_12 = arith.constant 0 : index
    %c0_13 = arith.constant 0 : index
    %16 = vector.load %arg4[%c2, %c0_12, %c0_13] : memref<4x128x256xf32, #tpu.memory_space<vmem>>, vector<1x128x256xf32>
    %17 = vector.shape_cast %16 : vector<1x128x256xf32> to vector<128x256xf32>
    %cst_14 = arith.constant dense<0.000000e+00> : vector<2x256xf32>
    %18 = tpu.matmul %15, %17, %cst_14 {dimension_numbers = #tpu.dot_dimension_numbers<[1], [0], [0], [1], [0, 0, 1, 1], [], []>} : vector<2x128xf32>, vector<128x256xf32>, vector<2x256xf32> -> vector<2x256xf32>
    %19 = arith.addf %14, %18 : vector<2x256xf32>
    %20 = vector.extract_strided_slice %5 {offsets = [6, 0], sizes = [2, 128], strides = [1, 1]} : vector<8x128xf32> to vector<2x128xf32>
    %c3 = arith.constant 3 : index
    %c0_15 = arith.constant 0 : index
    %c0_16 = arith.constant 0 : index
    %21 = vector.load %arg4[%c3, %c0_15, %c0_16] : memref<4x128x256xf32, #tpu.memory_space<vmem>>, vector<1x128x256xf32>
    %22 = vector.shape_cast %21 : vector<1x128x256xf32> to vector<128x256xf32>
    %cst_17 = arith.constant dense<0.000000e+00> : vector<2x256xf32>
    %23 = tpu.matmul %20, %22, %cst_17 {dimension_numbers = #tpu.dot_dimension_numbers<[1], [0], [0], [1], [0, 0, 1, 1], [], []>} : vector<2x128xf32>, vector<128x256xf32>, vector<2x256xf32> -> vector<2x256xf32>
    %24 = arith.addf %19, %23 : vector<2x256xf32>
    %c0_18 = arith.constant 0 : index
    %c0_19 = arith.constant 0 : index
    %25 = vector.load %arg5[%c0_18, %c0_19] : memref<1x256xf32, #tpu.memory_space<vmem>>, vector<1x256xf32>
    %26 = vector.broadcast %25 : vector<1x256xf32> to vector<2x256xf32>
    %27 = arith.addf %24, %26 : vector<2x256xf32>
    %cst_20 = arith.constant dense<0.000000e+00> : vector<256xf32>
    %28 = vector.multi_reduction <add>, %27, %cst_20 [0] : vector<2x256xf32> to vector<256xf32>
    %29 = vector.shape_cast %28 : vector<256xf32> to vector<1x256xf32>
    %cst_21 = arith.constant 2.000000e+00 : f32
    %30 = vector.broadcast %cst_21 : f32 to vector<1x256xf32>
    %31 = arith.divf %29, %30 : vector<1x256xf32>
    %32 = vector.broadcast %31 : vector<1x256xf32> to vector<2x256xf32>
    %33 = arith.subf %27, %32 : vector<2x256xf32>
    %34 = arith.mulf %33, %33 : vector<2x256xf32>
    %cst_22 = arith.constant dense<0.000000e+00> : vector<256xf32>
    %35 = vector.multi_reduction <add>, %34, %cst_22 [0] : vector<2x256xf32> to vector<256xf32>
    %36 = vector.shape_cast %35 : vector<256xf32> to vector<1x256xf32>
    %cst_23 = arith.constant 2.000000e+00 : f32
    %37 = vector.broadcast %cst_23 : f32 to vector<1x256xf32>
    %38 = arith.divf %36, %37 : vector<1x256xf32>
    %39 = vector.broadcast %31 : vector<1x256xf32> to vector<2x256xf32>
    %40 = arith.subf %27, %39 : vector<2x256xf32>
    %cst_24 = arith.constant 9.99999974E-6 : f32
    %41 = vector.broadcast %cst_24 : f32 to vector<1x256xf32>
    %42 = arith.addf %38, %41 : vector<1x256xf32>
    %43 = math.rsqrt %42 : vector<1x256xf32>
    %44 = vector.broadcast %43 : vector<1x256xf32> to vector<2x256xf32>
    %45 = arith.mulf %40, %44 : vector<2x256xf32>
    %c0_25 = arith.constant 0 : index
    %c0_26 = arith.constant 0 : index
    %46 = vector.load %arg6[%c0_25, %c0_26] : memref<1x256xf32, #tpu.memory_space<vmem>>, vector<1x256xf32>
    %47 = vector.broadcast %46 : vector<1x256xf32> to vector<2x256xf32>
    %48 = arith.mulf %45, %47 : vector<2x256xf32>
    %c0_27 = arith.constant 0 : index
    %c0_28 = arith.constant 0 : index
    %49 = vector.load %arg7[%c0_27, %c0_28] : memref<1x256xf32, #tpu.memory_space<vmem>>, vector<1x256xf32>
    %50 = vector.broadcast %49 : vector<1x256xf32> to vector<2x256xf32>
    %51 = arith.addf %48, %50 : vector<2x256xf32>
    %cst_29 = arith.constant 0.000000e+00 : f32
    %52 = vector.broadcast %cst_29 : f32 to vector<2x256xf32>
    %53 = arith.maximumf %51, %52 : vector<2x256xf32>
    %c0_30 = arith.constant 0 : index
    %c0_31 = arith.constant 0 : index
    %54 = vector.load %arg8[%c0_30, %c0_31] : memref<256x128xf32, #tpu.memory_space<vmem>>, vector<256x128xf32>
    %cst_32 = arith.constant dense<0.000000e+00> : vector<2x128xf32>
    %55 = tpu.matmul %53, %54, %cst_32 {dimension_numbers = #tpu.dot_dimension_numbers<[1], [0], [0], [1], [0, 0, 1, 1], [], []>} : vector<2x256xf32>, vector<256x128xf32>, vector<2x128xf32> -> vector<2x128xf32>
    %c0_33 = arith.constant 0 : index
    %c0_34 = arith.constant 0 : index
    %56 = vector.load %arg9[%c0_33, %c0_34] : memref<2x128xf32, #tpu.memory_space<vmem>>, vector<2x128xf32>
    tpu.vector_store %arg9[%c0_33, %c0_34], %55 {strides = array<i32>} : memref<2x128xf32, #tpu.memory_space<vmem>>, vector<2x128xf32>,
    return
  }
  func.func @transform_0(%arg0: i32) -> (i32, i32) {
    %c0_i32 = arith.constant 0 : i32
    %c0_i32_0 = arith.constant 0 : i32
    %c0_i32_1 = arith.constant 0 : i32
    return %c0_i32, %c0_i32_0 : i32, i32
  }
  func.func @transform_1(%arg0: i32) -> (i32, i32) {
    %c0_i32 = arith.constant 0 : i32
    %c0_i32_0 = arith.constant 0 : i32
    %c0_i32_1 = arith.constant 0 : i32
    return %c0_i32, %c0_i32_0 : i32, i32
  }
  func.func @transform_2(%arg0: i32) -> (i32, i32) {
    %c0_i32 = arith.constant 0 : i32
    %c0_i32_0 = arith.constant 0 : i32
    %c0_i32_1 = arith.constant 0 : i32
    return %c0_i32, %c0_i32_0 : i32, i32
  }
  func.func @transform_3(%arg0: i32) -> (i32, i32, i32) {
    %c0_i32 = arith.constant 0 : i32
    %c0_i32_0 = arith.constant 0 : i32
    %c0_i32_1 = arith.constant 0 : i32
    %c0_i32_2 = arith.constant 0 : i32
    return %c0_i32, %c0_i32_0, %c0_i32_1 : i32, i32, i32
  }
  func.func @transform_4(%arg0: i32) -> (i32, i32) {
    %c0_i32 = arith.constant 0 : i32
    %c0_i32_0 = arith.constant 0 : i32
    %c0_i32_1 = arith.constant 0 : i32
    return %c0_i32, %c0_i32_0 : i32, i32
  }
  func.func @transform_5(%arg0: i32) -> (i32, i32) {
    %c0_i32 = arith.constant 0 : i32
    %c0_i32_0 = arith.constant 0 : i32
    %c0_i32_1 = arith.constant 0 : i32
    return %c0_i32, %c0_i32_0 : i32, i32
  }
  func.func @transform_6(%arg0: i32) -> (i32, i32) {
    %c0_i32 = arith.constant 0 : i32
    %c0_i32_0 = arith.constant 0 : i32
    %c0_i32_1 = arith.constant 0 : i32
    return %c0_i32, %c0_i32_0 : i32, i32
  }
  func.func @transform_7(%arg0: i32) -> (i32, i32) {
    %c0_i32 = arith.constant 0 : i32
    %c0_i32_0 = arith.constant 0 : i32
    %c0_i32_1 = arith.constant 0 : i32
    return %c0_i32, %c0_i32_0 : i32, i32
  }
  func.func @transform_8(%arg0: i32) -> (i32, i32) {
    %c0_i32 = arith.constant 0 : i32
    %c0_i32_0 = arith.constant 0 : i32
    %c0_i32_1 = arith.constant 0 : i32
    return %c0_i32, %c0_i32_0 : i32, i32
  }
}

</mosaic_0001>

<bundles_post_ra>
// kernel: teacher_forward.3
= control target key start
LH: loop header
LB: loop body
LE: loop exit
PB: predicated region body
PF: predicated region fallthrough
CT: control target
= control target key end

     0   :  { %8 = vsyncpa [#allocation3], 0  ;;  %s4795_s0 = inlined_call_operand.vmem [shape: f32[2048,3], index: 0, kind: input, shape index: {}]   ;;  %s4796_s1 = inlined_call_operand.hbm [shape: f32[3,256], index: 1, kind: input, shape index: {}]   ;;  %s4797_s2 = inlined_call_operand.hbm [shape: f32[1,256], index: 2, kind: input, shape index: {}]   ;;  %s4798_s3 = inlined_call_operand.vmem [shape: f32[2048,256], index: 3, kind: output, shape index: {}]  }
   0x1   :  { %9 = vsyncpa [#allocation5], 0  ;;  %s2420_s12 = smov 0  }
   0x2 LB: > { %s2252_s13 = sadd.s32 4294967295, %s2393_s12   ;;  %p2254_p0 = scmp.ge.s32.totalorder %s2393_s12, 1  ;;  %s2393_s12 = sphi %s2420_s12, %s15_s12  }
   0x3   : > { %p114_p1 = scmp.lt.s32.totalorder %s2393_s12, 5  ;;  %p2430_p2 = scmp.eq.s32.totalorder %s2252_s13, 0 }
   0x4   : > { %s2395_s16 = smov [#allocation2]   ;;  %s2396_s18 = smov [#allocation4]  }
   0x5   : > { %s4929_s14 = scalar_select %p2430_p2, 1, 0 }
   0x6   : > { %p2434_p3 = pnand %p2254_p0, %p114_p1  ;;  %s127_s17 = sshll.u32 %s2395_s16, 4  ;;  %s128_s17 = int_to_ptr.vmem [resolvable:$true] %s127_s17 }
   0x7   : > { %s138_s19 = sshll.u32 %s2396_s18, 4  ;;  %s2338_s21 = scalar_lea.vmem %s128_s17, 128  ;;  %s139_s19 = int_to_ptr.vmem [resolvable:$true] %s138_s19 }
   0x8   : > { %s4930_s15 = scalar_select %p2434_p3, 1, 0 }
   0x9   : > { %p2277_p4 = pneg %p2434_p3  ;;  %p2339_p7 = scmp.ne.s32.totalorder %s128_s17, %s2338_s21 }
   0xa   : > { %p2346_p10 = scmp.lt.s32.totalorder %s128_s17, %s128_s17  ;;  %p2347_p11 = scmp.lt.s32.totalorder %s2338_s21, %s2338_s21 }
   0xb   : > { %p2442_p5 = pnand %p2430_p2, %p2277_p4 }
   0xc   : > { %p2348_p12 = por %p2347_p11, %p2346_p10 }
   0xd   : > { %p2329_p6 = pneg %p2442_p5 }
   0xf   : > { %p2341_p8 = pnand %p2339_p7, %p2329_p6 }
  0x11   : > { %p2342_p9 = pneg %p2341_p8 }
  0x13   : > { %p2349_p13 = pnand %p2348_p12, %p2342_p9 }
  0x15   : > { %2352 = shalt.err (!%p2349_p13)
}
  0x16   : > { %2280 = dma.hbm_to_vmem [thread:$0]  (!%p2442_p5), %s4796_s1, 128, %s128_s17, [#allocation3]  }
  0x17   : > { %s2364_s24 = scalar_lea.vmem %s139_s19, 32  ;;  %p2372_p7 = scmp.lt.s32.totalorder %s139_s19, %s139_s19 }
  0x18   : > { %p2365_p0 = scmp.ne.s32.totalorder %s139_s19, %s2364_s24  ;;  %p2373_p8 = scmp.lt.s32.totalorder %s2364_s24, %s2364_s24 }
  0x1a   : > { %p2367_p1 = pnand %p2365_p0, %p2329_p6  ;;  %p2374_p2 = por %p2373_p8, %p2372_p7 }
  0x1c   : > { %p2368_p4 = pneg %p2367_p1 }
  0x1e   : > { %p2375_p3 = pnand %p2374_p2, %p2368_p4 }
  0x20   : > { %2378 = shalt.err (!%p2375_p3)
}
  0x21   : > { %2283 = dma.hbm_to_vmem [thread:$0]  (!%p2442_p5), %s4797_s2, 32, %s139_s19, [#allocation5]  }
  0x22   : > { %p4932_p9 = scmp.ne.s32.totalorder %s4930_s15, 0 }
  0x24   : > { %160 = sbr.rel (%p4932_p9) target bundleno = 597 (0x255), region = 32 }
  0x29   : > { %p4933_p10 = scmp.ne.s32.totalorder %s4929_s14, 0 }
  0x2b   : > { %2384 = dma.done.wait (%p4933_p10), [#allocation3], 128  }
  0x2c   : > { %2386 = vsyncadd (%p4933_p10), [#allocation3], 4294967168 }
  0x2d   : > { %2388 = dma.done.wait (%p4933_p10), [#allocation5], 32  }
  0x2e   : > { %2390 = vsyncadd (%p4933_p10), [#allocation5], 4294967264  ;;  %s2261_s27 = sshll.u32 %s2252_s13, 6  ;;  %v2397_v0 = vmov 0  }
  0x2f   : > { %2302 = vset.pattern.permute.xlu1 %v2397_v0  ;;  %2301 = vset.pattern.permute.xlu0 %v2397_v0  ;;  %p190_p2 = scmp.lt.s32.totalorder %s2261_s27, 255 }
  0x31   : > { %s5449_s27 = smov (!%p190_p2, %s2261_s27), 255 }
  0x32   : > { %s2262_s28 = sshll.u32 %s5449_s27, 3  ;;  %s2268_s5 = sshll.u32 %s5449_s27, 4 }
  0x33   : > { %s2482_s4 = scalar_lea.vmem %s4795_s0, %s2262_s28  ;;  %s4127_s8 = scalar_lea.vmem %s4798_s3, %s2268_s5 }
  0x34   : > { %v2485_v1 = vld [vmem:[%s2482_s4 + $0x10] sm:$0xff]  ;;  %v2488_v2 = vld [vmem:[%s2482_s4] sm:$0xff]  ;;  %v2493_v3 = vld [vmem:[%s2482_s4 + $0x18] sm:$0xff] }
  0x35   : > { %279 = vperm.xlu1 %2302, %v2485_v1   ;;  %269 = vperm.xlu0 %2301, %v2488_v2   ;;  %v2496_v4 = vld [vmem:[%s2482_s4 + $0x8] sm:$0xff]  ;;  %v2504_v6 = vld [vmem:[%s2482_s4 + $0x20] sm:$0xff]  ;;  %v2509_v7 = vld [vmem:[%s2482_s4 + $0x38] sm:$0xff] }
  0x36   : > { %v2501_v5 = vld [vmem:[%s2482_s4 + $0x28] sm:$0xff]  ;;  %v2512_v8 = vld [vmem:[%s2482_s4 + $0x30] sm:$0xff]  ;;  %v2520_v10 = vld [vmem:[%s2482_s4 + $0x40] sm:$0xff] }
  0x37   : > { %v2517_v9 = vld [vmem:[%s2482_s4 + $0x48] sm:$0xff]  ;;  %v2525_v11 = vld [vmem:[%s2482_s4 + $0x58] sm:$0xff]  ;;  %v2528_v12 = vld [vmem:[%s2482_s4 + $0x50] sm:$0xff] }
  0x38   : > { %v2533_v13 = vld [vmem:[%s2482_s4 + $0x68] sm:$0xff]  ;;  %v2536_v14 = vld [vmem:[%s2482_s4 + $0x60] sm:$0xff]  ;;  %v2541_v15 = vld [vmem:[%s2482_s4 + $0x78] sm:$0xff] }
  0x39   : > { %284 = vperm.xlu1 %2302, %v2493_v3   ;;  %274 = vperm.xlu0 %2301, %v2496_v4   ;;  %v2544_v16 = vld [vmem:[%s2482_s4 + $0x70] sm:$0xff]  ;;  %v2549_v17 = vld [vmem:[%s2482_s4 + $0x88] sm:$0xff]  ;;  %v2552_v18 = vld [vmem:[%s2482_s4 + $0x80] sm:$0xff] }
  0x3a   : > { %v2557_v19 = vld [vmem:[%s2482_s4 + $0x98] sm:$0xff]  ;;  %v2560_v20 = vld [vmem:[%s2482_s4 + $0x90] sm:$0xff]  ;;  %v2565_v21 = vld [vmem:[%s2482_s4 + $0xa8] sm:$0xff] }
  0x3b   : > { %v2568_v22 = vld [vmem:[%s2482_s4 + $0xa0] sm:$0xff]  ;;  %v2573_v23 = vld [vmem:[%s2482_s4 + $0xb8] sm:$0xff]  ;;  %v2576_v24 = vld [vmem:[%s2482_s4 + $0xb0] sm:$0xff] }
  0x3c   : > { %v2581_v25 = vld [vmem:[%s2482_s4 + $0xc8] sm:$0xff]  ;;  %v2584_v26 = vld [vmem:[%s2482_s4 + $0xc0] sm:$0xff]  ;;  %v2589_v27 = vld [vmem:[%s2482_s4 + $0xd8] sm:$0xff] }
  0x3d   : > { %294 = vperm.xlu1 %2302, %v2501_v5   ;;  %289 = vperm.xlu0 %2301, %v2504_v6   ;;  %4934 = vst [vmem:[#allocation8_spill] sm:$0xff] %v2589_v27  ;;  %v2592_v28 = vld [vmem:[%s2482_s4 + $0xd0] sm:$0xff]  ;;  %v2597_v29 = vld [vmem:[%s2482_s4 + $0xe8] sm:$0xff]  ;;  %v2600_v30 = vld [vmem:[%s2482_s4 + $0xe0] sm:$0xff] }
  0x3e   : > { %4935 = vst [vmem:[#allocation9_spill] sm:$0xff] %v2597_v29  ;;  %v2605_v31 = vld [vmem:[%s2482_s4 + $0xf8] sm:$0xff]  ;;  %v2608_v32 = vld [vmem:[%s2482_s4 + $0xf0] sm:$0xff]  ;;  %v2613_v33 = vld [vmem:[%s2482_s4 + $0x108] sm:$0xff] }
  0x3f   : > { %4936 = vst [vmem:[#allocation10_spill] sm:$0xff] %v2605_v31  ;;  %4937 = vst [vmem:[#allocation11_spill] sm:$0xff] %v2613_v33  ;;  %v2616_v34 = vld [vmem:[%s2482_s4 + $0x100] sm:$0xff]  ;;  %v2621_v35 = vld [vmem:[%s2482_s4 + $0x118] sm:$0xff] }
  0x40   : > { %4938 = vst [vmem:[#allocation12_spill] sm:$0xff] %v2616_v34  ;;  %4939 = vst [vmem:[#allocation13_spill] sm:$0xff] %v2621_v35  ;;  %v2624_v36 = vld [vmem:[%s2482_s4 + $0x110] sm:$0xff]  ;;  %v2629_v37 = vld [vmem:[%s2482_s4 + $0x128] sm:$0xff] }
  0x41   : > { %304 = vperm.xlu1 %2302, %v2509_v7   ;;  %299 = vperm.xlu0 %2301, %v2512_v8   ;;  %4940 = vst [vmem:[#allocation14_spill] sm:$0xff] %v2624_v36  ;;  %4941 = vst [vmem:[#allocation15_spill] sm:$0xff] %v2629_v37  ;;  %v2632_v38 = vld [vmem:[%s2482_s4 + $0x120] sm:$0xff]  ;;  %v2637_v39 = vld [vmem:[%s2482_s4 + $0x138] sm:$0xff] }
  0x42   : > { %4942 = vst [vmem:[#allocation16_spill] sm:$0xff] %v2632_v38  ;;  %4943 = vst [vmem:[#allocation17_spill] sm:$0xff] %v2637_v39  ;;  %v2640_v40 = vld [vmem:[%s2482_s4 + $0x130] sm:$0xff]  ;;  %v2645_v41 = vld [vmem:[%s2482_s4 + $0x148] sm:$0xff] }
  0x43   : > { %4944 = vst [vmem:[#allocation18_spill] sm:$0xff] %v2640_v40  ;;  %4945 = vst [vmem:[#allocation19_spill] sm:$0xff] %v2645_v41  ;;  %v2648_v42 = vld [vmem:[%s2482_s4 + $0x140] sm:$0xff]  ;;  %v2653_v43 = vld [vmem:[%s2482_s4 + $0x158] sm:$0xff] }
  0x44   : > { %4946 = vst [vmem:[#allocation20_spill] sm:$0xff] %v2648_v42  ;;  %v2656_v44 = vld [vmem:[%s2482_s4 + $0x150] sm:$0xff]  ;;  %v2661_v45 = vld [vmem:[%s2482_s4 + $0x168] sm:$0xff]  ;;  %v2664_v46 = vld [vmem:[%s2482_s4 + $0x160] sm:$0xff] }
  0x45   : > { %314 = vperm.xlu1 %2302, %v2517_v9   ;;  %309 = vperm.xlu0 %2301, %v2520_v10   ;;  %4947 = vst [vmem:[#allocation21_spill] sm:$0xff] %v2656_v44  ;;  %4948 = vst [vmem:[#allocation22_spill] sm:$0xff] %v2664_v46  ;;  %v2669_v47 = vld [vmem:[%s2482_s4 + $0x178] sm:$0xff]  ;;  %v2672_v48 = vld [vmem:[%s2482_s4 + $0x170] sm:$0xff] }
  0x46   : > { %v2677_v49 = vld [vmem:[%s2482_s4 + $0x188] sm:$0xff]  ;;  %v2680_v50 = vld [vmem:[%s2482_s4 + $0x180] sm:$0xff]  ;;  %v2685_v51 = vld [vmem:[%s2482_s4 + $0x198] sm:$0xff] }
  0x47   : > { %v2688_v52 = vld [vmem:[%s2482_s4 + $0x190] sm:$0xff]  ;;  %v2693_v53 = vld [vmem:[%s2482_s4 + $0x1a8] sm:$0xff]  ;;  %v2696_v54 = vld [vmem:[%s2482_s4 + $0x1a0] sm:$0xff] }
  0x48   : > { %v2701_v55 = vld [vmem:[%s2482_s4 + $0x1b8] sm:$0xff]  ;;  %v2704_v56 = vld [vmem:[%s2482_s4 + $0x1b0] sm:$0xff]  ;;  %v2709_v57 = vld [vmem:[%s2482_s4 + $0x1c8] sm:$0xff] }
  0x49   : > { %324 = vperm.xlu1 %2302, %v2525_v11   ;;  %319 = vperm.xlu0 %2301, %v2528_v12   ;;  %4949 = vst [vmem:[#allocation23_spill] sm:$0xff] %v2701_v55  ;;  %4950 = vst [vmem:[#allocation24_spill] sm:$0xff] %v2709_v57  ;;  %v2712_v58 = vld [vmem:[%s2482_s4 + $0x1c0] sm:$0xff]  ;;  %v2717_v59 = vld [vmem:[%s2482_s4 + $0x1d8] sm:$0xff] }
  0x4a   : > { %4951 = vst [vmem:[#allocation25_spill] sm:$0xff] %v2712_v58  ;;  %4952 = vst [vmem:[#allocation26_spill] sm:$0xff] %v2717_v59  ;;  %v2720_v60 = vld [vmem:[%s2482_s4 + $0x1d0] sm:$0xff]  ;;  %v2725_v61 = vld [vmem:[%s2482_s4 + $0x1e8] sm:$0xff] }
  0x4b   : > { %4953 = vst [vmem:[#allocation27_spill] sm:$0xff] %v2720_v60  ;;  %4954 = vst [vmem:[#allocation28_spill] sm:$0xff] %v2725_v61  ;;  %v2728_v62 = vld [vmem:[%s2482_s4 + $0x1e0] sm:$0xff]  ;;  %v2733_v63 = vld [vmem:[%s2482_s4 + $0x1f8] sm:$0xff] }
  0x4c   : > { %v2736_v0 = vld [vmem:[%s2482_s4 + $0x1f0] sm:$0xff] }
  0x4d   : > { %334 = vperm.xlu1 %2302, %v2533_v13   ;;  %329 = vperm.xlu0 %2301, %v2536_v14  }
  0x51   : > { %344 = vperm.xlu1 %2302, %v2541_v15   ;;  %339 = vperm.xlu0 %2301, %v2544_v16  }
  0x55   : > { %354 = vperm.xlu1 %2302, %v2549_v17   ;;  %349 = vperm.xlu0 %2301, %v2552_v18  }
  0x59   : > { %364 = vperm.xlu1 %2302, %v2557_v19   ;;  %359 = vperm.xlu0 %2301, %v2560_v20  }
  0x5d   : > { %374 = vperm.xlu1 %2302, %v2565_v21   ;;  %369 = vperm.xlu0 %2301, %v2568_v22  }
  0x61   : > { %384 = vperm.xlu1 %2302, %v2573_v23   ;;  %379 = vperm.xlu0 %2301, %v2576_v24  }
  0x65   : > { %394 = vperm.xlu1 %2302, %v2581_v25   ;;  %389 = vperm.xlu0 %2301, %v2584_v26  }
  0x69   : > { %404 = vperm.xlu1 %2302, %v2589_v27   ;;  %399 = vperm.xlu0 %2301, %v2592_v28  }
  0x6d   : > { %414 = vperm.xlu1 %2302, %v2597_v29   ;;  %409 = vperm.xlu0 %2301, %v2600_v30  }
  0x71   : > { %424 = vperm.xlu1 %2302, %v2605_v31   ;;  %419 = vperm.xlu0 %2301, %v2608_v32  }
  0x75   : > { %434 = vperm.xlu1 %2302, %v2613_v33   ;;  %429 = vperm.xlu0 %2301, %v2616_v34  }
  0x79   : > { %444 = vperm.xlu1 %2302, %v2621_v35   ;;  %439 = vperm.xlu0 %2301, %v2624_v36  }
  0x7d   : > { %454 = vperm.xlu1 %2302, %v2629_v37   ;;  %449 = vperm.xlu0 %2301, %v2632_v38  }
  0x81   : > { %464 = vperm.xlu1 %2302, %v2637_v39   ;;  %459 = vperm.xlu0 %2301, %v2640_v40  }
  0x85   : > { %474 = vperm.xlu1 %2302, %v2645_v41   ;;  %469 = vperm.xlu0 %2301, %v2648_v42  }
  0x89   : > { %484 = vperm.xlu1 %2302, %v2653_v43   ;;  %479 = vperm.xlu0 %2301, %v2656_v44  }
  0x8d   : > { %494 = vperm.xlu1 %2302, %v2661_v45   ;;  %489 = vperm.xlu0 %2301, %v2664_v46  }
  0x91   : > { %504 = vperm.xlu1 %2302, %v2669_v47   ;;  %499 = vperm.xlu0 %2301, %v2672_v48  }
  0x95   : > { %514 = vperm.xlu1 %2302, %v2677_v49   ;;  %509 = vperm.xlu0 %2301, %v2680_v50  }
  0x99   : > { %524 = vperm.xlu1 %2302, %v2685_v51   ;;  %519 = vperm.xlu0 %2301, %v2688_v52  }
  0x9d   : > { %534 = vperm.xlu1 %2302, %v2693_v53   ;;  %529 = vperm.xlu0 %2301, %v2696_v54  }
  0xa1   : > { %544 = vperm.xlu1 %2302, %v2701_v55   ;;  %539 = vperm.xlu0 %2301, %v2704_v56   ;;  %v2398_v55 = vmov 1  }
  0xa5   : > { %554 = vperm.xlu1 %2302, %v2709_v57   ;;  %549 = vperm.xlu0 %2301, %v2712_v58  }
  0xa9   : > { %564 = vperm.xlu1 %2302, %v2717_v59   ;;  %559 = vperm.xlu0 %2301, %v2720_v60  }
  0xad   : > { %574 = vperm.xlu1 %2302, %v2725_v61   ;;  %569 = vperm.xlu0 %2301, %v2728_v62  }
  0xb0   : > { %v2738_v57 = vpop.permute.xlu1 %279  ;;  %v2740_v58 = vpop.permute.xlu0 %269 }
  0xb1   : > { %4955 = vst [vmem:[#allocation29_spill] sm:$0xff] %v2738_v57  ;;  %4956 = vst [vmem:[#allocation30_spill] sm:$0xff] %v2740_v58  ;;  %584 = vperm.xlu1 %2302, %v2733_v63   ;;  %579 = vperm.xlu0 %2301, %v2736_v0  }
  0xb4   : > { %v2744_v59 = vpop.permute.xlu1 %284  ;;  %v2746_v60 = vpop.permute.xlu0 %274 }
  0xb5   : > { %4957 = vst [vmem:[#allocation31_spill] sm:$0xff] %v2744_v59  ;;  %4958 = vst [vmem:[#allocation32_spill] sm:$0xff] %v2746_v60  ;;  %2304 = vset.pattern.permute.xlu1 %v2398_v55  ;;  %2303 = vset.pattern.permute.xlu0 %v2398_v55 }
  0xb6   : > { %873 = vperm.xlu1 %2304, %v2496_v4   ;;  %869 = vperm.xlu0 %2303, %v2488_v2  }
  0xb8   : > { %v2750_v61 = vpop.permute.xlu1 %294  ;;  %v2752_v57 = vpop.permute.xlu0 %289 }
  0xb9   : > { %4959 = vst [vmem:[#allocation33_spill] sm:$0xff] %v2750_v61  ;;  %4960 = vst [vmem:[#allocation34_spill] sm:$0xff] %v2752_v57 }
  0xba   : > { %877 = vperm.xlu1 %2304, %v2485_v1   ;;  %881 = vperm.xlu0 %2303, %v2493_v3  }
  0xbc   : > { %v2756_v58 = vpop.permute.xlu1 %304  ;;  %v2758_v59 = vpop.permute.xlu0 %299 }
  0xbd   : > { %4961 = vst [vmem:[#allocation35_spill] sm:$0xff] %v2756_v58  ;;  %4962 = vst [vmem:[#allocation36_spill] sm:$0xff] %v2758_v59 }
  0xbe   : > { %885 = vperm.xlu1 %2304, %v2504_v6   ;;  %889 = vperm.xlu0 %2303, %v2501_v5  }
  0xc0   : > { %v2762_v55 = vpop.permute.xlu1 %314  ;;  %v2764_v60 = vpop.permute.xlu0 %309 }
  0xc1   : > { %4963 = vst [vmem:[#allocation37_spill] sm:$0xff] %v2762_v55  ;;  %4964 = vst [vmem:[#allocation38_spill] sm:$0xff] %v2764_v60 }
  0xc2   : > { %893 = vperm.xlu1 %2304, %v2512_v8   ;;  %897 = vperm.xlu0 %2303, %v2509_v7  }
  0xc4   : > { %v2768_v57 = vpop.permute.xlu1 %324  ;;  %v2770_v61 = vpop.permute.xlu0 %319 }
  0xc5   : > { %4965 = vst [vmem:[#allocation39_spill] sm:$0xff] %v2768_v57  ;;  %4966 = vst [vmem:[#allocation40_spill] sm:$0xff] %v2770_v61 }
  0xc6   : > { %901 = vperm.xlu1 %2304, %v2520_v10   ;;  %905 = vperm.xlu0 %2303, %v2517_v9  }
  0xc8   : > { %v2774_v59 = vpop.permute.xlu1 %334  ;;  %v2776_v58 = vpop.permute.xlu0 %329 }
  0xc9   : > { %4967 = vst [vmem:[#allocation41_spill] sm:$0xff] %v2774_v59  ;;  %4968 = vst [vmem:[#allocation42_spill] sm:$0xff] %v2776_v58 }
  0xca   : > { %909 = vperm.xlu1 %2304, %v2528_v12   ;;  %913 = vperm.xlu0 %2303, %v2525_v11  }
  0xcc   : > { %v2780_v60 = vpop.permute.xlu1 %344  ;;  %v2782_v55 = vpop.permute.xlu0 %339 }
  0xcd   : > { %4969 = vst [vmem:[#allocation43_spill] sm:$0xff] %v2780_v60  ;;  %4970 = vst [vmem:[#allocation44_spill] sm:$0xff] %v2782_v55 }
  0xce   : > { %917 = vperm.xlu1 %2304, %v2536_v14   ;;  %921 = vperm.xlu0 %2303, %v2533_v13  }
  0xd0   : > { %v2786_v61 = vpop.permute.xlu1 %354  ;;  %v2788_v57 = vpop.permute.xlu0 %349 }
  0xd1   : > { %4971 = vst [vmem:[#allocation45_spill] sm:$0xff] %v2786_v61  ;;  %4972 = vst [vmem:[#allocation46_spill] sm:$0xff] %v2788_v57 }
  0xd2   : > { %925 = vperm.xlu1 %2304, %v2544_v16   ;;  %929 = vperm.xlu0 %2303, %v2541_v15  }
  0xd4   : > { %v2792_v58 = vpop.permute.xlu1 %364  ;;  %v2794_v59 = vpop.permute.xlu0 %359 }
  0xd5   : > { %4973 = vst [vmem:[#allocation47_spill] sm:$0xff] %v2792_v58  ;;  %4974 = vst [vmem:[#allocation48_spill] sm:$0xff] %v2794_v59 }
  0xd6   : > { %933 = vperm.xlu1 %2304, %v2552_v18   ;;  %937 = vperm.xlu0 %2303, %v2549_v17  }
  0xd8   : > { %v2798_v55 = vpop.permute.xlu1 %374  ;;  %v2800_v60 = vpop.permute.xlu0 %369 }
  0xd9   : > { %4975 = vst [vmem:[#allocation49_spill] sm:$0xff] %v2798_v55  ;;  %4976 = vst [vmem:[#allocation50_spill] sm:$0xff] %v2800_v60 }
  0xda   : > { %941 = vperm.xlu1 %2304, %v2560_v20   ;;  %945 = vperm.xlu0 %2303, %v2557_v19  }
  0xdc   : > { %v2804_v57 = vpop.permute.xlu1 %384  ;;  %v2806_v61 = vpop.permute.xlu0 %379 }
  0xdd   : > { %4977 = vst [vmem:[#allocation51_spill] sm:$0xff] %v2804_v57  ;;  %4978 = vst [vmem:[#allocation52_spill] sm:$0xff] %v2806_v61 }
  0xde   : > { %949 = vperm.xlu1 %2304, %v2568_v22   ;;  %953 = vperm.xlu0 %2303, %v2565_v21  }
  0xe0   : > { %v2810_v59 = vpop.permute.xlu1 %394  ;;  %v2812_v58 = vpop.permute.xlu0 %389 }
  0xe1   : > { %4979 = vst [vmem:[#allocation53_spill] sm:$0xff] %v2810_v59  ;;  %4980 = vst [vmem:[#allocation54_spill] sm:$0xff] %v2812_v58 }
  0xe2   : > { %957 = vperm.xlu1 %2304, %v2576_v24   ;;  %961 = vperm.xlu0 %2303, %v2573_v23  }
  0xe4   : > { %v2816_v60 = vpop.permute.xlu1 %404  ;;  %v2818_v55 = vpop.permute.xlu0 %399 }
  0xe5   : > { %4981 = vst [vmem:[#allocation55_spill] sm:$0xff] %v2816_v60  ;;  %4982 = vst [vmem:[#allocation56_spill] sm:$0xff] %v2818_v55 }
  0xe6   : > { %965 = vperm.xlu1 %2304, %v2584_v26   ;;  %969 = vperm.xlu0 %2303, %v2581_v25  }
  0xe8   : > { %v2822_v61 = vpop.permute.xlu1 %414  ;;  %v2824_v57 = vpop.permute.xlu0 %409 }
  0xe9   : > { %4983 = vst [vmem:[#allocation57_spill] sm:$0xff] %v2822_v61  ;;  %4984 = vst [vmem:[#allocation58_spill] sm:$0xff] %v2824_v57 }
  0xea   : > { %973 = vperm.xlu1 %2304, %v2592_v28   ;;  %977 = vperm.xlu0 %2303, %v2589_v27  }
  0xec   : > { %v2828_v58 = vpop.permute.xlu1 %424  ;;  %v2830_v59 = vpop.permute.xlu0 %419 }
  0xed   : > { %4985 = vst [vmem:[#allocation59_spill] sm:$0xff] %v2830_v59 }
  0xee   : > { %981 = vperm.xlu1 %2304, %v2600_v30   ;;  %985 = vperm.xlu0 %2303, %v2597_v29  }
  0xf0   : > { %v2834_v55 = vpop.permute.xlu1 %434  ;;  %v2836_v60 = vpop.permute.xlu0 %429 }
  0xf1   : > { %4986 = vst [vmem:[#allocation60_spill] sm:$0xff] %v2836_v60 }
  0xf2   : > { %989 = vperm.xlu1 %2304, %v2608_v32   ;;  %993 = vperm.xlu0 %2303, %v2605_v31  }
  0xf4   : > { %v2840_v57 = vpop.permute.xlu1 %444  ;;  %v2842_v61 = vpop.permute.xlu0 %439 }
  0xf6   : > { %997 = vperm.xlu1 %2304, %v2616_v34   ;;  %1001 = vperm.xlu0 %2303, %v2613_v33  }
  0xf8   : > { %v2846_v59 = vpop.permute.xlu1 %454  ;;  %v2848_v27 = vpop.permute.xlu0 %449 }
  0xfa   : > { %1005 = vperm.xlu1 %2304, %v2624_v36   ;;  %1009 = vperm.xlu0 %2303, %v2621_v35  }
  0xfc   : > { %v2852_v29 = vpop.permute.xlu1 %464  ;;  %v2854_v60 = vpop.permute.xlu0 %459 }
  0xfe   : > { %1013 = vperm.xlu1 %2304, %v2632_v38   ;;  %1017 = vperm.xlu0 %2303, %v2629_v37  }
 0x100   : > { %v2858_v31 = vpop.permute.xlu1 %474  ;;  %v2860_v34 = vpop.permute.xlu0 %469 }
 0x102   : > { %1021 = vperm.xlu1 %2304, %v2640_v40   ;;  %1025 = vperm.xlu0 %2303, %v2637_v39  }
 0x104   : > { %v2864_v33 = vpop.permute.xlu1 %484  ;;  %v2866_v36 = vpop.permute.xlu0 %479 }
 0x106   : > { %1029 = vperm.xlu1 %2304, %v2648_v42   ;;  %1033 = vperm.xlu0 %2303, %v2645_v41  }
 0x108   : > { %v2870_v35 = vpop.permute.xlu1 %494  ;;  %v2872_v38 = vpop.permute.xlu0 %489 }
 0x10a   : > { %1037 = vperm.xlu1 %2304, %v2656_v44   ;;  %1041 = vperm.xlu0 %2303, %v2653_v43  }
 0x10c   : > { %v2876_v37 = vpop.permute.xlu1 %504  ;;  %v2878_v40 = vpop.permute.xlu0 %499 }
 0x10e   : > { %1045 = vperm.xlu1 %2304, %v2664_v46   ;;  %1049 = vperm.xlu0 %2303, %v2661_v45  }
 0x110   : > { %v2882_v39 = vpop.permute.xlu1 %514  ;;  %v2884_v42 = vpop.permute.xlu0 %509 }
 0x112   : > { %1053 = vperm.xlu1 %2304, %v2672_v48   ;;  %1057 = vperm.xlu0 %2303, %v2669_v47  }
 0x114   : > { %v2888_v41 = vpop.permute.xlu1 %524  ;;  %v2890_v44 = vpop.permute.xlu0 %519 }
 0x116   : > { %1061 = vperm.xlu1 %2304, %v2680_v50   ;;  %1065 = vperm.xlu0 %2303, %v2677_v49   ;;  %v4992_v49 = vld [vmem:[#allocation23_spill] sm:$0xff] }
 0x118   : > { %v2894_v43 = vpop.permute.xlu1 %534  ;;  %v2896_v46 = vpop.permute.xlu0 %529 }
 0x119   : > { %4987 = vst [vmem:[#allocation61_spill] sm:$0xff] %v2896_v46 }
 0x11a   : > { %1069 = vperm.xlu1 %2304, %v2688_v52   ;;  %1073 = vperm.xlu0 %2303, %v2685_v51   ;;  %v4994_v51 = vld [vmem:[#allocation25_spill] sm:$0xff] }
 0x11c   : > { %v2900_v45 = vpop.permute.xlu1 %544  ;;  %v2902_v48 = vpop.permute.xlu0 %539 }
 0x11d   : > { %4988 = vst [vmem:[#allocation62_spill] sm:$0xff] %v2900_v45  ;;  %4989 = vst [vmem:[#allocation63_spill] sm:$0xff] %v2902_v48  ;;  %v4995_v45 = vld [vmem:[#allocation24_spill] sm:$0xff] }
 0x11e   : > { %1077 = vperm.xlu1 %2304, %v2696_v54   ;;  %1081 = vperm.xlu0 %2303, %v2693_v53   ;;  %v4996_v53 = vld [vmem:[#allocation27_spill] sm:$0xff] }
 0x120   : > { %v2906_v47 = vpop.permute.xlu1 %554  ;;  %v2908_v50 = vpop.permute.xlu0 %549 }
 0x121   : > { %4990 = vst [vmem:[#allocation64_spill] sm:$0xff] %v2906_v47  ;;  %4991 = vst [vmem:[#allocation65_spill] sm:$0xff] %v2908_v50  ;;  %v4997_v47 = vld [vmem:[#allocation26_spill] sm:$0xff] }
 0x122   : > { %1085 = vperm.xlu1 %2304, %v2704_v56   ;;  %1089 = vperm.xlu0 %2303, %v4992_v49   ;;  %v5000_v49 = vld [vmem:[#allocation28_spill] sm:$0xff] }
 0x124   : > { %v2912_v46 = vpop.permute.xlu1 %564  ;;  %v2914_v52 = vpop.permute.xlu0 %559 }
 0x125   : > { %4993 = vst [vmem:[#allocation23_spill] sm:$0xff] %v2914_v52 }
 0x126   : > { %1093 = vperm.xlu1 %2304, %v4994_v51   ;;  %1097 = vperm.xlu0 %2303, %v4995_v45  }
 0x128   : > { %v2918_v48 = vpop.permute.xlu1 %574  ;;  %v2920_v54 = vpop.permute.xlu0 %569 }
 0x12a   : > { %1101 = vperm.xlu1 %2304, %v4996_v53   ;;  %1105 = vperm.xlu0 %2303, %v4997_v47   ;;  %v2399_v47 = vmov 2  }
 0x12c   : > { %v2924_v50 = vpop.permute.xlu1 %584  ;;  %v2926_v56 = vpop.permute.xlu0 %579 }
 0x12d   : > { %4998 = vst [vmem:[#allocation25_spill] sm:$0xff] %v2924_v50  ;;  %4999 = vst [vmem:[#allocation24_spill] sm:$0xff] %v2926_v56 }
 0x12e   : > { %1109 = vperm.xlu1 %2304, %v2728_v62   ;;  %1113 = vperm.xlu0 %2303, %v5000_v49  }
 0x131   : > { %v2930_v52 = vpop.permute.xlu1 %873  ;;  %v2932_v51 = vpop.permute.xlu0 %869 }
 0x132   : > { %5001 = vst [vmem:[#allocation27_spill] sm:$0xff] %v2930_v52  ;;  %5002 = vst [vmem:[#allocation26_spill] sm:$0xff] %v2932_v51  ;;  %1117 = vperm.xlu1 %2304, %v2736_v0   ;;  %1121 = vperm.xlu0 %2303, %v2733_v63  }
 0x135   : > { %v2936_v45 = vpop.permute.xlu1 %877  ;;  %v2938_v53 = vpop.permute.xlu0 %881 }
 0x136   : > { %5003 = vst [vmem:[#allocation28_spill] sm:$0xff] %v2936_v45  ;;  %5004 = vst [vmem:[#allocation66_spill] sm:$0xff] %v2938_v53  ;;  %2305 = vset.pattern.permute.xlu1 %v2399_v47  ;;  %2306 = vset.pattern.permute.xlu0 %v2399_v47  ;;  %v5026_v53 = vld [vmem:[#allocation34_spill] sm:$0xff] }
 0x137   : > { %1394 = vperm.xlu1 %2305, %v2488_v2   ;;  %1398 = vperm.xlu0 %2306, %v2496_v4   ;;  %v588_v2 = vlaneseq }
 0x139   : > { %v2942_v62 = vpop.permute.xlu1 %885  ;;  %v2944_v49 = vpop.permute.xlu0 %889 }
 0x13a   : > { %5005 = vst [vmem:[#allocation67_spill] sm:$0xff] %v2942_v62  ;;  %5006 = vst [vmem:[#allocation68_spill] sm:$0xff] %v2944_v49  ;;  %v5025_v62 = vld [vmem:[#allocation33_spill] sm:$0xff] }
 0x13b   : > { %1402 = vperm.xlu1 %2305, %v2485_v1   ;;  %1410 = vperm.xlu0 %2306, %v2504_v6   ;;  %v589_v6 = vshrl.u32 %v588_v2, 7 }
 0x13d   : > { %v2948_v63 = vpop.permute.xlu1 %893  ;;  %v2950_v0 = vpop.permute.xlu0 %897 }
 0x13e   : > { %5007 = vst [vmem:[#allocation69_spill] sm:$0xff] %v2948_v63  ;;  %5008 = vst [vmem:[#allocation70_spill] sm:$0xff] %v2950_v0  ;;  %v5024_v63 = vld [vmem:[#allocation32_spill] sm:$0xff] }
 0x13f   : > { %1406 = vperm.xlu1 %2305, %v2493_v3   ;;  %1418 = vperm.xlu0 %2306, %v2512_v8   ;;  %v2968_v8 = vsub.s32 0, %v589_v6 }
 0x141   : > { %v2954_v47 = vpop.permute.xlu1 %901  ;;  %v2956_v4 = vpop.permute.xlu0 %905 }
 0x142   : > { %5009 = vst [vmem:[#allocation71_spill] sm:$0xff] %v2954_v47  ;;  %5010 = vst [vmem:[#allocation72_spill] sm:$0xff] %v2956_v4  ;;  %v2970_v47 = vsub.s32 1, %v589_v6 }
 0x143   : > { %1414 = vperm.xlu1 %2305, %v2501_v5   ;;  %1426 = vperm.xlu0 %2306, %v2520_v10   ;;  %v266_v5 = vld [vmem:[#allocation2] ss:$4 sm:$0x3] }
 0x144   : > { %v2979_v2 = vrot.slane %v266_v5, %v2968_v8 }
 0x145   : > { %v2960_v1 = vpop.permute.xlu1 %909  ;;  %v2962_v49 = vpop.permute.xlu0 %913 }
 0x146   : > { %5011 = vst [vmem:[#allocation73_spill] sm:$0xff] %v2960_v1  ;;  %5012 = vst [vmem:[#allocation74_spill] sm:$0xff] %v2962_v49  ;;  %v5022_v49 = vld [vmem:[#allocation30_spill] sm:$0xff]  ;;  %v5023_v1 = vld [vmem:[#allocation31_spill] sm:$0xff]  ;;  %v606_v45 = vmul.f32 %v2979_v2, %v5026_v53 }
 0x147   : > { %1422 = vperm.xlu1 %2305, %v2509_v7   ;;  %1434 = vperm.xlu0 %2306, %v2528_v12   ;;  %v2982_v7 = vrot.slane %v266_v5, %v2970_v47 }
 0x149   : > { %v2966_v3 = vpop.permute.xlu1 %917  ;;  %v2972_v4 = vpop.permute.xlu0 %921  ;;  %v605_v0 = vmul.f32 %v2982_v7, %v5023_v1 }
 0x14a   : > { %5013 = vst [vmem:[#allocation75_spill] sm:$0xff] %v2966_v3  ;;  %5014 = vst [vmem:[#allocation76_spill] sm:$0xff] %v2972_v4  ;;  %v726_v3 = vld [vmem:[#allocation4] sm:$0x3] }
 0x14b   : > { %1430 = vperm.xlu1 %2305, %v2517_v9   ;;  %1442 = vperm.xlu0 %2306, %v2536_v14   ;;  %v2991_v9 = vrot.slane %v726_v3, %v2968_v8  ;;  %v2994_v14 = vrot.slane %v726_v3, %v2970_v47  ;;  %v604_v3 = vmul.f32 %v2979_v2, %v5023_v1 }
 0x14c   : > { %v607_v1 = vmul.f32 %v2982_v7, %v5026_v53 }
 0x14d   : > { %v2976_v10 = vpop.permute.xlu1 %925  ;;  %v2984_v12 = vpop.permute.xlu0 %929  ;;  %5018 = vst [vmem:[#allocation80_spill] sm:$0xff] %v2991_v9  ;;  %5019 = vst [vmem:[#allocation81_spill] sm:$0xff] %v2994_v14 }
 0x14e   : > { %5015 = vst [vmem:[#allocation77_spill] sm:$0xff] %v2976_v10  ;;  %5016 = vst [vmem:[#allocation78_spill] sm:$0xff] %v2984_v12  ;;  %v5020_v10 = vld [vmem:[#allocation29_spill] sm:$0xff] }
 0x14f   : > { %1438 = vperm.xlu1 %2305, %v2525_v11   ;;  %1450 = vperm.xlu0 %2306, %v2544_v16   ;;  %v602_v4 = vmul.f32 %v2979_v2, %v5020_v10  ;;  %v603_v5 = vmul.f32 %v2982_v7, %v5020_v10  ;;  %v598_v11 = vmul.f32 %v2979_v2, %v5022_v49 }
 0x150   : > { %v599_v16 = vmul.f32 %v2982_v7, %v5022_v49  ;;  %v600_v10 = vmul.f32 %v2979_v2, %v5024_v63  ;;  %v608_v49 = vmul.f32 %v2979_v2, %v5025_v62 }
 0x151   : > { %v2988_v6 = vpop.permute.xlu1 %933  ;;  %v3000_v12 = vpop.permute.xlu0 %937  ;;  %v3027_v52 = vadd.f32 %v2991_v9, %v602_v4  ;;  %v3041_v56 = vadd.f32 %v2991_v9, %v598_v11 }
 0x152   : > { %5017 = vst [vmem:[#allocation79_spill] sm:$0xff] %v2988_v6  ;;  %5021 = vst [vmem:[#allocation29_spill] sm:$0xff] %v3000_v12  ;;  %v867_v6 = vld [vmem:[#allocation2 + $0x1] ss:$4 sm:$0x3]  ;;  %v601_v12 = vmul.f32 %v2982_v7, %v5024_v63  ;;  %v3030_v63 = vadd.f32 %v2994_v14, %v603_v5  ;;  %v3044_v53 = vadd.f32 %v2994_v14, %v599_v16 }
 0x153   : > { %1446 = vperm.xlu1 %2305, %v2533_v13   ;;  %1458 = vperm.xlu0 %2306, %v2552_v18   ;;  %v609_v13 = vmul.f32 %v2982_v7, %v5025_v62  ;;  %5028 = vst [vmem:[#allocation31_spill] sm:$0xff] %v3027_v52  ;;  %v3033_v18 = vrot.slane %v867_v6, %v2968_v8  ;;  %5031 = vst [vmem:[#allocation34_spill] sm:$0xff] %v3041_v56 }
 0x154   : > { %5029 = vst [vmem:[#allocation32_spill] sm:$0xff] %v3030_v63  ;;  %v3036_v50 = vrot.slane %v867_v6, %v2970_v47  ;;  %5032 = vst [vmem:[#allocation82_spill] sm:$0xff] %v3044_v53  ;;  %v3052_v63 = vadd.f32 %v2991_v9, %v604_v3  ;;  %v3055_v6 = vadd.f32 %v2994_v14, %v605_v0 }
 0x155   : > { %v3024_v51 = vpop.permute.xlu1 %941  ;;  %v3038_v62 = vpop.permute.xlu0 %945  ;;  %v3058_v11 = vadd.f32 %v2991_v9, %v600_v10  ;;  %v3061_v16 = vadd.f32 %v2994_v14, %v601_v12  ;;  %v3074_v0 = vadd.f32 %v2994_v14, %v607_v1  ;;  %v5042_v10 = vld [vmem:[#allocation36_spill] sm:$0xff] }
 0x156   : > { %5027 = vst [vmem:[#allocation30_spill] sm:$0xff] %v3024_v51  ;;  %5030 = vst [vmem:[#allocation33_spill] sm:$0xff] %v3038_v62  ;;  %v5033_v51 = vld [vmem:[#allocation35_spill] sm:$0xff]  ;;  %v3065_v62 = vadd.f32 %v2991_v9, %v608_v49  ;;  %v610_v12 = vmul.f32 %v2979_v2, %v5042_v10 }
 0x157   : > { %v612_v4 = vmul.f32 %v2979_v2, %v5033_v51  ;;  %v613_v5 = vmul.f32 %v2982_v7, %v5033_v51  ;;  %1454 = vperm.xlu1 %2305, %v2541_v15   ;;  %5034 = vst [vmem:[#allocation35_spill] sm:$0xff] %v3052_v63  ;;  %5035 = vst [vmem:[#allocation83_spill] sm:$0xff] %v3055_v6  ;;  %1466 = vperm.xlu0 %2306, %v2560_v20   ;;  %v5043_v6 = vld [vmem:[#allocation37_spill] sm:$0xff] }
 0x158   : > { %5036 = vst [vmem:[#allocation84_spill] sm:$0xff] %v3061_v16  ;;  %5037 = vst [vmem:[#allocation85_spill] sm:$0xff] %v3065_v62  ;;  %v3068_v51 = vadd.f32 %v2994_v14, %v609_v13  ;;  %v3071_v15 = vadd.f32 %v2991_v9, %v606_v45  ;;  %v611_v20 = vmul.f32 %v2982_v7, %v5042_v10 }
 0x159   : > { %5040 = vst [vmem:[#allocation88_spill] sm:$0xff] %v3074_v0  ;;  %v3076_v3 = vpop.permute.xlu1 %949  ;;  %v616_v49 = vmul.f32 %v2979_v2, %v5043_v6  ;;  %v617_v13 = vmul.f32 %v2982_v7, %v5043_v6  ;;  %v3089_v45 = vadd.f32 %v2991_v9, %v612_v4  ;;  %v3092_v1 = vadd.f32 %v2994_v14, %v613_v5  ;;  %v5048_v0 = vld [vmem:[#allocation39_spill] sm:$0xff] }
 0x15a   : > { %5038 = vst [vmem:[#allocation86_spill] sm:$0xff] %v3068_v51  ;;  %5039 = vst [vmem:[#allocation87_spill] sm:$0xff] %v3071_v15  ;;  %v3086_v51 = vpop.permute.xlu0 %953  ;;  %v620_v15 = vmul.f32 %v2979_v2, %v5048_v0  ;;  %v621_v6 = vmul.f32 %v2982_v7, %v5048_v0  ;;  %v3119_v53 = vadd.f32 %v2991_v9, %v610_v12 }
 0x15b   : > { %5041 = vst [vmem:[#allocation89_spill] sm:$0xff] %v3076_v3  ;;  %5044 = vst [vmem:[#allocation36_spill] sm:$0xff] %v3086_v51  ;;  %v5047_v3 = vld [vmem:[#allocation38_spill] sm:$0xff]  ;;  %1462 = vperm.xlu1 %2305, %v2549_v17   ;;  %v5049_v51 = vld [vmem:[#allocation40_spill] sm:$0xff]  ;;  %1474 = vperm.xlu0 %2306, %v2568_v22   ;;  %v3125_v22 = vadd.f32 %v2991_v9, %v616_v49  ;;  %v3128_v56 = vadd.f32 %v2994_v14, %v617_v13 }
 0x15c   : > { %5045 = vst [vmem:[#allocation37_spill] sm:$0xff] %v3089_v45  ;;  %5046 = vst [vmem:[#allocation90_spill] sm:$0xff] %v3092_v1  ;;  %v614_v62 = vmul.f32 %v2979_v2, %v5047_v3  ;;  %v615_v10 = vmul.f32 %v2982_v7, %v5047_v3  ;;  %v618_v4 = vmul.f32 %v2979_v2, %v5049_v51  ;;  %v5050_v1 = vld [vmem:[#allocation41_spill] sm:$0xff]  ;;  %v5051_v3 = vld [vmem:[#allocation42_spill] sm:$0xff] }
 0x15d   : > { %v619_v5 = vmul.f32 %v2982_v7, %v5049_v51  ;;  %v624_v45 = vmul.f32 %v2979_v2, %v5050_v1  ;;  %v625_v17 = vmul.f32 %v2982_v7, %v5050_v1  ;;  %v622_v63 = vmul.f32 %v2979_v2, %v5051_v3  ;;  %v3116_v52 = vpop.permute.xlu1 %957  ;;  %5053 = vst [vmem:[#allocation39_spill] sm:$0xff] %v3125_v22 }
 0x15e   : > { %v623_v0 = vmul.f32 %v2982_v7, %v5051_v3  ;;  %5052 = vst [vmem:[#allocation38_spill] sm:$0xff] %v3116_v52  ;;  %v3122_v51 = vadd.f32 %v2994_v14, %v611_v20  ;;  %5054 = vst [vmem:[#allocation40_spill] sm:$0xff] %v3128_v56  ;;  %v3130_v1 = vpop.permute.xlu0 %961  ;;  %v3133_v16 = vadd.f32 %v2991_v9, %v614_v62  ;;  %v5056_v52 = vld [vmem:[#allocation43_spill] sm:$0xff] }
 0x15f   : > { %5055 = vst [vmem:[#allocation41_spill] sm:$0xff] %v3130_v1  ;;  %v3136_v3 = vadd.f32 %v2994_v14, %v615_v10  ;;  %v628_v12 = vmul.f32 %v2979_v2, %v5056_v52  ;;  %v629_v20 = vmul.f32 %v2982_v7, %v5056_v52  ;;  %1470 = vperm.xlu1 %2305, %v2557_v19  }
 0x160   : > { %v3144_v49 = vadd.f32 %v2991_v9, %v620_v15  ;;  %v3147_v13 = vadd.f32 %v2994_v14, %v621_v6  ;;  %v3150_v62 = vadd.f32 %v2991_v9, %v618_v4  ;;  %v3153_v10 = vadd.f32 %v2994_v14, %v619_v5  ;;  %1482 = vperm.xlu0 %2306, %v2576_v24   ;;  %v5066_v4 = vld [vmem:[#allocation44_spill] sm:$0xff] }
 0x161   : > { %v3157_v1 = vadd.f32 %v2991_v9, %v624_v45  ;;  %v3160_v52 = vadd.f32 %v2994_v14, %v625_v17  ;;  %v3163_v19 = vadd.f32 %v2991_v9, %v622_v63  ;;  %v3166_v15 = vadd.f32 %v2994_v14, %v623_v0  ;;  %v3168_v6 = vpop.permute.xlu1 %965 }
 0x162   : > { %5057 = vst [vmem:[#allocation42_spill] sm:$0xff] %v3144_v49  ;;  %5058 = vst [vmem:[#allocation43_spill] sm:$0xff] %v3147_v13  ;;  %v626_v5 = vmul.f32 %v2979_v2, %v5066_v4  ;;  %v627_v24 = vmul.f32 %v2982_v7, %v5066_v4  ;;  %v5067_v13 = vld [vmem:[#allocation45_spill] sm:$0xff]  ;;  %v3181_v63 = vadd.f32 %v2991_v9, %v628_v12 }
 0x163   : > { %5059 = vst [vmem:[#allocation91_spill] sm:$0xff] %v3150_v62  ;;  %5060 = vst [vmem:[#allocation92_spill] sm:$0xff] %v3153_v10  ;;  %v632_v45 = vmul.f32 %v2979_v2, %v5067_v13  ;;  %v633_v17 = vmul.f32 %v2982_v7, %v5067_v13  ;;  %v3184_v0 = vadd.f32 %v2994_v14, %v629_v20  ;;  %1478 = vperm.xlu1 %2305, %v2565_v21  }
 0x164   : > { %5061 = vst [vmem:[#allocation93_spill] sm:$0xff] %v3157_v1  ;;  %5062 = vst [vmem:[#allocation94_spill] sm:$0xff] %v3160_v52  ;;  %v3178_v52 = vpop.permute.xlu0 %969  ;;  %1490 = vperm.xlu0 %2306, %v2584_v26   ;;  %v3211_v62 = vadd.f32 %v2991_v9, %v626_v5 }
 0x165   : > { %5063 = vst [vmem:[#allocation95_spill] sm:$0xff] %v3163_v19  ;;  %5064 = vst [vmem:[#allocation96_spill] sm:$0xff] %v3166_v15  ;;  %v5072_v15 = vld [vmem:[#allocation47_spill] sm:$0xff]  ;;  %v3208_v10 = vpop.permute.xlu1 %973  ;;  %v3217_v26 = vadd.f32 %v2991_v9, %v632_v45  ;;  %v3220_v56 = vadd.f32 %v2994_v14, %v633_v17 }
 0x166   : > { %5065 = vst [vmem:[#allocation97_spill] sm:$0xff] %v3168_v6  ;;  %5068 = vst [vmem:[#allocation44_spill] sm:$0xff] %v3178_v52  ;;  %v5071_v6 = vld [vmem:[#allocation46_spill] sm:$0xff]  ;;  %v636_v19 = vmul.f32 %v2979_v2, %v5072_v15  ;;  %v637_v13 = vmul.f32 %v2982_v7, %v5072_v15  ;;  %v5073_v52 = vld [vmem:[#allocation48_spill] sm:$0xff] }
 0x167   : > { %5069 = vst [vmem:[#allocation45_spill] sm:$0xff] %v3181_v63  ;;  %5070 = vst [vmem:[#allocation98_spill] sm:$0xff] %v3184_v0  ;;  %v630_v1 = vmul.f32 %v2979_v2, %v5071_v6  ;;  %v631_v4 = vmul.f32 %v2982_v7, %v5071_v6  ;;  %v634_v12 = vmul.f32 %v2979_v2, %v5073_v52  ;;  %v5074_v0 = vld [vmem:[#allocation49_spill] sm:$0xff]  ;;  %v5075_v6 = vld [vmem:[#allocation50_spill] sm:$0xff]  ;;  %1486 = vperm.xlu1 %2305, %v2573_v23  }
 0x168   : > { %v635_v20 = vmul.f32 %v2982_v7, %v5073_v52  ;;  %v640_v63 = vmul.f32 %v2979_v2, %v5074_v0  ;;  %v641_v21 = vmul.f32 %v2982_v7, %v5074_v0  ;;  %v638_v49 = vmul.f32 %v2979_v2, %v5075_v6  ;;  %5076 = vst [vmem:[#allocation46_spill] sm:$0xff] %v3208_v10  ;;  %v3222_v0 = vpop.permute.xlu0 %977  ;;  %v5080_v10 = vld [vmem:[#allocation51_spill] sm:$0xff] }
 0x169   : > { %v639_v15 = vmul.f32 %v2982_v7, %v5075_v6  ;;  %v3214_v52 = vadd.f32 %v2994_v14, %v627_v24  ;;  %5077 = vst [vmem:[#allocation47_spill] sm:$0xff] %v3217_v26  ;;  %5078 = vst [vmem:[#allocation48_spill] sm:$0xff] %v3220_v56  ;;  %v3225_v22 = vadd.f32 %v2991_v9, %v630_v1  ;;  %1498 = vperm.xlu0 %2306, %v2592_v28  }
 0x16a   : > { %5079 = vst [vmem:[#allocation49_spill] sm:$0xff] %v3222_v0  ;;  %v3228_v6 = vadd.f32 %v2994_v14, %v631_v4  ;;  %v644_v5 = vmul.f32 %v2979_v2, %v5080_v10  ;;  %v645_v24 = vmul.f32 %v2982_v7, %v5080_v10  ;;  %v3236_v45 = vadd.f32 %v2991_v9, %v636_v19 }
 0x16b   : > { %v3239_v17 = vadd.f32 %v2994_v14, %v637_v13  ;;  %v3242_v1 = vadd.f32 %v2991_v9, %v634_v12  ;;  %v3245_v4 = vadd.f32 %v2994_v14, %v635_v20  ;;  %v3249_v0 = vadd.f32 %v2991_v9, %v640_v63  ;;  %v3260_v13 = vpop.permute.xlu1 %981  ;;  %v5090_v12 = vld [vmem:[#allocation52_spill] sm:$0xff]  ;;  %1494 = vperm.xlu1 %2305, %v2581_v25  }
 0x16c   : > { %5081 = vst [vmem:[#allocation50_spill] sm:$0xff] %v3236_v45  ;;  %v3252_v10 = vadd.f32 %v2994_v14, %v641_v21  ;;  %v3255_v23 = vadd.f32 %v2991_v9, %v638_v49  ;;  %v3258_v19 = vadd.f32 %v2994_v14, %v639_v15  ;;  %5089 = vst [vmem:[#allocation105_spill] sm:$0xff] %v3260_v13  ;;  %v5095_v13 = vld [vmem:[#allocation54_spill] sm:$0xff] }
 0x16d   : > { %5082 = vst [vmem:[#allocation51_spill] sm:$0xff] %v3239_v17  ;;  %5083 = vst [vmem:[#allocation99_spill] sm:$0xff] %v3242_v1  ;;  %v642_v20 = vmul.f32 %v2979_v2, %v5090_v12  ;;  %v643_v28 = vmul.f32 %v2982_v7, %v5090_v12  ;;  %v5091_v17 = vld [vmem:[#allocation53_spill] sm:$0xff]  ;;  %v3273_v49 = vadd.f32 %v2991_v9, %v644_v5  ;;  %1506 = vperm.xlu0 %2306, %v2600_v30  }
 0x16e   : > { %5084 = vst [vmem:[#allocation100_spill] sm:$0xff] %v3245_v4  ;;  %5085 = vst [vmem:[#allocation101_spill] sm:$0xff] %v3249_v0  ;;  %v648_v63 = vmul.f32 %v2979_v2, %v5091_v17  ;;  %v649_v21 = vmul.f32 %v2982_v7, %v5091_v17  ;;  %v3276_v15 = vadd.f32 %v2994_v14, %v645_v24 }
 0x16f   : > { %5086 = vst [vmem:[#allocation102_spill] sm:$0xff] %v3252_v10  ;;  %5087 = vst [vmem:[#allocation103_spill] sm:$0xff] %v3255_v23  ;;  %v3270_v10 = vpop.permute.xlu0 %985  ;;  %v646_v0 = vmul.f32 %v2979_v2, %v5095_v13  ;;  %v647_v12 = vmul.f32 %v2982_v7, %v5095_v13  ;;  %v5099_v13 = vld [vmem:[#allocation58_spill] sm:$0xff]  ;;  %v3300_v4 = vpop.permute.xlu1 %989  ;;  %v3303_v1 = vadd.f32 %v2991_v9, %v642_v20 }
 0x170   : > { %5088 = vst [vmem:[#allocation104_spill] sm:$0xff] %v3258_v19  ;;  %5092 = vst [vmem:[#allocation52_spill] sm:$0xff] %v3270_v10  ;;  %v5096_v19 = vld [vmem:[#allocation55_spill] sm:$0xff]  ;;  %v5097_v10 = vld [vmem:[#allocation56_spill] sm:$0xff]  ;;  %v654_v45 = vmul.f32 %v2979_v2, %v5099_v13  ;;  %v3309_v30 = vadd.f32 %v2991_v9, %v648_v63  ;;  %v3312_v56 = vadd.f32 %v2994_v14, %v649_v21 }
 0x171   : > { %5093 = vst [vmem:[#allocation53_spill] sm:$0xff] %v3273_v49  ;;  %5094 = vst [vmem:[#allocation106_spill] sm:$0xff] %v3276_v15  ;;  %v652_v23 = vmul.f32 %v2979_v2, %v5096_v19  ;;  %v653_v17 = vmul.f32 %v2982_v7, %v5096_v19  ;;  %v650_v5 = vmul.f32 %v2979_v2, %v5097_v10  ;;  %v5098_v15 = vld [vmem:[#allocation57_spill] sm:$0xff]  ;;  %1514 = vperm.xlu0 %2306, %v2608_v32  }
 0x172   : > { %v651_v24 = vmul.f32 %v2982_v7, %v5097_v10  ;;  %v656_v49 = vmul.f32 %v2979_v2, %v5098_v15  ;;  %v657_v25 = vmul.f32 %v2982_v7, %v5098_v15  ;;  %v655_v19 = vmul.f32 %v2982_v7, %v5099_v13  ;;  %5100 = vst [vmem:[#allocation54_spill] sm:$0xff] %v3300_v4  ;;  %v5102_v4 = vld [vmem:[#allocation8_spill] sm:$0xff] }
 0x173   : > { %v3306_v10 = vadd.f32 %v2994_v14, %v643_v28  ;;  %v3314_v15 = vpop.permute.xlu0 %993  ;;  %v3317_v26 = vadd.f32 %v2991_v9, %v646_v0  ;;  %v3320_v13 = vadd.f32 %v2994_v14, %v647_v12  ;;  %v660_v20 = vmul.f32 %v2979_v2, %v2828_v58  ;;  %1502 = vperm.xlu1 %2305, %v5102_v4  }
 0x174   : > { %5101 = vst [vmem:[#allocation55_spill] sm:$0xff] %v3314_v15  ;;  %v661_v28 = vmul.f32 %v2982_v7, %v2828_v58  ;;  %v3328_v63 = vadd.f32 %v2991_v9, %v652_v23  ;;  %v3331_v21 = vadd.f32 %v2994_v14, %v653_v17  ;;  %v3334_v0 = vadd.f32 %v2991_v9, %v650_v5  ;;  %v3352_v17 = vpop.permute.xlu1 %997  ;;  %v5111_v5 = vld [vmem:[#allocation59_spill] sm:$0xff] }
 0x175   : > { %v3337_v12 = vadd.f32 %v2994_v14, %v651_v24  ;;  %v3341_v15 = vadd.f32 %v2991_v9, %v656_v49  ;;  %v3344_v58 = vadd.f32 %v2994_v14, %v657_v25  ;;  %v3347_v4 = vadd.f32 %v2991_v9, %v654_v45  ;;  %5110 = vst [vmem:[#allocation110_spill] sm:$0xff] %v3352_v17  ;;  %v5115_v17 = vld [vmem:[#allocation60_spill] sm:$0xff] }
 0x176   : > { %5103 = vst [vmem:[#allocation56_spill] sm:$0xff] %v3328_v63  ;;  %5104 = vst [vmem:[#allocation57_spill] sm:$0xff] %v3331_v21  ;;  %v3350_v23 = vadd.f32 %v2994_v14, %v655_v19  ;;  %v658_v24 = vmul.f32 %v2979_v2, %v5111_v5  ;;  %v659_v32 = vmul.f32 %v2982_v7, %v5111_v5 }
 0x177   : > { %5105 = vst [vmem:[#allocation58_spill] sm:$0xff] %v3337_v12  ;;  %5106 = vst [vmem:[#allocation8_spill] sm:$0xff] %v3341_v15  ;;  %v664_v49 = vmul.f32 %v2979_v2, %v2834_v55  ;;  %v665_v25 = vmul.f32 %v2982_v7, %v2834_v55  ;;  %v3365_v45 = vadd.f32 %v2991_v9, %v660_v20 }
 0x178   : > { %5107 = vst [vmem:[#allocation107_spill] sm:$0xff] %v3344_v58  ;;  %5108 = vst [vmem:[#allocation108_spill] sm:$0xff] %v3347_v4  ;;  %v3362_v58 = vpop.permute.xlu0 %1001  ;;  %v3368_v19 = vadd.f32 %v2994_v14, %v661_v28  ;;  %v662_v15 = vmul.f32 %v2979_v2, %v5115_v17  ;;  %v663_v5 = vmul.f32 %v2982_v7, %v5115_v17 }
 0x179   : > { %5109 = vst [vmem:[#allocation109_spill] sm:$0xff] %v3350_v23  ;;  %5112 = vst [vmem:[#allocation59_spill] sm:$0xff] %v3362_v58  ;;  %v5116_v23 = vld [vmem:[#allocation9_spill] sm:$0xff]  ;;  %v668_v4 = vmul.f32 %v2979_v2, %v2840_v57  ;;  %v669_v55 = vmul.f32 %v2982_v7, %v2840_v57  ;;  %v666_v20 = vmul.f32 %v2979_v2, %v2842_v61  ;;  %v5117_v58 = vld [vmem:[#allocation12_spill] sm:$0xff] }
 0x17a   : > { %5113 = vst [vmem:[#allocation111_spill] sm:$0xff] %v3365_v45  ;;  %5114 = vst [vmem:[#allocation112_spill] sm:$0xff] %v3368_v19  ;;  %1510 = vperm.xlu1 %2305, %v5116_v23   ;;  %v667_v28 = vmul.f32 %v2982_v7, %v2842_v61  ;;  %1522 = vperm.xlu0 %2306, %v5117_v58   ;;  %v672_v19 = vmul.f32 %v2979_v2, %v2846_v59  ;;  %v3392_v45 = vpop.permute.xlu1 %1005 }
 0x17b   : > { %v673_v23 = vmul.f32 %v2982_v7, %v2846_v59  ;;  %v670_v17 = vmul.f32 %v2979_v2, %v2848_v27  ;;  %v671_v57 = vmul.f32 %v2982_v7, %v2848_v27  ;;  %5118 = vst [vmem:[#allocation60_spill] sm:$0xff] %v3392_v45  ;;  %v3395_v21 = vadd.f32 %v2991_v9, %v658_v24  ;;  %v5121_v45 = vld [vmem:[#allocation10_spill] sm:$0xff] }
 0x17c   : > { %v3398_v61 = vadd.f32 %v2994_v14, %v659_v32  ;;  %v3401_v58 = vadd.f32 %v2991_v9, %v664_v49  ;;  %v3404_v63 = vadd.f32 %v2994_v14, %v665_v25  ;;  %v3406_v59 = vpop.permute.xlu0 %1009  ;;  %v3409_v12 = vadd.f32 %v2991_v9, %v662_v15 }
 0x17d   : > { %5120 = vst [vmem:[#allocation12_spill] sm:$0xff] %v3406_v59  ;;  %v3412_v27 = vadd.f32 %v2994_v14, %v663_v5  ;;  %v676_v24 = vmul.f32 %v2979_v2, %v2852_v29  ;;  %v677_v32 = vmul.f32 %v2982_v7, %v2852_v29  ;;  %v3420_v49 = vadd.f32 %v2991_v9, %v668_v4  ;;  %v5123_v59 = vld [vmem:[#allocation14_spill] sm:$0xff] }
 0x17e   : > { %5119 = vst [vmem:[#allocation9_spill] sm:$0xff] %v3404_v63  ;;  %1518 = vperm.xlu1 %2305, %v5121_v45   ;;  %v3423_v25 = vadd.f32 %v2994_v14, %v669_v55  ;;  %v3426_v15 = vadd.f32 %v2991_v9, %v666_v20  ;;  %v3429_v5 = vadd.f32 %v2994_v14, %v667_v28  ;;  %v3444_v55 = vpop.permute.xlu1 %1013 }
 0x17f   : > { %1530 = vperm.xlu0 %2306, %v5123_v59   ;;  %v3433_v63 = vadd.f32 %v2991_v9, %v672_v19  ;;  %v3436_v29 = vadd.f32 %v2994_v14, %v673_v23  ;;  %v3439_v4 = vadd.f32 %v2991_v9, %v670_v17  ;;  %v3442_v45 = vadd.f32 %v2994_v14, %v671_v57 }
 0x180   : > { %5122 = vst [vmem:[#allocation10_spill] sm:$0xff] %v3423_v25  ;;  %5128 = vst [vmem:[#allocation116_spill] sm:$0xff] %v3444_v55  ;;  %v674_v20 = vmul.f32 %v2979_v2, %v2854_v60  ;;  %v675_v28 = vmul.f32 %v2982_v7, %v2854_v60  ;;  %v680_v19 = vmul.f32 %v2979_v2, %v2858_v31  ;;  %v3454_v59 = vpop.permute.xlu0 %1017 }
 0x181   : > { %5124 = vst [vmem:[#allocation14_spill] sm:$0xff] %v3433_v63  ;;  %5125 = vst [vmem:[#allocation113_spill] sm:$0xff] %v3436_v29  ;;  %v681_v23 = vmul.f32 %v2982_v7, %v2858_v31  ;;  %v3457_v17 = vadd.f32 %v2991_v9, %v676_v24  ;;  %v3460_v57 = vadd.f32 %v2994_v14, %v677_v32  ;;  %v5132_v63 = vld [vmem:[#allocation11_spill] sm:$0xff] }
 0x182   : > { %5126 = vst [vmem:[#allocation114_spill] sm:$0xff] %v3439_v4  ;;  %5127 = vst [vmem:[#allocation115_spill] sm:$0xff] %v3442_v45  ;;  %v678_v29 = vmul.f32 %v2979_v2, %v2860_v34  ;;  %v679_v60 = vmul.f32 %v2982_v7, %v2860_v34  ;;  %1526 = vperm.xlu1 %2305, %v5132_v63   ;;  %v684_v45 = vmul.f32 %v2979_v2, %v2864_v33  ;;  %v3484_v4 = vpop.permute.xlu1 %1021 }
 0x183   : > { %5129 = vst [vmem:[#allocation117_spill] sm:$0xff] %v3454_v59  ;;  %5130 = vst [vmem:[#allocation118_spill] sm:$0xff] %v3457_v17  ;;  %v685_v31 = vmul.f32 %v2982_v7, %v2864_v33  ;;  %v682_v24 = vmul.f32 %v2979_v2, %v2866_v36  ;;  %v683_v32 = vmul.f32 %v2982_v7, %v2866_v36 }
 0x184   : > { %5131 = vst [vmem:[#allocation119_spill] sm:$0xff] %v3460_v57  ;;  %v5133_v57 = vld [vmem:[#allocation16_spill] sm:$0xff]  ;;  %v688_v17 = vmul.f32 %v2979_v2, %v2870_v35  ;;  %v689_v34 = vmul.f32 %v2982_v7, %v2870_v35  ;;  %v686_v63 = vmul.f32 %v2979_v2, %v2872_v38  ;;  %v687_v33 = vmul.f32 %v2982_v7, %v2872_v38  ;;  %v3498_v35 = vpop.permute.xlu0 %1025 }
 0x185   : > { %1538 = vperm.xlu0 %2306, %v5133_v57   ;;  %5134 = vst [vmem:[#allocation11_spill] sm:$0xff] %v3484_v4  ;;  %v3487_v59 = vadd.f32 %v2991_v9, %v674_v20  ;;  %v3490_v36 = vadd.f32 %v2994_v14, %v675_v28  ;;  %v3493_v57 = vadd.f32 %v2991_v9, %v680_v19  ;;  %5139 = vst [vmem:[#allocation123_spill] sm:$0xff] %v3498_v35 }
 0x186   : > { %v3496_v55 = vadd.f32 %v2994_v14, %v681_v23  ;;  %v3501_v25 = vadd.f32 %v2991_v9, %v678_v29  ;;  %v3504_v38 = vadd.f32 %v2994_v14, %v679_v60  ;;  %v692_v20 = vmul.f32 %v2979_v2, %v2876_v37 }
 0x187   : > { %5135 = vst [vmem:[#allocation16_spill] sm:$0xff] %v3487_v59  ;;  %5136 = vst [vmem:[#allocation120_spill] sm:$0xff] %v3490_v36  ;;  %v693_v28 = vmul.f32 %v2982_v7, %v2876_v37  ;;  %v5142_v36 = vld [vmem:[#allocation13_spill] sm:$0xff]  ;;  %v3512_v19 = vadd.f32 %v2991_v9, %v684_v45  ;;  %v3515_v23 = vadd.f32 %v2994_v14, %v685_v31 }
 0x188   : > { %5137 = vst [vmem:[#allocation121_spill] sm:$0xff] %v3493_v57  ;;  %5138 = vst [vmem:[#allocation122_spill] sm:$0xff] %v3496_v55  ;;  %1534 = vperm.xlu1 %2305, %v5142_v36   ;;  %v3518_v29 = vadd.f32 %v2991_v9, %v682_v24  ;;  %v3521_v60 = vadd.f32 %v2994_v14, %v683_v32  ;;  %v5147_v55 = vld [vmem:[#allocation18_spill] sm:$0xff]  ;;  %v3525_v57 = vadd.f32 %v2991_v9, %v688_v17  ;;  %v3536_v36 = vpop.permute.xlu1 %1029  ;;  %v5249_v59 = vld [vmem:[#allocation77_spill] sm:$0xff] }
 0x189   : > { %5140 = vst [vmem:[#allocation124_spill] sm:$0xff] %v3501_v25  ;;  %5141 = vst [vmem:[#allocation125_spill] sm:$0xff] %v3504_v38  ;;  %1546 = vperm.xlu0 %2306, %v5147_v55   ;;  %v3528_v37 = vadd.f32 %v2994_v14, %v689_v34  ;;  %v3531_v45 = vadd.f32 %v2991_v9, %v686_v63  ;;  %v3534_v31 = vadd.f32 %v2994_v14, %v687_v33  ;;  %v3546_v34 = vpop.permute.xlu0 %1033 }
 0x18a   : > { %5143 = vst [vmem:[#allocation13_spill] sm:$0xff] %v3512_v19  ;;  %5144 = vst [vmem:[#allocation126_spill] sm:$0xff] %v3515_v23  ;;  %v690_v24 = vmul.f32 %v2979_v2, %v2878_v40  ;;  %v691_v55 = vmul.f32 %v2982_v7, %v2878_v40  ;;  %v696_v17 = vmul.f32 %v2979_v2, %v2882_v39 }
 0x18b   : > { %5145 = vst [vmem:[#allocation127_spill] sm:$0xff] %v3518_v29  ;;  %5146 = vst [vmem:[#allocation128_spill] sm:$0xff] %v3521_v60  ;;  %v697_v32 = vmul.f32 %v2982_v7, %v2882_v39  ;;  %v3549_v63 = vadd.f32 %v2991_v9, %v692_v20  ;;  %v3552_v33 = vadd.f32 %v2994_v14, %v693_v28 }
 0x18c   : > { %5148 = vst [vmem:[#allocation18_spill] sm:$0xff] %v3525_v57  ;;  %5149 = vst [vmem:[#allocation129_spill] sm:$0xff] %v3528_v37  ;;  %v694_v37 = vmul.f32 %v2979_v2, %v2884_v42  ;;  %v695_v40 = vmul.f32 %v2982_v7, %v2884_v42  ;;  %v5156_v57 = vld [vmem:[#allocation15_spill] sm:$0xff]  ;;  %v701_v39 = vmul.f32 %v2982_v7, %v2888_v41  ;;  %v3576_v23 = vpop.permute.xlu1 %1037 }
 0x18d   : > { %5150 = vst [vmem:[#allocation130_spill] sm:$0xff] %v3531_v45  ;;  %5151 = vst [vmem:[#allocation131_spill] sm:$0xff] %v3534_v31  ;;  %1542 = vperm.xlu1 %2305, %v5156_v57   ;;  %v700_v31 = vmul.f32 %v2979_v2, %v2888_v41  ;;  %v698_v20 = vmul.f32 %v2979_v2, %v2890_v44  ;;  %v699_v28 = vmul.f32 %v2982_v7, %v2890_v44  ;;  %v5158_v57 = vld [vmem:[#allocation61_spill] sm:$0xff] }
 0x18e   : > { %5152 = vst [vmem:[#allocation132_spill] sm:$0xff] %v3536_v36  ;;  %5153 = vst [vmem:[#allocation133_spill] sm:$0xff] %v3546_v34  ;;  %v705_v42 = vmul.f32 %v2982_v7, %v2894_v43  ;;  %v702_v45 = vmul.f32 %v2979_v2, %v5158_v57  ;;  %v703_v41 = vmul.f32 %v2982_v7, %v5158_v57  ;;  %v5245_v34 = vld [vmem:[#allocation39_spill] sm:$0xff] }
 0x18f   : > { %5154 = vst [vmem:[#allocation134_spill] sm:$0xff] %v3549_v63  ;;  %5155 = vst [vmem:[#allocation135_spill] sm:$0xff] %v3552_v33  ;;  %v5157_v33 = vld [vmem:[#allocation20_spill] sm:$0xff]  ;;  %v704_v63 = vmul.f32 %v2979_v2, %v2894_v43  ;;  %v3579_v19 = vadd.f32 %v2991_v9, %v690_v24  ;;  %v3582_v44 = vadd.f32 %v2994_v14, %v691_v55  ;;  %v3590_v43 = vpop.permute.xlu0 %1041 }
 0x190   : > { %1554 = vperm.xlu0 %2306, %v5157_v33   ;;  %5159 = vst [vmem:[#allocation15_spill] sm:$0xff] %v3576_v23  ;;  %v3585_v33 = vadd.f32 %v2991_v9, %v696_v17  ;;  %v3588_v60 = vadd.f32 %v2994_v14, %v697_v32  ;;  %5164 = vst [vmem:[#allocation138_spill] sm:$0xff] %v3590_v43  ;;  %v3593_v29 = vadd.f32 %v2991_v9, %v694_v37  ;;  %v5167_v23 = vld [vmem:[#allocation62_spill] sm:$0xff]  ;;  %v5243_v43 = vld [vmem:[#allocation76_spill] sm:$0xff] }
 0x191   : > { %5160 = vst [vmem:[#allocation20_spill] sm:$0xff] %v3579_v19  ;;  %5161 = vst [vmem:[#allocation61_spill] sm:$0xff] %v3582_v44  ;;  %v3596_v57 = vadd.f32 %v2994_v14, %v695_v40  ;;  %v708_v24 = vmul.f32 %v2979_v2, %v5167_v23  ;;  %v709_v55 = vmul.f32 %v2982_v7, %v5167_v23  ;;  %v5168_v44 = vld [vmem:[#allocation17_spill] sm:$0xff] }
 0x192   : > { %5162 = vst [vmem:[#allocation136_spill] sm:$0xff] %v3585_v33  ;;  %5163 = vst [vmem:[#allocation137_spill] sm:$0xff] %v3588_v60  ;;  %1550 = vperm.xlu1 %2305, %v5168_v44   ;;  %v3604_v17 = vadd.f32 %v2991_v9, %v700_v31  ;;  %v3607_v32 = vadd.f32 %v2994_v14, %v701_v39  ;;  %v3610_v37 = vadd.f32 %v2991_v9, %v698_v20  ;;  %v5173_v60 = vld [vmem:[#allocation21_spill] sm:$0xff]  ;;  %v3628_v44 = vpop.permute.xlu1 %1045  ;;  %v5179_v20 = vld [vmem:[#allocation63_spill] sm:$0xff] }
 0x193   : > { %5165 = vst [vmem:[#allocation139_spill] sm:$0xff] %v3593_v29  ;;  %5166 = vst [vmem:[#allocation140_spill] sm:$0xff] %v3596_v57  ;;  %v3613_v40 = vadd.f32 %v2994_v14, %v699_v28  ;;  %v3617_v33 = vadd.f32 %v2991_v9, %v704_v63  ;;  %v3620_v23 = vadd.f32 %v2994_v14, %v705_v42 }
 0x194   : > { %5169 = vst [vmem:[#allocation62_spill] sm:$0xff] %v3604_v17  ;;  %5170 = vst [vmem:[#allocation17_spill] sm:$0xff] %v3607_v32  ;;  %1562 = vperm.xlu0 %2306, %v5173_v60   ;;  %v3623_v31 = vadd.f32 %v2991_v9, %v702_v45  ;;  %v3626_v39 = vadd.f32 %v2994_v14, %v703_v41  ;;  %v706_v28 = vmul.f32 %v2979_v2, %v5179_v20  ;;  %v5180_v32 = vld [vmem:[#allocation64_spill] sm:$0xff] }
 0x195   : > { %5171 = vst [vmem:[#allocation141_spill] sm:$0xff] %v3610_v37  ;;  %5172 = vst [vmem:[#allocation142_spill] sm:$0xff] %v3613_v40  ;;  %v707_v60 = vmul.f32 %v2982_v7, %v5179_v20  ;;  %v712_v63 = vmul.f32 %v2979_v2, %v5180_v32  ;;  %v713_v42 = vmul.f32 %v2982_v7, %v5180_v32  ;;  %v5186_v40 = vld [vmem:[#allocation23_spill] sm:$0xff] }
 0x196   : > { %5174 = vst [vmem:[#allocation21_spill] sm:$0xff] %v3617_v33  ;;  %5175 = vst [vmem:[#allocation143_spill] sm:$0xff] %v3620_v23  ;;  %v3638_v23 = vpop.permute.xlu0 %1049  ;;  %v3641_v45 = vadd.f32 %v2991_v9, %v708_v24  ;;  %v3644_v41 = vadd.f32 %v2994_v14, %v709_v55  ;;  %v5184_v33 = vld [vmem:[#allocation65_spill] sm:$0xff]  ;;  %v716_v17 = vmul.f32 %v2979_v2, %v2912_v46  ;;  %v3668_v37 = vpop.permute.xlu1 %1053 }
 0x197   : > { %5176 = vst [vmem:[#allocation144_spill] sm:$0xff] %v3623_v31  ;;  %5177 = vst [vmem:[#allocation145_spill] sm:$0xff] %v3626_v39  ;;  %v710_v39 = vmul.f32 %v2979_v2, %v5184_v33  ;;  %v711_v20 = vmul.f32 %v2982_v7, %v5184_v33  ;;  %v5185_v31 = vld [vmem:[#allocation19_spill] sm:$0xff]  ;;  %v717_v32 = vmul.f32 %v2982_v7, %v2912_v46 }
 0x198   : > { %5178 = vst [vmem:[#allocation146_spill] sm:$0xff] %v3628_v44  ;;  %5181 = vst [vmem:[#allocation63_spill] sm:$0xff] %v3638_v23  ;;  %1558 = vperm.xlu1 %2305, %v5185_v31   ;;  %v714_v24 = vmul.f32 %v2979_v2, %v5186_v40  ;;  %v715_v55 = vmul.f32 %v2982_v7, %v5186_v40  ;;  %v720_v33 = vmul.f32 %v2979_v2, %v2918_v48  ;;  %v5232_v23 = vld [vmem:[#allocation85_spill] sm:$0xff]  ;;  %v5233_v44 = vld [vmem:[#allocation86_spill] sm:$0xff] }
 0x199   : > { %5182 = vst [vmem:[#allocation64_spill] sm:$0xff] %v3641_v45  ;;  %5183 = vst [vmem:[#allocation147_spill] sm:$0xff] %v3644_v41  ;;  %v5187_v41 = vld [vmem:[#allocation22_spill] sm:$0xff]  ;;  %v721_v31 = vmul.f32 %v2982_v7, %v2918_v48  ;;  %v718_v45 = vmul.f32 %v2979_v2, %v2920_v54  ;;  %v719_v46 = vmul.f32 %v2982_v7, %v2920_v54 }
 0x19a   : > { %1570 = vperm.xlu0 %2306, %v5187_v41   ;;  %5188 = vst [vmem:[#allocation65_spill] sm:$0xff] %v3668_v37  ;;  %v3671_v40 = vadd.f32 %v2991_v9, %v706_v28  ;;  %v3674_v41 = vadd.f32 %v2994_v14, %v707_v60  ;;  %v3677_v57 = vadd.f32 %v2991_v9, %v712_v63  ;;  %v3682_v29 = vpop.permute.xlu0 %1057  ;;  %v5196_v37 = vld [vmem:[#allocation24_spill] sm:$0xff] }
 0x19b   : > { %v3680_v48 = vadd.f32 %v2994_v14, %v713_v42  ;;  %5193 = vst [vmem:[#allocation149_spill] sm:$0xff] %v3682_v29  ;;  %v3685_v19 = vadd.f32 %v2991_v9, %v710_v39  ;;  %v3688_v54 = vadd.f32 %v2994_v14, %v711_v20  ;;  %v722_v28 = vmul.f32 %v2979_v2, %v5196_v37 }
 0x19c   : > { %5189 = vst [vmem:[#allocation19_spill] sm:$0xff] %v3671_v40  ;;  %5190 = vst [vmem:[#allocation23_spill] sm:$0xff] %v3674_v41  ;;  %v723_v60 = vmul.f32 %v2982_v7, %v5196_v37  ;;  %v2307_v41 = vld [vmem:[%s2482_s4 + $0x158] sm:$0xff]  ;;  %v3696_v63 = vadd.f32 %v2991_v9, %v716_v17  ;;  %v3699_v42 = vadd.f32 %v2994_v14, %v717_v32 }
 0x19d   : > { %5191 = vst [vmem:[#allocation22_spill] sm:$0xff] %v3677_v57  ;;  %5192 = vst [vmem:[#allocation148_spill] sm:$0xff] %v3680_v48  ;;  %1566 = vperm.xlu1 %2305, %v2307_v41   ;;  %v3702_v39 = vadd.f32 %v2991_v9, %v714_v24  ;;  %v3705_v20 = vadd.f32 %v2994_v14, %v715_v55  ;;  %v2308_v48 = vld [vmem:[%s2482_s4 + $0x170] sm:$0xff]  ;;  %v3709_v57 = vadd.f32 %v2991_v9, %v720_v33  ;;  %v3720_v24 = vpop.permute.xlu1 %1061  ;;  %v1392_v55 = vld [vmem:[#allocation2 + $0x2] ss:$4 sm:$0x3] }
 0x19e   : > { %5194 = vst [vmem:[#allocation150_spill] sm:$0xff] %v3685_v19  ;;  %5195 = vst [vmem:[#allocation151_spill] sm:$0xff] %v3688_v54  ;;  %1578 = vperm.xlu0 %2306, %v2308_v48   ;;  %v3712_v37 = vadd.f32 %v2994_v14, %v721_v31  ;;  %v3715_v17 = vadd.f32 %v2991_v9, %v718_v45  ;;  %v3718_v32 = vadd.f32 %v2994_v14, %v719_v46  ;;  %v5206_v41 = vld [vmem:[#allocation25_spill] sm:$0xff]  ;;  %v5209_v31 = vld [vmem:[#allocation27_spill] sm:$0xff]  ;;  %v3734_v46 = vpop.permute.xlu0 %1065 }
 0x19f   : > { %5197 = vst [vmem:[#allocation24_spill] sm:$0xff] %v3696_v63  ;;  %5198 = vst [vmem:[#allocation152_spill] sm:$0xff] %v3699_v42  ;;  %v3724_v48 = vmul.f32 %v2979_v2, %v5206_v41  ;;  %v3728_v33 = vmul.f32 %v2982_v7, %v5206_v41  ;;  %v1138_v45 = vmul.f32 %v3036_v50, %v5209_v31  ;;  %v5213_v2 = vld [vmem:[#allocation26_spill] sm:$0xff]  ;;  %v2309_v41 = vld [vmem:[%s2482_s4 + $0x168] sm:$0xff] }
 0x1a0   : > { %5199 = vst [vmem:[#allocation153_spill] sm:$0xff] %v3702_v39  ;;  %5200 = vst [vmem:[#allocation154_spill] sm:$0xff] %v3705_v20  ;;  %v1136_v7 = vmul.f32 %v3036_v50, %v5213_v2  ;;  %v2310_v42 = vld [vmem:[%s2482_s4 + $0x180] sm:$0xff]  ;;  %v5223_v40 = vld [vmem:[#allocation69_spill] sm:$0xff]  ;;  %v1161_v38 = vmul.f32 %v3033_v18, %v5243_v43 }
 0x1a1   : > { %5201 = vst [vmem:[#allocation155_spill] sm:$0xff] %v3709_v57  ;;  %5202 = vst [vmem:[#allocation156_spill] sm:$0xff] %v3712_v37  ;;  %v1137_v37 = vmul.f32 %v3033_v18, %v5209_v31  ;;  %v3737_v57 = vadd.f32 %v2991_v9, %v722_v28  ;;  %1574 = vperm.xlu1 %2305, %v2309_v41   ;;  %v3753_v28 = vrot.slane %v1392_v55, %v2968_v8  ;;  %v5216_v9 = vld [vmem:[#allocation67_spill] sm:$0xff]  ;;  %v5221_v39 = vld [vmem:[#allocation34_spill] sm:$0xff] }
 0x1a2   : > { %5203 = vst [vmem:[#allocation157_spill] sm:$0xff] %v3715_v17  ;;  %5204 = vst [vmem:[#allocation158_spill] sm:$0xff] %v3718_v32  ;;  %v3740_v32 = vadd.f32 %v2994_v14, %v723_v60  ;;  %1586 = vperm.xlu0 %2306, %v2310_v42   ;;  %v3756_v60 = vrot.slane %v1392_v55, %v2970_v47  ;;  %v5215_v14 = vld [vmem:[#allocation66_spill] sm:$0xff]  ;;  %v3766_v42 = vpop.permute.xlu1 %1069  ;;  %v5218_v47 = vld [vmem:[#allocation84_spill] sm:$0xff]  ;;  %v3778_v20 = vpop.permute.xlu0 %1073 }
 0x1a3   : > { %5205 = vst [vmem:[#allocation159_spill] sm:$0xff] %v3720_v24  ;;  %5207 = vst [vmem:[#allocation25_spill] sm:$0xff] %v3724_v48  ;;  %v1135_v48 = vmul.f32 %v3033_v18, %v5213_v2  ;;  %v1141_v2 = vmul.f32 %v3033_v18, %v5215_v14  ;;  %v1142_v41 = vmul.f32 %v3036_v50, %v5215_v14 }
 0x1a4   : > { %5208 = vst [vmem:[#allocation160_spill] sm:$0xff] %v3728_v33  ;;  %5210 = vst [vmem:[#allocation27_spill] sm:$0xff] %v3734_v46  ;;  %v5214_v33 = vld [vmem:[#allocation28_spill] sm:$0xff]  ;;  %v3769_v8 = vadd.f32 %v1137_v37, %v3058_v11  ;;  %v3772_v55 = vadd.f32 %v1138_v45, %v5218_v47  ;;  %v1147_v11 = vmul.f32 %v3033_v18, %v5223_v40  ;;  %v2311_v45 = vld [vmem:[%s2482_s4 + $0x178] sm:$0xff] }
 0x1a5   : > { %5211 = vst [vmem:[#allocation161_spill] sm:$0xff] %v3737_v57  ;;  %5212 = vst [vmem:[#allocation162_spill] sm:$0xff] %v3740_v32  ;;  %v1139_v17 = vmul.f32 %v3033_v18, %v5214_v33  ;;  %v1140_v31 = vmul.f32 %v3036_v50, %v5214_v33  ;;  %v1143_v32 = vmul.f32 %v3033_v18, %v5216_v9  ;;  %v5219_v57 = vld [vmem:[#allocation68_spill] sm:$0xff]  ;;  %1582 = vperm.xlu1 %2305, %v2311_v45   ;;  %v5224_v47 = vld [vmem:[#allocation31_spill] sm:$0xff] }
 0x1a6   : > { %v1144_v33 = vmul.f32 %v3036_v50, %v5216_v9  ;;  %5217 = vst [vmem:[#allocation26_spill] sm:$0xff] %v3766_v42  ;;  %v1145_v63 = vmul.f32 %v3033_v18, %v5219_v57  ;;  %v1146_v14 = vmul.f32 %v3036_v50, %v5219_v57  ;;  %5220 = vst [vmem:[#allocation28_spill] sm:$0xff] %v3778_v20  ;;  %v5222_v9 = vld [vmem:[#allocation82_spill] sm:$0xff]  ;;  %v5225_v57 = vld [vmem:[#allocation32_spill] sm:$0xff]  ;;  %v3814_v29 = vpop.permute.xlu1 %1077 }
 0x1a7   : > { %v3781_v54 = vadd.f32 %v1135_v48, %v5221_v39  ;;  %v3784_v19 = vadd.f32 %v1136_v7, %v5222_v9  ;;  %v1148_v37 = vmul.f32 %v3036_v50, %v5223_v40  ;;  %v3792_v42 = vadd.f32 %v1139_v17, %v5224_v47  ;;  %v5226_v20 = vld [vmem:[#allocation70_spill] sm:$0xff]  ;;  %v2312_v7 = vld [vmem:[%s2482_s4 + $0x190] sm:$0xff]  ;;  %v5227_v9 = vld [vmem:[#allocation35_spill] sm:$0xff]  ;;  %5231 = vst [vmem:[#allocation66_spill] sm:$0xff] %v3814_v29 }
 0x1a8   : > { %v3795_v46 = vadd.f32 %v1140_v31, %v5225_v57  ;;  %v1149_v39 = vmul.f32 %v3033_v18, %v5226_v20  ;;  %v1150_v48 = vmul.f32 %v3036_v50, %v5226_v20  ;;  %1594 = vperm.xlu0 %2306, %v2312_v7   ;;  %v3803_v24 = vadd.f32 %v1141_v2, %v5227_v9  ;;  %v5228_v40 = vld [vmem:[#allocation83_spill] sm:$0xff]  ;;  %v5230_v31 = vld [vmem:[#allocation88_spill] sm:$0xff] }
 0x1a9   : > { %v3806_v45 = vadd.f32 %v1142_v41, %v5228_v40  ;;  %v5229_v17 = vld [vmem:[#allocation87_spill] sm:$0xff]  ;;  %v3812_v57 = vadd.f32 %v1144_v33, %v5230_v31  ;;  %v3817_v20 = vadd.f32 %v1145_v63, %v5232_v23  ;;  %v3820_v7 = vadd.f32 %v1146_v14, %v5233_v44  ;;  %v5237_v14 = vld [vmem:[#allocation37_spill] sm:$0xff] }
 0x1aa   : > { %v3809_v47 = vadd.f32 %v1143_v32, %v5229_v17  ;;  %v5234_v2 = vld [vmem:[#allocation71_spill] sm:$0xff]  ;;  %v3826_v32 = vpop.permute.xlu0 %1081  ;;  %v3829_v33 = vadd.f32 %v1147_v11, %v3119_v53  ;;  %v3832_v40 = vadd.f32 %v1148_v37, %v3122_v51  ;;  %v5236_v17 = vld [vmem:[#allocation72_spill] sm:$0xff]  ;;  %v3840_v31 = vadd.f32 %v1149_v39, %v5237_v14  ;;  %v5240_v37 = vld [vmem:[#allocation74_spill] sm:$0xff] }
 0x1ab   : > { %v1151_v9 = vmul.f32 %v3033_v18, %v5234_v2  ;;  %v1152_v41 = vmul.f32 %v3036_v50, %v5234_v2  ;;  %5235 = vst [vmem:[#allocation67_spill] sm:$0xff] %v3826_v32  ;;  %v1153_v23 = vmul.f32 %v3033_v18, %v5236_v17  ;;  %v1154_v44 = vmul.f32 %v3036_v50, %v5236_v17  ;;  %v2313_v63 = vld [vmem:[%s2482_s4 + $0x188] sm:$0xff]  ;;  %v5238_v2 = vld [vmem:[#allocation90_spill] sm:$0xff]  ;;  %v5239_v32 = vld [vmem:[#allocation73_spill] sm:$0xff] }
 0x1ac   : > { %1590 = vperm.xlu1 %2305, %v2313_v63   ;;  %v3843_v29 = vadd.f32 %v1150_v48, %v5238_v2  ;;  %v1155_v53 = vmul.f32 %v3033_v18, %v5239_v32  ;;  %v1156_v51 = vmul.f32 %v3036_v50, %v5239_v32  ;;  %v2314_v11 = vld [vmem:[%s2482_s4 + $0x1a0] sm:$0xff]  ;;  %v1157_v17 = vmul.f32 %v3033_v18, %v5240_v37  ;;  %v3858_v2 = vpop.permute.xlu1 %1085 }
 0x1ad   : > { %1602 = vperm.xlu0 %2306, %v2314_v11   ;;  %v1158_v63 = vmul.f32 %v3036_v50, %v5240_v37  ;;  %v5241_v39 = vld [vmem:[#allocation75_spill] sm:$0xff]  ;;  %5242 = vst [vmem:[#allocation84_spill] sm:$0xff] %v3858_v2  ;;  %v3861_v32 = vadd.f32 %v1151_v9, %v3133_v16  ;;  %v3864_v11 = vadd.f32 %v1152_v41, %v3136_v3  ;;  %v2315_v9 = vld [vmem:[%s2482_s4 + $0x198] sm:$0xff] }
 0x1ae   : > { %v1159_v14 = vmul.f32 %v3033_v18, %v5241_v39  ;;  %v1160_v48 = vmul.f32 %v3036_v50, %v5241_v39  ;;  %v1162_v37 = vmul.f32 %v3036_v50, %v5243_v43  ;;  %v3870_v25 = vpop.permute.xlu0 %1089  ;;  %v3873_v36 = vadd.f32 %v1153_v23, %v5245_v34  ;;  %v5247_v39 = vld [vmem:[#allocation40_spill] sm:$0xff]  ;;  %v5250_v41 = vld [vmem:[#allocation91_spill] sm:$0xff] }
 0x1af   : > { %5244 = vst [vmem:[#allocation68_spill] sm:$0xff] %v3870_v25  ;;  %v3876_v2 = vadd.f32 %v1154_v44, %v5247_v39  ;;  %v1163_v16 = vmul.f32 %v3033_v18, %v5249_v59  ;;  %v1164_v3 = vmul.f32 %v3036_v50, %v5249_v59  ;;  %v3884_v35 = vadd.f32 %v1155_v53, %v5250_v41  ;;  %v5252_v43 = vld [vmem:[#allocation92_spill] sm:$0xff]  ;;  %v5254_v25 = vld [vmem:[#allocation78_spill] sm:$0xff]  ;;  %v5256_v59 = vld [vmem:[#allocation43_spill] sm:$0xff] }
 0x1b0   : > { %5246 = vst [vmem:[#allocation34_spill] sm:$0xff] %v3873_v36  ;;  %1598 = vperm.xlu1 %2305, %v2315_v9   ;;  %v3887_v4 = vadd.f32 %v1156_v51, %v5252_v43  ;;  %v1165_v34 = vmul.f32 %v3033_v18, %v5254_v25  ;;  %v1166_v23 = vmul.f32 %v3036_v50, %v5254_v25  ;;  %v2316_v44 = vld [vmem:[%s2482_s4 + $0x1b0] sm:$0xff]  ;;  %v5255_v39 = vld [vmem:[#allocation42_spill] sm:$0xff]  ;;  %v5257_v53 = vld [vmem:[#allocation95_spill] sm:$0xff]  ;;  %v3906_v36 = vpop.permute.xlu1 %1093 }
 0x1b1   : > { %5248 = vst [vmem:[#allocation82_spill] sm:$0xff] %v3876_v2  ;;  %5251 = vst [vmem:[#allocation69_spill] sm:$0xff] %v3884_v35  ;;  %1610 = vperm.xlu0 %2306, %v2316_v44   ;;  %v3895_v2 = vadd.f32 %v1157_v17, %v5255_v39  ;;  %v3898_v9 = vadd.f32 %v1158_v63, %v5256_v59  ;;  %v3901_v41 = vadd.f32 %v1159_v14, %v5257_v53  ;;  %v5258_v51 = vld [vmem:[#allocation96_spill] sm:$0xff]  ;;  %v5262_v35 = vld [vmem:[#allocation94_spill] sm:$0xff] }
 0x1b2   : > { %5253 = vst [vmem:[#allocation31_spill] sm:$0xff] %v3887_v4  ;;  %v3904_v43 = vadd.f32 %v1160_v48, %v5258_v51  ;;  %5259 = vst [vmem:[#allocation32_spill] sm:$0xff] %v3906_v36  ;;  %v5260_v4 = vld [vmem:[#allocation93_spill] sm:$0xff]  ;;  %v3912_v44 = vadd.f32 %v1162_v37, %v5262_v35  ;;  %v5264_v17 = vld [vmem:[#allocation79_spill] sm:$0xff]  ;;  %v3918_v14 = vpop.permute.xlu0 %1097  ;;  %v3921_v48 = vadd.f32 %v1163_v16, %v3211_v62 }
 0x1b3   : > { %v3909_v25 = vadd.f32 %v1161_v38, %v5260_v4  ;;  %v1167_v39 = vmul.f32 %v3033_v18, %v5264_v17  ;;  %v1168_v63 = vmul.f32 %v3036_v50, %v5264_v17  ;;  %5265 = vst [vmem:[#allocation83_spill] sm:$0xff] %v3918_v14  ;;  %v3924_v59 = vadd.f32 %v1164_v3, %v3214_v52  ;;  %v5268_v53 = vld [vmem:[#allocation29_spill] sm:$0xff]  ;;  %v2317_v38 = vld [vmem:[%s2482_s4 + $0x1a8] sm:$0xff]  ;;  %v5271_v17 = vld [vmem:[#allocation98_spill] sm:$0xff] }
 0x1b4   : > { %5263 = vst [vmem:[#allocation35_spill] sm:$0xff] %v3912_v44  ;;  %5266 = vst [vmem:[#allocation87_spill] sm:$0xff] %v3921_v48  ;;  %v1169_v4 = vmul.f32 %v3033_v18, %v5268_v53  ;;  %v1170_v35 = vmul.f32 %v3036_v50, %v5268_v53  ;;  %1606 = vperm.xlu1 %2305, %v2317_v38   ;;  %v5269_v37 = vld [vmem:[#allocation45_spill] sm:$0xff]  ;;  %v3935_v36 = vadd.f32 %v1166_v23, %v5271_v17  ;;  %v5273_v14 = vld [vmem:[#allocation30_spill] sm:$0xff]  ;;  %v3950_v17 = vpop.permute.xlu1 %1101 }
 0x1b5   : > { %5261 = vst [vmem:[#allocation70_spill] sm:$0xff] %v3909_v25  ;;  %5267 = vst [vmem:[#allocation88_spill] sm:$0xff] %v3924_v59  ;;  %v3932_v51 = vadd.f32 %v1165_v34, %v5269_v37  ;;  %v1171_v62 = vmul.f32 %v3033_v18, %v5273_v14  ;;  %v1172_v52 = vmul.f32 %v3036_v50, %v5273_v14  ;;  %v2318_v16 = vld [vmem:[%s2482_s4 + $0x1c0] sm:$0xff]  ;;  %v5274_v3 = vld [vmem:[#allocation33_spill] sm:$0xff] }
 0x1b6   : > { %5272 = vst [vmem:[#allocation86_spill] sm:$0xff] %v3935_v36  ;;  %1618 = vperm.xlu0 %2306, %v2318_v16   ;;  %v1173_v53 = vmul.f32 %v3033_v18, %v5274_v3  ;;  %v1174_v38 = vmul.f32 %v3036_v50, %v5274_v3  ;;  %v5275_v34 = vld [vmem:[#allocation89_spill] sm:$0xff]  ;;  %5276 = vst [vmem:[#allocation71_spill] sm:$0xff] %v3950_v17  ;;  %v3953_v14 = vadd.f32 %v1167_v39, %v3225_v22  ;;  %v5279_v36 = vld [vmem:[#allocation36_spill] sm:$0xff]  ;;  %v3962_v44 = vpop.permute.xlu0 %1105 }
 0x1b7   : > { %5270 = vst [vmem:[#allocation85_spill] sm:$0xff] %v3932_v51  ;;  %v1175_v37 = vmul.f32 %v3033_v18, %v5275_v34  ;;  %v1176_v23 = vmul.f32 %v3036_v50, %v5275_v34  ;;  %v3956_v16 = vadd.f32 %v1168_v63, %v3228_v6  ;;  %v1177_v51 = vmul.f32 %v3033_v18, %v5279_v36  ;;  %v5281_v25 = vld [vmem:[#allocation47_spill] sm:$0xff]  ;;  %v5283_v34 = vld [vmem:[#allocation48_spill] sm:$0xff]  ;;  %v5285_v48 = vld [vmem:[#allocation38_spill] sm:$0xff] }
 0x1b8   : > { %5277 = vst [vmem:[#allocation72_spill] sm:$0xff] %v3953_v14  ;;  %v1178_v3 = vmul.f32 %v3036_v50, %v5279_v36  ;;  %5280 = vst [vmem:[#allocation90_spill] sm:$0xff] %v3962_v44  ;;  %v3965_v59 = vadd.f32 %v1169_v4, %v5281_v25  ;;  %v3968_v17 = vadd.f32 %v1170_v35, %v5283_v34  ;;  %v2319_v39 = vld [vmem:[%s2482_s4 + $0x1b8] sm:$0xff]  ;;  %v5286_v63 = vld [vmem:[#allocation99_spill] sm:$0xff] }
 0x1b9   : > { %5278 = vst [vmem:[#allocation37_spill] sm:$0xff] %v3956_v16  ;;  %v1179_v22 = vmul.f32 %v3033_v18, %v5285_v48  ;;  %v1180_v6 = vmul.f32 %v3036_v50, %v5285_v48  ;;  %1614 = vperm.xlu1 %2305, %v2319_v39   ;;  %v3976_v16 = vadd.f32 %v1171_v62, %v5286_v63  ;;  %v5288_v36 = vld [vmem:[#allocation100_spill] sm:$0xff]  ;;  %v5290_v44 = vld [vmem:[#allocation41_spill] sm:$0xff]  ;;  %v5291_v34 = vld [vmem:[#allocation50_spill] sm:$0xff] }
 0x1ba   : > { %5282 = vst [vmem:[#allocation73_spill] sm:$0xff] %v3965_v59  ;;  %5284 = vst [vmem:[#allocation74_spill] sm:$0xff] %v3968_v17  ;;  %v3979_v14 = vadd.f32 %v1172_v52, %v5288_v36  ;;  %v1181_v25 = vmul.f32 %v3033_v18, %v5290_v44  ;;  %v1182_v4 = vmul.f32 %v3036_v50, %v5290_v44  ;;  %v2320_v35 = vld [vmem:[%s2482_s4 + $0x1d0] sm:$0xff]  ;;  %v5292_v48 = vld [vmem:[#allocation51_spill] sm:$0xff]  ;;  %v3998_v59 = vpop.permute.xlu1 %1109 }
 0x1bb   : > { %5287 = vst [vmem:[#allocation75_spill] sm:$0xff] %v3976_v16  ;;  %1626 = vperm.xlu0 %2306, %v2320_v35   ;;  %v3987_v17 = vadd.f32 %v1173_v53, %v5291_v34  ;;  %v3990_v39 = vadd.f32 %v1174_v38, %v5292_v48  ;;  %v5293_v62 = vld [vmem:[#allocation103_spill] sm:$0xff]  ;;  %v5294_v52 = vld [vmem:[#allocation104_spill] sm:$0xff]  ;;  %5295 = vst [vmem:[#allocation39_spill] sm:$0xff] %v3998_v59  ;;  %v4016_v48 = vadd.f32 %v1180_v6, %v3306_v10 }
 0x1bc   : > { %5289 = vst [vmem:[#allocation76_spill] sm:$0xff] %v3979_v14  ;;  %v3993_v63 = vadd.f32 %v1175_v37, %v5293_v62  ;;  %v3996_v36 = vadd.f32 %v1176_v23, %v5294_v52  ;;  %v5296_v14 = vld [vmem:[#allocation101_spill] sm:$0xff]  ;;  %v5298_v16 = vld [vmem:[#allocation102_spill] sm:$0xff]  ;;  %v4010_v37 = vpop.permute.xlu0 %1113  ;;  %v4013_v23 = vadd.f32 %v1179_v22, %v3303_v1  ;;  %v5302_v62 = vld [vmem:[#allocation44_spill] sm:$0xff] }
 0x1bd   : > { %v4001_v44 = vadd.f32 %v1177_v51, %v5296_v14  ;;  %v4004_v35 = vadd.f32 %v1178_v3, %v5298_v16  ;;  %v5300_v53 = vld [vmem:[#allocation97_spill] sm:$0xff]  ;;  %5301 = vst [vmem:[#allocation91_spill] sm:$0xff] %v4010_v37  ;;  %v1185_v51 = vmul.f32 %v3033_v18, %v5302_v62  ;;  %v1186_v14 = vmul.f32 %v3036_v50, %v5302_v62  ;;  %v2321_v16 = vld [vmem:[%s2482_s4 + $0x1c8] sm:$0xff]  ;;  %v5307_v37 = vld [vmem:[#allocation46_spill] sm:$0xff] }
 0x1be   : > { %v1183_v34 = vmul.f32 %v3033_v18, %v5300_v53  ;;  %v1184_v38 = vmul.f32 %v3036_v50, %v5300_v53  ;;  %1622 = vperm.xlu1 %2305, %v2321_v16   ;;  %v5303_v3 = vld [vmem:[#allocation53_spill] sm:$0xff]  ;;  %v5305_v53 = vld [vmem:[#allocation106_spill] sm:$0xff]  ;;  %v1187_v1 = vmul.f32 %v3033_v18, %v5307_v37  ;;  %v1188_v10 = vmul.f32 %v3036_v50, %v5307_v37 }
 0x1bf   : > { %5297 = vst [vmem:[#allocation40_spill] sm:$0xff] %v4001_v44  ;;  %5299 = vst [vmem:[#allocation77_spill] sm:$0xff] %v4004_v35  ;;  %v4024_v52 = vadd.f32 %v1181_v25, %v5303_v3  ;;  %v4027_v59 = vadd.f32 %v1182_v4, %v5305_v53  ;;  %v2322_v22 = vld [vmem:[%s2482_s4 + $0x1e0] sm:$0xff]  ;;  %v5308_v6 = vld [vmem:[#allocation49_spill] sm:$0xff]  ;;  %v4042_v53 = vpop.permute.xlu1 %1117  ;;  %v4057_v44 = vadd.f32 %v1185_v51, %v3309_v30 }
 0x1c0   : > { %1634 = vperm.xlu0 %2306, %v2322_v22   ;;  %v1189_v62 = vmul.f32 %v3033_v18, %v5308_v6  ;;  %v1190_v16 = vmul.f32 %v3036_v50, %v5308_v6  ;;  %v5309_v25 = vld [vmem:[#allocation105_spill] sm:$0xff]  ;;  %5310 = vst [vmem:[#allocation42_spill] sm:$0xff] %v4042_v53  ;;  %v4045_v37 = vadd.f32 %v1183_v34, %v3317_v26  ;;  %v4054_v35 = vpop.permute.xlu0 %1121  ;;  %v5317_v53 = vld [vmem:[#allocation54_spill] sm:$0xff]  ;;  %v5321_v30 = vld [vmem:[#allocation55_spill] sm:$0xff] }
 0x1c1   : > { %5304 = vst [vmem:[#allocation92_spill] sm:$0xff] %v4024_v52  ;;  %5306 = vst [vmem:[#allocation78_spill] sm:$0xff] %v4027_v59  ;;  %v1191_v3 = vmul.f32 %v3033_v18, %v5309_v25  ;;  %v1192_v4 = vmul.f32 %v3036_v50, %v5309_v25  ;;  %v4048_v22 = vadd.f32 %v1184_v38, %v3320_v13  ;;  %v5313_v59 = vld [vmem:[#allocation52_spill] sm:$0xff]  ;;  %v2323_v34 = vld [vmem:[%s2482_s4 + $0x1d8] sm:$0xff] }
 0x1c2   : > { %5311 = vst [vmem:[#allocation43_spill] sm:$0xff] %v4045_v37  ;;  %v1193_v52 = vmul.f32 %v3033_v18, %v5313_v59  ;;  %v1194_v6 = vmul.f32 %v3036_v50, %v5313_v59  ;;  %5314 = vst [vmem:[#allocation96_spill] sm:$0xff] %v4054_v35  ;;  %v4060_v25 = vadd.f32 %v1186_v14, %v3312_v56  ;;  %1630 = vperm.xlu1 %2305, %v2323_v34   ;;  %v5319_v59 = vld [vmem:[#allocation58_spill] sm:$0xff]  ;;  %v2324_v14 = vld [vmem:[%s2482_s4 + $0x1f0] sm:$0xff] }
 0x1c3   : > { %5312 = vst [vmem:[#allocation95_spill] sm:$0xff] %v4048_v22  ;;  %5315 = vst [vmem:[#allocation93_spill] sm:$0xff] %v4057_v44  ;;  %v1195_v26 = vmul.f32 %v3033_v18, %v5317_v53  ;;  %v1196_v13 = vmul.f32 %v3036_v50, %v5317_v53  ;;  %v4068_v38 = vadd.f32 %v1187_v1, %v3334_v0  ;;  %v5323_v34 = vld [vmem:[#allocation57_spill] sm:$0xff]  ;;  %v5324_v0 = vld [vmem:[#allocation108_spill] sm:$0xff] }
 0x1c4   : > { %5316 = vst [vmem:[#allocation94_spill] sm:$0xff] %v4060_v25  ;;  %v4071_v35 = vadd.f32 %v1188_v10, %v5319_v59  ;;  %v1197_v51 = vmul.f32 %v3033_v18, %v5321_v30  ;;  %v1198_v56 = vmul.f32 %v3036_v50, %v5321_v30  ;;  %1642 = vperm.xlu0 %2306, %v2324_v14   ;;  %v5322_v25 = vld [vmem:[#allocation56_spill] sm:$0xff]  ;;  %v5325_v10 = vld [vmem:[#allocation109_spill] sm:$0xff]  ;;  %v5327_v22 = vld [vmem:[#allocation107_spill] sm:$0xff] }
 0x1c5   : > { %5318 = vst [vmem:[#allocation79_spill] sm:$0xff] %v4068_v38  ;;  %v4079_v53 = vadd.f32 %v1189_v62, %v5322_v25  ;;  %v4082_v44 = vadd.f32 %v1190_v16, %v5323_v34  ;;  %v4085_v1 = vadd.f32 %v1191_v3, %v5324_v0  ;;  %v4088_v59 = vadd.f32 %v1192_v4, %v5325_v10  ;;  %v5328_v14 = vld [vmem:[#allocation110_spill] sm:$0xff]  ;;  %v1395_v16 = vpop.permute.xlu1 %1394  ;;  %v5329_v25 = vld [vmem:[#allocation111_spill] sm:$0xff]  ;;  %v5330_v0 = vld [vmem:[#allocation112_spill] sm:$0xff] }
 0x1c6   : > { %5320 = vst [vmem:[#allocation29_spill] sm:$0xff] %v4071_v35  ;;  %v5326_v35 = vld [vmem:[#allocation8_spill] sm:$0xff]  ;;  %v4094_v30 = vadd.f32 %v1194_v6, %v5327_v22  ;;  %v1199_v37 = vmul.f32 %v3033_v18, %v5328_v14  ;;  %v1200_v62 = vmul.f32 %v3036_v50, %v5328_v14  ;;  %v4102_v3 = vadd.f32 %v1195_v26, %v3395_v21  ;;  %v1399_v22 = vpop.permute.xlu0 %1398  ;;  %v5331_v26 = vld [vmem:[#allocation59_spill] sm:$0xff] }
 0x1c7   : > { %v4091_v38 = vadd.f32 %v1193_v52, %v5326_v35  ;;  %v4105_v4 = vadd.f32 %v1196_v13, %v3398_v61  ;;  %v1660_v35 = vmul.f32 %v3753_v28, %v1395_v16  ;;  %v1661_v52 = vmul.f32 %v3756_v60, %v1395_v16  ;;  %v2325_v6 = vld [vmem:[%s2482_s4 + $0x1e8] sm:$0xff] }
 0x1c8   : > { %1638 = vperm.xlu1 %2305, %v2325_v6   ;;  %v4111_v34 = vadd.f32 %v1197_v51, %v5329_v25  ;;  %v4114_v10 = vadd.f32 %v1198_v56, %v5330_v0  ;;  %v1662_v14 = vmul.f32 %v3753_v28, %v1399_v22  ;;  %v1663_v21 = vmul.f32 %v3756_v60, %v1399_v22 }
 0x1c9   : > { %v1201_v61 = vmul.f32 %v3033_v18, %v5331_v26  ;;  %v1202_v13 = vmul.f32 %v3036_v50, %v5331_v26  ;;  %v1788_v16 = vadd.f32 %v1660_v35, %v3781_v54  ;;  %v1789_v6 = vadd.f32 %v1661_v52, %v3784_v19  ;;  %v1403_v54 = vpop.permute.xlu1 %1402 }
 0x1ca   : > { %v4130_v51 = vadd.f32 %v1199_v37, %v3409_v12  ;;  %v4133_v56 = vadd.f32 %v1200_v62, %v3412_v27  ;;  %v1790_v22 = vadd.f32 %v1662_v14, %v3769_v8  ;;  %v1791_v25 = vadd.f32 %v1663_v21, %v3772_v55  ;;  %v1411_v26 = vpop.permute.xlu0 %1410  ;;  %v2326_v12 = vld [vmem:[%s2482_s4 + $0x1f8] sm:$0xff] }
 0x1cb   : > { %v1916_v35 = vmax.f32 %v1788_v16, 0.0  ;;  %v1917_v19 = vmax.f32 %v1789_v6, 0.0  ;;  %v1664_v52 = vmul.f32 %v3753_v28, %v1403_v54  ;;  %v1665_v0 = vmul.f32 %v3756_v60, %v1403_v54  ;;  %v5332_v14 = vld [vmem:[#allocation9_spill] sm:$0xff]  ;;  %v5333_v54 = vld [vmem:[#allocation60_spill] sm:$0xff] }
 0x1cc   : > { %1646 = vperm.xlu1 %2305, %v2326_v12   ;;  %v1918_v27 = vmax.f32 %v1790_v22, 0.0  ;;  %v1919_v37 = vmax.f32 %v1791_v25, 0.0  ;;  %v1668_v8 = vmul.f32 %v3753_v28, %v1411_v26  ;;  %v1669_v62 = vmul.f32 %v3756_v60, %v1411_v26 }
 0x1cd   : > { %v4143_v55 = vadd.f32 %v1201_v61, %v3401_v58  ;;  %v4146_v21 = vadd.f32 %v1202_v13, %v5332_v14  ;;  %2044 = vst [vmem:[%s4127_s8] sm:$0xff] %v1916_v35  ;;  %2045 = vst [vmem:[%s4127_s8 + $0x8] sm:$0xff] %v1917_v19  ;;  %v1792_v16 = vadd.f32 %v1664_v52, %v3792_v42  ;;  %v1407_v13 = vpop.permute.xlu1 %1406 }
 0x1ce   : > { %v1793_v6 = vadd.f32 %v1665_v0, %v3795_v46  ;;  %v1203_v22 = vmul.f32 %v3033_v18, %v5333_v54  ;;  %v1204_v25 = vmul.f32 %v3036_v50, %v5333_v54  ;;  %2046 = vst [vmem:[%s4127_s8 + $0x10] sm:$0xff] %v1918_v27  ;;  %2047 = vst [vmem:[%s4127_s8 + $0x18] sm:$0xff] %v1919_v37  ;;  %v1419_v52 = vpop.permute.xlu0 %1418  ;;  %v5334_v37 = vld [vmem:[#allocation12_spill] sm:$0xff] }
 0x1cf   : > { %v1796_v58 = vadd.f32 %v1668_v8, %v3809_v47  ;;  %v1797_v61 = vadd.f32 %v1669_v62, %v3812_v57  ;;  %v1920_v35 = vmax.f32 %v1792_v16, 0.0  ;;  %v1666_v46 = vmul.f32 %v3753_v28, %v1407_v13 }
 0x1d0   : > { %v1921_v19 = vmax.f32 %v1793_v6, 0.0  ;;  %v1667_v42 = vmul.f32 %v3756_v60, %v1407_v13  ;;  %v1672_v12 = vmul.f32 %v3753_v28, %v1419_v52  ;;  %v1673_v27 = vmul.f32 %v3756_v60, %v1419_v52  ;;  %v5336_v52 = vld [vmem:[#allocation116_spill] sm:$0xff] }
 0x1d1   : > { %v1924_v0 = vmax.f32 %v1796_v58, 0.0  ;;  %v1925_v26 = vmax.f32 %v1797_v61, 0.0  ;;  %v1205_v47 = vmul.f32 %v3033_v18, %v5334_v37  ;;  %v1206_v57 = vmul.f32 %v3036_v50, %v5334_v37  ;;  %2048 = vst [vmem:[%s4127_s8 + $0x20] sm:$0xff] %v1920_v35  ;;  %v1415_v58 = vpop.permute.xlu1 %1414 }
 0x1d2   : > { %2049 = vst [vmem:[%s4127_s8 + $0x28] sm:$0xff] %v1921_v19  ;;  %v1794_v8 = vadd.f32 %v1666_v46, %v3803_v24  ;;  %v1795_v62 = vadd.f32 %v1667_v42, %v3806_v45  ;;  %v4173_v14 = vadd.f32 %v1203_v22, %v3426_v15  ;;  %v4176_v16 = vadd.f32 %v1204_v25, %v3429_v5  ;;  %v1427_v45 = vpop.permute.xlu0 %1426 }
 0x1d3   : > { %2052 = vst [vmem:[%s4127_s8 + $0x40] sm:$0xff] %v1924_v0  ;;  %2053 = vst [vmem:[%s4127_s8 + $0x48] sm:$0xff] %v1925_v26  ;;  %v1800_v6 = vadd.f32 %v1672_v12, %v3829_v33  ;;  %v1801_v54 = vadd.f32 %v1673_v27, %v3832_v40  ;;  %v1670_v24 = vmul.f32 %v3753_v28, %v1415_v58  ;;  %v5335_v40 = vld [vmem:[#allocation10_spill] sm:$0xff] }
 0x1d4   : > { %v1922_v61 = vmax.f32 %v1794_v8, 0.0  ;;  %v1923_v13 = vmax.f32 %v1795_v62, 0.0  ;;  %v1671_v15 = vmul.f32 %v3756_v60, %v1415_v58  ;;  %v1676_v25 = vmul.f32 %v3753_v28, %v1427_v45  ;;  %v5337_v58 = vld [vmem:[#allocation117_spill] sm:$0xff] }
 0x1d5   : > { %v1928_v5 = vmax.f32 %v1800_v6, 0.0  ;;  %v1929_v22 = vmax.f32 %v1801_v54, 0.0  ;;  %v1677_v35 = vmul.f32 %v3756_v60, %v1427_v45  ;;  %v4187_v33 = vadd.f32 %v1205_v47, %v3420_v49  ;;  %v1423_v27 = vpop.permute.xlu1 %1422  ;;  %v5339_v45 = vld [vmem:[#allocation115_spill] sm:$0xff] }
 0x1d6   : > { %v4190_v19 = vadd.f32 %v1206_v57, %v5335_v40  ;;  %2050 = vst [vmem:[%s4127_s8 + $0x30] sm:$0xff] %v1922_v61  ;;  %2051 = vst [vmem:[%s4127_s8 + $0x38] sm:$0xff] %v1923_v13  ;;  %v1798_v46 = vadd.f32 %v1670_v24, %v3817_v20  ;;  %v1799_v42 = vadd.f32 %v1671_v15, %v3820_v7  ;;  %v1435_v57 = vpop.permute.xlu0 %1434  ;;  %v5338_v24 = vld [vmem:[#allocation114_spill] sm:$0xff] }
 0x1d7   : > { %v1207_v0 = vmul.f32 %v3033_v18, %v5336_v52  ;;  %v1208_v26 = vmul.f32 %v3036_v50, %v5336_v52  ;;  %2056 = vst [vmem:[%s4127_s8 + $0x60] sm:$0xff] %v1928_v5  ;;  %2057 = vst [vmem:[%s4127_s8 + $0x68] sm:$0xff] %v1929_v22  ;;  %v1804_v49 = vadd.f32 %v1676_v25, %v3861_v32  ;;  %v5340_v22 = vld [vmem:[#allocation69_spill] sm:$0xff] }
 0x1d8   : > { %v1805_v12 = vadd.f32 %v1677_v35, %v3864_v11  ;;  %v1926_v37 = vmax.f32 %v1798_v46, 0.0  ;;  %v1927_v47 = vmax.f32 %v1799_v42, 0.0  ;;  %v1674_v20 = vmul.f32 %v3753_v28, %v1423_v27  ;;  %v5341_v35 = vld [vmem:[#allocation31_spill] sm:$0xff] }
 0x1d9   : > { %v1675_v7 = vmul.f32 %v3756_v60, %v1423_v27  ;;  %v1932_v8 = vmax.f32 %v1804_v49, 0.0  ;;  %v1680_v6 = vmul.f32 %v3753_v28, %v1435_v57  ;;  %v1681_v54 = vmul.f32 %v3756_v60, %v1435_v57  ;;  %v1431_v46 = vpop.permute.xlu1 %1430  ;;  %v5344_v57 = vld [vmem:[#allocation34_spill] sm:$0xff] }
 0x1da   : > { %v1933_v62 = vmax.f32 %v1805_v12, 0.0  ;;  %v1209_v32 = vmul.f32 %v3033_v18, %v5337_v58  ;;  %v1210_v11 = vmul.f32 %v3036_v50, %v5337_v58  ;;  %2054 = vst [vmem:[%s4127_s8 + $0x50] sm:$0xff] %v1926_v37  ;;  %2055 = vst [vmem:[%s4127_s8 + $0x58] sm:$0xff] %v1927_v47  ;;  %v1802_v61 = vadd.f32 %v1674_v20, %v3840_v31  ;;  %v5342_v37 = vld [vmem:[#allocation14_spill] sm:$0xff]  ;;  %v5343_v20 = vld [vmem:[#allocation113_spill] sm:$0xff] }
 0x1db   : > { %v1803_v13 = vadd.f32 %v1675_v7, %v3843_v29  ;;  %v4217_v15 = vadd.f32 %v1207_v0, %v5338_v24  ;;  %v4220_v5 = vadd.f32 %v1208_v26, %v5339_v45  ;;  %2060 = vst [vmem:[%s4127_s8 + $0x80] sm:$0xff] %v1932_v8  ;;  %v1808_v25 = vadd.f32 %v1680_v6, %v5340_v22  ;;  %v1443_v0 = vpop.permute.xlu0 %1442 }
 0x1dc   : > { %2061 = vst [vmem:[%s4127_s8 + $0x88] sm:$0xff] %v1933_v62  ;;  %v1809_v40 = vadd.f32 %v1681_v54, %v5341_v35  ;;  %v1930_v42 = vmax.f32 %v1802_v61, 0.0  ;;  %v1678_v29 = vmul.f32 %v3753_v28, %v1431_v46  ;;  %v1679_v31 = vmul.f32 %v3756_v60, %v1431_v46  ;;  %v5345_v62 = vld [vmem:[#allocation82_spill] sm:$0xff]  ;;  %v5346_v54 = vld [vmem:[#allocation11_spill] sm:$0xff] }
 0x1dd   : > { %v1931_v52 = vmax.f32 %v1803_v13, 0.0  ;;  %v1936_v26 = vmax.f32 %v1808_v25, 0.0  ;;  %v1684_v12 = vmul.f32 %v3753_v28, %v1443_v0  ;;  %v1685_v27 = vmul.f32 %v3756_v60, %v1443_v0  ;;  %v1439_v13 = vpop.permute.xlu1 %1438 }
 0x1de   : > { %v1937_v49 = vmax.f32 %v1809_v40, 0.0  ;;  %v4231_v47 = vadd.f32 %v1209_v32, %v5342_v37  ;;  %v4234_v7 = vadd.f32 %v1210_v11, %v5343_v20  ;;  %2058 = vst [vmem:[%s4127_s8 + $0x70] sm:$0xff] %v1930_v42  ;;  %v1806_v8 = vadd.f32 %v1678_v29, %v5344_v57  ;;  %v5347_v29 = vld [vmem:[#allocation123_spill] sm:$0xff]  ;;  %v5351_v57 = vld [vmem:[#allocation88_spill] sm:$0xff] }
 0x1df   : > { %2059 = vst [vmem:[%s4127_s8 + $0x78] sm:$0xff] %v1931_v52  ;;  %v1807_v6 = vadd.f32 %v1679_v31, %v5345_v62  ;;  %v1211_v58 = vmul.f32 %v3033_v18, %v5346_v54  ;;  %v1212_v61 = vmul.f32 %v3036_v50, %v5346_v54  ;;  %2064 = vst [vmem:[%s4127_s8 + $0xa0] sm:$0xff] %v1936_v26  ;;  %v1451_v35 = vpop.permute.xlu0 %1450  ;;  %v5348_v26 = vld [vmem:[#allocation16_spill] sm:$0xff]  ;;  %v5350_v37 = vld [vmem:[#allocation87_spill] sm:$0xff] }
 0x1e0   : > { %2065 = vst [vmem:[%s4127_s8 + $0xa8] sm:$0xff] %v1937_v49  ;;  %v1812_v32 = vadd.f32 %v1684_v12, %v3901_v41  ;;  %v1813_v11 = vadd.f32 %v1685_v27, %v3904_v43  ;;  %v1934_v24 = vmax.f32 %v1806_v8, 0.0  ;;  %v1682_v22 = vmul.f32 %v3753_v28, %v1439_v13  ;;  %v5349_v12 = vld [vmem:[#allocation120_spill] sm:$0xff] }
 0x1e1   : > { %v1935_v45 = vmax.f32 %v1807_v6, 0.0  ;;  %v1683_v25 = vmul.f32 %v3756_v60, %v1439_v13  ;;  %v1688_v42 = vmul.f32 %v3753_v28, %v1451_v35  ;;  %v1689_v52 = vmul.f32 %v3756_v60, %v1451_v35  ;;  %v1447_v62 = vpop.permute.xlu1 %1446  ;;  %v5354_v35 = vld [vmem:[#allocation70_spill] sm:$0xff] }
 0x1e2   : > { %v1940_v40 = vmax.f32 %v1812_v32, 0.0  ;;  %v1941_v46 = vmax.f32 %v1813_v11, 0.0  ;;  %v1213_v41 = vmul.f32 %v3033_v18, %v5347_v29  ;;  %v1214_v43 = vmul.f32 %v3036_v50, %v5347_v29  ;;  %2062 = vst [vmem:[%s4127_s8 + $0x90] sm:$0xff] %v1934_v24  ;;  %v5352_v24 = vld [vmem:[#allocation118_spill] sm:$0xff] }
 0x1e3   : > { %2063 = vst [vmem:[%s4127_s8 + $0x98] sm:$0xff] %v1935_v45  ;;  %v1810_v31 = vadd.f32 %v1682_v22, %v3895_v2  ;;  %v1811_v0 = vadd.f32 %v1683_v25, %v3898_v9  ;;  %v4261_v49 = vadd.f32 %v1211_v58, %v5348_v26  ;;  %v4264_v27 = vadd.f32 %v1212_v61, %v5349_v12  ;;  %v1459_v58 = vpop.permute.xlu0 %1458  ;;  %v5353_v22 = vld [vmem:[#allocation119_spill] sm:$0xff] }
 0x1e4   : > { %2068 = vst [vmem:[%s4127_s8 + $0xc0] sm:$0xff] %v1940_v40  ;;  %2069 = vst [vmem:[%s4127_s8 + $0xc8] sm:$0xff] %v1941_v46  ;;  %v1816_v20 = vadd.f32 %v1688_v42, %v5350_v37  ;;  %v1817_v8 = vadd.f32 %v1689_v52, %v5351_v57  ;;  %v1686_v2 = vmul.f32 %v3753_v28, %v1447_v62  ;;  %v5355_v46 = vld [vmem:[#allocation35_spill] sm:$0xff]  ;;  %v5356_v52 = vld [vmem:[#allocation132_spill] sm:$0xff] }
 0x1e5   : > { %v1938_v6 = vmax.f32 %v1810_v31, 0.0  ;;  %v1939_v54 = vmax.f32 %v1811_v0, 0.0  ;;  %v1687_v9 = vmul.f32 %v3756_v60, %v1447_v62  ;;  %v1692_v11 = vmul.f32 %v3753_v28, %v1459_v58  ;;  %v1455_v12 = vpop.permute.xlu1 %1454 }
 0x1e6   : > { %v1944_v61 = vmax.f32 %v1816_v20, 0.0  ;;  %v1945_v32 = vmax.f32 %v1817_v8, 0.0  ;;  %v1693_v13 = vmul.f32 %v3756_v60, %v1459_v58  ;;  %v4275_v45 = vadd.f32 %v1213_v41, %v5352_v24  ;;  %v5357_v41 = vld [vmem:[#allocation72_spill] sm:$0xff]  ;;  %v5359_v58 = vld [vmem:[#allocation133_spill] sm:$0xff]  ;;  %v5361_v24 = vld [vmem:[#allocation86_spill] sm:$0xff] }
 0x1e7   : > { %v4278_v25 = vadd.f32 %v1214_v43, %v5353_v22  ;;  %2066 = vst [vmem:[%s4127_s8 + $0xb0] sm:$0xff] %v1938_v6  ;;  %2067 = vst [vmem:[%s4127_s8 + $0xb8] sm:$0xff] %v1939_v54  ;;  %v1814_v40 = vadd.f32 %v1686_v2, %v5354_v35  ;;  %v1815_v42 = vadd.f32 %v1687_v9, %v5355_v46  ;;  %v5358_v43 = vld [vmem:[#allocation37_spill] sm:$0xff]  ;;  %v1467_v62 = vpop.permute.xlu0 %1466  ;;  %v5362_v35 = vld [vmem:[#allocation124_spill] sm:$0xff] }
 0x1e8   : > { %v1215_v29 = vmul.f32 %v3033_v18, %v5356_v52  ;;  %v1216_v31 = vmul.f32 %v3036_v50, %v5356_v52  ;;  %2072 = vst [vmem:[%s4127_s8 + $0xe0] sm:$0xff] %v1944_v61  ;;  %2073 = vst [vmem:[%s4127_s8 + $0xe8] sm:$0xff] %v1945_v32  ;;  %v1820_v0 = vadd.f32 %v1692_v11, %v5357_v41  ;;  %v5360_v11 = vld [vmem:[#allocation85_spill] sm:$0xff]  ;;  %v5364_v52 = vld [vmem:[#allocation75_spill] sm:$0xff] }
 0x1e9   : > { %v1821_v26 = vadd.f32 %v1693_v13, %v5358_v43  ;;  %v1942_v37 = vmax.f32 %v1814_v40, 0.0  ;;  %v1943_v20 = vmax.f32 %v1815_v42, 0.0  ;;  %v1690_v57 = vmul.f32 %v3753_v28, %v1455_v12  ;;  %v5363_v46 = vld [vmem:[#allocation125_spill] sm:$0xff] }
 0x1ea   : > { %v1691_v8 = vmul.f32 %v3756_v60, %v1455_v12  ;;  %v1948_v6 = vmax.f32 %v1820_v0, 0.0  ;;  %v1696_v2 = vmul.f32 %v3753_v28, %v1467_v62  ;;  %v1697_v9 = vmul.f32 %v3756_v60, %v1467_v62  ;;  %v5365_v0 = vld [vmem:[#allocation76_spill] sm:$0xff] }
 0x1eb   : > { %v1949_v54 = vmax.f32 %v1821_v26, 0.0  ;;  %v1217_v61 = vmul.f32 %v3033_v18, %v5359_v58  ;;  %v1218_v32 = vmul.f32 %v3036_v50, %v5359_v58  ;;  %2070 = vst [vmem:[%s4127_s8 + $0xd0] sm:$0xff] %v1942_v37  ;;  %2071 = vst [vmem:[%s4127_s8 + $0xd8] sm:$0xff] %v1943_v20  ;;  %v1818_v13 = vadd.f32 %v1690_v57, %v5360_v11  ;;  %v1463_v26 = vpop.permute.xlu1 %1462  ;;  %v1475_v57 = vpop.permute.xlu0 %1474  ;;  %v5368_v11 = vld [vmem:[#allocation73_spill] sm:$0xff] }
 0x1ec   : > { %v1819_v22 = vadd.f32 %v1691_v8, %v5361_v24  ;;  %v4305_v40 = vadd.f32 %v1215_v29, %v5362_v35  ;;  %v4308_v42 = vadd.f32 %v1216_v31, %v5363_v46  ;;  %2076 = vst [vmem:[%s4127_s8 + $0x100] sm:$0xff] %v1948_v6  ;;  %v1824_v41 = vadd.f32 %v1696_v2, %v5364_v52  ;;  %v5369_v24 = vld [vmem:[#allocation74_spill] sm:$0xff]  ;;  %v5370_v35 = vld [vmem:[#allocation15_spill] sm:$0xff] }
 0x1ed   : > { %2077 = vst [vmem:[%s4127_s8 + $0x108] sm:$0xff] %v1949_v54  ;;  %v1825_v43 = vadd.f32 %v1697_v9, %v5365_v0  ;;  %v1946_v12 = vmax.f32 %v1818_v13, 0.0  ;;  %v1694_v20 = vmul.f32 %v3753_v28, %v1463_v26  ;;  %v1695_v29 = vmul.f32 %v3756_v60, %v1463_v26  ;;  %v5366_v54 = vld [vmem:[#allocation121_spill] sm:$0xff]  ;;  %v5367_v9 = vld [vmem:[#allocation122_spill] sm:$0xff] }
 0x1ee   : > { %v1947_v37 = vmax.f32 %v1819_v22, 0.0  ;;  %v1952_v31 = vmax.f32 %v1824_v41, 0.0  ;;  %v1700_v62 = vmul.f32 %v3753_v28, %v1475_v57  ;;  %v1701_v6 = vmul.f32 %v3756_v60, %v1475_v57 }
 0x1ef   : > { %v1953_v8 = vmax.f32 %v1825_v43, 0.0  ;;  %v4319_v2 = vadd.f32 %v1217_v61, %v5366_v54  ;;  %v4322_v58 = vadd.f32 %v1218_v32, %v5367_v9  ;;  %2074 = vst [vmem:[%s4127_s8 + $0xf0] sm:$0xff] %v1946_v12  ;;  %v1822_v13 = vadd.f32 %v1694_v20, %v5368_v11  ;;  %v1471_v41 = vpop.permute.xlu1 %1470  ;;  %v5372_v54 = vld [vmem:[#allocation127_spill] sm:$0xff]  ;;  %v5373_v11 = vld [vmem:[#allocation128_spill] sm:$0xff] }
 0x1f0   : > { %2075 = vst [vmem:[%s4127_s8 + $0xf8] sm:$0xff] %v1947_v37  ;;  %v1823_v22 = vadd.f32 %v1695_v29, %v5369_v24  ;;  %v1219_v46 = vmul.f32 %v3033_v18, %v5370_v35  ;;  %v1220_v52 = vmul.f32 %v3036_v50, %v5370_v35  ;;  %2080 = vst [vmem:[%s4127_s8 + $0x120] sm:$0xff] %v1952_v31  ;;  %v1483_v37 = vpop.permute.xlu0 %1482 }
 0x1f1   : > { %2081 = vst [vmem:[%s4127_s8 + $0x128] sm:$0xff] %v1953_v8  ;;  %v1828_v61 = vadd.f32 %v1700_v62, %v3993_v63  ;;  %v1829_v32 = vadd.f32 %v1701_v6, %v3996_v36  ;;  %v1950_v0 = vmax.f32 %v1822_v13, 0.0  ;;  %v1698_v26 = vmul.f32 %v3753_v28, %v1471_v41  ;;  %v5371_v8 = vld [vmem:[#allocation138_spill] sm:$0xff] }
 0x1f2   : > { %v1951_v43 = vmax.f32 %v1823_v22, 0.0  ;;  %v1699_v12 = vmul.f32 %v3756_v60, %v1471_v41  ;;  %v1704_v57 = vmul.f32 %v3753_v28, %v1483_v37  ;;  %v1705_v31 = vmul.f32 %v3756_v60, %v1483_v37  ;;  %v5376_v37 = vld [vmem:[#allocation40_spill] sm:$0xff] }
 0x1f3   : > { %v1956_v20 = vmax.f32 %v1828_v61, 0.0  ;;  %v1957_v29 = vmax.f32 %v1829_v32, 0.0  ;;  %v1221_v63 = vmul.f32 %v3033_v18, %v5371_v8  ;;  %v1222_v36 = vmul.f32 %v3036_v50, %v5371_v8  ;;  %2078 = vst [vmem:[%s4127_s8 + $0x110] sm:$0xff] %v1950_v0  ;;  %v1479_v35 = vpop.permute.xlu1 %1478 }
 0x1f4   : > { %2079 = vst [vmem:[%s4127_s8 + $0x118] sm:$0xff] %v1951_v43  ;;  %v1826_v62 = vadd.f32 %v1698_v26, %v3987_v17  ;;  %v1827_v6 = vadd.f32 %v1699_v12, %v3990_v39  ;;  %v4349_v9 = vadd.f32 %v1219_v46, %v5372_v54  ;;  %v4352_v13 = vadd.f32 %v1220_v52, %v5373_v11  ;;  %v1491_v46 = vpop.permute.xlu0 %1490  ;;  %v5374_v26 = vld [vmem:[#allocation13_spill] sm:$0xff] }
 0x1f5   : > { %2084 = vst [vmem:[%s4127_s8 + $0x140] sm:$0xff] %v1956_v20  ;;  %2085 = vst [vmem:[%s4127_s8 + $0x148] sm:$0xff] %v1957_v29  ;;  %v1832_v24 = vadd.f32 %v1704_v57, %v4013_v23  ;;  %v1833_v22 = vadd.f32 %v1705_v31, %v4016_v48  ;;  %v1702_v17 = vmul.f32 %v3753_v28, %v1479_v35  ;;  %v5375_v48 = vld [vmem:[#allocation126_spill] sm:$0xff]  ;;  %v5377_v29 = vld [vmem:[#allocation77_spill] sm:$0xff] }
 0x1f6   : > { %v1954_v61 = vmax.f32 %v1826_v62, 0.0  ;;  %v1955_v32 = vmax.f32 %v1827_v6, 0.0  ;;  %v1703_v39 = vmul.f32 %v3756_v60, %v1479_v35  ;;  %v1708_v0 = vmul.f32 %v3753_v28, %v1491_v46  ;;  %v5378_v31 = vld [vmem:[#allocation146_spill] sm:$0xff] }
 0x1f7   : > { %v1960_v52 = vmax.f32 %v1832_v24, 0.0  ;;  %v1961_v41 = vmax.f32 %v1833_v22, 0.0  ;;  %v1709_v43 = vmul.f32 %v3756_v60, %v1491_v46  ;;  %v4363_v23 = vadd.f32 %v1221_v63, %v5374_v26  ;;  %v5379_v63 = vld [vmem:[#allocation43_spill] sm:$0xff]  ;;  %v1487_v11 = vpop.permute.xlu1 %1486  ;;  %v5382_v26 = vld [vmem:[#allocation92_spill] sm:$0xff] }
 0x1f8   : > { %v4366_v12 = vadd.f32 %v1222_v36, %v5375_v48  ;;  %2082 = vst [vmem:[%s4127_s8 + $0x130] sm:$0xff] %v1954_v61  ;;  %2083 = vst [vmem:[%s4127_s8 + $0x138] sm:$0xff] %v1955_v32  ;;  %v1830_v20 = vadd.f32 %v1702_v17, %v5376_v37  ;;  %v1831_v57 = vadd.f32 %v1703_v39, %v5377_v29  ;;  %v5380_v36 = vld [vmem:[#allocation95_spill] sm:$0xff]  ;;  %v1499_v32 = vpop.permute.xlu0 %1498  ;;  %v5383_v37 = vld [vmem:[#allocation78_spill] sm:$0xff] }
 0x1f9   : > { %v1223_v8 = vmul.f32 %v3033_v18, %v5378_v31  ;;  %v1224_v62 = vmul.f32 %v3036_v50, %v5378_v31  ;;  %2088 = vst [vmem:[%s4127_s8 + $0x160] sm:$0xff] %v1960_v52  ;;  %2089 = vst [vmem:[%s4127_s8 + $0x168] sm:$0xff] %v1961_v41  ;;  %v1836_v6 = vadd.f32 %v1708_v0, %v5379_v63  ;;  %v5381_v41 = vld [vmem:[#allocation63_spill] sm:$0xff]  ;;  %v5384_v29 = vld [vmem:[#allocation130_spill] sm:$0xff] }
 0x1fa   : > { %v1837_v54 = vadd.f32 %v1709_v43, %v5380_v36  ;;  %v1958_v24 = vmax.f32 %v1830_v20, 0.0  ;;  %v1959_v22 = vmax.f32 %v1831_v57, 0.0  ;;  %v1706_v35 = vmul.f32 %v3753_v28, %v1487_v11  ;;  %v5385_v31 = vld [vmem:[#allocation131_spill] sm:$0xff] }
 0x1fb   : > { %v1707_v61 = vmul.f32 %v3756_v60, %v1487_v11  ;;  %v1964_v17 = vmax.f32 %v1836_v6, 0.0  ;;  %v1712_v46 = vmul.f32 %v3753_v28, %v1499_v32  ;;  %v1713_v52 = vmul.f32 %v3756_v60, %v1499_v32  ;;  %v5386_v6 = vld [vmem:[#allocation79_spill] sm:$0xff] }
 0x1fc   : > { %v1965_v39 = vmax.f32 %v1837_v54, 0.0  ;;  %v1225_v0 = vmul.f32 %v3033_v18, %v5381_v41  ;;  %v1226_v43 = vmul.f32 %v3036_v50, %v5381_v41  ;;  %2086 = vst [vmem:[%s4127_s8 + $0x150] sm:$0xff] %v1958_v24  ;;  %2087 = vst [vmem:[%s4127_s8 + $0x158] sm:$0xff] %v1959_v22  ;;  %v1834_v48 = vadd.f32 %v1706_v35, %v5382_v26  ;;  %v5387_v54 = vld [vmem:[#allocation29_spill] sm:$0xff]  ;;  %v1495_v24 = vpop.permute.xlu1 %1494  ;;  %v5388_v26 = vld [vmem:[#allocation18_spill] sm:$0xff] }
 0x1fd   : > { %v1835_v20 = vadd.f32 %v1707_v61, %v5383_v37  ;;  %v4393_v57 = vadd.f32 %v1223_v8, %v5384_v29  ;;  %v4396_v63 = vadd.f32 %v1224_v62, %v5385_v31  ;;  %2092 = vst [vmem:[%s4127_s8 + $0x180] sm:$0xff] %v1964_v17  ;;  %v1840_v36 = vadd.f32 %v1712_v46, %v5386_v6  ;;  %v1507_v61 = vpop.permute.xlu0 %1506  ;;  %v5391_v29 = vld [vmem:[#allocation94_spill] sm:$0xff]  ;;  %v5392_v6 = vld [vmem:[#allocation65_spill] sm:$0xff] }
 0x1fe   : > { %2093 = vst [vmem:[%s4127_s8 + $0x188] sm:$0xff] %v1965_v39  ;;  %v1841_v11 = vadd.f32 %v1713_v52, %v5387_v54  ;;  %v1962_v22 = vmax.f32 %v1834_v48, 0.0  ;;  %v1710_v35 = vmul.f32 %v3753_v28, %v1495_v24  ;;  %v1711_v8 = vmul.f32 %v3756_v60, %v1495_v24  ;;  %v5389_v52 = vld [vmem:[#allocation129_spill] sm:$0xff] }
 0x1ff   : > { %v1963_v32 = vmax.f32 %v1835_v20, 0.0  ;;  %v1968_v62 = vmax.f32 %v1840_v36, 0.0  ;;  %v1716_v17 = vmul.f32 %v3753_v28, %v1507_v61  ;;  %v1717_v39 = vmul.f32 %v3756_v60, %v1507_v61  ;;  %v5390_v48 = vld [vmem:[#allocation93_spill] sm:$0xff] }
 0x200   : > { %v1969_v41 = vmax.f32 %v1841_v11, 0.0  ;;  %v4407_v46 = vadd.f32 %v1225_v0, %v5388_v26  ;;  %v4410_v37 = vadd.f32 %v1226_v43, %v5389_v52  ;;  %2090 = vst [vmem:[%s4127_s8 + $0x170] sm:$0xff] %v1962_v22  ;;  %v1838_v20 = vadd.f32 %v1710_v35, %v5390_v48  ;;  %v1503_v11 = vpop.permute.xlu1 %1502  ;;  %v5393_v52 = vld [vmem:[#allocation149_spill] sm:$0xff]  ;;  %v5394_v48 = vld [vmem:[#allocation20_spill] sm:$0xff] }
 0x201   : > { %2091 = vst [vmem:[%s4127_s8 + $0x178] sm:$0xff] %v1963_v32  ;;  %v1839_v31 = vadd.f32 %v1711_v8, %v5391_v29  ;;  %v1227_v36 = vmul.f32 %v3033_v18, %v5392_v6  ;;  %v1228_v54 = vmul.f32 %v3036_v50, %v5392_v6  ;;  %2096 = vst [vmem:[%s4127_s8 + $0x1a0] sm:$0xff] %v1968_v62  ;;  %v1515_v8 = vpop.permute.xlu0 %1514  ;;  %v5395_v29 = vld [vmem:[#allocation61_spill] sm:$0xff] }
 0x202   : > { %2097 = vst [vmem:[%s4127_s8 + $0x1a8] sm:$0xff] %v1969_v41  ;;  %v1844_v0 = vadd.f32 %v1716_v17, %v4085_v1  ;;  %v1845_v43 = vadd.f32 %v1717_v39, %v4088_v59  ;;  %v1966_v24 = vmax.f32 %v1838_v20, 0.0  ;;  %v1714_v32 = vmul.f32 %v3753_v28, %v1503_v11 }
 0x203   : > { %v1967_v22 = vmax.f32 %v1839_v31, 0.0  ;;  %v1715_v35 = vmul.f32 %v3756_v60, %v1503_v11  ;;  %v1720_v62 = vmul.f32 %v3753_v28, %v1515_v8  ;;  %v1721_v41 = vmul.f32 %v3756_v60, %v1515_v8  ;;  %v5396_v8 = vld [vmem:[#allocation134_spill] sm:$0xff] }
 0x204   : > { %v1972_v61 = vmax.f32 %v1844_v0, 0.0  ;;  %v1973_v26 = vmax.f32 %v1845_v43, 0.0  ;;  %v1229_v1 = vmul.f32 %v3033_v18, %v5393_v52  ;;  %v1230_v59 = vmul.f32 %v3036_v50, %v5393_v52  ;;  %2094 = vst [vmem:[%s4127_s8 + $0x190] sm:$0xff] %v1966_v24  ;;  %v1511_v43 = vpop.permute.xlu1 %1510 }
 0x205   : > { %2095 = vst [vmem:[%s4127_s8 + $0x198] sm:$0xff] %v1967_v22  ;;  %v1842_v17 = vadd.f32 %v1714_v32, %v4079_v53  ;;  %v1843_v39 = vadd.f32 %v1715_v35, %v4082_v44  ;;  %v4437_v20 = vadd.f32 %v1227_v36, %v5394_v48  ;;  %v4440_v31 = vadd.f32 %v1228_v54, %v5395_v29  ;;  %v1523_v36 = vpop.permute.xlu0 %1522 }
 0x206   : > { %2100 = vst [vmem:[%s4127_s8 + $0x1c0] sm:$0xff] %v1972_v61  ;;  %2101 = vst [vmem:[%s4127_s8 + $0x1c8] sm:$0xff] %v1973_v26  ;;  %v1848_v6 = vadd.f32 %v1720_v62, %v4102_v3  ;;  %v1849_v0 = vadd.f32 %v1721_v41, %v4105_v4  ;;  %v1718_v44 = vmul.f32 %v3753_v28, %v1511_v43  ;;  %v5397_v4 = vld [vmem:[#allocation135_spill] sm:$0xff] }
 0x207   : > { %v1970_v11 = vmax.f32 %v1842_v17, 0.0  ;;  %v1971_v24 = vmax.f32 %v1843_v39, 0.0  ;;  %v1719_v53 = vmul.f32 %v3756_v60, %v1511_v43  ;;  %v1724_v32 = vmul.f32 %v3753_v28, %v1523_v36  ;;  %v5398_v41 = vld [vmem:[#allocation159_spill] sm:$0xff] }
 0x208   : > { %v1976_v54 = vmax.f32 %v1848_v6, 0.0  ;;  %v1977_v22 = vmax.f32 %v1849_v0, 0.0  ;;  %v1725_v35 = vmul.f32 %v3756_v60, %v1523_v36  ;;  %v4451_v3 = vadd.f32 %v1229_v1, %v5396_v8  ;;  %v1519_v39 = vpop.permute.xlu1 %1518 }
 0x209   : > { %v4454_v61 = vadd.f32 %v1230_v59, %v5397_v4  ;;  %2098 = vst [vmem:[%s4127_s8 + $0x1b0] sm:$0xff] %v1970_v11  ;;  %2099 = vst [vmem:[%s4127_s8 + $0x1b8] sm:$0xff] %v1971_v24  ;;  %v1846_v26 = vadd.f32 %v1718_v44, %v4091_v38  ;;  %v1847_v62 = vadd.f32 %v1719_v53, %v4094_v30  ;;  %v1531_v6 = vpop.permute.xlu0 %1530  ;;  %v5399_v44 = vld [vmem:[#allocation27_spill] sm:$0xff] }
 0x20a   : > { %v1231_v52 = vmul.f32 %v3033_v18, %v5398_v41  ;;  %v1232_v17 = vmul.f32 %v3036_v50, %v5398_v41  ;;  %2104 = vst [vmem:[%s4127_s8 + $0x1e0] sm:$0xff] %v1976_v54  ;;  %2105 = vst [vmem:[%s4127_s8 + $0x1e8] sm:$0xff] %v1977_v22  ;;  %v1852_v1 = vadd.f32 %v1724_v32, %v4130_v51  ;;  %v5400_v54 = vld [vmem:[#allocation139_spill] sm:$0xff]  ;;  %v5401_v32 = vld [vmem:[#allocation140_spill] sm:$0xff] }
 0x20b   : > { %v1853_v59 = vadd.f32 %v1725_v35, %v4133_v56  ;;  %v1974_v48 = vmax.f32 %v1846_v26, 0.0  ;;  %v1975_v29 = vmax.f32 %v1847_v62, 0.0  ;;  %v1722_v38 = vmul.f32 %v3753_v28, %v1519_v39 }
 0x20c   : > { %v1723_v30 = vmul.f32 %v3756_v60, %v1519_v39  ;;  %v1980_v0 = vmax.f32 %v1852_v1, 0.0  ;;  %v1728_v11 = vmul.f32 %v3753_v28, %v1531_v6  ;;  %v1729_v24 = vmul.f32 %v3756_v60, %v1531_v6  ;;  %v1527_v26 = vpop.permute.xlu1 %1526  ;;  %v5404_v6 = vld [vmem:[#allocation26_spill] sm:$0xff] }
 0x20d   : > { %v1981_v43 = vmax.f32 %v1853_v59, 0.0  ;;  %v1233_v51 = vmul.f32 %v3033_v18, %v5399_v44  ;;  %v1234_v56 = vmul.f32 %v3036_v50, %v5399_v44  ;;  %2102 = vst [vmem:[%s4127_s8 + $0x1d0] sm:$0xff] %v1974_v48  ;;  %2103 = vst [vmem:[%s4127_s8 + $0x1d8] sm:$0xff] %v1975_v29  ;;  %v1850_v53 = vadd.f32 %v1722_v38, %v4111_v34  ;;  %v5402_v48 = vld [vmem:[#allocation136_spill] sm:$0xff] }
 0x20e   : > { %v1851_v36 = vadd.f32 %v1723_v30, %v4114_v10  ;;  %v4481_v22 = vadd.f32 %v1231_v52, %v5400_v54  ;;  %v4484_v35 = vadd.f32 %v1232_v17, %v5401_v32  ;;  %2108 = vst [vmem:[%s4127_s8 + $0x200] sm:$0xff] %v1980_v0  ;;  %v1856_v8 = vadd.f32 %v1728_v11, %v4173_v14  ;;  %v1539_v52 = vpop.permute.xlu0 %1538 }
 0x20f   : > { %2109 = vst [vmem:[%s4127_s8 + $0x208] sm:$0xff] %v1981_v43  ;;  %v1857_v4 = vadd.f32 %v1729_v24, %v4176_v16  ;;  %v1978_v62 = vmax.f32 %v1850_v53, 0.0  ;;  %v1726_v34 = vmul.f32 %v3753_v28, %v1527_v26  ;;  %v1727_v10 = vmul.f32 %v3756_v60, %v1527_v26  ;;  %v5403_v16 = vld [vmem:[#allocation137_spill] sm:$0xff] }
 0x210   : > { %v1979_v41 = vmax.f32 %v1851_v36, 0.0  ;;  %v1984_v17 = vmax.f32 %v1856_v8, 0.0  ;;  %v1732_v59 = vmul.f32 %v3753_v28, %v1539_v52  ;;  %v1733_v39 = vmul.f32 %v3756_v60, %v1539_v52  ;;  %v1535_v44 = vpop.permute.xlu1 %1534 }
 0x211   : > { %v1985_v1 = vmax.f32 %v1857_v4, 0.0  ;;  %v4495_v14 = vadd.f32 %v1233_v51, %v5402_v48  ;;  %v4498_v29 = vadd.f32 %v1234_v56, %v5403_v16  ;;  %2106 = vst [vmem:[%s4127_s8 + $0x1f0] sm:$0xff] %v1978_v62  ;;  %v1854_v38 = vadd.f32 %v1726_v34, %v4143_v55  ;;  %v5405_v4 = vld [vmem:[#allocation28_spill] sm:$0xff] }
 0x212   : > { %2107 = vst [vmem:[%s4127_s8 + $0x1f8] sm:$0xff] %v1979_v41  ;;  %v1855_v30 = vadd.f32 %v1727_v10, %v4146_v21  ;;  %v1235_v0 = vmul.f32 %v3033_v18, %v5404_v6  ;;  %v1236_v43 = vmul.f32 %v3036_v50, %v5404_v6  ;;  %2112 = vst [vmem:[%s4127_s8 + $0x220] sm:$0xff] %v1984_v17  ;;  %v1547_v53 = vpop.permute.xlu0 %1546  ;;  %v5406_v41 = vld [vmem:[#allocation141_spill] sm:$0xff]  ;;  %v5407_v10 = vld [vmem:[#allocation142_spill] sm:$0xff] }
 0x213   : > { %2113 = vst [vmem:[%s4127_s8 + $0x228] sm:$0xff] %v1985_v1  ;;  %v1860_v11 = vadd.f32 %v1732_v59, %v4217_v15  ;;  %v1861_v24 = vadd.f32 %v1733_v39, %v4220_v5  ;;  %v1982_v51 = vmax.f32 %v1854_v38, 0.0  ;;  %v1730_v55 = vmul.f32 %v3753_v28, %v1535_v44 }
 0x214   : > { %v1983_v56 = vmax.f32 %v1855_v30, 0.0  ;;  %v1731_v21 = vmul.f32 %v3756_v60, %v1535_v44  ;;  %v1736_v32 = vmul.f32 %v3753_v28, %v1547_v53  ;;  %v1737_v8 = vmul.f32 %v3756_v60, %v1547_v53  ;;  %v1543_v59 = vpop.permute.xlu1 %1542 }
 0x215   : > { %v1988_v36 = vmax.f32 %v1860_v11, 0.0  ;;  %v1989_v54 = vmax.f32 %v1861_v24, 0.0  ;;  %v1237_v15 = vmul.f32 %v3033_v18, %v5405_v4  ;;  %v1238_v5 = vmul.f32 %v3036_v50, %v5405_v4  ;;  %2110 = vst [vmem:[%s4127_s8 + $0x210] sm:$0xff] %v1982_v51  ;;  %v5410_v51 = vld [vmem:[#allocation66_spill] sm:$0xff] }
 0x216   : > { %2111 = vst [vmem:[%s4127_s8 + $0x218] sm:$0xff] %v1983_v56  ;;  %v1858_v26 = vadd.f32 %v1730_v55, %v4187_v33  ;;  %v1859_v62 = vadd.f32 %v1731_v21, %v4190_v19  ;;  %v4525_v34 = vadd.f32 %v1235_v0, %v5406_v41  ;;  %v4528_v52 = vadd.f32 %v1236_v43, %v5407_v10  ;;  %v1555_v16 = vpop.permute.xlu0 %1554  ;;  %v5408_v43 = vld [vmem:[#allocation62_spill] sm:$0xff] }
 0x217   : > { %2116 = vst [vmem:[%s4127_s8 + $0x240] sm:$0xff] %v1988_v36  ;;  %2117 = vst [vmem:[%s4127_s8 + $0x248] sm:$0xff] %v1989_v54  ;;  %v1864_v17 = vadd.f32 %v1736_v32, %v4261_v49  ;;  %v1865_v1 = vadd.f32 %v1737_v8, %v4264_v27  ;;  %v1734_v33 = vmul.f32 %v3753_v28, %v1543_v59  ;;  %v5409_v27 = vld [vmem:[#allocation17_spill] sm:$0xff] }
 0x218   : > { %v1986_v39 = vmax.f32 %v1858_v26, 0.0  ;;  %v1987_v48 = vmax.f32 %v1859_v62, 0.0  ;;  %v1735_v19 = vmul.f32 %v3756_v60, %v1543_v59  ;;  %v1740_v6 = vmul.f32 %v3753_v28, %v1555_v16  ;;  %v1551_v36 = vpop.permute.xlu1 %1550  ;;  %v5411_v62 = vld [vmem:[#allocation67_spill] sm:$0xff]  ;;  %v5413_v59 = vld [vmem:[#allocation145_spill] sm:$0xff] }
 0x219   : > { %v1992_v38 = vmax.f32 %v1864_v17, 0.0  ;;  %v1993_v30 = vmax.f32 %v1865_v1, 0.0  ;;  %v1741_v0 = vmul.f32 %v3756_v60, %v1555_v16  ;;  %v4539_v49 = vadd.f32 %v1237_v15, %v5408_v43  ;;  %v5412_v17 = vld [vmem:[#allocation144_spill] sm:$0xff] }
 0x21a   : > { %v4542_v11 = vadd.f32 %v1238_v5, %v5409_v27  ;;  %2114 = vst [vmem:[%s4127_s8 + $0x230] sm:$0xff] %v1986_v39  ;;  %2115 = vst [vmem:[%s4127_s8 + $0x238] sm:$0xff] %v1987_v48  ;;  %v1862_v24 = vadd.f32 %v1734_v33, %v4231_v47  ;;  %v1863_v44 = vadd.f32 %v1735_v19, %v4234_v7  ;;  %v1563_v8 = vpop.permute.xlu0 %1562 }
 0x21b   : > { %v1239_v56 = vmul.f32 %v3033_v18, %v5410_v51  ;;  %v1240_v55 = vmul.f32 %v3036_v50, %v5410_v51  ;;  %2120 = vst [vmem:[%s4127_s8 + $0x260] sm:$0xff] %v1992_v38  ;;  %2121 = vst [vmem:[%s4127_s8 + $0x268] sm:$0xff] %v1993_v30  ;;  %v1868_v21 = vadd.f32 %v1740_v6, %v4305_v40 }
 0x21c   : > { %v1869_v53 = vadd.f32 %v1741_v0, %v4308_v42  ;;  %v1990_v54 = vmax.f32 %v1862_v24, 0.0  ;;  %v1991_v32 = vmax.f32 %v1863_v44, 0.0  ;;  %v1738_v47 = vmul.f32 %v3753_v28, %v1551_v36  ;;  %v1559_v19 = vpop.permute.xlu1 %1558  ;;  %v5414_v24 = vld [vmem:[#allocation21_spill] sm:$0xff] }
 0x21d   : > { %v1739_v7 = vmul.f32 %v3756_v60, %v1551_v36  ;;  %v1996_v4 = vmax.f32 %v1868_v21, 0.0  ;;  %v1744_v5 = vmul.f32 %v3753_v28, %v1563_v8  ;;  %v1745_v26 = vmul.f32 %v3756_v60, %v1563_v8 }
 0x21e   : > { %v1997_v15 = vmax.f32 %v1869_v53, 0.0  ;;  %v1241_v40 = vmul.f32 %v3033_v18, %v5411_v62  ;;  %v1242_v42 = vmul.f32 %v3036_v50, %v5411_v62  ;;  %2118 = vst [vmem:[%s4127_s8 + $0x250] sm:$0xff] %v1990_v54  ;;  %2119 = vst [vmem:[%s4127_s8 + $0x258] sm:$0xff] %v1991_v32  ;;  %v1866_v41 = vadd.f32 %v1738_v47, %v4275_v45  ;;  %v1571_v30 = vpop.permute.xlu0 %1570  ;;  %v5417_v62 = vld [vmem:[#allocation68_spill] sm:$0xff] }
 0x21f   : > { %v1867_v10 = vadd.f32 %v1739_v7, %v4278_v25  ;;  %v4569_v1 = vadd.f32 %v1239_v56, %v5412_v17  ;;  %v4572_v39 = vadd.f32 %v1240_v55, %v5413_v59  ;;  %2124 = vst [vmem:[%s4127_s8 + $0x280] sm:$0xff] %v1996_v4  ;;  %v1872_v48 = vadd.f32 %v1744_v5, %v4349_v9  ;;  %v5416_v55 = vld [vmem:[#allocation84_spill] sm:$0xff]  ;;  %v5419_v17 = vld [vmem:[#allocation23_spill] sm:$0xff] }
 0x220   : > { %2125 = vst [vmem:[%s4127_s8 + $0x288] sm:$0xff] %v1997_v15  ;;  %v1873_v33 = vadd.f32 %v1745_v26, %v4352_v13  ;;  %v1994_v16 = vmax.f32 %v1866_v41, 0.0  ;;  %v1742_v45 = vmul.f32 %v3753_v28, %v1559_v19  ;;  %v1743_v25 = vmul.f32 %v3756_v60, %v1559_v19  ;;  %v5415_v13 = vld [vmem:[#allocation143_spill] sm:$0xff]  ;;  %v1567_v32 = vpop.permute.xlu1 %1566 }
 0x221   : > { %v1995_v38 = vmax.f32 %v1867_v10, 0.0  ;;  %v2000_v6 = vmax.f32 %v1872_v48, 0.0  ;;  %v1748_v43 = vmul.f32 %v3753_v28, %v1571_v30  ;;  %v1749_v27 = vmul.f32 %v3756_v60, %v1571_v30  ;;  %v5418_v41 = vld [vmem:[#allocation19_spill] sm:$0xff] }
 0x222   : > { %v2001_v0 = vmax.f32 %v1873_v33, 0.0  ;;  %v4583_v9 = vadd.f32 %v1241_v40, %v5414_v24  ;;  %v4586_v44 = vadd.f32 %v1242_v42, %v5415_v13  ;;  %2122 = vst [vmem:[%s4127_s8 + $0x270] sm:$0xff] %v1994_v16  ;;  %v1870_v51 = vadd.f32 %v1742_v45, %v4319_v2  ;;  %v1579_v8 = vpop.permute.xlu0 %1578 }
 0x223   : > { %2123 = vst [vmem:[%s4127_s8 + $0x278] sm:$0xff] %v1995_v38  ;;  %v1871_v56 = vadd.f32 %v1743_v25, %v4322_v58  ;;  %v1243_v21 = vmul.f32 %v3033_v18, %v5416_v55  ;;  %v1244_v53 = vmul.f32 %v3036_v50, %v5416_v55  ;;  %2128 = vst [vmem:[%s4127_s8 + $0x2a0] sm:$0xff] %v2000_v6 }
 0x224   : > { %2129 = vst [vmem:[%s4127_s8 + $0x2a8] sm:$0xff] %v2001_v0  ;;  %v1876_v36 = vadd.f32 %v1748_v43, %v4393_v57  ;;  %v1877_v54 = vadd.f32 %v1749_v27, %v4396_v63  ;;  %v1998_v47 = vmax.f32 %v1870_v51, 0.0  ;;  %v1746_v2 = vmul.f32 %v3753_v28, %v1567_v32  ;;  %v1575_v19 = vpop.permute.xlu1 %1574  ;;  %v5420_v43 = vld [vmem:[#allocation64_spill] sm:$0xff] }
 0x225   : > { %v1999_v7 = vmax.f32 %v1871_v56, 0.0  ;;  %v1747_v58 = vmul.f32 %v3756_v60, %v1567_v32  ;;  %v1752_v5 = vmul.f32 %v3753_v28, %v1579_v8  ;;  %v1753_v26 = vmul.f32 %v3756_v60, %v1579_v8  ;;  %v5422_v51 = vld [vmem:[#allocation32_spill] sm:$0xff] }
 0x226   : > { %v2004_v4 = vmax.f32 %v1876_v36, 0.0  ;;  %v2005_v15 = vmax.f32 %v1877_v54, 0.0  ;;  %v1245_v57 = vmul.f32 %v3033_v18, %v5417_v62  ;;  %v1246_v63 = vmul.f32 %v3036_v50, %v5417_v62  ;;  %2126 = vst [vmem:[%s4127_s8 + $0x290] sm:$0xff] %v1998_v47  ;;  %v1587_v45 = vpop.permute.xlu0 %1586 }
 0x227   : > { %2127 = vst [vmem:[%s4127_s8 + $0x298] sm:$0xff] %v1999_v7  ;;  %v1874_v40 = vadd.f32 %v1746_v2, %v4363_v23  ;;  %v1875_v42 = vadd.f32 %v1747_v58, %v4366_v12  ;;  %v4613_v10 = vadd.f32 %v1243_v21, %v5418_v41  ;;  %v4616_v59 = vadd.f32 %v1244_v53, %v5419_v17 }
 0x228   : > { %2132 = vst [vmem:[%s4127_s8 + $0x2c0] sm:$0xff] %v2004_v4  ;;  %2133 = vst [vmem:[%s4127_s8 + $0x2c8] sm:$0xff] %v2005_v15  ;;  %v1880_v48 = vadd.f32 %v1752_v5, %v4437_v20  ;;  %v1881_v33 = vadd.f32 %v1753_v26, %v4440_v31  ;;  %v1750_v23 = vmul.f32 %v3753_v28, %v1575_v19  ;;  %v5421_v31 = vld [vmem:[#allocation147_spill] sm:$0xff]  ;;  %v1583_v36 = vpop.permute.xlu1 %1582  ;;  %v5424_v26 = vld [vmem:[#allocation150_spill] sm:$0xff] }
 0x229   : > { %v2002_v16 = vmax.f32 %v1874_v40, 0.0  ;;  %v2003_v38 = vmax.f32 %v1875_v42, 0.0  ;;  %v1751_v12 = vmul.f32 %v3756_v60, %v1575_v19  ;;  %v1756_v6 = vmul.f32 %v3753_v28, %v1587_v45  ;;  %v5423_v4 = vld [vmem:[#allocation83_spill] sm:$0xff] }
 0x22a   : > { %v2008_v25 = vmax.f32 %v1880_v48, 0.0  ;;  %v2009_v30 = vmax.f32 %v1881_v33, 0.0  ;;  %v1757_v0 = vmul.f32 %v3756_v60, %v1587_v45  ;;  %v4627_v20 = vadd.f32 %v1245_v57, %v5420_v43  ;;  %v1595_v47 = vpop.permute.xlu0 %1594  ;;  %v5425_v57 = vld [vmem:[#allocation151_spill] sm:$0xff] }
 0x22b   : > { %v4630_v27 = vadd.f32 %v1246_v63, %v5421_v31  ;;  %2130 = vst [vmem:[%s4127_s8 + $0x2b0] sm:$0xff] %v2002_v16  ;;  %2131 = vst [vmem:[%s4127_s8 + $0x2b8] sm:$0xff] %v2003_v38  ;;  %v1878_v24 = vadd.f32 %v1750_v23, %v4407_v46  ;;  %v1879_v13 = vadd.f32 %v1751_v12, %v4410_v37  ;;  %v5426_v12 = vld [vmem:[#allocation22_spill] sm:$0xff] }
 0x22c   : > { %v1247_v56 = vmul.f32 %v3033_v18, %v5422_v51  ;;  %v1248_v55 = vmul.f32 %v3036_v50, %v5422_v51  ;;  %2136 = vst [vmem:[%s4127_s8 + $0x2e0] sm:$0xff] %v2008_v25  ;;  %2137 = vst [vmem:[%s4127_s8 + $0x2e8] sm:$0xff] %v2009_v30  ;;  %v1884_v21 = vadd.f32 %v1756_v6, %v4481_v22  ;;  %v1591_v41 = vpop.permute.xlu1 %1590  ;;  %v5428_v6 = vld [vmem:[#allocation71_spill] sm:$0xff] }
 0x22d   : > { %v1885_v53 = vadd.f32 %v1757_v0, %v4484_v35  ;;  %v2006_v54 = vmax.f32 %v1878_v24, 0.0  ;;  %v2007_v32 = vmax.f32 %v1879_v13, 0.0  ;;  %v1754_v46 = vmul.f32 %v3753_v28, %v1583_v36 }
 0x22e   : > { %v1755_v37 = vmul.f32 %v3756_v60, %v1583_v36  ;;  %v2012_v7 = vmax.f32 %v1884_v21, 0.0  ;;  %v1760_v58 = vmul.f32 %v3753_v28, %v1595_v47  ;;  %v1761_v8 = vmul.f32 %v3756_v60, %v1595_v47  ;;  %v1603_v33 = vpop.permute.xlu0 %1602  ;;  %v5430_v47 = vld [vmem:[#allocation153_spill] sm:$0xff] }
 0x22f   : > { %v2013_v2 = vmax.f32 %v1885_v53, 0.0  ;;  %v1249_v22 = vmul.f32 %v3033_v18, %v5423_v4  ;;  %v1250_v35 = vmul.f32 %v3036_v50, %v5423_v4  ;;  %2134 = vst [vmem:[%s4127_s8 + $0x2d0] sm:$0xff] %v2006_v54  ;;  %2135 = vst [vmem:[%s4127_s8 + $0x2d8] sm:$0xff] %v2007_v32  ;;  %v1882_v15 = vadd.f32 %v1754_v46, %v4451_v3  ;;  %v5429_v32 = vld [vmem:[#allocation90_spill] sm:$0xff] }
 0x230   : > { %v1883_v5 = vadd.f32 %v1755_v37, %v4454_v61  ;;  %v4657_v62 = vadd.f32 %v1247_v56, %v5424_v26  ;;  %v4660_v63 = vadd.f32 %v1248_v55, %v5425_v57  ;;  %2140 = vst [vmem:[%s4127_s8 + $0x300] sm:$0xff] %v2012_v7  ;;  %v1888_v40 = vadd.f32 %v1760_v58, %v4525_v34  ;;  %v1599_v13 = vpop.permute.xlu1 %1598 }
 0x231   : > { %2141 = vst [vmem:[%s4127_s8 + $0x308] sm:$0xff] %v2013_v2  ;;  %v1889_v42 = vadd.f32 %v1761_v8, %v4528_v52  ;;  %v2010_v17 = vmax.f32 %v1882_v15, 0.0  ;;  %v1758_v3 = vmul.f32 %v3753_v28, %v1591_v41  ;;  %v1759_v61 = vmul.f32 %v3756_v60, %v1591_v41  ;;  %v5427_v52 = vld [vmem:[#allocation148_spill] sm:$0xff]  ;;  %v5431_v2 = vld [vmem:[#allocation154_spill] sm:$0xff]  ;;  %v5432_v41 = vld [vmem:[#allocation39_spill] sm:$0xff] }
 0x232   : > { %v2011_v48 = vmax.f32 %v1883_v5, 0.0  ;;  %v2016_v19 = vmax.f32 %v1888_v40, 0.0  ;;  %v1764_v38 = vmul.f32 %v3753_v28, %v1603_v33  ;;  %v1765_v23 = vmul.f32 %v3756_v60, %v1603_v33  ;;  %v1611_v55 = vpop.permute.xlu0 %1610  ;;  %v5434_v33 = vld [vmem:[#allocation152_spill] sm:$0xff] }
 0x233   : > { %v2017_v16 = vmax.f32 %v1889_v42, 0.0  ;;  %v4671_v34 = vadd.f32 %v1249_v22, %v5426_v12  ;;  %v4674_v45 = vadd.f32 %v1250_v35, %v5427_v52  ;;  %2138 = vst [vmem:[%s4127_s8 + $0x2f0] sm:$0xff] %v2010_v17  ;;  %v1886_v25 = vadd.f32 %v1758_v3, %v4495_v14  ;;  %v5433_v3 = vld [vmem:[#allocation24_spill] sm:$0xff] }
 0x234   : > { %2139 = vst [vmem:[%s4127_s8 + $0x2f8] sm:$0xff] %v2011_v48  ;;  %v1887_v30 = vadd.f32 %v1759_v61, %v4498_v29  ;;  %v1251_v0 = vmul.f32 %v3033_v18, %v5428_v6  ;;  %v1252_v43 = vmul.f32 %v3036_v50, %v5428_v6  ;;  %2144 = vst [vmem:[%s4127_s8 + $0x320] sm:$0xff] %v2016_v19  ;;  %v1607_v22 = vpop.permute.xlu1 %1606 }
 0x235   : > { %2145 = vst [vmem:[%s4127_s8 + $0x328] sm:$0xff] %v2017_v16  ;;  %v1892_v31 = vadd.f32 %v1764_v38, %v4569_v1  ;;  %v1893_v24 = vadd.f32 %v1765_v23, %v4572_v39  ;;  %v2014_v51 = vmax.f32 %v1886_v25, 0.0  ;;  %v1762_v14 = vmul.f32 %v3753_v28, %v1599_v13 }
 0x236   : > { %v2015_v56 = vmax.f32 %v1887_v30, 0.0  ;;  %v1763_v29 = vmul.f32 %v3756_v60, %v1599_v13  ;;  %v1768_v36 = vmul.f32 %v3753_v28, %v1611_v55  ;;  %v1769_v54 = vmul.f32 %v3756_v60, %v1611_v55  ;;  %v1619_v5 = vpop.permute.xlu0 %1618 }
 0x237   : > { %v2020_v21 = vmax.f32 %v1892_v31, 0.0  ;;  %v2021_v53 = vmax.f32 %v1893_v24, 0.0  ;;  %v1253_v1 = vmul.f32 %v3033_v18, %v5429_v32  ;;  %v1254_v39 = vmul.f32 %v3036_v50, %v5429_v32  ;;  %2142 = vst [vmem:[%s4127_s8 + $0x310] sm:$0xff] %v2014_v51  ;;  %v5435_v31 = vld [vmem:[#allocation157_spill] sm:$0xff]  ;;  %v5436_v24 = vld [vmem:[#allocation158_spill] sm:$0xff] }
 0x238   : > { %2143 = vst [vmem:[%s4127_s8 + $0x318] sm:$0xff] %v2015_v56  ;;  %v1890_v46 = vadd.f32 %v1762_v14, %v4539_v49  ;;  %v1891_v37 = vadd.f32 %v1763_v29, %v4542_v11  ;;  %v1379_v7 = vadd.f32 %v1251_v0, %v5430_v47  ;;  %v1380_v58 = vadd.f32 %v1252_v43, %v5431_v2  ;;  %v1615_v23 = vpop.permute.xlu1 %1614  ;;  %v5437_v56 = vld [vmem:[#allocation42_spill] sm:$0xff]  ;;  %v5438_v47 = vld [vmem:[#allocation91_spill] sm:$0xff] }
 0x239   : > { %2148 = vst [vmem:[%s4127_s8 + $0x340] sm:$0xff] %v2020_v21  ;;  %2149 = vst [vmem:[%s4127_s8 + $0x348] sm:$0xff] %v2021_v53  ;;  %v1896_v8 = vadd.f32 %v1768_v36, %v4613_v10  ;;  %v1897_v4 = vadd.f32 %v1769_v54, %v4616_v59  ;;  %v1766_v49 = vmul.f32 %v3753_v28, %v1607_v22 }
 0x23a   : > { %v2018_v35 = vmax.f32 %v1890_v46, 0.0  ;;  %v2019_v15 = vmax.f32 %v1891_v37, 0.0  ;;  %v1767_v11 = vmul.f32 %v3756_v60, %v1607_v22  ;;  %v1772_v40 = vmul.f32 %v3753_v28, %v1619_v5  ;;  %v1627_v25 = vpop.permute.xlu0 %1626 }
 0x23b   : > { %v2024_v26 = vmax.f32 %v1896_v8, 0.0  ;;  %v2025_v57 = vmax.f32 %v1897_v4, 0.0  ;;  %v1773_v42 = vmul.f32 %v3756_v60, %v1619_v5  ;;  %v1255_v10 = vmul.f32 %v3033_v18, %v5432_v41  ;;  %v5439_v4 = vld [vmem:[#allocation161_spill] sm:$0xff] }
 0x23c   : > { %v1256_v59 = vmul.f32 %v3036_v50, %v5432_v41  ;;  %2146 = vst [vmem:[%s4127_s8 + $0x330] sm:$0xff] %v2018_v35  ;;  %2147 = vst [vmem:[%s4127_s8 + $0x338] sm:$0xff] %v2019_v15  ;;  %v1894_v17 = vadd.f32 %v1766_v49, %v4583_v9  ;;  %v1895_v48 = vadd.f32 %v1767_v11, %v4586_v44  ;;  %v1623_v53 = vpop.permute.xlu1 %1622  ;;  %v5440_v35 = vld [vmem:[#allocation162_spill] sm:$0xff] }
 0x23d   : > { %v4719_v61 = vadd.f32 %v1253_v1, %v5433_v3  ;;  %v4722_v19 = vadd.f32 %v1254_v39, %v5434_v33  ;;  %2152 = vst [vmem:[%s4127_s8 + $0x360] sm:$0xff] %v2024_v26  ;;  %2153 = vst [vmem:[%s4127_s8 + $0x368] sm:$0xff] %v2025_v57  ;;  %v1900_v16 = vadd.f32 %v1772_v40, %v4657_v62  ;;  %v5442_v3 = vld [vmem:[#allocation156_spill] sm:$0xff] }
 0x23e   : > { %v1901_v38 = vadd.f32 %v1773_v42, %v4660_v63  ;;  %v2022_v12 = vmax.f32 %v1894_v17, 0.0  ;;  %v2023_v52 = vmax.f32 %v1895_v48, 0.0  ;;  %v1770_v9 = vmul.f32 %v3753_v28, %v1615_v23  ;;  %v1635_v32 = vpop.permute.xlu0 %1634  ;;  %v5441_v17 = vld [vmem:[#allocation155_spill] sm:$0xff] }
 0x23f   : > { %v1771_v44 = vmul.f32 %v3756_v60, %v1615_v23  ;;  %v2028_v30 = vmax.f32 %v1900_v16, 0.0  ;;  %v1776_v0 = vmul.f32 %v3753_v28, %v1627_v25  ;;  %v1777_v43 = vmul.f32 %v3756_v60, %v1627_v25  ;;  %v5443_v23 = vld [vmem:[#allocation96_spill] sm:$0xff] }
 0x240   : > { %v2029_v6 = vmax.f32 %v1901_v38, 0.0  ;;  %v1383_v62 = vadd.f32 %v1255_v10, %v5435_v31  ;;  %v1384_v63 = vadd.f32 %v1256_v59, %v5436_v24  ;;  %2150 = vst [vmem:[%s4127_s8 + $0x350] sm:$0xff] %v2022_v12  ;;  %2151 = vst [vmem:[%s4127_s8 + $0x358] sm:$0xff] %v2023_v52  ;;  %v1898_v13 = vadd.f32 %v1770_v9, %v4627_v20  ;;  %v1631_v5 = vpop.permute.xlu1 %1630  ;;  %v5446_v31 = vld [vmem:[#allocation160_spill] sm:$0xff] }
 0x241   : > { %v1899_v51 = vadd.f32 %v1771_v44, %v4630_v27  ;;  %v1259_v14 = vmul.f32 %v3033_v18, %v5437_v56  ;;  %v1260_v29 = vmul.f32 %v3036_v50, %v5437_v56  ;;  %2156 = vst [vmem:[%s4127_s8 + $0x380] sm:$0xff] %v2028_v30  ;;  %v1904_v55 = vadd.f32 %v1776_v0, %v1379_v7  ;;  %v5444_v0 = vld [vmem:[#allocation25_spill] sm:$0xff] }
 0x242   : > { %2157 = vst [vmem:[%s4127_s8 + $0x388] sm:$0xff] %v2029_v6  ;;  %v1905_v21 = vadd.f32 %v1777_v43, %v1380_v58  ;;  %v2026_v36 = vmax.f32 %v1898_v13, 0.0  ;;  %v1774_v20 = vmul.f32 %v3753_v28, %v1623_v53  ;;  %v1775_v27 = vmul.f32 %v3756_v60, %v1623_v53  ;;  %v5445_v43 = vld [vmem:[#allocation80_spill] sm:$0xff] }
 0x243   : > { %v2027_v54 = vmax.f32 %v1899_v51, 0.0  ;;  %v2032_v1 = vmax.f32 %v1904_v55, 0.0  ;;  %v1780_v46 = vmul.f32 %v3753_v28, %v1635_v32  ;;  %v1781_v37 = vmul.f32 %v3756_v60, %v1635_v32 }
 0x244   : > { %v2033_v39 = vmax.f32 %v1905_v21, 0.0  ;;  %v1257_v7 = vmul.f32 %v3033_v18, %v5438_v47  ;;  %v1258_v2 = vmul.f32 %v3036_v50, %v5438_v47  ;;  %2154 = vst [vmem:[%s4127_s8 + $0x370] sm:$0xff] %v2026_v36  ;;  %v1902_v58 = vadd.f32 %v1774_v20, %v4671_v34  ;;  %v1639_v25 = vpop.permute.xlu1 %1638 }
 0x245   : > { %2155 = vst [vmem:[%s4127_s8 + $0x378] sm:$0xff] %v2027_v54  ;;  %v1903_v8 = vadd.f32 %v1775_v27, %v4674_v45  ;;  %v1387_v22 = vadd.f32 %v1259_v14, %v5439_v4  ;;  %v1388_v15 = vadd.f32 %v1260_v29, %v5440_v35  ;;  %2160 = vst [vmem:[%s4127_s8 + $0x3a0] sm:$0xff] %v2032_v1  ;;  %v1643_v45 = vpop.permute.xlu0 %1642 }
 0x246   : > { %2161 = vst [vmem:[%s4127_s8 + $0x3a8] sm:$0xff] %v2033_v39  ;;  %v1908_v49 = vadd.f32 %v1780_v46, %v1383_v62  ;;  %v1909_v11 = vadd.f32 %v1781_v37, %v1384_v63  ;;  %v2030_v26 = vmax.f32 %v1902_v58, 0.0  ;;  %v1778_v40 = vmul.f32 %v3753_v28, %v1631_v5  ;;  %v5447_v62 = vld [vmem:[#allocation81_spill] sm:$0xff] }
 0x247   : > { %v2031_v57 = vmax.f32 %v1903_v8, 0.0  ;;  %v1779_v34 = vmul.f32 %v3756_v60, %v1631_v5  ;;  %v1784_v10 = vmul.f32 %v3753_v28, %v1643_v45  ;;  %v1785_v59 = vmul.f32 %v3756_v60, %v1643_v45 }
 0x248   : > { %v2036_v42 = vmax.f32 %v1908_v49, 0.0  ;;  %v2037_v41 = vmax.f32 %v1909_v11, 0.0  ;;  %v1385_v48 = vadd.f32 %v1257_v7, %v5441_v17  ;;  %v1386_v33 = vadd.f32 %v1258_v2, %v5442_v3  ;;  %2158 = vst [vmem:[%s4127_s8 + $0x390] sm:$0xff] %v2030_v26  ;;  %v1647_v29 = vpop.permute.xlu1 %1646 }
 0x249   : > { %2159 = vst [vmem:[%s4127_s8 + $0x398] sm:$0xff] %v2031_v57  ;;  %v1906_v16 = vadd.f32 %v1778_v40, %v4719_v61  ;;  %v1907_v38 = vadd.f32 %v1779_v34, %v4722_v19  ;;  %v1261_v12 = vmul.f32 %v3033_v18, %v5443_v23  ;;  %v1262_v52 = vmul.f32 %v3036_v50, %v5443_v23 }
 0x24a   : > { %2164 = vst [vmem:[%s4127_s8 + $0x3c0] sm:$0xff] %v2036_v42  ;;  %2165 = vst [vmem:[%s4127_s8 + $0x3c8] sm:$0xff] %v2037_v41  ;;  %v1912_v9 = vadd.f32 %v1784_v10, %v1387_v22  ;;  %v1913_v44 = vadd.f32 %v1785_v59, %v1388_v15  ;;  %v1782_v61 = vmul.f32 %v3753_v28, %v1639_v25 }
 0x24b   : > { %v2034_v30 = vmax.f32 %v1906_v16, 0.0  ;;  %v2035_v6 = vmax.f32 %v1907_v38, 0.0  ;;  %v1783_v19 = vmul.f32 %v3756_v60, %v1639_v25  ;;  %v864_v18 = vadd.f32 %v5445_v43, %v5444_v0 }
 0x24c   : > { %v865_v24 = vadd.f32 %v5447_v62, %v5446_v31  ;;  %v2040_v50 = vmax.f32 %v1912_v9, 0.0  ;;  %v2041_v63 = vmax.f32 %v1913_v44, 0.0  ;;  %v1910_v13 = vadd.f32 %v1782_v61, %v1385_v48 }
 0x24d   : > { %2162 = vst [vmem:[%s4127_s8 + $0x3b0] sm:$0xff] %v2034_v30  ;;  %2163 = vst [vmem:[%s4127_s8 + $0x3b8] sm:$0xff] %v2035_v6  ;;  %v1911_v51 = vadd.f32 %v1783_v19, %v1386_v33  ;;  %v1389_v56 = vadd.f32 %v1261_v12, %v864_v18  ;;  %v1786_v53 = vmul.f32 %v3753_v28, %v1647_v29 }
 0x24e   : > { %v1390_v14 = vadd.f32 %v1262_v52, %v865_v24  ;;  %2168 = vst [vmem:[%s4127_s8 + $0x3e0] sm:$0xff] %v2040_v50  ;;  %2169 = vst [vmem:[%s4127_s8 + $0x3e8] sm:$0xff] %v2041_v63  ;;  %v2038_v55 = vmax.f32 %v1910_v13, 0.0  ;;  %v1787_v36 = vmul.f32 %v3756_v60, %v1647_v29 }
 0x24f   : > { %v2039_v21 = vmax.f32 %v1911_v51, 0.0  ;;  %v1914_v54 = vadd.f32 %v1786_v53, %v1389_v56 }
 0x250   : > { %2166 = vst [vmem:[%s4127_s8 + $0x3d0] sm:$0xff] %v2038_v55  ;;  %v1915_v20 = vadd.f32 %v1787_v36, %v1390_v14 }
 0x251   : > { %2167 = vst [vmem:[%s4127_s8 + $0x3d8] sm:$0xff] %v2039_v21  ;;  %v2042_v27 = vmax.f32 %v1914_v54, 0.0 }
 0x252   : > { %v2043_v32 = vmax.f32 %v1915_v20, 0.0 }
 0x253   : > { %2170 = vst [vmem:[%s4127_s8 + $0x3f0] sm:$0xff] %v2042_v27 }
 0x254   : > { %2171 = vst [vmem:[%s4127_s8 + $0x3f8] sm:$0xff] %v2043_v32 }
 0x255 PF: > { %s15_s12 = sadd.s32 1, %s2393_s12  }
 0x256   : > { %p12_p3 = scmp.ge.s32.totalorder %s15_s12, 6  }
 0x258   :  { %14 = sbr.rel (!%p12_p3) target bundleno = 2 (0x2), region = 73 }
 0x25d   :  { %2196 = vsyncpa [#allocation3], 1 }
 0x25e   :  { %2198 = vsyncpa [#allocation3 + $0x1], 1 }
 0x25f   :  { %2199 = vsyncpa [#allocation5], 1 }

// kernel: teacher_forward.4
= control target key start
LH: loop header
LB: loop body
LE: loop exit
PB: predicated region body
PF: predicated region fallthrough
CT: control target
= control target key end

     0   :  { %s3330_s12 = smov 0   ;;  %s3332_s13 = smov 0   ;;  %s4851_s0 = inlined_call_operand.vmem [shape: f32[128,4096], index: 0, kind: input, shape index: {}]   ;;  %s4852_s1 = inlined_call_operand.vmem [shape: f32[4096,128], index: 1, kind: input, shape index: {}]   ;;  %s4853_s2 = inlined_call_operand.vmem [shape: f32[1,128], index: 2, kind: input, shape index: {}]   ;;  %s4854_s3 = inlined_call_operand.vmem [shape: f32[128,128], index: 3, kind: output, shape index: {}]  }
   0x1   :  { %s3334_s14 = smov 0   ;;  %s3336_s15 = smov 0  }
   0x2   :  { %s3338_s16 = smov 0  }
   0x3 LB: > { %s22_s17 = sadd.s32 1, %s3304_s15  ;;  %p41_p1 = scmp.ne.s32.totalorder %s3296_s13, %s3292_s12  ;;  %s3308_s16 = sphi %s3338_s16, %s13_s16   ;;  %s3304_s15 = sphi %s3336_s15, %s4914_s15   ;;  %s3300_s14 = sphi %s3334_s14, %s4913_s14   ;;  %s3296_s13 = sphi %s3332_s13, %s4912_s13   ;;  %s3292_s12 = sphi %s3330_s12, %s4911_s12  }
   0x4   : > { %p23_p0 = scmp.ge.s32.totalorder %s22_s17, 2  ;;  %p42_p2 = scmp.eq.s32.totalorder %s3308_s16, 0 }
   0x5   : > { %s34_s19 = sadd.s32 1, %s3296_s13  ;;  %p2575_p5 = scmp.ge.s32.totalorder %s3308_s16, 2 }
   0x6   : > { %s4916_s17 = smov (%p23_p0, %s22_s17), 0  ;;  %p43_p3 = por %p42_p2, %p41_p1 }
   0x7   : > { %s30_s18 = ssub.s32 %s3304_s15, %s4916_s17  ;;  %143 = sbr.rel (%p2575_p5) target bundleno = 144 (0x90), region = 20 }
   0x8   : > { %p32_p4 = scmp.eq.s32.totalorder %s30_s18, 0 }
   0xa   : > { %s3365_s20 = scalar_select %p32_p4, %s3296_s13, %s34_s19  }
   0xc   : > { %146 = sbr.rel (!%p43_p3) target bundleno = 144 (0x90), region = 24  ;;  %s148_s21 = sand.u32 (%p43_p3), 1, %s3296_s13  }
   0xd   : > { %s2589_s22 = sshll.u32 (%p43_p3), %s3304_s15, 7  ;;  %s2576_s23 = sshll.u32 (%p43_p3), %s148_s21, 11 }
   0xe   : > { %s3373_s26 = scalar_lea.vmem (%p43_p3), %s4851_s0, %s2589_s22  ;;  %s3378_s27 = scalar_lea.vmem (%p43_p3), [#allocation2], %s2576_s23 }
   0xf   : > { %v169_v0 = vld [vmem:[%s3373_s26] sm:$0xff] (%p43_p3)  ;;  %v171_v1 = vld [vmem:[%s3373_s26 + $0x8] sm:$0xff] (%p43_p3)  ;;  %v173_v2 = vld [vmem:[%s3373_s26 + $0x10] sm:$0xff] (%p43_p3) }
  0x10   : > { %170 = vst [vmem:[%s3378_s27] sm:$0xff] (%p43_p3), %v169_v0  ;;  %172 = vst [vmem:[%s3378_s27 + $0x8] sm:$0xff] (%p43_p3), %v171_v1  ;;  %v175_v3 = vld [vmem:[%s3373_s26 + $0x18] sm:$0xff] (%p43_p3)  ;;  %v177_v4 = vld [vmem:[%s3373_s26 + $0x20] sm:$0xff] (%p43_p3) }
  0x11   : > { %174 = vst [vmem:[%s3378_s27 + $0x10] sm:$0xff] %v173_v2  ;;  %v179_v5 = vld [vmem:[%s3373_s26 + $0x28] sm:$0xff]  ;;  %176 = vst [vmem:[%s3378_s27 + $0x18] sm:$0xff] %v175_v3  ;;  %v181_v6 = vld [vmem:[%s3373_s26 + $0x30] sm:$0xff] }
  0x12   : > { %178 = vst [vmem:[%s3378_s27 + $0x20] sm:$0xff] %v177_v4  ;;  %180 = vst [vmem:[%s3378_s27 + $0x28] sm:$0xff] %v179_v5  ;;  %v183_v7 = vld [vmem:[%s3373_s26 + $0x38] sm:$0xff]  ;;  %v185_v8 = vld [vmem:[%s3373_s26 + $0x40] sm:$0xff] }
  0x13   : > { %182 = vst [vmem:[%s3378_s27 + $0x30] sm:$0xff] %v181_v6  ;;  %184 = vst [vmem:[%s3378_s27 + $0x38] sm:$0xff] %v183_v7  ;;  %v187_v9 = vld [vmem:[%s3373_s26 + $0x48] sm:$0xff]  ;;  %v189_v10 = vld [vmem:[%s3373_s26 + $0x50] sm:$0xff] }
  0x14   : > { %186 = vst [vmem:[%s3378_s27 + $0x40] sm:$0xff] %v185_v8  ;;  %v191_v11 = vld [vmem:[%s3373_s26 + $0x58] sm:$0xff]  ;;  %188 = vst [vmem:[%s3378_s27 + $0x48] sm:$0xff] %v187_v9  ;;  %v193_v12 = vld [vmem:[%s3373_s26 + $0x60] sm:$0xff] }
  0x15   : > { %190 = vst [vmem:[%s3378_s27 + $0x50] sm:$0xff] %v189_v10  ;;  %192 = vst [vmem:[%s3378_s27 + $0x58] sm:$0xff] %v191_v11  ;;  %v195_v13 = vld [vmem:[%s3373_s26 + $0x68] sm:$0xff]  ;;  %v197_v14 = vld [vmem:[%s3373_s26 + $0x70] sm:$0xff] }
  0x16   : > { %194 = vst [vmem:[%s3378_s27 + $0x60] sm:$0xff] %v193_v12  ;;  %196 = vst [vmem:[%s3378_s27 + $0x68] sm:$0xff] %v195_v13  ;;  %v199_v15 = vld [vmem:[%s3373_s26 + $0x78] sm:$0xff]  ;;  %v201_v16 = vld [vmem:[%s3373_s26 + $0x100] sm:$0xff] }
  0x17   : > { %198 = vst [vmem:[%s3378_s27 + $0x70] sm:$0xff] %v197_v14  ;;  %v203_v17 = vld [vmem:[%s3373_s26 + $0x108] sm:$0xff]  ;;  %200 = vst [vmem:[%s3378_s27 + $0x78] sm:$0xff] %v199_v15  ;;  %v205_v18 = vld [vmem:[%s3373_s26 + $0x110] sm:$0xff] }
  0x18   : > { %202 = vst [vmem:[%s3378_s27 + $0x80] sm:$0xff] %v201_v16  ;;  %204 = vst [vmem:[%s3378_s27 + $0x88] sm:$0xff] %v203_v17  ;;  %v207_v19 = vld [vmem:[%s3373_s26 + $0x118] sm:$0xff]  ;;  %v209_v20 = vld [vmem:[%s3373_s26 + $0x120] sm:$0xff] }
  0x19   : > { %206 = vst [vmem:[%s3378_s27 + $0x90] sm:$0xff] %v205_v18  ;;  %208 = vst [vmem:[%s3378_s27 + $0x98] sm:$0xff] %v207_v19  ;;  %v211_v21 = vld [vmem:[%s3373_s26 + $0x128] sm:$0xff]  ;;  %v213_v22 = vld [vmem:[%s3373_s26 + $0x130] sm:$0xff] }
  0x1a   : > { %210 = vst [vmem:[%s3378_s27 + $0xa0] sm:$0xff] %v209_v20  ;;  %v215_v23 = vld [vmem:[%s3373_s26 + $0x138] sm:$0xff]  ;;  %212 = vst [vmem:[%s3378_s27 + $0xa8] sm:$0xff] %v211_v21  ;;  %v217_v24 = vld [vmem:[%s3373_s26 + $0x140] sm:$0xff] }
  0x1b   : > { %214 = vst [vmem:[%s3378_s27 + $0xb0] sm:$0xff] %v213_v22  ;;  %216 = vst [vmem:[%s3378_s27 + $0xb8] sm:$0xff] %v215_v23  ;;  %v219_v25 = vld [vmem:[%s3373_s26 + $0x148] sm:$0xff]  ;;  %v221_v26 = vld [vmem:[%s3373_s26 + $0x150] sm:$0xff] }
  0x1c   : > { %218 = vst [vmem:[%s3378_s27 + $0xc0] sm:$0xff] %v217_v24  ;;  %220 = vst [vmem:[%s3378_s27 + $0xc8] sm:$0xff] %v219_v25  ;;  %v223_v27 = vld [vmem:[%s3373_s26 + $0x158] sm:$0xff]  ;;  %v225_v28 = vld [vmem:[%s3373_s26 + $0x160] sm:$0xff] }
  0x1d   : > { %222 = vst [vmem:[%s3378_s27 + $0xd0] sm:$0xff] %v221_v26  ;;  %v227_v29 = vld [vmem:[%s3373_s26 + $0x168] sm:$0xff]  ;;  %224 = vst [vmem:[%s3378_s27 + $0xd8] sm:$0xff] %v223_v27  ;;  %v229_v30 = vld [vmem:[%s3373_s26 + $0x170] sm:$0xff] }
  0x1e   : > { %226 = vst [vmem:[%s3378_s27 + $0xe0] sm:$0xff] %v225_v28  ;;  %228 = vst [vmem:[%s3378_s27 + $0xe8] sm:$0xff] %v227_v29  ;;  %v231_v31 = vld [vmem:[%s3373_s26 + $0x178] sm:$0xff]  ;;  %v233_v32 = vld [vmem:[%s3373_s26 + $0x200] sm:$0xff] }
  0x1f   : > { %230 = vst [vmem:[%s3378_s27 + $0xf0] sm:$0xff] %v229_v30  ;;  %232 = vst [vmem:[%s3378_s27 + $0xf8] sm:$0xff] %v231_v31  ;;  %v235_v33 = vld [vmem:[%s3373_s26 + $0x208] sm:$0xff]  ;;  %v237_v34 = vld [vmem:[%s3373_s26 + $0x210] sm:$0xff] }
  0x20   : > { %234 = vst [vmem:[%s3378_s27 + $0x100] sm:$0xff] %v233_v32  ;;  %v239_v35 = vld [vmem:[%s3373_s26 + $0x218] sm:$0xff]  ;;  %236 = vst [vmem:[%s3378_s27 + $0x108] sm:$0xff] %v235_v33  ;;  %v241_v36 = vld [vmem:[%s3373_s26 + $0x220] sm:$0xff] }
  0x21   : > { %238 = vst [vmem:[%s3378_s27 + $0x110] sm:$0xff] %v237_v34  ;;  %240 = vst [vmem:[%s3378_s27 + $0x118] sm:$0xff] %v239_v35  ;;  %v243_v37 = vld [vmem:[%s3373_s26 + $0x228] sm:$0xff]  ;;  %v245_v38 = vld [vmem:[%s3373_s26 + $0x230] sm:$0xff] }
  0x22   : > { %242 = vst [vmem:[%s3378_s27 + $0x120] sm:$0xff] %v241_v36  ;;  %244 = vst [vmem:[%s3378_s27 + $0x128] sm:$0xff] %v243_v37  ;;  %v247_v39 = vld [vmem:[%s3373_s26 + $0x238] sm:$0xff]  ;;  %v249_v40 = vld [vmem:[%s3373_s26 + $0x240] sm:$0xff] }
  0x23   : > { %246 = vst [vmem:[%s3378_s27 + $0x130] sm:$0xff] %v245_v38  ;;  %v251_v41 = vld [vmem:[%s3373_s26 + $0x248] sm:$0xff]  ;;  %248 = vst [vmem:[%s3378_s27 + $0x138] sm:$0xff] %v247_v39  ;;  %v253_v42 = vld [vmem:[%s3373_s26 + $0x250] sm:$0xff] }
  0x24   : > { %250 = vst [vmem:[%s3378_s27 + $0x140] sm:$0xff] %v249_v40  ;;  %252 = vst [vmem:[%s3378_s27 + $0x148] sm:$0xff] %v251_v41  ;;  %v255_v43 = vld [vmem:[%s3373_s26 + $0x258] sm:$0xff]  ;;  %v257_v44 = vld [vmem:[%s3373_s26 + $0x260] sm:$0xff] }
  0x25   : > { %254 = vst [vmem:[%s3378_s27 + $0x150] sm:$0xff] %v253_v42  ;;  %256 = vst [vmem:[%s3378_s27 + $0x158] sm:$0xff] %v255_v43  ;;  %v259_v45 = vld [vmem:[%s3373_s26 + $0x268] sm:$0xff]  ;;  %v261_v46 = vld [vmem:[%s3373_s26 + $0x270] sm:$0xff] }
  0x26   : > { %258 = vst [vmem:[%s3378_s27 + $0x160] sm:$0xff] %v257_v44  ;;  %v263_v47 = vld [vmem:[%s3373_s26 + $0x278] sm:$0xff]  ;;  %260 = vst [vmem:[%s3378_s27 + $0x168] sm:$0xff] %v259_v45  ;;  %v265_v48 = vld [vmem:[%s3373_s26 + $0x300] sm:$0xff] }
  0x27   : > { %262 = vst [vmem:[%s3378_s27 + $0x170] sm:$0xff] %v261_v46  ;;  %264 = vst [vmem:[%s3378_s27 + $0x178] sm:$0xff] %v263_v47  ;;  %v267_v49 = vld [vmem:[%s3373_s26 + $0x308] sm:$0xff]  ;;  %v269_v50 = vld [vmem:[%s3373_s26 + $0x310] sm:$0xff] }
  0x28   : > { %266 = vst [vmem:[%s3378_s27 + $0x180] sm:$0xff] %v265_v48  ;;  %268 = vst [vmem:[%s3378_s27 + $0x188] sm:$0xff] %v267_v49  ;;  %v271_v51 = vld [vmem:[%s3373_s26 + $0x318] sm:$0xff]  ;;  %v273_v52 = vld [vmem:[%s3373_s26 + $0x320] sm:$0xff] }
  0x29   : > { %270 = vst [vmem:[%s3378_s27 + $0x190] sm:$0xff] %v269_v50  ;;  %v275_v53 = vld [vmem:[%s3373_s26 + $0x328] sm:$0xff]  ;;  %272 = vst [vmem:[%s3378_s27 + $0x198] sm:$0xff] %v271_v51  ;;  %v277_v54 = vld [vmem:[%s3373_s26 + $0x330] sm:$0xff] }
  0x2a   : > { %274 = vst [vmem:[%s3378_s27 + $0x1a0] sm:$0xff] %v273_v52  ;;  %276 = vst [vmem:[%s3378_s27 + $0x1a8] sm:$0xff] %v275_v53  ;;  %v279_v55 = vld [vmem:[%s3373_s26 + $0x338] sm:$0xff]  ;;  %v281_v56 = vld [vmem:[%s3373_s26 + $0x340] sm:$0xff] }
  0x2b   : > { %278 = vst [vmem:[%s3378_s27 + $0x1b0] sm:$0xff] %v277_v54  ;;  %280 = vst [vmem:[%s3378_s27 + $0x1b8] sm:$0xff] %v279_v55  ;;  %v283_v57 = vld [vmem:[%s3373_s26 + $0x348] sm:$0xff]  ;;  %v285_v58 = vld [vmem:[%s3373_s26 + $0x350] sm:$0xff] }
  0x2c   : > { %282 = vst [vmem:[%s3378_s27 + $0x1c0] sm:$0xff] %v281_v56  ;;  %v287_v59 = vld [vmem:[%s3373_s26 + $0x358] sm:$0xff]  ;;  %284 = vst [vmem:[%s3378_s27 + $0x1c8] sm:$0xff] %v283_v57  ;;  %v289_v60 = vld [vmem:[%s3373_s26 + $0x360] sm:$0xff] }
  0x2d   : > { %286 = vst [vmem:[%s3378_s27 + $0x1d0] sm:$0xff] %v285_v58  ;;  %288 = vst [vmem:[%s3378_s27 + $0x1d8] sm:$0xff] %v287_v59  ;;  %v291_v61 = vld [vmem:[%s3373_s26 + $0x368] sm:$0xff]  ;;  %v293_v62 = vld [vmem:[%s3373_s26 + $0x370] sm:$0xff] }
  0x2e   : > { %290 = vst [vmem:[%s3378_s27 + $0x1e0] sm:$0xff] %v289_v60  ;;  %292 = vst [vmem:[%s3378_s27 + $0x1e8] sm:$0xff] %v291_v61  ;;  %v295_v63 = vld [vmem:[%s3373_s26 + $0x378] sm:$0xff]  ;;  %v297_v0 = vld [vmem:[%s3373_s26 + $0x400] sm:$0xff] }
  0x2f   : > { %294 = vst [vmem:[%s3378_s27 + $0x1f0] sm:$0xff] %v293_v62  ;;  %v299_v1 = vld [vmem:[%s3373_s26 + $0x408] sm:$0xff]  ;;  %296 = vst [vmem:[%s3378_s27 + $0x1f8] sm:$0xff] %v295_v63  ;;  %v301_v2 = vld [vmem:[%s3373_s26 + $0x410] sm:$0xff] }
  0x30   : > { %298 = vst [vmem:[%s3378_s27 + $0x200] sm:$0xff] %v297_v0  ;;  %300 = vst [vmem:[%s3378_s27 + $0x208] sm:$0xff] %v299_v1  ;;  %v303_v3 = vld [vmem:[%s3373_s26 + $0x418] sm:$0xff]  ;;  %v305_v4 = vld [vmem:[%s3373_s26 + $0x420] sm:$0xff] }
  0x31   : > { %302 = vst [vmem:[%s3378_s27 + $0x210] sm:$0xff] %v301_v2  ;;  %304 = vst [vmem:[%s3378_s27 + $0x218] sm:$0xff] %v303_v3  ;;  %v307_v5 = vld [vmem:[%s3373_s26 + $0x428] sm:$0xff]  ;;  %v309_v6 = vld [vmem:[%s3373_s26 + $0x430] sm:$0xff] }
  0x32   : > { %306 = vst [vmem:[%s3378_s27 + $0x220] sm:$0xff] %v305_v4  ;;  %v311_v7 = vld [vmem:[%s3373_s26 + $0x438] sm:$0xff]  ;;  %308 = vst [vmem:[%s3378_s27 + $0x228] sm:$0xff] %v307_v5  ;;  %v313_v8 = vld [vmem:[%s3373_s26 + $0x440] sm:$0xff] }
  0x33   : > { %310 = vst [vmem:[%s3378_s27 + $0x230] sm:$0xff] %v309_v6  ;;  %312 = vst [vmem:[%s3378_s27 + $0x238] sm:$0xff] %v311_v7  ;;  %v315_v9 = vld [vmem:[%s3373_s26 + $0x448] sm:$0xff]  ;;  %v317_v10 = vld [vmem:[%s3373_s26 + $0x450] sm:$0xff] }
  0x34   : > { %314 = vst [vmem:[%s3378_s27 + $0x240] sm:$0xff] %v313_v8  ;;  %316 = vst [vmem:[%s3378_s27 + $0x248] sm:$0xff] %v315_v9  ;;  %v319_v11 = vld [vmem:[%s3373_s26 + $0x458] sm:$0xff]  ;;  %v321_v12 = vld [vmem:[%s3373_s26 + $0x460] sm:$0xff] }
  0x35   : > { %318 = vst [vmem:[%s3378_s27 + $0x250] sm:$0xff] %v317_v10  ;;  %v323_v13 = vld [vmem:[%s3373_s26 + $0x468] sm:$0xff]  ;;  %320 = vst [vmem:[%s3378_s27 + $0x258] sm:$0xff] %v319_v11  ;;  %v325_v14 = vld [vmem:[%s3373_s26 + $0x470] sm:$0xff] }
  0x36   : > { %322 = vst [vmem:[%s3378_s27 + $0x260] sm:$0xff] %v321_v12  ;;  %324 = vst [vmem:[%s3378_s27 + $0x268] sm:$0xff] %v323_v13  ;;  %v327_v15 = vld [vmem:[%s3373_s26 + $0x478] sm:$0xff]  ;;  %v329_v16 = vld [vmem:[%s3373_s26 + $0x500] sm:$0xff] }
  0x37   : > { %326 = vst [vmem:[%s3378_s27 + $0x270] sm:$0xff] %v325_v14  ;;  %328 = vst [vmem:[%s3378_s27 + $0x278] sm:$0xff] %v327_v15  ;;  %v331_v17 = vld [vmem:[%s3373_s26 + $0x508] sm:$0xff]  ;;  %v333_v18 = vld [vmem:[%s3373_s26 + $0x510] sm:$0xff] }
  0x38   : > { %330 = vst [vmem:[%s3378_s27 + $0x280] sm:$0xff] %v329_v16  ;;  %v335_v19 = vld [vmem:[%s3373_s26 + $0x518] sm:$0xff]  ;;  %332 = vst [vmem:[%s3378_s27 + $0x288] sm:$0xff] %v331_v17  ;;  %v337_v20 = vld [vmem:[%s3373_s26 + $0x520] sm:$0xff] }
  0x39   : > { %334 = vst [vmem:[%s3378_s27 + $0x290] sm:$0xff] %v333_v18  ;;  %336 = vst [vmem:[%s3378_s27 + $0x298] sm:$0xff] %v335_v19  ;;  %v339_v21 = vld [vmem:[%s3373_s26 + $0x528] sm:$0xff]  ;;  %v341_v22 = vld [vmem:[%s3373_s26 + $0x530] sm:$0xff] }
  0x3a   : > { %338 = vst [vmem:[%s3378_s27 + $0x2a0] sm:$0xff] %v337_v20  ;;  %340 = vst [vmem:[%s3378_s27 + $0x2a8] sm:$0xff] %v339_v21  ;;  %v343_v23 = vld [vmem:[%s3373_s26 + $0x538] sm:$0xff]  ;;  %v345_v24 = vld [vmem:[%s3373_s26 + $0x540] sm:$0xff] }
  0x3b   : > { %342 = vst [vmem:[%s3378_s27 + $0x2b0] sm:$0xff] %v341_v22  ;;  %v347_v25 = vld [vmem:[%s3373_s26 + $0x548] sm:$0xff]  ;;  %344 = vst [vmem:[%s3378_s27 + $0x2b8] sm:$0xff] %v343_v23  ;;  %v349_v26 = vld [vmem:[%s3373_s26 + $0x550] sm:$0xff] }
  0x3c   : > { %346 = vst [vmem:[%s3378_s27 + $0x2c0] sm:$0xff] %v345_v24  ;;  %348 = vst [vmem:[%s3378_s27 + $0x2c8] sm:$0xff] %v347_v25  ;;  %v351_v27 = vld [vmem:[%s3373_s26 + $0x558] sm:$0xff]  ;;  %v353_v28 = vld [vmem:[%s3373_s26 + $0x560] sm:$0xff] }
  0x3d   : > { %350 = vst [vmem:[%s3378_s27 + $0x2d0] sm:$0xff] %v349_v26  ;;  %352 = vst [vmem:[%s3378_s27 + $0x2d8] sm:$0xff] %v351_v27  ;;  %v355_v29 = vld [vmem:[%s3373_s26 + $0x568] sm:$0xff]  ;;  %v357_v30 = vld [vmem:[%s3373_s26 + $0x570] sm:$0xff] }
  0x3e   : > { %354 = vst [vmem:[%s3378_s27 + $0x2e0] sm:$0xff] %v353_v28  ;;  %v359_v31 = vld [vmem:[%s3373_s26 + $0x578] sm:$0xff]  ;;  %356 = vst [vmem:[%s3378_s27 + $0x2e8] sm:$0xff] %v355_v29  ;;  %v361_v32 = vld [vmem:[%s3373_s26 + $0x600] sm:$0xff] }
  0x3f   : > { %358 = vst [vmem:[%s3378_s27 + $0x2f0] sm:$0xff] %v357_v30  ;;  %360 = vst [vmem:[%s3378_s27 + $0x2f8] sm:$0xff] %v359_v31  ;;  %v363_v33 = vld [vmem:[%s3373_s26 + $0x608] sm:$0xff]  ;;  %v365_v34 = vld [vmem:[%s3373_s26 + $0x610] sm:$0xff] }
  0x40   : > { %362 = vst [vmem:[%s3378_s27 + $0x300] sm:$0xff] %v361_v32  ;;  %364 = vst [vmem:[%s3378_s27 + $0x308] sm:$0xff] %v363_v33  ;;  %v367_v35 = vld [vmem:[%s3373_s26 + $0x618] sm:$0xff]  ;;  %v369_v36 = vld [vmem:[%s3373_s26 + $0x620] sm:$0xff] }
  0x41   : > { %366 = vst [vmem:[%s3378_s27 + $0x310] sm:$0xff] %v365_v34  ;;  %v371_v37 = vld [vmem:[%s3373_s26 + $0x628] sm:$0xff]  ;;  %368 = vst [vmem:[%s3378_s27 + $0x318] sm:$0xff] %v367_v35  ;;  %v373_v38 = vld [vmem:[%s3373_s26 + $0x630] sm:$0xff] }
  0x42   : > { %370 = vst [vmem:[%s3378_s27 + $0x320] sm:$0xff] %v369_v36  ;;  %372 = vst [vmem:[%s3378_s27 + $0x328] sm:$0xff] %v371_v37  ;;  %v375_v39 = vld [vmem:[%s3373_s26 + $0x638] sm:$0xff]  ;;  %v377_v40 = vld [vmem:[%s3373_s26 + $0x640] sm:$0xff] }
  0x43   : > { %374 = vst [vmem:[%s3378_s27 + $0x330] sm:$0xff] %v373_v38  ;;  %376 = vst [vmem:[%s3378_s27 + $0x338] sm:$0xff] %v375_v39  ;;  %v379_v41 = vld [vmem:[%s3373_s26 + $0x648] sm:$0xff]  ;;  %v381_v42 = vld [vmem:[%s3373_s26 + $0x650] sm:$0xff] }
  0x44   : > { %378 = vst [vmem:[%s3378_s27 + $0x340] sm:$0xff] %v377_v40  ;;  %v383_v43 = vld [vmem:[%s3373_s26 + $0x658] sm:$0xff]  ;;  %380 = vst [vmem:[%s3378_s27 + $0x348] sm:$0xff] %v379_v41  ;;  %v385_v44 = vld [vmem:[%s3373_s26 + $0x660] sm:$0xff] }
  0x45   : > { %382 = vst [vmem:[%s3378_s27 + $0x350] sm:$0xff] %v381_v42  ;;  %384 = vst [vmem:[%s3378_s27 + $0x358] sm:$0xff] %v383_v43  ;;  %v387_v45 = vld [vmem:[%s3373_s26 + $0x668] sm:$0xff]  ;;  %v389_v46 = vld [vmem:[%s3373_s26 + $0x670] sm:$0xff] }
  0x46   : > { %386 = vst [vmem:[%s3378_s27 + $0x360] sm:$0xff] %v385_v44  ;;  %388 = vst [vmem:[%s3378_s27 + $0x368] sm:$0xff] %v387_v45  ;;  %v391_v47 = vld [vmem:[%s3373_s26 + $0x678] sm:$0xff]  ;;  %v393_v48 = vld [vmem:[%s3373_s26 + $0x700] sm:$0xff] }
  0x47   : > { %390 = vst [vmem:[%s3378_s27 + $0x370] sm:$0xff] %v389_v46  ;;  %v395_v49 = vld [vmem:[%s3373_s26 + $0x708] sm:$0xff]  ;;  %392 = vst [vmem:[%s3378_s27 + $0x378] sm:$0xff] %v391_v47  ;;  %v397_v50 = vld [vmem:[%s3373_s26 + $0x710] sm:$0xff] }
  0x48   : > { %394 = vst [vmem:[%s3378_s27 + $0x380] sm:$0xff] %v393_v48  ;;  %396 = vst [vmem:[%s3378_s27 + $0x388] sm:$0xff] %v395_v49  ;;  %v399_v51 = vld [vmem:[%s3373_s26 + $0x718] sm:$0xff]  ;;  %v401_v52 = vld [vmem:[%s3373_s26 + $0x720] sm:$0xff] }
  0x49   : > { %398 = vst [vmem:[%s3378_s27 + $0x390] sm:$0xff] %v397_v50  ;;  %400 = vst [vmem:[%s3378_s27 + $0x398] sm:$0xff] %v399_v51  ;;  %v403_v53 = vld [vmem:[%s3373_s26 + $0x728] sm:$0xff]  ;;  %v405_v54 = vld [vmem:[%s3373_s26 + $0x730] sm:$0xff] }
  0x4a   : > { %402 = vst [vmem:[%s3378_s27 + $0x3a0] sm:$0xff] %v401_v52  ;;  %v407_v55 = vld [vmem:[%s3373_s26 + $0x738] sm:$0xff]  ;;  %404 = vst [vmem:[%s3378_s27 + $0x3a8] sm:$0xff] %v403_v53  ;;  %v409_v56 = vld [vmem:[%s3373_s26 + $0x740] sm:$0xff] }
  0x4b   : > { %406 = vst [vmem:[%s3378_s27 + $0x3b0] sm:$0xff] %v405_v54  ;;  %408 = vst [vmem:[%s3378_s27 + $0x3b8] sm:$0xff] %v407_v55  ;;  %v411_v57 = vld [vmem:[%s3373_s26 + $0x748] sm:$0xff]  ;;  %v413_v58 = vld [vmem:[%s3373_s26 + $0x750] sm:$0xff] }
  0x4c   : > { %410 = vst [vmem:[%s3378_s27 + $0x3c0] sm:$0xff] %v409_v56  ;;  %412 = vst [vmem:[%s3378_s27 + $0x3c8] sm:$0xff] %v411_v57  ;;  %v415_v59 = vld [vmem:[%s3373_s26 + $0x758] sm:$0xff]  ;;  %v417_v60 = vld [vmem:[%s3373_s26 + $0x760] sm:$0xff] }
  0x4d   : > { %414 = vst [vmem:[%s3378_s27 + $0x3d0] sm:$0xff] %v413_v58  ;;  %v419_v61 = vld [vmem:[%s3373_s26 + $0x768] sm:$0xff]  ;;  %416 = vst [vmem:[%s3378_s27 + $0x3d8] sm:$0xff] %v415_v59  ;;  %v421_v62 = vld [vmem:[%s3373_s26 + $0x770] sm:$0xff] }
  0x4e   : > { %418 = vst [vmem:[%s3378_s27 + $0x3e0] sm:$0xff] %v417_v60  ;;  %420 = vst [vmem:[%s3378_s27 + $0x3e8] sm:$0xff] %v419_v61  ;;  %v423_v63 = vld [vmem:[%s3373_s26 + $0x778] sm:$0xff]  ;;  %v425_v0 = vld [vmem:[%s3373_s26 + $0x800] sm:$0xff] }
  0x4f   : > { %422 = vst [vmem:[%s3378_s27 + $0x3f0] sm:$0xff] %v421_v62  ;;  %424 = vst [vmem:[%s3378_s27 + $0x3f8] sm:$0xff] %v423_v63  ;;  %v427_v1 = vld [vmem:[%s3373_s26 + $0x808] sm:$0xff]  ;;  %v429_v2 = vld [vmem:[%s3373_s26 + $0x810] sm:$0xff] }
  0x50   : > { %426 = vst [vmem:[%s3378_s27 + $0x400] sm:$0xff] %v425_v0  ;;  %v431_v3 = vld [vmem:[%s3373_s26 + $0x818] sm:$0xff]  ;;  %428 = vst [vmem:[%s3378_s27 + $0x408] sm:$0xff] %v427_v1  ;;  %v433_v4 = vld [vmem:[%s3373_s26 + $0x820] sm:$0xff] }
  0x51   : > { %430 = vst [vmem:[%s3378_s27 + $0x410] sm:$0xff] %v429_v2  ;;  %432 = vst [vmem:[%s3378_s27 + $0x418] sm:$0xff] %v431_v3  ;;  %v435_v5 = vld [vmem:[%s3373_s26 + $0x828] sm:$0xff]  ;;  %v437_v6 = vld [vmem:[%s3373_s26 + $0x830] sm:$0xff] }
  0x52   : > { %434 = vst [vmem:[%s3378_s27 + $0x420] sm:$0xff] %v433_v4  ;;  %436 = vst [vmem:[%s3378_s27 + $0x428] sm:$0xff] %v435_v5  ;;  %v439_v7 = vld [vmem:[%s3373_s26 + $0x838] sm:$0xff]  ;;  %v441_v8 = vld [vmem:[%s3373_s26 + $0x840] sm:$0xff] }
  0x53   : > { %438 = vst [vmem:[%s3378_s27 + $0x430] sm:$0xff] %v437_v6  ;;  %v443_v9 = vld [vmem:[%s3373_s26 + $0x848] sm:$0xff]  ;;  %440 = vst [vmem:[%s3378_s27 + $0x438] sm:$0xff] %v439_v7  ;;  %v445_v10 = vld [vmem:[%s3373_s26 + $0x850] sm:$0xff] }
  0x54   : > { %442 = vst [vmem:[%s3378_s27 + $0x440] sm:$0xff] %v441_v8  ;;  %444 = vst [vmem:[%s3378_s27 + $0x448] sm:$0xff] %v443_v9  ;;  %v447_v11 = vld [vmem:[%s3373_s26 + $0x858] sm:$0xff]  ;;  %v449_v12 = vld [vmem:[%s3373_s26 + $0x860] sm:$0xff] }
  0x55   : > { %446 = vst [vmem:[%s3378_s27 + $0x450] sm:$0xff] %v445_v10  ;;  %448 = vst [vmem:[%s3378_s27 + $0x458] sm:$0xff] %v447_v11  ;;  %v451_v13 = vld [vmem:[%s3373_s26 + $0x868] sm:$0xff]  ;;  %v453_v14 = vld [vmem:[%s3373_s26 + $0x870] sm:$0xff] }
  0x56   : > { %450 = vst [vmem:[%s3378_s27 + $0x460] sm:$0xff] %v449_v12  ;;  %v455_v15 = vld [vmem:[%s3373_s26 + $0x878] sm:$0xff]  ;;  %452 = vst [vmem:[%s3378_s27 + $0x468] sm:$0xff] %v451_v13  ;;  %v457_v16 = vld [vmem:[%s3373_s26 + $0x900] sm:$0xff] }
  0x57   : > { %454 = vst [vmem:[%s3378_s27 + $0x470] sm:$0xff] %v453_v14  ;;  %456 = vst [vmem:[%s3378_s27 + $0x478] sm:$0xff] %v455_v15  ;;  %v459_v17 = vld [vmem:[%s3373_s26 + $0x908] sm:$0xff]  ;;  %v461_v18 = vld [vmem:[%s3373_s26 + $0x910] sm:$0xff] }
  0x58   : > { %458 = vst [vmem:[%s3378_s27 + $0x480] sm:$0xff] %v457_v16  ;;  %460 = vst [vmem:[%s3378_s27 + $0x488] sm:$0xff] %v459_v17  ;;  %v463_v19 = vld [vmem:[%s3373_s26 + $0x918] sm:$0xff]  ;;  %v465_v20 = vld [vmem:[%s3373_s26 + $0x920] sm:$0xff] }
  0x59   : > { %462 = vst [vmem:[%s3378_s27 + $0x490] sm:$0xff] %v461_v18  ;;  %v467_v21 = vld [vmem:[%s3373_s26 + $0x928] sm:$0xff]  ;;  %464 = vst [vmem:[%s3378_s27 + $0x498] sm:$0xff] %v463_v19  ;;  %v469_v22 = vld [vmem:[%s3373_s26 + $0x930] sm:$0xff] }
  0x5a   : > { %466 = vst [vmem:[%s3378_s27 + $0x4a0] sm:$0xff] %v465_v20  ;;  %468 = vst [vmem:[%s3378_s27 + $0x4a8] sm:$0xff] %v467_v21  ;;  %v471_v23 = vld [vmem:[%s3373_s26 + $0x938] sm:$0xff]  ;;  %v473_v24 = vld [vmem:[%s3373_s26 + $0x940] sm:$0xff] }
  0x5b   : > { %470 = vst [vmem:[%s3378_s27 + $0x4b0] sm:$0xff] %v469_v22  ;;  %472 = vst [vmem:[%s3378_s27 + $0x4b8] sm:$0xff] %v471_v23  ;;  %v475_v25 = vld [vmem:[%s3373_s26 + $0x948] sm:$0xff]  ;;  %v477_v26 = vld [vmem:[%s3373_s26 + $0x950] sm:$0xff] }
  0x5c   : > { %474 = vst [vmem:[%s3378_s27 + $0x4c0] sm:$0xff] %v473_v24  ;;  %v479_v27 = vld [vmem:[%s3373_s26 + $0x958] sm:$0xff]  ;;  %476 = vst [vmem:[%s3378_s27 + $0x4c8] sm:$0xff] %v475_v25  ;;  %v481_v28 = vld [vmem:[%s3373_s26 + $0x960] sm:$0xff] }
  0x5d   : > { %478 = vst [vmem:[%s3378_s27 + $0x4d0] sm:$0xff] %v477_v26  ;;  %480 = vst [vmem:[%s3378_s27 + $0x4d8] sm:$0xff] %v479_v27  ;;  %v483_v29 = vld [vmem:[%s3373_s26 + $0x968] sm:$0xff]  ;;  %v485_v30 = vld [vmem:[%s3373_s26 + $0x970] sm:$0xff] }
  0x5e   : > { %482 = vst [vmem:[%s3378_s27 + $0x4e0] sm:$0xff] %v481_v28  ;;  %484 = vst [vmem:[%s3378_s27 + $0x4e8] sm:$0xff] %v483_v29  ;;  %v487_v31 = vld [vmem:[%s3373_s26 + $0x978] sm:$0xff]  ;;  %v489_v32 = vld [vmem:[%s3373_s26 + $0xa00] sm:$0xff] }
  0x5f   : > { %486 = vst [vmem:[%s3378_s27 + $0x4f0] sm:$0xff] %v485_v30  ;;  %v491_v33 = vld [vmem:[%s3373_s26 + $0xa08] sm:$0xff]  ;;  %488 = vst [vmem:[%s3378_s27 + $0x4f8] sm:$0xff] %v487_v31  ;;  %v493_v34 = vld [vmem:[%s3373_s26 + $0xa10] sm:$0xff] }
  0x60   : > { %490 = vst [vmem:[%s3378_s27 + $0x500] sm:$0xff] %v489_v32  ;;  %492 = vst [vmem:[%s3378_s27 + $0x508] sm:$0xff] %v491_v33  ;;  %v495_v35 = vld [vmem:[%s3373_s26 + $0xa18] sm:$0xff]  ;;  %v497_v36 = vld [vmem:[%s3373_s26 + $0xa20] sm:$0xff] }
  0x61   : > { %494 = vst [vmem:[%s3378_s27 + $0x510] sm:$0xff] %v493_v34  ;;  %496 = vst [vmem:[%s3378_s27 + $0x518] sm:$0xff] %v495_v35  ;;  %v499_v37 = vld [vmem:[%s3373_s26 + $0xa28] sm:$0xff]  ;;  %v501_v38 = vld [vmem:[%s3373_s26 + $0xa30] sm:$0xff] }
  0x62   : > { %498 = vst [vmem:[%s3378_s27 + $0x520] sm:$0xff] %v497_v36  ;;  %v503_v39 = vld [vmem:[%s3373_s26 + $0xa38] sm:$0xff]  ;;  %500 = vst [vmem:[%s3378_s27 + $0x528] sm:$0xff] %v499_v37  ;;  %v505_v40 = vld [vmem:[%s3373_s26 + $0xa40] sm:$0xff] }
  0x63   : > { %502 = vst [vmem:[%s3378_s27 + $0x530] sm:$0xff] %v501_v38  ;;  %504 = vst [vmem:[%s3378_s27 + $0x538] sm:$0xff] %v503_v39  ;;  %v507_v41 = vld [vmem:[%s3373_s26 + $0xa48] sm:$0xff]  ;;  %v509_v42 = vld [vmem:[%s3373_s26 + $0xa50] sm:$0xff] }
  0x64   : > { %506 = vst [vmem:[%s3378_s27 + $0x540] sm:$0xff] %v505_v40  ;;  %508 = vst [vmem:[%s3378_s27 + $0x548] sm:$0xff] %v507_v41  ;;  %v511_v43 = vld [vmem:[%s3373_s26 + $0xa58] sm:$0xff]  ;;  %v513_v44 = vld [vmem:[%s3373_s26 + $0xa60] sm:$0xff] }
  0x65   : > { %510 = vst [vmem:[%s3378_s27 + $0x550] sm:$0xff] %v509_v42  ;;  %v515_v45 = vld [vmem:[%s3373_s26 + $0xa68] sm:$0xff]  ;;  %512 = vst [vmem:[%s3378_s27 + $0x558] sm:$0xff] %v511_v43  ;;  %v517_v46 = vld [vmem:[%s3373_s26 + $0xa70] sm:$0xff] }
  0x66   : > { %514 = vst [vmem:[%s3378_s27 + $0x560] sm:$0xff] %v513_v44  ;;  %516 = vst [vmem:[%s3378_s27 + $0x568] sm:$0xff] %v515_v45  ;;  %v519_v47 = vld [vmem:[%s3373_s26 + $0xa78] sm:$0xff]  ;;  %v521_v48 = vld [vmem:[%s3373_s26 + $0xb00] sm:$0xff] }
  0x67   : > { %518 = vst [vmem:[%s3378_s27 + $0x570] sm:$0xff] %v517_v46  ;;  %520 = vst [vmem:[%s3378_s27 + $0x578] sm:$0xff] %v519_v47  ;;  %v523_v49 = vld [vmem:[%s3373_s26 + $0xb08] sm:$0xff]  ;;  %v525_v50 = vld [vmem:[%s3373_s26 + $0xb10] sm:$0xff] }
  0x68   : > { %522 = vst [vmem:[%s3378_s27 + $0x580] sm:$0xff] %v521_v48  ;;  %v527_v51 = vld [vmem:[%s3373_s26 + $0xb18] sm:$0xff]  ;;  %524 = vst [vmem:[%s3378_s27 + $0x588] sm:$0xff] %v523_v49  ;;  %v529_v52 = vld [vmem:[%s3373_s26 + $0xb20] sm:$0xff] }
  0x69   : > { %526 = vst [vmem:[%s3378_s27 + $0x590] sm:$0xff] %v525_v50  ;;  %528 = vst [vmem:[%s3378_s27 + $0x598] sm:$0xff] %v527_v51  ;;  %v531_v53 = vld [vmem:[%s3373_s26 + $0xb28] sm:$0xff]  ;;  %v533_v54 = vld [vmem:[%s3373_s26 + $0xb30] sm:$0xff] }
  0x6a   : > { %530 = vst [vmem:[%s3378_s27 + $0x5a0] sm:$0xff] %v529_v52  ;;  %532 = vst [vmem:[%s3378_s27 + $0x5a8] sm:$0xff] %v531_v53  ;;  %v535_v55 = vld [vmem:[%s3373_s26 + $0xb38] sm:$0xff]  ;;  %v537_v56 = vld [vmem:[%s3373_s26 + $0xb40] sm:$0xff] }
  0x6b   : > { %534 = vst [vmem:[%s3378_s27 + $0x5b0] sm:$0xff] %v533_v54  ;;  %v539_v57 = vld [vmem:[%s3373_s26 + $0xb48] sm:$0xff]  ;;  %536 = vst [vmem:[%s3378_s27 + $0x5b8] sm:$0xff] %v535_v55  ;;  %v541_v58 = vld [vmem:[%s3373_s26 + $0xb50] sm:$0xff] }
  0x6c   : > { %538 = vst [vmem:[%s3378_s27 + $0x5c0] sm:$0xff] %v537_v56  ;;  %540 = vst [vmem:[%s3378_s27 + $0x5c8] sm:$0xff] %v539_v57  ;;  %v543_v59 = vld [vmem:[%s3373_s26 + $0xb58] sm:$0xff]  ;;  %v545_v60 = vld [vmem:[%s3373_s26 + $0xb60] sm:$0xff] }
  0x6d   : > { %542 = vst [vmem:[%s3378_s27 + $0x5d0] sm:$0xff] %v541_v58  ;;  %544 = vst [vmem:[%s3378_s27 + $0x5d8] sm:$0xff] %v543_v59  ;;  %v547_v61 = vld [vmem:[%s3373_s26 + $0xb68] sm:$0xff]  ;;  %v549_v62 = vld [vmem:[%s3373_s26 + $0xb70] sm:$0xff] }
  0x6e   : > { %546 = vst [vmem:[%s3378_s27 + $0x5e0] sm:$0xff] %v545_v60  ;;  %v551_v63 = vld [vmem:[%s3373_s26 + $0xb78] sm:$0xff]  ;;  %548 = vst [vmem:[%s3378_s27 + $0x5e8] sm:$0xff] %v547_v61  ;;  %v553_v0 = vld [vmem:[%s3373_s26 + $0xc00] sm:$0xff] }
  0x6f   : > { %550 = vst [vmem:[%s3378_s27 + $0x5f0] sm:$0xff] %v549_v62  ;;  %552 = vst [vmem:[%s3378_s27 + $0x5f8] sm:$0xff] %v551_v63  ;;  %v555_v1 = vld [vmem:[%s3373_s26 + $0xc08] sm:$0xff]  ;;  %v557_v2 = vld [vmem:[%s3373_s26 + $0xc10] sm:$0xff] }
  0x70   : > { %554 = vst [vmem:[%s3378_s27 + $0x600] sm:$0xff] %v553_v0  ;;  %556 = vst [vmem:[%s3378_s27 + $0x608] sm:$0xff] %v555_v1  ;;  %v559_v3 = vld [vmem:[%s3373_s26 + $0xc18] sm:$0xff]  ;;  %v561_v4 = vld [vmem:[%s3373_s26 + $0xc20] sm:$0xff] }
  0x71   : > { %558 = vst [vmem:[%s3378_s27 + $0x610] sm:$0xff] %v557_v2  ;;  %v563_v5 = vld [vmem:[%s3373_s26 + $0xc28] sm:$0xff]  ;;  %560 = vst [vmem:[%s3378_s27 + $0x618] sm:$0xff] %v559_v3  ;;  %v565_v6 = vld [vmem:[%s3373_s26 + $0xc30] sm:$0xff] }
  0x72   : > { %562 = vst [vmem:[%s3378_s27 + $0x620] sm:$0xff] %v561_v4  ;;  %564 = vst [vmem:[%s3378_s27 + $0x628] sm:$0xff] %v563_v5  ;;  %v567_v7 = vld [vmem:[%s3373_s26 + $0xc38] sm:$0xff]  ;;  %v569_v8 = vld [vmem:[%s3373_s26 + $0xc40] sm:$0xff] }
  0x73   : > { %566 = vst [vmem:[%s3378_s27 + $0x630] sm:$0xff] %v565_v6  ;;  %568 = vst [vmem:[%s3378_s27 + $0x638] sm:$0xff] %v567_v7  ;;  %v571_v9 = vld [vmem:[%s3373_s26 + $0xc48] sm:$0xff]  ;;  %v573_v10 = vld [vmem:[%s3373_s26 + $0xc50] sm:$0xff] }
  0x74   : > { %570 = vst [vmem:[%s3378_s27 + $0x640] sm:$0xff] %v569_v8  ;;  %v575_v11 = vld [vmem:[%s3373_s26 + $0xc58] sm:$0xff]  ;;  %572 = vst [vmem:[%s3378_s27 + $0x648] sm:$0xff] %v571_v9  ;;  %v577_v12 = vld [vmem:[%s3373_s26 + $0xc60] sm:$0xff] }
  0x75   : > { %574 = vst [vmem:[%s3378_s27 + $0x650] sm:$0xff] %v573_v10  ;;  %576 = vst [vmem:[%s3378_s27 + $0x658] sm:$0xff] %v575_v11  ;;  %v579_v13 = vld [vmem:[%s3373_s26 + $0xc68] sm:$0xff]  ;;  %v581_v14 = vld [vmem:[%s3373_s26 + $0xc70] sm:$0xff] }
  0x76   : > { %578 = vst [vmem:[%s3378_s27 + $0x660] sm:$0xff] %v577_v12  ;;  %580 = vst [vmem:[%s3378_s27 + $0x668] sm:$0xff] %v579_v13  ;;  %v583_v15 = vld [vmem:[%s3373_s26 + $0xc78] sm:$0xff]  ;;  %v585_v16 = vld [vmem:[%s3373_s26 + $0xd00] sm:$0xff] }
  0x77   : > { %582 = vst [vmem:[%s3378_s27 + $0x670] sm:$0xff] %v581_v14  ;;  %v587_v17 = vld [vmem:[%s3373_s26 + $0xd08] sm:$0xff]  ;;  %584 = vst [vmem:[%s3378_s27 + $0x678] sm:$0xff] %v583_v15  ;;  %v589_v18 = vld [vmem:[%s3373_s26 + $0xd10] sm:$0xff] }
  0x78   : > { %586 = vst [vmem:[%s3378_s27 + $0x680] sm:$0xff] %v585_v16  ;;  %588 = vst [vmem:[%s3378_s27 + $0x688] sm:$0xff] %v587_v17  ;;  %v591_v19 = vld [vmem:[%s3373_s26 + $0xd18] sm:$0xff]  ;;  %v593_v20 = vld [vmem:[%s3373_s26 + $0xd20] sm:$0xff] }
  0x79   : > { %590 = vst [vmem:[%s3378_s27 + $0x690] sm:$0xff] %v589_v18  ;;  %592 = vst [vmem:[%s3378_s27 + $0x698] sm:$0xff] %v591_v19  ;;  %v595_v21 = vld [vmem:[%s3373_s26 + $0xd28] sm:$0xff]  ;;  %v597_v22 = vld [vmem:[%s3373_s26 + $0xd30] sm:$0xff] }
  0x7a   : > { %594 = vst [vmem:[%s3378_s27 + $0x6a0] sm:$0xff] %v593_v20  ;;  %v599_v23 = vld [vmem:[%s3373_s26 + $0xd38] sm:$0xff]  ;;  %596 = vst [vmem:[%s3378_s27 + $0x6a8] sm:$0xff] %v595_v21  ;;  %v601_v24 = vld [vmem:[%s3373_s26 + $0xd40] sm:$0xff] }
  0x7b   : > { %598 = vst [vmem:[%s3378_s27 + $0x6b0] sm:$0xff] %v597_v22  ;;  %600 = vst [vmem:[%s3378_s27 + $0x6b8] sm:$0xff] %v599_v23  ;;  %v603_v25 = vld [vmem:[%s3373_s26 + $0xd48] sm:$0xff]  ;;  %v605_v26 = vld [vmem:[%s3373_s26 + $0xd50] sm:$0xff] }
  0x7c   : > { %602 = vst [vmem:[%s3378_s27 + $0x6c0] sm:$0xff] %v601_v24  ;;  %604 = vst [vmem:[%s3378_s27 + $0x6c8] sm:$0xff] %v603_v25  ;;  %v607_v27 = vld [vmem:[%s3373_s26 + $0xd58] sm:$0xff]  ;;  %v609_v28 = vld [vmem:[%s3373_s26 + $0xd60] sm:$0xff] }
  0x7d   : > { %606 = vst [vmem:[%s3378_s27 + $0x6d0] sm:$0xff] %v605_v26  ;;  %v611_v29 = vld [vmem:[%s3373_s26 + $0xd68] sm:$0xff]  ;;  %608 = vst [vmem:[%s3378_s27 + $0x6d8] sm:$0xff] %v607_v27  ;;  %v613_v30 = vld [vmem:[%s3373_s26 + $0xd70] sm:$0xff] }
  0x7e   : > { %610 = vst [vmem:[%s3378_s27 + $0x6e0] sm:$0xff] %v609_v28  ;;  %612 = vst [vmem:[%s3378_s27 + $0x6e8] sm:$0xff] %v611_v29  ;;  %v615_v31 = vld [vmem:[%s3373_s26 + $0xd78] sm:$0xff]  ;;  %v617_v32 = vld [vmem:[%s3373_s26 + $0xe00] sm:$0xff] }
  0x7f   : > { %614 = vst [vmem:[%s3378_s27 + $0x6f0] sm:$0xff] %v613_v30  ;;  %616 = vst [vmem:[%s3378_s27 + $0x6f8] sm:$0xff] %v615_v31  ;;  %v619_v33 = vld [vmem:[%s3373_s26 + $0xe08] sm:$0xff]  ;;  %v621_v34 = vld [vmem:[%s3373_s26 + $0xe10] sm:$0xff] }
  0x80   : > { %618 = vst [vmem:[%s3378_s27 + $0x700] sm:$0xff] %v617_v32  ;;  %v623_v35 = vld [vmem:[%s3373_s26 + $0xe18] sm:$0xff]  ;;  %620 = vst [vmem:[%s3378_s27 + $0x708] sm:$0xff] %v619_v33  ;;  %v625_v36 = vld [vmem:[%s3373_s26 + $0xe20] sm:$0xff] }
  0x81   : > { %622 = vst [vmem:[%s3378_s27 + $0x710] sm:$0xff] %v621_v34  ;;  %624 = vst [vmem:[%s3378_s27 + $0x718] sm:$0xff] %v623_v35  ;;  %v627_v37 = vld [vmem:[%s3373_s26 + $0xe28] sm:$0xff]  ;;  %v629_v38 = vld [vmem:[%s3373_s26 + $0xe30] sm:$0xff] }
  0x82   : > { %626 = vst [vmem:[%s3378_s27 + $0x720] sm:$0xff] %v625_v36  ;;  %628 = vst [vmem:[%s3378_s27 + $0x728] sm:$0xff] %v627_v37  ;;  %v631_v39 = vld [vmem:[%s3373_s26 + $0xe38] sm:$0xff]  ;;  %v633_v40 = vld [vmem:[%s3373_s26 + $0xe40] sm:$0xff] }
  0x83   : > { %630 = vst [vmem:[%s3378_s27 + $0x730] sm:$0xff] %v629_v38  ;;  %v635_v41 = vld [vmem:[%s3373_s26 + $0xe48] sm:$0xff]  ;;  %632 = vst [vmem:[%s3378_s27 + $0x738] sm:$0xff] %v631_v39  ;;  %v637_v42 = vld [vmem:[%s3373_s26 + $0xe50] sm:$0xff] }
  0x84   : > { %634 = vst [vmem:[%s3378_s27 + $0x740] sm:$0xff] %v633_v40  ;;  %636 = vst [vmem:[%s3378_s27 + $0x748] sm:$0xff] %v635_v41  ;;  %v639_v43 = vld [vmem:[%s3373_s26 + $0xe58] sm:$0xff]  ;;  %v641_v44 = vld [vmem:[%s3373_s26 + $0xe60] sm:$0xff] }
  0x85   : > { %638 = vst [vmem:[%s3378_s27 + $0x750] sm:$0xff] %v637_v42  ;;  %640 = vst [vmem:[%s3378_s27 + $0x758] sm:$0xff] %v639_v43  ;;  %v643_v45 = vld [vmem:[%s3373_s26 + $0xe68] sm:$0xff]  ;;  %v645_v46 = vld [vmem:[%s3373_s26 + $0xe70] sm:$0xff] }
  0x86   : > { %642 = vst [vmem:[%s3378_s27 + $0x760] sm:$0xff] %v641_v44  ;;  %v647_v47 = vld [vmem:[%s3373_s26 + $0xe78] sm:$0xff]  ;;  %644 = vst [vmem:[%s3378_s27 + $0x768] sm:$0xff] %v643_v45  ;;  %v649_v48 = vld [vmem:[%s3373_s26 + $0xf00] sm:$0xff] }
  0x87   : > { %646 = vst [vmem:[%s3378_s27 + $0x770] sm:$0xff] %v645_v46  ;;  %648 = vst [vmem:[%s3378_s27 + $0x778] sm:$0xff] %v647_v47  ;;  %v651_v49 = vld [vmem:[%s3373_s26 + $0xf08] sm:$0xff]  ;;  %v653_v50 = vld [vmem:[%s3373_s26 + $0xf10] sm:$0xff] }
  0x88   : > { %650 = vst [vmem:[%s3378_s27 + $0x780] sm:$0xff] %v649_v48  ;;  %652 = vst [vmem:[%s3378_s27 + $0x788] sm:$0xff] %v651_v49  ;;  %v655_v51 = vld [vmem:[%s3373_s26 + $0xf18] sm:$0xff]  ;;  %v657_v52 = vld [vmem:[%s3373_s26 + $0xf20] sm:$0xff] }
  0x89   : > { %654 = vst [vmem:[%s3378_s27 + $0x790] sm:$0xff] %v653_v50  ;;  %v659_v53 = vld [vmem:[%s3373_s26 + $0xf28] sm:$0xff]  ;;  %656 = vst [vmem:[%s3378_s27 + $0x798] sm:$0xff] %v655_v51  ;;  %v661_v54 = vld [vmem:[%s3373_s26 + $0xf30] sm:$0xff] }
  0x8a   : > { %658 = vst [vmem:[%s3378_s27 + $0x7a0] sm:$0xff] %v657_v52  ;;  %660 = vst [vmem:[%s3378_s27 + $0x7a8] sm:$0xff] %v659_v53  ;;  %v663_v55 = vld [vmem:[%s3373_s26 + $0xf38] sm:$0xff]  ;;  %v665_v56 = vld [vmem:[%s3373_s26 + $0xf40] sm:$0xff] }
  0x8b   : > { %662 = vst [vmem:[%s3378_s27 + $0x7b0] sm:$0xff] %v661_v54  ;;  %664 = vst [vmem:[%s3378_s27 + $0x7b8] sm:$0xff] %v663_v55  ;;  %v667_v57 = vld [vmem:[%s3373_s26 + $0xf48] sm:$0xff]  ;;  %v669_v58 = vld [vmem:[%s3373_s26 + $0xf50] sm:$0xff] }
  0x8c   : > { %666 = vst [vmem:[%s3378_s27 + $0x7c0] sm:$0xff] %v665_v56  ;;  %v671_v59 = vld [vmem:[%s3373_s26 + $0xf58] sm:$0xff]  ;;  %668 = vst [vmem:[%s3378_s27 + $0x7c8] sm:$0xff] %v667_v57  ;;  %v673_v60 = vld [vmem:[%s3373_s26 + $0xf60] sm:$0xff] }
  0x8d   : > { %670 = vst [vmem:[%s3378_s27 + $0x7d0] sm:$0xff] %v669_v58  ;;  %672 = vst [vmem:[%s3378_s27 + $0x7d8] sm:$0xff] %v671_v59  ;;  %v675_v61 = vld [vmem:[%s3373_s26 + $0xf68] sm:$0xff]  ;;  %v677_v62 = vld [vmem:[%s3373_s26 + $0xf70] sm:$0xff] }
  0x8e   : > { %674 = vst [vmem:[%s3378_s27 + $0x7e0] sm:$0xff] %v673_v60  ;;  %676 = vst [vmem:[%s3378_s27 + $0x7e8] sm:$0xff] %v675_v61  ;;  %v679_v63 = vld [vmem:[%s3373_s26 + $0xf78] sm:$0xff] }
  0x8f   : > { %678 = vst [vmem:[%s3378_s27 + $0x7f0] sm:$0xff] %v677_v62  ;;  %680 = vst [vmem:[%s3378_s27 + $0x7f8] sm:$0xff] %v679_v63 }
  0x90 PF: > { %p2579_p6 = scmp.ge.s32.totalorder %s3308_s16, 1  ;;  %p694_p7 = scmp.lt.s32.totalorder %s3308_s16, 3 }
  0x92   : > { %p695_p8 = pnand %p2579_p6, %p694_p7 }
  0x94   : > { %698 = sbr.rel (%p695_p8) target bundleno = 662 (0x296), region = 51 }
  0x99   : > { %s701_s28 = sand.u32 1, %s3292_s12   ;;  %s2581_s29 = sshll.u32 %s3300_s14, 8 }
  0x9a   : > { %s2580_s30 = sshll.u32 %s701_s28, 11  ;;  %p732_p9 = scmp.lt.s32.totalorder %s2581_s29, 511 }
  0x9b   : > { %s3898_s8 = scalar_lea.vmem [#allocation2], %s2580_s30  ;;  %p2583_p10 = scmp.ne.s32.totalorder %s3300_s14, 0 }
  0x9c   : > { %s4918_s29 = smov (!%p732_p9, %s2581_s29), 511 }
  0x9d   : > { %s2582_s4 = sshll.u32 %s4918_s29, 3  ;;  %746 = sbr.rel (%p2583_p10) target bundleno = 171 (0xab), region = 59 }
  0x9e   : > { %s3896_s7 = scalar_lea.vmem %s4852_s1, %s2582_s4 }
  0xa2   : > { %v2584_v0 = vld [vmem:[%s4853_s2] ss:$0 sm:$0xff] }
  0xa3   : > { %754 = vst [vmem:[%s4854_s3] sm:$0xff] %v2584_v0  ;;  %755 = vst [vmem:[%s4854_s3 + $0x8] sm:$0xff] %v2584_v0 }
  0xa4   : > { %756 = vst [vmem:[%s4854_s3 + $0x10] sm:$0xff] %v2584_v0  ;;  %757 = vst [vmem:[%s4854_s3 + $0x18] sm:$0xff] %v2584_v0 }
  0xa5   : > { %758 = vst [vmem:[%s4854_s3 + $0x20] sm:$0xff] %v2584_v0  ;;  %759 = vst [vmem:[%s4854_s3 + $0x28] sm:$0xff] %v2584_v0 }
  0xa6   : > { %760 = vst [vmem:[%s4854_s3 + $0x30] sm:$0xff] %v2584_v0  ;;  %761 = vst [vmem:[%s4854_s3 + $0x38] sm:$0xff] %v2584_v0 }
  0xa7   : > { %762 = vst [vmem:[%s4854_s3 + $0x40] sm:$0xff] %v2584_v0  ;;  %763 = vst [vmem:[%s4854_s3 + $0x48] sm:$0xff] %v2584_v0 }
  0xa8   : > { %764 = vst [vmem:[%s4854_s3 + $0x50] sm:$0xff] %v2584_v0  ;;  %765 = vst [vmem:[%s4854_s3 + $0x58] sm:$0xff] %v2584_v0 }
  0xa9   : > { %766 = vst [vmem:[%s4854_s3 + $0x60] sm:$0xff] %v2584_v0  ;;  %767 = vst [vmem:[%s4854_s3 + $0x68] sm:$0xff] %v2584_v0 }
  0xaa   : > { %768 = vst [vmem:[%s4854_s3 + $0x70] sm:$0xff] %v2584_v0  ;;  %769 = vst [vmem:[%s4854_s3 + $0x78] sm:$0xff] %v2584_v0 }
  0xab PF: > { %v1073_v1 = vld [vmem:[%s3896_s7 + $0xf8] sm:$0xff]  ;;  %v1072_v5 = vld [vmem:[%s3896_s7 + $0xf0] sm:$0xff]  ;;  %v1071_v9 = vld [vmem:[%s3896_s7 + $0xe8] sm:$0xff] }
  0xac   : > { %v1105_v2 = vld [vmem:[%s3896_s7 + $0x1f8] sm:$0xff]  ;;  %2590 = vmatprep.subr.mxu0 %v1073_v1  ;;  %v1104_v6 = vld [vmem:[%s3896_s7 + $0x1f0] sm:$0xff]  ;;  %v1103_v10 = vld [vmem:[%s3896_s7 + $0x1e8] sm:$0xff] }
  0xad   : > { %v1057_v3 = vld [vmem:[%s3896_s7 + $0x78] sm:$0xff]  ;;  %2670 = vmatprep.subr.mxu1 %v1105_v2  ;;  %v1056_v7 = vld [vmem:[%s3896_s7 + $0x70] sm:$0xff]  ;;  %v1055_v11 = vld [vmem:[%s3896_s7 + $0x68] sm:$0xff] }
  0xae   : > { %v1089_v4 = vld [vmem:[%s3896_s7 + $0x178] sm:$0xff]  ;;  %2591 = vmatpush3.msra.mxu0 %v1057_v3  ;;  %v1088_v8 = vld [vmem:[%s3896_s7 + $0x170] sm:$0xff]  ;;  %v1087_v12 = vld [vmem:[%s3896_s7 + $0x168] sm:$0xff] }
  0xaf   : > { %2671 = vmatpush3.msra.mxu1 %v1089_v4  ;;  %2592 = vmatprep.subr.mxu0 %v1072_v5  ;;  %v1070_v13 = vld [vmem:[%s3896_s7 + $0xe0] sm:$0xff]  ;;  %v1069_v17 = vld [vmem:[%s3896_s7 + $0xd8] sm:$0xff]  ;;  %v1068_v21 = vld [vmem:[%s3896_s7 + $0xd0] sm:$0xff] }
  0xb0   : > { %2672 = vmatprep.subr.mxu1 %v1104_v6  ;;  %2593 = vmatpush3.msra.mxu0 %v1056_v7  ;;  %v1102_v14 = vld [vmem:[%s3896_s7 + $0x1e0] sm:$0xff]  ;;  %v1101_v18 = vld [vmem:[%s3896_s7 + $0x1d8] sm:$0xff]  ;;  %v1100_v22 = vld [vmem:[%s3896_s7 + $0x1d0] sm:$0xff] }
  0xb1   : > { %2673 = vmatpush3.msra.mxu1 %v1088_v8  ;;  %2594 = vmatprep.subr.mxu0 %v1071_v9  ;;  %v1054_v15 = vld [vmem:[%s3896_s7 + $0x60] sm:$0xff]  ;;  %v1053_v19 = vld [vmem:[%s3896_s7 + $0x58] sm:$0xff]  ;;  %v1052_v23 = vld [vmem:[%s3896_s7 + $0x50] sm:$0xff] }
  0xb2   : > { %2674 = vmatprep.subr.mxu1 %v1103_v10  ;;  %v1086_v16 = vld [vmem:[%s3896_s7 + $0x160] sm:$0xff]  ;;  %2595 = vmatpush3.msra.mxu0 %v1055_v11  ;;  %v1085_v20 = vld [vmem:[%s3896_s7 + $0x158] sm:$0xff]  ;;  %v1084_v24 = vld [vmem:[%s3896_s7 + $0x150] sm:$0xff] }
  0xb3   : > { %2675 = vmatpush3.msra.mxu1 %v1087_v12  ;;  %2596 = vmatprep.subr.mxu0 %v1070_v13  ;;  %v1067_v25 = vld [vmem:[%s3896_s7 + $0xc8] sm:$0xff]  ;;  %v1066_v29 = vld [vmem:[%s3896_s7 + $0xc0] sm:$0xff]  ;;  %v1065_v33 = vld [vmem:[%s3896_s7 + $0xb8] sm:$0xff] }
  0xb4   : > { %2676 = vmatprep.subr.mxu1 %v1102_v14  ;;  %2597 = vmatpush3.msra.mxu0 %v1054_v15  ;;  %v1099_v26 = vld [vmem:[%s3896_s7 + $0x1c8] sm:$0xff]  ;;  %v1098_v30 = vld [vmem:[%s3896_s7 + $0x1c0] sm:$0xff]  ;;  %v1097_v34 = vld [vmem:[%s3896_s7 + $0x1b8] sm:$0xff] }
  0xb5   : > { %2677 = vmatpush3.msra.mxu1 %v1086_v16  ;;  %2598 = vmatprep.subr.mxu0 %v1069_v17  ;;  %v1051_v27 = vld [vmem:[%s3896_s7 + $0x48] sm:$0xff]  ;;  %v1050_v31 = vld [vmem:[%s3896_s7 + $0x40] sm:$0xff]  ;;  %v1049_v35 = vld [vmem:[%s3896_s7 + $0x38] sm:$0xff] }
  0xb6   : > { %2678 = vmatprep.subr.mxu1 %v1101_v18  ;;  %2599 = vmatpush3.msra.mxu0 %v1053_v19  ;;  %v1083_v28 = vld [vmem:[%s3896_s7 + $0x148] sm:$0xff]  ;;  %v1082_v32 = vld [vmem:[%s3896_s7 + $0x140] sm:$0xff]  ;;  %v1081_v36 = vld [vmem:[%s3896_s7 + $0x138] sm:$0xff] }
  0xb7   : > { %2679 = vmatpush3.msra.mxu1 %v1085_v20  ;;  %2600 = vmatprep.subr.mxu0 %v1068_v21  ;;  %v1064_v37 = vld [vmem:[%s3896_s7 + $0xb0] sm:$0xff]  ;;  %v1063_v41 = vld [vmem:[%s3896_s7 + $0xa8] sm:$0xff]  ;;  %v1062_v45 = vld [vmem:[%s3896_s7 + $0xa0] sm:$0xff] }
  0xb8   : > { %2680 = vmatprep.subr.mxu1 %v1100_v22  ;;  %2601 = vmatpush3.msra.mxu0 %v1052_v23  ;;  %v1096_v38 = vld [vmem:[%s3896_s7 + $0x1b0] sm:$0xff]  ;;  %v1095_v42 = vld [vmem:[%s3896_s7 + $0x1a8] sm:$0xff]  ;;  %v1094_v46 = vld [vmem:[%s3896_s7 + $0x1a0] sm:$0xff] }
  0xb9   : > { %2681 = vmatpush3.msra.mxu1 %v1084_v24  ;;  %2602 = vmatprep.subr.mxu0 %v1067_v25  ;;  %v1048_v39 = vld [vmem:[%s3896_s7 + $0x30] sm:$0xff]  ;;  %v1047_v43 = vld [vmem:[%s3896_s7 + $0x28] sm:$0xff]  ;;  %v1046_v47 = vld [vmem:[%s3896_s7 + $0x20] sm:$0xff] }
  0xba   : > { %2682 = vmatprep.subr.mxu1 %v1099_v26  ;;  %2603 = vmatpush3.msra.mxu0 %v1051_v27  ;;  %v1080_v40 = vld [vmem:[%s3896_s7 + $0x130] sm:$0xff]  ;;  %v1079_v44 = vld [vmem:[%s3896_s7 + $0x128] sm:$0xff]  ;;  %v1078_v48 = vld [vmem:[%s3896_s7 + $0x120] sm:$0xff] }
  0xbb   : > { %2683 = vmatpush3.msra.mxu1 %v1083_v28  ;;  %2604 = vmatprep.subr.mxu0 %v1066_v29  ;;  %v1061_v49 = vld [vmem:[%s3896_s7 + $0x98] sm:$0xff]  ;;  %v1060_v53 = vld [vmem:[%s3896_s7 + $0x90] sm:$0xff]  ;;  %v1059_v57 = vld [vmem:[%s3896_s7 + $0x88] sm:$0xff] }
  0xbc   : > { %2684 = vmatprep.subr.mxu1 %v1098_v30  ;;  %2605 = vmatpush3.msra.mxu0 %v1050_v31  ;;  %v1093_v50 = vld [vmem:[%s3896_s7 + $0x198] sm:$0xff]  ;;  %v1092_v54 = vld [vmem:[%s3896_s7 + $0x190] sm:$0xff]  ;;  %v1091_v58 = vld [vmem:[%s3896_s7 + $0x188] sm:$0xff] }
  0xbd   : > { %2685 = vmatpush3.msra.mxu1 %v1082_v32  ;;  %2606 = vmatprep.subr.mxu0 %v1065_v33  ;;  %v1045_v51 = vld [vmem:[%s3896_s7 + $0x18] sm:$0xff]  ;;  %v1044_v55 = vld [vmem:[%s3896_s7 + $0x10] sm:$0xff]  ;;  %v1043_v59 = vld [vmem:[%s3896_s7 + $0x8] sm:$0xff] }
  0xbe   : > { %2686 = vmatprep.subr.mxu1 %v1097_v34  ;;  %2607 = vmatpush3.msra.mxu0 %v1049_v35  ;;  %v1077_v52 = vld [vmem:[%s3896_s7 + $0x118] sm:$0xff]  ;;  %v1076_v56 = vld [vmem:[%s3896_s7 + $0x110] sm:$0xff]  ;;  %v1075_v60 = vld [vmem:[%s3896_s7 + $0x108] sm:$0xff] }
  0xbf   : > { %2687 = vmatpush3.msra.mxu1 %v1081_v36  ;;  %2608 = vmatprep.subr.mxu0 %v1064_v37  ;;  %v1058_v61 = vld [vmem:[%s3896_s7 + $0x80] sm:$0xff]  ;;  %v787_v0 = vld [vmem:[%s3898_s8 + $0x8] sm:$0xff]  ;;  %v789_v2 = vld [vmem:[%s3898_s8 + $0x18] sm:$0xff] }
  0xc0   : > { %2688 = vmatprep.subr.mxu1 %v1096_v38  ;;  %2609 = vmatpush3.msra.mxu0 %v1048_v39  ;;  %v1090_v62 = vld [vmem:[%s3896_s7 + $0x180] sm:$0xff]  ;;  %v788_v4 = vld [vmem:[%s3898_s8 + $0x10] sm:$0xff]  ;;  %v1137_v5 = vld [vmem:[%s3896_s7 + $0x2f8] sm:$0xff] }
  0xc1   : > { %2689 = vmatpush3.msra.mxu1 %v1080_v40  ;;  %2610 = vmatprep.subr.mxu0 %v1063_v41  ;;  %v1042_v63 = vld [vmem:[%s3896_s7] sm:$0xff]  ;;  %v1169_v6 = vld [vmem:[%s3896_s7 + $0x3f8] sm:$0xff]  ;;  %v803_v8 = vld [vmem:[%s3898_s8 + $0x88] sm:$0xff] }
  0xc2   : > { %2690 = vmatprep.subr.mxu1 %v1095_v42  ;;  %2611 = vmatpush3.msra.mxu0 %v1047_v43  ;;  %v1074_v1 = vld [vmem:[%s3896_s7 + $0x100] sm:$0xff]  ;;  %v1121_v7 = vld [vmem:[%s3896_s7 + $0x278] sm:$0xff]  ;;  %v804_v12 = vld [vmem:[%s3898_s8 + $0x90] sm:$0xff] }
  0xc3   : > { %2691 = vmatpush3.msra.mxu1 %v1079_v44  ;;  %2612 = vmatprep.subr.mxu0 %v1062_v45  ;;  %v786_v3 = vld [vmem:[%s3898_s8] sm:$0xff]  ;;  %v805_v9 = vld [vmem:[%s3898_s8 + $0x98] sm:$0xff]  ;;  %v1136_v13 = vld [vmem:[%s3896_s7 + $0x2f0] sm:$0xff] }
  0xc4   : > { %2692 = vmatprep.subr.mxu1 %v1094_v46  ;;  %2613 = vmatpush3.msra.mxu0 %v1046_v47  ;;  %v1153_v10 = vld [vmem:[%s3896_s7 + $0x378] sm:$0xff]  ;;  %v802_v11 = vld [vmem:[%s3898_s8 + $0x80] sm:$0xff]  ;;  %v1168_v14 = vld [vmem:[%s3896_s7 + $0x3f0] sm:$0xff] }
  0xc5   : > { %2693 = vmatpush3.msra.mxu1 %v1078_v48  ;;  %2614 = vmatprep.subr.mxu0 %v1061_v49  ;;  %v1120_v15 = vld [vmem:[%s3896_s7 + $0x270] sm:$0xff]  ;;  %v819_v16 = vld [vmem:[%s3898_s8 + $0x108] sm:$0xff]  ;;  %v821_v17 = vld [vmem:[%s3898_s8 + $0x118] sm:$0xff] }
  0xc6   : > { %2694 = vmatprep.subr.mxu1 %v1093_v50  ;;  %2615 = vmatpush3.msra.mxu0 %v1045_v51  ;;  %v1152_v18 = vld [vmem:[%s3896_s7 + $0x370] sm:$0xff]  ;;  %v818_v19 = vld [vmem:[%s3898_s8 + $0x100] sm:$0xff]  ;;  %v1135_v21 = vld [vmem:[%s3896_s7 + $0x2e8] sm:$0xff] }
  0xc7   : > { %2695 = vmatpush3.msra.mxu1 %v1077_v52  ;;  %2616 = vmatprep.subr.mxu0 %v1060_v53  ;;  %v820_v20 = vld [vmem:[%s3898_s8 + $0x110] sm:$0xff]  ;;  %v1167_v22 = vld [vmem:[%s3896_s7 + $0x3e8] sm:$0xff]  ;;  %v837_v25 = vld [vmem:[%s3898_s8 + $0x198] sm:$0xff] }
  0xc8   : > { %2696 = vmatprep.subr.mxu1 %v1092_v54  ;;  %2617 = vmatpush3.msra.mxu0 %v1044_v55  ;;  %v1119_v23 = vld [vmem:[%s3896_s7 + $0x268] sm:$0xff]  ;;  %v834_v27 = vld [vmem:[%s3898_s8 + $0x180] sm:$0xff]  ;;  %v836_v28 = vld [vmem:[%s3898_s8 + $0x190] sm:$0xff] }
  0xc9   : > { %2697 = vmatpush3.msra.mxu1 %v1076_v56  ;;  %2618 = vmatprep.subr.mxu0 %v1059_v57  ;;  %v835_v24 = vld [vmem:[%s3898_s8 + $0x188] sm:$0xff]  ;;  %v1134_v29 = vld [vmem:[%s3896_s7 + $0x2e0] sm:$0xff]  ;;  %v853_v33 = vld [vmem:[%s3898_s8 + $0x218] sm:$0xff] }
  0xca   : > { %2698 = vmatprep.subr.mxu1 %v1091_v58  ;;  %2619 = vmatpush3.msra.mxu0 %v1043_v59  ;;  %v1151_v26 = vld [vmem:[%s3896_s7 + $0x368] sm:$0xff]  ;;  %v1166_v30 = vld [vmem:[%s3896_s7 + $0x3e0] sm:$0xff]  ;;  %v852_v36 = vld [vmem:[%s3898_s8 + $0x210] sm:$0xff] }
  0xcb   : > { %2699 = vmatpush3.msra.mxu1 %v1075_v60  ;;  %2620 = vmatprep.subr.mxu0 %v1058_v61  ;;  %v1118_v31 = vld [vmem:[%s3896_s7 + $0x260] sm:$0xff]  ;;  %v851_v32 = vld [vmem:[%s3898_s8 + $0x208] sm:$0xff]  ;;  %v1133_v37 = vld [vmem:[%s3896_s7 + $0x2d8] sm:$0xff] }
  0xcc   : > { %2700 = vmatprep.subr.mxu1 %v1090_v62  ;;  %2621 = vmatpush3.msra.mxu0 %v1042_v63  ;;  %v1150_v34 = vld [vmem:[%s3896_s7 + $0x360] sm:$0xff]  ;;  %v1165_v38 = vld [vmem:[%s3896_s7 + $0x3d8] sm:$0xff]  ;;  %v867_v40 = vld [vmem:[%s3898_s8 + $0x288] sm:$0xff] }
  0xcd   : > { %1362 = vmatprep.mubr.f32.mxu0 %v787_v0  ;;  %2701 = vmatpush3.msra.mxu1 %v1074_v1  ;;  %v850_v35 = vld [vmem:[%s3898_s8 + $0x200] sm:$0xff]  ;;  %v1117_v39 = vld [vmem:[%s3896_s7 + $0x258] sm:$0xff]  ;;  %v868_v44 = vld [vmem:[%s3898_s8 + $0x290] sm:$0xff] }
  0xce   : > { %1507 = vmatprep.mubr.f32.mxu1 %v789_v2  ;;  %1363 = vmatmul.mubr.f32.vlgmr.msra.gmra.mxu0 %v786_v3  ;;  %v869_v41 = vld [vmem:[%s3898_s8 + $0x298] sm:$0xff]  ;;  %v866_v43 = vld [vmem:[%s3898_s8 + $0x280] sm:$0xff]  ;;  %v1132_v45 = vld [vmem:[%s3896_s7 + $0x2d0] sm:$0xff] }
  0xcf   : > { %1508 = vmatmul.mubr.f32.vlgmr.msra.gmra.mxu1 %v788_v4  ;;  %2750 = vmatprep.subr.mxu0 %v1137_v5  ;;  %v1149_v42 = vld [vmem:[%s3896_s7 + $0x358] sm:$0xff]  ;;  %v1164_v46 = vld [vmem:[%s3896_s7 + $0x3d0] sm:$0xff]  ;;  %v883_v48 = vld [vmem:[%s3898_s8 + $0x308] sm:$0xff] }
  0xd0   : > { %2830 = vmatprep.subr.mxu1 %v1169_v6  ;;  %2751 = vmatpush3.msra.mxu0 %v1121_v7  ;;  %v1116_v47 = vld [vmem:[%s3896_s7 + $0x250] sm:$0xff]  ;;  %v885_v49 = vld [vmem:[%s3898_s8 + $0x318] sm:$0xff]  ;;  %v882_v51 = vld [vmem:[%s3898_s8 + $0x300] sm:$0xff] }
  0xd1   : > { %1367 = vmatprep.mubr.f32.mxu0 %v803_v8  ;;  %1512 = vmatprep.mubr.f32.mxu1 %v805_v9  ;;  %v1148_v50 = vld [vmem:[%s3896_s7 + $0x350] sm:$0xff]  ;;  %v1131_v53 = vld [vmem:[%s3896_s7 + $0x2c8] sm:$0xff]  ;;  %v901_v57 = vld [vmem:[%s3898_s8 + $0x398] sm:$0xff] }
  0xd2   : > { %2831 = vmatpush3.msra.mxu1 %v1153_v10  ;;  %1368 = vmatmul.mubr.f32.gmra.mxu0 %v802_v11  ;;  %v884_v52 = vld [vmem:[%s3898_s8 + $0x310] sm:$0xff]  ;;  %v1163_v54 = vld [vmem:[%s3896_s7 + $0x3c8] sm:$0xff]  ;;  %v898_v59 = vld [vmem:[%s3898_s8 + $0x380] sm:$0xff] }
  0xd3   : > { %1513 = vmatmul.mubr.f32.gmra.mxu1 %v804_v12  ;;  %2752 = vmatprep.subr.mxu0 %v1136_v13  ;;  %v1115_v55 = vld [vmem:[%s3896_s7 + $0x248] sm:$0xff]  ;;  %v900_v60 = vld [vmem:[%s3898_s8 + $0x390] sm:$0xff]  ;;  %v1130_v61 = vld [vmem:[%s3896_s7 + $0x2c0] sm:$0xff] }
  0xd4   : > { %2832 = vmatprep.subr.mxu1 %v1168_v14  ;;  %2753 = vmatpush3.msra.mxu0 %v1120_v15  ;;  %v899_v56 = vld [vmem:[%s3898_s8 + $0x388] sm:$0xff]  ;;  %v1162_v62 = vld [vmem:[%s3896_s7 + $0x3c0] sm:$0xff]  ;;  %v917_v1 = vld [vmem:[%s3898_s8 + $0x418] sm:$0xff] }
  0xd5   : > { %1372 = vmatprep.mubr.f32.mxu0 %v819_v16  ;;  %1517 = vmatprep.mubr.f32.mxu1 %v821_v17  ;;  %v1147_v58 = vld [vmem:[%s3896_s7 + $0x348] sm:$0xff]  ;;  %v1114_v63 = vld [vmem:[%s3896_s7 + $0x240] sm:$0xff]  ;;  %v916_v4 = vld [vmem:[%s3898_s8 + $0x410] sm:$0xff] }
  0xd6   : > { %2833 = vmatpush3.msra.mxu1 %v1152_v18  ;;  %1373 = vmatmul.mubr.f32.gmra.mxu0 %v818_v19  ;;  %v915_v0 = vld [vmem:[%s3898_s8 + $0x408] sm:$0xff]  ;;  %v1146_v2 = vld [vmem:[%s3896_s7 + $0x340] sm:$0xff]  ;;  %v1129_v5 = vld [vmem:[%s3896_s7 + $0x2b8] sm:$0xff] }
  0xd7   : > { %1518 = vmatmul.mubr.f32.gmra.mxu1 %v820_v20  ;;  %2754 = vmatprep.subr.mxu0 %v1135_v21  ;;  %v914_v3 = vld [vmem:[%s3898_s8 + $0x400] sm:$0xff]  ;;  %v1161_v6 = vld [vmem:[%s3896_s7 + $0x3b8] sm:$0xff]  ;;  %v931_v8 = vld [vmem:[%s3898_s8 + $0x488] sm:$0xff] }
  0xd8   : > { %2834 = vmatprep.subr.mxu1 %v1167_v22  ;;  %2755 = vmatpush3.msra.mxu0 %v1119_v23  ;;  %v1113_v7 = vld [vmem:[%s3896_s7 + $0x238] sm:$0xff]  ;;  %v930_v11 = vld [vmem:[%s3898_s8 + $0x480] sm:$0xff]  ;;  %v932_v12 = vld [vmem:[%s3898_s8 + $0x490] sm:$0xff] }
  0xd9   : > { %1377 = vmatprep.mubr.f32.mxu0 %v835_v24  ;;  %1522 = vmatprep.mubr.f32.mxu1 %v837_v25  ;;  %v933_v9 = vld [vmem:[%s3898_s8 + $0x498] sm:$0xff]  ;;  %v1128_v13 = vld [vmem:[%s3896_s7 + $0x2b0] sm:$0xff]  ;;  %v947_v16 = vld [vmem:[%s3898_s8 + $0x508] sm:$0xff] }
  0xda   : > { %2835 = vmatpush3.msra.mxu1 %v1151_v26  ;;  %1378 = vmatmul.mubr.f32.gmra.mxu0 %v834_v27  ;;  %v1145_v10 = vld [vmem:[%s3896_s7 + $0x338] sm:$0xff]  ;;  %v1160_v14 = vld [vmem:[%s3896_s7 + $0x3b0] sm:$0xff]  ;;  %v946_v19 = vld [vmem:[%s3898_s8 + $0x500] sm:$0xff] }
  0xdb   : > { %1523 = vmatmul.mubr.f32.gmra.mxu1 %v836_v28  ;;  %2756 = vmatprep.subr.mxu0 %v1134_v29  ;;  %v1112_v15 = vld [vmem:[%s3896_s7 + $0x230] sm:$0xff]  ;;  %v949_v17 = vld [vmem:[%s3898_s8 + $0x518] sm:$0xff]  ;;  %v1127_v21 = vld [vmem:[%s3896_s7 + $0x2a8] sm:$0xff] }
  0xdc   : > { %2836 = vmatprep.subr.mxu1 %v1166_v30  ;;  %2757 = vmatpush3.msra.mxu0 %v1118_v31  ;;  %v1144_v18 = vld [vmem:[%s3896_s7 + $0x330] sm:$0xff]  ;;  %v1159_v22 = vld [vmem:[%s3896_s7 + $0x3a8] sm:$0xff]  ;;  %v965_v25 = vld [vmem:[%s3898_s8 + $0x598] sm:$0xff] }
  0xdd   : > { %1382 = vmatprep.mubr.f32.mxu0 %v851_v32  ;;  %1527 = vmatprep.mubr.f32.mxu1 %v853_v33  ;;  %v948_v20 = vld [vmem:[%s3898_s8 + $0x510] sm:$0xff]  ;;  %v1111_v23 = vld [vmem:[%s3896_s7 + $0x228] sm:$0xff]  ;;  %v962_v27 = vld [vmem:[%s3898_s8 + $0x580] sm:$0xff] }
  0xde   : > { %2837 = vmatpush3.msra.mxu1 %v1150_v34  ;;  %1383 = vmatmul.mubr.f32.gmra.mxu0 %v850_v35  ;;  %v963_v24 = vld [vmem:[%s3898_s8 + $0x588] sm:$0xff]  ;;  %v964_v28 = vld [vmem:[%s3898_s8 + $0x590] sm:$0xff]  ;;  %v1126_v29 = vld [vmem:[%s3896_s7 + $0x2a0] sm:$0xff] }
  0xdf   : > { %1528 = vmatmul.mubr.f32.gmra.mxu1 %v852_v36  ;;  %2758 = vmatprep.subr.mxu0 %v1133_v37  ;;  %v1143_v26 = vld [vmem:[%s3896_s7 + $0x328] sm:$0xff]  ;;  %v1158_v30 = vld [vmem:[%s3896_s7 + $0x3a0] sm:$0xff]  ;;  %v981_v33 = vld [vmem:[%s3898_s8 + $0x618] sm:$0xff] }
  0xe0   : > { %2838 = vmatprep.subr.mxu1 %v1165_v38  ;;  %2759 = vmatpush3.msra.mxu0 %v1117_v39  ;;  %v1110_v31 = vld [vmem:[%s3896_s7 + $0x220] sm:$0xff]  ;;  %v979_v32 = vld [vmem:[%s3898_s8 + $0x608] sm:$0xff]  ;;  %v980_v36 = vld [vmem:[%s3898_s8 + $0x610] sm:$0xff] }
  0xe1   : > { %1387 = vmatprep.mubr.f32.mxu0 %v867_v40  ;;  %1532 = vmatprep.mubr.f32.mxu1 %v869_v41  ;;  %v1142_v34 = vld [vmem:[%s3896_s7 + $0x320] sm:$0xff]  ;;  %v1125_v37 = vld [vmem:[%s3896_s7 + $0x298] sm:$0xff]  ;;  %v995_v40 = vld [vmem:[%s3898_s8 + $0x688] sm:$0xff] }
  0xe2   : > { %2839 = vmatpush3.msra.mxu1 %v1149_v42  ;;  %1388 = vmatmul.mubr.f32.gmra.mxu0 %v866_v43  ;;  %v978_v35 = vld [vmem:[%s3898_s8 + $0x600] sm:$0xff]  ;;  %v1157_v38 = vld [vmem:[%s3896_s7 + $0x398] sm:$0xff] }
  0xe3   : > { %1533 = vmatmul.mubr.f32.gmra.mxu1 %v868_v44  ;;  %2760 = vmatprep.subr.mxu0 %v1132_v45  ;;  %v1109_v39 = vld [vmem:[%s3896_s7 + $0x218] sm:$0xff]  ;;  %v994_v43 = vld [vmem:[%s3898_s8 + $0x680] sm:$0xff]  ;;  %v996_v44 = vld [vmem:[%s3898_s8 + $0x690] sm:$0xff] }
  0xe4   : > { %2840 = vmatprep.subr.mxu1 %v1164_v46  ;;  %2761 = vmatpush3.msra.mxu0 %v1116_v47  ;;  %v997_v41 = vld [vmem:[%s3898_s8 + $0x698] sm:$0xff]  ;;  %v1124_v45 = vld [vmem:[%s3896_s7 + $0x290] sm:$0xff] }
  0xe5   : > { %1392 = vmatprep.mubr.f32.mxu0 %v883_v48  ;;  %1537 = vmatprep.mubr.f32.mxu1 %v885_v49  ;;  %v1141_v42 = vld [vmem:[%s3896_s7 + $0x318] sm:$0xff]  ;;  %v1156_v46 = vld [vmem:[%s3896_s7 + $0x390] sm:$0xff]  ;;  %v1011_v48 = vld [vmem:[%s3898_s8 + $0x708] sm:$0xff] }
  0xe6   : > { %2841 = vmatpush3.msra.mxu1 %v1148_v50  ;;  %1393 = vmatmul.mubr.f32.gmra.mxu0 %v882_v51  ;;  %v1108_v47 = vld [vmem:[%s3896_s7 + $0x210] sm:$0xff]  ;;  %v1013_v49 = vld [vmem:[%s3898_s8 + $0x718] sm:$0xff]  ;;  %v1010_v51 = vld [vmem:[%s3898_s8 + $0x700] sm:$0xff] }
  0xe7   : > { %1538 = vmatmul.mubr.f32.gmra.mxu1 %v884_v52  ;;  %2762 = vmatprep.subr.mxu0 %v1131_v53  ;;  %v1140_v50 = vld [vmem:[%s3896_s7 + $0x310] sm:$0xff]  ;;  %v1123_v53 = vld [vmem:[%s3896_s7 + $0x288] sm:$0xff] }
  0xe8   : > { %2842 = vmatprep.subr.mxu1 %v1163_v54  ;;  %2763 = vmatpush3.msra.mxu0 %v1115_v55  ;;  %v1012_v52 = vld [vmem:[%s3898_s8 + $0x710] sm:$0xff]  ;;  %v1155_v54 = vld [vmem:[%s3896_s7 + $0x388] sm:$0xff] }
  0xe9   : > { %1397 = vmatprep.mubr.f32.mxu0 %v899_v56  ;;  %1542 = vmatprep.mubr.f32.mxu1 %v901_v57  ;;  %v1107_v55 = vld [vmem:[%s3896_s7 + $0x208] sm:$0xff]  ;;  %v1029_v57 = vld [vmem:[%s3898_s8 + $0x798] sm:$0xff] }
  0xea   : > { %2843 = vmatpush3.msra.mxu1 %v1147_v58  ;;  %1398 = vmatmul.mubr.f32.gmra.mxu0 %v898_v59  ;;  %v1027_v56 = vld [vmem:[%s3898_s8 + $0x788] sm:$0xff]  ;;  %v1026_v59 = vld [vmem:[%s3898_s8 + $0x780] sm:$0xff] }
  0xeb   : > { %1543 = vmatmul.mubr.f32.gmra.mxu1 %v900_v60  ;;  %2764 = vmatprep.subr.mxu0 %v1130_v61  ;;  %v1139_v58 = vld [vmem:[%s3896_s7 + $0x308] sm:$0xff]  ;;  %v1028_v60 = vld [vmem:[%s3898_s8 + $0x790] sm:$0xff]  ;;  %v1122_v61 = vld [vmem:[%s3896_s7 + $0x280] sm:$0xff] }
  0xec   : > { %2844 = vmatprep.subr.mxu1 %v1162_v62  ;;  %2765 = vmatpush3.msra.mxu0 %v1114_v63  ;;  %v1154_v62 = vld [vmem:[%s3896_s7 + $0x380] sm:$0xff] }
  0xed   : > { %1402 = vmatprep.mubr.f32.mxu0 %v915_v0  ;;  %1547 = vmatprep.mubr.f32.mxu1 %v917_v1  ;;  %v1106_v63 = vld [vmem:[%s3896_s7 + $0x200] sm:$0xff]  ;;  %v791_v0 = vld [vmem:[%s3898_s8 + $0x28] sm:$0xff] }
  0xee   : > { %2845 = vmatpush3.msra.mxu1 %v1146_v2  ;;  %1403 = vmatmul.mubr.f32.gmra.mxu0 %v914_v3  ;;  %v1138_v1 = vld [vmem:[%s3896_s7 + $0x300] sm:$0xff]  ;;  %v793_v2 = vld [vmem:[%s3898_s8 + $0x38] sm:$0xff] }
  0xef   : > { %1548 = vmatmul.mubr.f32.gmra.mxu1 %v916_v4  ;;  %2766 = vmatprep.subr.mxu0 %v1129_v5  ;;  %v790_v3 = vld [vmem:[%s3898_s8 + $0x20] sm:$0xff]  ;;  %v1201_v4 = vld [vmem:[%s3896_s7 + $0x4f8] sm:$0xff]  ;;  %v792_v5 = vld [vmem:[%s3898_s8 + $0x30] sm:$0xff] }
  0xf0   : > { %2846 = vmatprep.subr.mxu1 %v1161_v6  ;;  %2767 = vmatpush3.msra.mxu0 %v1113_v7  ;;  %v1185_v6 = vld [vmem:[%s3896_s7 + $0x478] sm:$0xff] }
  0xf1   : > { %1407 = vmatprep.mubr.f32.mxu0 %v931_v8  ;;  %1552 = vmatprep.mubr.f32.mxu1 %v933_v9  ;;  %v1233_v7 = vld [vmem:[%s3896_s7 + $0x5f8] sm:$0xff]  ;;  %v807_v8 = vld [vmem:[%s3898_s8 + $0xa8] sm:$0xff] }
  0xf2   : > { %2847 = vmatpush3.msra.mxu1 %v1145_v10  ;;  %1408 = vmatmul.mubr.f32.gmra.mxu0 %v930_v11  ;;  %v1217_v9 = vld [vmem:[%s3896_s7 + $0x578] sm:$0xff]  ;;  %v806_v11 = vld [vmem:[%s3898_s8 + $0xa0] sm:$0xff] }
  0xf3   : > { %1553 = vmatmul.mubr.f32.gmra.mxu1 %v932_v12  ;;  %2768 = vmatprep.subr.mxu0 %v1128_v13  ;;  %v809_v10 = vld [vmem:[%s3898_s8 + $0xb8] sm:$0xff]  ;;  %v1200_v12 = vld [vmem:[%s3896_s7 + $0x4f0] sm:$0xff] }
  0xf4   : > { %2848 = vmatprep.subr.mxu1 %v1160_v14  ;;  %2769 = vmatpush3.msra.mxu0 %v1112_v15  ;;  %v808_v13 = vld [vmem:[%s3898_s8 + $0xb0] sm:$0xff] }
  0xf5   : > { %1412 = vmatprep.mubr.f32.mxu0 %v947_v16  ;;  %1557 = vmatprep.mubr.f32.mxu1 %v949_v17  ;;  %v1184_v14 = vld [vmem:[%s3896_s7 + $0x470] sm:$0xff]  ;;  %v823_v16 = vld [vmem:[%s3898_s8 + $0x128] sm:$0xff] }
  0xf6   : > { %2849 = vmatpush3.msra.mxu1 %v1144_v18  ;;  %1413 = vmatmul.mubr.f32.gmra.mxu0 %v946_v19  ;;  %v1232_v15 = vld [vmem:[%s3896_s7 + $0x5f0] sm:$0xff]  ;;  %v825_v18 = vld [vmem:[%s3898_s8 + $0x138] sm:$0xff]  ;;  %v822_v19 = vld [vmem:[%s3898_s8 + $0x120] sm:$0xff] }
  0xf7   : > { %1558 = vmatmul.mubr.f32.gmra.mxu1 %v948_v20  ;;  %2770 = vmatprep.subr.mxu0 %v1127_v21  ;;  %v1216_v17 = vld [vmem:[%s3896_s7 + $0x570] sm:$0xff]  ;;  %v1199_v20 = vld [vmem:[%s3896_s7 + $0x4e8] sm:$0xff] }
  0xf8   : > { %2850 = vmatprep.subr.mxu1 %v1159_v22  ;;  %2771 = vmatpush3.msra.mxu0 %v1111_v23  ;;  %v824_v21 = vld [vmem:[%s3898_s8 + $0x130] sm:$0xff]  ;;  %v1183_v22 = vld [vmem:[%s3896_s7 + $0x468] sm:$0xff] }
  0xf9   : > { %1417 = vmatprep.mubr.f32.mxu0 %v963_v24  ;;  %1562 = vmatprep.mubr.f32.mxu1 %v965_v25  ;;  %v1231_v23 = vld [vmem:[%s3896_s7 + $0x5e8] sm:$0xff] }
  0xfa   : > { %2851 = vmatpush3.msra.mxu1 %v1143_v26  ;;  %1418 = vmatmul.mubr.f32.gmra.mxu0 %v962_v27  ;;  %v839_v24 = vld [vmem:[%s3898_s8 + $0x1a8] sm:$0xff]  ;;  %v841_v26 = vld [vmem:[%s3898_s8 + $0x1b8] sm:$0xff]  ;;  %v838_v27 = vld [vmem:[%s3898_s8 + $0x1a0] sm:$0xff] }
  0xfb   : > { %1563 = vmatmul.mubr.f32.gmra.mxu1 %v964_v28  ;;  %2772 = vmatprep.subr.mxu0 %v1126_v29  ;;  %v1215_v25 = vld [vmem:[%s3896_s7 + $0x568] sm:$0xff]  ;;  %v1198_v28 = vld [vmem:[%s3896_s7 + $0x4e0] sm:$0xff]  ;;  %v840_v29 = vld [vmem:[%s3898_s8 + $0x1b0] sm:$0xff] }
  0xfc   : > { %2852 = vmatprep.subr.mxu1 %v1158_v30  ;;  %2773 = vmatpush3.msra.mxu0 %v1110_v31  ;;  %v1182_v30 = vld [vmem:[%s3896_s7 + $0x460] sm:$0xff] }
  0xfd   : > { %1422 = vmatprep.mubr.f32.mxu0 %v979_v32  ;;  %1567 = vmatprep.mubr.f32.mxu1 %v981_v33  ;;  %v1230_v31 = vld [vmem:[%s3896_s7 + $0x5e0] sm:$0xff]  ;;  %v855_v32 = vld [vmem:[%s3898_s8 + $0x228] sm:$0xff] }
  0xfe   : > { %2853 = vmatpush3.msra.mxu1 %v1142_v34  ;;  %1423 = vmatmul.mubr.f32.gmra.mxu0 %v978_v35  ;;  %v1214_v33 = vld [vmem:[%s3896_s7 + $0x560] sm:$0xff]  ;;  %v857_v34 = vld [vmem:[%s3898_s8 + $0x238] sm:$0xff] }
  0xff   : > { %1568 = vmatmul.mubr.f32.gmra.mxu1 %v980_v36  ;;  %2774 = vmatprep.subr.mxu0 %v1125_v37  ;;  %v854_v35 = vld [vmem:[%s3898_s8 + $0x220] sm:$0xff]  ;;  %v1197_v36 = vld [vmem:[%s3896_s7 + $0x4d8] sm:$0xff]  ;;  %v856_v37 = vld [vmem:[%s3898_s8 + $0x230] sm:$0xff] }
 0x100   : > { %2854 = vmatprep.subr.mxu1 %v1157_v38  ;;  %2775 = vmatpush3.msra.mxu0 %v1109_v39  ;;  %v1181_v38 = vld [vmem:[%s3896_s7 + $0x458] sm:$0xff] }
 0x101   : > { %1427 = vmatprep.mubr.f32.mxu0 %v995_v40  ;;  %1572 = vmatprep.mubr.f32.mxu1 %v997_v41  ;;  %v1229_v39 = vld [vmem:[%s3896_s7 + $0x5d8] sm:$0xff]  ;;  %v871_v40 = vld [vmem:[%s3898_s8 + $0x2a8] sm:$0xff] }
 0x102   : > { %2855 = vmatpush3.msra.mxu1 %v1141_v42  ;;  %1428 = vmatmul.mubr.f32.gmra.mxu0 %v994_v43  ;;  %v1213_v41 = vld [vmem:[%s3896_s7 + $0x558] sm:$0xff]  ;;  %v870_v43 = vld [vmem:[%s3898_s8 + $0x2a0] sm:$0xff] }
 0x103   : > { %1573 = vmatmul.mubr.f32.gmra.mxu1 %v996_v44  ;;  %2776 = vmatprep.subr.mxu0 %v1124_v45  ;;  %v873_v42 = vld [vmem:[%s3898_s8 + $0x2b8] sm:$0xff]  ;;  %v1196_v44 = vld [vmem:[%s3896_s7 + $0x4d0] sm:$0xff] }
 0x104   : > { %2856 = vmatprep.subr.mxu1 %v1156_v46  ;;  %2777 = vmatpush3.msra.mxu0 %v1108_v47  ;;  %v872_v45 = vld [vmem:[%s3898_s8 + $0x2b0] sm:$0xff] }
 0x105   : > { %1432 = vmatprep.mubr.f32.mxu0 %v1011_v48  ;;  %1577 = vmatprep.mubr.f32.mxu1 %v1013_v49  ;;  %v1180_v46 = vld [vmem:[%s3896_s7 + $0x450] sm:$0xff]  ;;  %v887_v48 = vld [vmem:[%s3898_s8 + $0x328] sm:$0xff] }
 0x106   : > { %2857 = vmatpush3.msra.mxu1 %v1140_v50  ;;  %1433 = vmatmul.mubr.f32.gmra.mxu0 %v1010_v51  ;;  %v1228_v47 = vld [vmem:[%s3896_s7 + $0x5d0] sm:$0xff]  ;;  %v889_v50 = vld [vmem:[%s3898_s8 + $0x338] sm:$0xff]  ;;  %v886_v51 = vld [vmem:[%s3898_s8 + $0x320] sm:$0xff] }
 0x107   : > { %1578 = vmatmul.mubr.f32.gmra.mxu1 %v1012_v52  ;;  %2778 = vmatprep.subr.mxu0 %v1123_v53  ;;  %v1212_v49 = vld [vmem:[%s3896_s7 + $0x550] sm:$0xff]  ;;  %v1195_v52 = vld [vmem:[%s3896_s7 + $0x4c8] sm:$0xff] }
 0x108   : > { %2858 = vmatprep.subr.mxu1 %v1155_v54  ;;  %2779 = vmatpush3.msra.mxu0 %v1107_v55  ;;  %v888_v53 = vld [vmem:[%s3898_s8 + $0x330] sm:$0xff]  ;;  %v1179_v54 = vld [vmem:[%s3896_s7 + $0x448] sm:$0xff] }
 0x109   : > { %1437 = vmatprep.mubr.f32.mxu0 %v1027_v56  ;;  %1582 = vmatprep.mubr.f32.mxu1 %v1029_v57  ;;  %v1227_v55 = vld [vmem:[%s3896_s7 + $0x5c8] sm:$0xff] }
 0x10a   : > { %2859 = vmatpush3.msra.mxu1 %v1139_v58  ;;  %1438 = vmatmul.mubr.f32.gmra.mxu0 %v1026_v59  ;;  %v903_v56 = vld [vmem:[%s3898_s8 + $0x3a8] sm:$0xff]  ;;  %v905_v58 = vld [vmem:[%s3898_s8 + $0x3b8] sm:$0xff]  ;;  %v902_v59 = vld [vmem:[%s3898_s8 + $0x3a0] sm:$0xff] }
 0x10b   : > { %1583 = vmatmul.mubr.f32.gmra.mxu1 %v1028_v60  ;;  %2780 = vmatprep.subr.mxu0 %v1122_v61  ;;  %v1211_v57 = vld [vmem:[%s3896_s7 + $0x548] sm:$0xff]  ;;  %v1194_v60 = vld [vmem:[%s3896_s7 + $0x4c0] sm:$0xff]  ;;  %v904_v61 = vld [vmem:[%s3898_s8 + $0x3b0] sm:$0xff] }
 0x10c   : > { %2860 = vmatprep.subr.mxu1 %v1154_v62  ;;  %2781 = vmatpush3.msra.mxu0 %v1106_v63  ;;  %v1178_v62 = vld [vmem:[%s3896_s7 + $0x440] sm:$0xff] }
 0x10d   : > { %1652 = vmatprep.mubr.f32.mxu0 %v791_v0  ;;  %2861 = vmatpush3.msra.mxu1 %v1138_v1  ;;  %v1226_v63 = vld [vmem:[%s3896_s7 + $0x5c0] sm:$0xff]  ;;  %v919_v0 = vld [vmem:[%s3898_s8 + $0x428] sm:$0xff] }
 0x10e   : > { %1797 = vmatprep.mubr.f32.mxu1 %v793_v2  ;;  %1653 = vmatmul.mubr.f32.vlgmr.msra.gmra.mxu0 %v790_v3  ;;  %v1210_v1 = vld [vmem:[%s3896_s7 + $0x540] sm:$0xff]  ;;  %v921_v2 = vld [vmem:[%s3898_s8 + $0x438] sm:$0xff] }
 0x10f   : > { %2910 = vmatprep.subr.mxu0 %v1201_v4  ;;  %1798 = vmatmul.mubr.f32.vlgmr.msra.gmra.mxu1 %v792_v5  ;;  %v918_v3 = vld [vmem:[%s3898_s8 + $0x420] sm:$0xff]  ;;  %v1193_v4 = vld [vmem:[%s3896_s7 + $0x4b8] sm:$0xff]  ;;  %v920_v5 = vld [vmem:[%s3898_s8 + $0x430] sm:$0xff] }
 0x110   : > { %2911 = vmatpush3.msra.mxu0 %v1185_v6  ;;  %2990 = vmatprep.subr.mxu1 %v1233_v7  ;;  %v1177_v6 = vld [vmem:[%s3896_s7 + $0x438] sm:$0xff] }
 0x111   : > { %1657 = vmatprep.mubr.f32.mxu0 %v807_v8  ;;  %2991 = vmatpush3.msra.mxu1 %v1217_v9  ;;  %v1225_v7 = vld [vmem:[%s3896_s7 + $0x5b8] sm:$0xff]  ;;  %v935_v8 = vld [vmem:[%s3898_s8 + $0x4a8] sm:$0xff] }
 0x112   : > { %1802 = vmatprep.mubr.f32.mxu1 %v809_v10  ;;  %1658 = vmatmul.mubr.f32.gmra.mxu0 %v806_v11  ;;  %v1209_v9 = vld [vmem:[%s3896_s7 + $0x538] sm:$0xff]  ;;  %v934_v11 = vld [vmem:[%s3898_s8 + $0x4a0] sm:$0xff] }
 0x113   : > { %2912 = vmatprep.subr.mxu0 %v1200_v12  ;;  %1803 = vmatmul.mubr.f32.gmra.mxu1 %v808_v13  ;;  %v937_v10 = vld [vmem:[%s3898_s8 + $0x4b8] sm:$0xff]  ;;  %v1192_v12 = vld [vmem:[%s3896_s7 + $0x4b0] sm:$0xff] }
 0x114   : > { %2913 = vmatpush3.msra.mxu0 %v1184_v14  ;;  %2992 = vmatprep.subr.mxu1 %v1232_v15  ;;  %v936_v13 = vld [vmem:[%s3898_s8 + $0x4b0] sm:$0xff] }
 0x115   : > { %1662 = vmatprep.mubr.f32.mxu0 %v823_v16  ;;  %2993 = vmatpush3.msra.mxu1 %v1216_v17  ;;  %v1176_v14 = vld [vmem:[%s3896_s7 + $0x430] sm:$0xff]  ;;  %v951_v16 = vld [vmem:[%s3898_s8 + $0x528] sm:$0xff] }
 0x116   : > { %1807 = vmatprep.mubr.f32.mxu1 %v825_v18  ;;  %1663 = vmatmul.mubr.f32.gmra.mxu0 %v822_v19  ;;  %v1224_v15 = vld [vmem:[%s3896_s7 + $0x5b0] sm:$0xff]  ;;  %v953_v18 = vld [vmem:[%s3898_s8 + $0x538] sm:$0xff]  ;;  %v950_v19 = vld [vmem:[%s3898_s8 + $0x520] sm:$0xff] }
 0x117   : > { %2914 = vmatprep.subr.mxu0 %v1199_v20  ;;  %1808 = vmatmul.mubr.f32.gmra.mxu1 %v824_v21  ;;  %v1208_v17 = vld [vmem:[%s3896_s7 + $0x530] sm:$0xff]  ;;  %v1191_v20 = vld [vmem:[%s3896_s7 + $0x4a8] sm:$0xff] }
 0x118   : > { %2915 = vmatpush3.msra.mxu0 %v1183_v22  ;;  %2994 = vmatprep.subr.mxu1 %v1231_v23  ;;  %v952_v21 = vld [vmem:[%s3898_s8 + $0x530] sm:$0xff]  ;;  %v1175_v22 = vld [vmem:[%s3896_s7 + $0x428] sm:$0xff] }
 0x119   : > { %1667 = vmatprep.mubr.f32.mxu0 %v839_v24  ;;  %2995 = vmatpush3.msra.mxu1 %v1215_v25  ;;  %v1223_v23 = vld [vmem:[%s3896_s7 + $0x5a8] sm:$0xff] }
 0x11a   : > { %1812 = vmatprep.mubr.f32.mxu1 %v841_v26  ;;  %1668 = vmatmul.mubr.f32.gmra.mxu0 %v838_v27  ;;  %v967_v24 = vld [vmem:[%s3898_s8 + $0x5a8] sm:$0xff]  ;;  %v969_v26 = vld [vmem:[%s3898_s8 + $0x5b8] sm:$0xff]  ;;  %v966_v27 = vld [vmem:[%s3898_s8 + $0x5a0] sm:$0xff] }
 0x11b   : > { %2916 = vmatprep.subr.mxu0 %v1198_v28  ;;  %1813 = vmatmul.mubr.f32.gmra.mxu1 %v840_v29  ;;  %v1207_v25 = vld [vmem:[%s3896_s7 + $0x528] sm:$0xff]  ;;  %v1190_v28 = vld [vmem:[%s3896_s7 + $0x4a0] sm:$0xff]  ;;  %v968_v29 = vld [vmem:[%s3898_s8 + $0x5b0] sm:$0xff] }
 0x11c   : > { %2917 = vmatpush3.msra.mxu0 %v1182_v30  ;;  %2996 = vmatprep.subr.mxu1 %v1230_v31  ;;  %v1174_v30 = vld [vmem:[%s3896_s7 + $0x420] sm:$0xff] }
 0x11d   : > { %1672 = vmatprep.mubr.f32.mxu0 %v855_v32  ;;  %2997 = vmatpush3.msra.mxu1 %v1214_v33  ;;  %v1222_v31 = vld [vmem:[%s3896_s7 + $0x5a0] sm:$0xff]  ;;  %v983_v32 = vld [vmem:[%s3898_s8 + $0x628] sm:$0xff] }
 0x11e   : > { %1817 = vmatprep.mubr.f32.mxu1 %v857_v34  ;;  %1673 = vmatmul.mubr.f32.gmra.mxu0 %v854_v35  ;;  %v1206_v33 = vld [vmem:[%s3896_s7 + $0x520] sm:$0xff]  ;;  %v985_v34 = vld [vmem:[%s3898_s8 + $0x638] sm:$0xff] }
 0x11f   : > { %2918 = vmatprep.subr.mxu0 %v1197_v36  ;;  %1818 = vmatmul.mubr.f32.gmra.mxu1 %v856_v37  ;;  %v982_v35 = vld [vmem:[%s3898_s8 + $0x620] sm:$0xff]  ;;  %v1189_v36 = vld [vmem:[%s3896_s7 + $0x498] sm:$0xff]  ;;  %v984_v37 = vld [vmem:[%s3898_s8 + $0x630] sm:$0xff] }
 0x120   : > { %2919 = vmatpush3.msra.mxu0 %v1181_v38  ;;  %2998 = vmatprep.subr.mxu1 %v1229_v39  ;;  %v1173_v38 = vld [vmem:[%s3896_s7 + $0x418] sm:$0xff] }
 0x121   : > { %1677 = vmatprep.mubr.f32.mxu0 %v871_v40  ;;  %2999 = vmatpush3.msra.mxu1 %v1213_v41  ;;  %v1221_v39 = vld [vmem:[%s3896_s7 + $0x598] sm:$0xff]  ;;  %v999_v40 = vld [vmem:[%s3898_s8 + $0x6a8] sm:$0xff] }
 0x122   : > { %1822 = vmatprep.mubr.f32.mxu1 %v873_v42  ;;  %1678 = vmatmul.mubr.f32.gmra.mxu0 %v870_v43  ;;  %v1205_v41 = vld [vmem:[%s3896_s7 + $0x518] sm:$0xff]  ;;  %v998_v43 = vld [vmem:[%s3898_s8 + $0x6a0] sm:$0xff] }
 0x123   : > { %2920 = vmatprep.subr.mxu0 %v1196_v44  ;;  %1823 = vmatmul.mubr.f32.gmra.mxu1 %v872_v45  ;;  %v1001_v42 = vld [vmem:[%s3898_s8 + $0x6b8] sm:$0xff]  ;;  %v1188_v44 = vld [vmem:[%s3896_s7 + $0x490] sm:$0xff] }
 0x124   : > { %2921 = vmatpush3.msra.mxu0 %v1180_v46  ;;  %3000 = vmatprep.subr.mxu1 %v1228_v47  ;;  %v1000_v45 = vld [vmem:[%s3898_s8 + $0x6b0] sm:$0xff] }
 0x125   : > { %1682 = vmatprep.mubr.f32.mxu0 %v887_v48  ;;  %3001 = vmatpush3.msra.mxu1 %v1212_v49  ;;  %v1172_v46 = vld [vmem:[%s3896_s7 + $0x410] sm:$0xff]  ;;  %v1015_v48 = vld [vmem:[%s3898_s8 + $0x728] sm:$0xff] }
 0x126   : > { %1827 = vmatprep.mubr.f32.mxu1 %v889_v50  ;;  %1683 = vmatmul.mubr.f32.gmra.mxu0 %v886_v51  ;;  %v1220_v47 = vld [vmem:[%s3896_s7 + $0x590] sm:$0xff]  ;;  %v1017_v50 = vld [vmem:[%s3898_s8 + $0x738] sm:$0xff]  ;;  %v1014_v51 = vld [vmem:[%s3898_s8 + $0x720] sm:$0xff] }
 0x127   : > { %2922 = vmatprep.subr.mxu0 %v1195_v52  ;;  %1828 = vmatmul.mubr.f32.gmra.mxu1 %v888_v53  ;;  %v1204_v49 = vld [vmem:[%s3896_s7 + $0x510] sm:$0xff]  ;;  %v1187_v52 = vld [vmem:[%s3896_s7 + $0x488] sm:$0xff] }
 0x128   : > { %2923 = vmatpush3.msra.mxu0 %v1179_v54  ;;  %3002 = vmatprep.subr.mxu1 %v1227_v55  ;;  %v1016_v53 = vld [vmem:[%s3898_s8 + $0x730] sm:$0xff]  ;;  %v1171_v54 = vld [vmem:[%s3896_s7 + $0x408] sm:$0xff] }
 0x129   : > { %1687 = vmatprep.mubr.f32.mxu0 %v903_v56  ;;  %3003 = vmatpush3.msra.mxu1 %v1211_v57  ;;  %v1219_v55 = vld [vmem:[%s3896_s7 + $0x588] sm:$0xff] }
 0x12a   : > { %1832 = vmatprep.mubr.f32.mxu1 %v905_v58  ;;  %1688 = vmatmul.mubr.f32.gmra.mxu0 %v902_v59  ;;  %v1031_v56 = vld [vmem:[%s3898_s8 + $0x7a8] sm:$0xff]  ;;  %v1033_v58 = vld [vmem:[%s3898_s8 + $0x7b8] sm:$0xff]  ;;  %v1030_v59 = vld [vmem:[%s3898_s8 + $0x7a0] sm:$0xff] }
 0x12b   : > { %2924 = vmatprep.subr.mxu0 %v1194_v60  ;;  %1833 = vmatmul.mubr.f32.gmra.mxu1 %v904_v61  ;;  %v1203_v57 = vld [vmem:[%s3896_s7 + $0x508] sm:$0xff]  ;;  %v1186_v60 = vld [vmem:[%s3896_s7 + $0x480] sm:$0xff]  ;;  %v1032_v61 = vld [vmem:[%s3898_s8 + $0x7b0] sm:$0xff] }
 0x12c   : > { %2925 = vmatpush3.msra.mxu0 %v1178_v62  ;;  %3004 = vmatprep.subr.mxu1 %v1226_v63  ;;  %v1170_v62 = vld [vmem:[%s3896_s7 + $0x400] sm:$0xff] }
 0x12d   : > { %1692 = vmatprep.mubr.f32.mxu0 %v919_v0  ;;  %3005 = vmatpush3.msra.mxu1 %v1210_v1  ;;  %v1218_v63 = vld [vmem:[%s3896_s7 + $0x580] sm:$0xff]  ;;  %v795_v0 = vld [vmem:[%s3898_s8 + $0x48] sm:$0xff] }
 0x12e   : > { %1837 = vmatprep.mubr.f32.mxu1 %v921_v2  ;;  %1693 = vmatmul.mubr.f32.gmra.mxu0 %v918_v3  ;;  %v1202_v1 = vld [vmem:[%s3896_s7 + $0x500] sm:$0xff]  ;;  %v797_v2 = vld [vmem:[%s3898_s8 + $0x58] sm:$0xff] }
 0x12f   : > { %2926 = vmatprep.subr.mxu0 %v1193_v4  ;;  %1838 = vmatmul.mubr.f32.gmra.mxu1 %v920_v5  ;;  %v794_v3 = vld [vmem:[%s3898_s8 + $0x40] sm:$0xff]  ;;  %v1265_v4 = vld [vmem:[%s3896_s7 + $0x6f8] sm:$0xff]  ;;  %v796_v5 = vld [vmem:[%s3898_s8 + $0x50] sm:$0xff] }
 0x130   : > { %2927 = vmatpush3.msra.mxu0 %v1177_v6  ;;  %3006 = vmatprep.subr.mxu1 %v1225_v7  ;;  %v1249_v6 = vld [vmem:[%s3896_s7 + $0x678] sm:$0xff] }
 0x131   : > { %1697 = vmatprep.mubr.f32.mxu0 %v935_v8  ;;  %3007 = vmatpush3.msra.mxu1 %v1209_v9  ;;  %v1297_v7 = vld [vmem:[%s3896_s7 + $0x7f8] sm:$0xff]  ;;  %v811_v8 = vld [vmem:[%s3898_s8 + $0xc8] sm:$0xff] }
 0x132   : > { %1842 = vmatprep.mubr.f32.mxu1 %v937_v10  ;;  %1698 = vmatmul.mubr.f32.gmra.mxu0 %v934_v11  ;;  %v1281_v9 = vld [vmem:[%s3896_s7 + $0x778] sm:$0xff]  ;;  %v810_v11 = vld [vmem:[%s3898_s8 + $0xc0] sm:$0xff] }
 0x133   : > { %2928 = vmatprep.subr.mxu0 %v1192_v12  ;;  %1843 = vmatmul.mubr.f32.gmra.mxu1 %v936_v13  ;;  %v813_v10 = vld [vmem:[%s3898_s8 + $0xd8] sm:$0xff]  ;;  %v1264_v12 = vld [vmem:[%s3896_s7 + $0x6f0] sm:$0xff] }
 0x134   : > { %2929 = vmatpush3.msra.mxu0 %v1176_v14  ;;  %3008 = vmatprep.subr.mxu1 %v1224_v15  ;;  %v812_v13 = vld [vmem:[%s3898_s8 + $0xd0] sm:$0xff] }
 0x135   : > { %1702 = vmatprep.mubr.f32.mxu0 %v951_v16  ;;  %3009 = vmatpush3.msra.mxu1 %v1208_v17  ;;  %v1248_v14 = vld [vmem:[%s3896_s7 + $0x670] sm:$0xff]  ;;  %v827_v16 = vld [vmem:[%s3898_s8 + $0x148] sm:$0xff] }
 0x136   : > { %1847 = vmatprep.mubr.f32.mxu1 %v953_v18  ;;  %1703 = vmatmul.mubr.f32.gmra.mxu0 %v950_v19  ;;  %v1296_v15 = vld [vmem:[%s3896_s7 + $0x7f0] sm:$0xff]  ;;  %v829_v18 = vld [vmem:[%s3898_s8 + $0x158] sm:$0xff]  ;;  %v826_v19 = vld [vmem:[%s3898_s8 + $0x140] sm:$0xff] }
 0x137   : > { %2930 = vmatprep.subr.mxu0 %v1191_v20  ;;  %1848 = vmatmul.mubr.f32.gmra.mxu1 %v952_v21  ;;  %v1280_v17 = vld [vmem:[%s3896_s7 + $0x770] sm:$0xff]  ;;  %v1263_v20 = vld [vmem:[%s3896_s7 + $0x6e8] sm:$0xff] }
 0x138   : > { %2931 = vmatpush3.msra.mxu0 %v1175_v22  ;;  %3010 = vmatprep.subr.mxu1 %v1223_v23  ;;  %v828_v21 = vld [vmem:[%s3898_s8 + $0x150] sm:$0xff]  ;;  %v1247_v22 = vld [vmem:[%s3896_s7 + $0x668] sm:$0xff] }
 0x139   : > { %1707 = vmatprep.mubr.f32.mxu0 %v967_v24  ;;  %3011 = vmatpush3.msra.mxu1 %v1207_v25  ;;  %v1295_v23 = vld [vmem:[%s3896_s7 + $0x7e8] sm:$0xff] }
 0x13a   : > { %1852 = vmatprep.mubr.f32.mxu1 %v969_v26  ;;  %1708 = vmatmul.mubr.f32.gmra.mxu0 %v966_v27  ;;  %v843_v24 = vld [vmem:[%s3898_s8 + $0x1c8] sm:$0xff]  ;;  %v845_v26 = vld [vmem:[%s3898_s8 + $0x1d8] sm:$0xff]  ;;  %v842_v27 = vld [vmem:[%s3898_s8 + $0x1c0] sm:$0xff] }
 0x13b   : > { %2932 = vmatprep.subr.mxu0 %v1190_v28  ;;  %1853 = vmatmul.mubr.f32.gmra.mxu1 %v968_v29  ;;  %v1279_v25 = vld [vmem:[%s3896_s7 + $0x768] sm:$0xff]  ;;  %v1262_v28 = vld [vmem:[%s3896_s7 + $0x6e0] sm:$0xff]  ;;  %v844_v29 = vld [vmem:[%s3898_s8 + $0x1d0] sm:$0xff] }
 0x13c   : > { %2933 = vmatpush3.msra.mxu0 %v1174_v30  ;;  %3012 = vmatprep.subr.mxu1 %v1222_v31  ;;  %v1246_v30 = vld [vmem:[%s3896_s7 + $0x660] sm:$0xff] }
 0x13d   : > { %1712 = vmatprep.mubr.f32.mxu0 %v983_v32  ;;  %3013 = vmatpush3.msra.mxu1 %v1206_v33  ;;  %v1294_v31 = vld [vmem:[%s3896_s7 + $0x7e0] sm:$0xff]  ;;  %v859_v32 = vld [vmem:[%s3898_s8 + $0x248] sm:$0xff] }
 0x13e   : > { %1857 = vmatprep.mubr.f32.mxu1 %v985_v34  ;;  %1713 = vmatmul.mubr.f32.gmra.mxu0 %v982_v35  ;;  %v1278_v33 = vld [vmem:[%s3896_s7 + $0x760] sm:$0xff]  ;;  %v861_v34 = vld [vmem:[%s3898_s8 + $0x258] sm:$0xff] }
 0x13f   : > { %2934 = vmatprep.subr.mxu0 %v1189_v36  ;;  %1858 = vmatmul.mubr.f32.gmra.mxu1 %v984_v37  ;;  %v858_v35 = vld [vmem:[%s3898_s8 + $0x240] sm:$0xff]  ;;  %v1261_v36 = vld [vmem:[%s3896_s7 + $0x6d8] sm:$0xff]  ;;  %v860_v37 = vld [vmem:[%s3898_s8 + $0x250] sm:$0xff] }
 0x140   : > { %2935 = vmatpush3.msra.mxu0 %v1173_v38  ;;  %3014 = vmatprep.subr.mxu1 %v1221_v39  ;;  %v1245_v38 = vld [vmem:[%s3896_s7 + $0x658] sm:$0xff] }
 0x141   : > { %1717 = vmatprep.mubr.f32.mxu0 %v999_v40  ;;  %3015 = vmatpush3.msra.mxu1 %v1205_v41  ;;  %v1293_v39 = vld [vmem:[%s3896_s7 + $0x7d8] sm:$0xff]  ;;  %v875_v40 = vld [vmem:[%s3898_s8 + $0x2c8] sm:$0xff] }
 0x142   : > { %1862 = vmatprep.mubr.f32.mxu1 %v1001_v42  ;;  %1718 = vmatmul.mubr.f32.gmra.mxu0 %v998_v43  ;;  %v1277_v41 = vld [vmem:[%s3896_s7 + $0x758] sm:$0xff]  ;;  %v874_v43 = vld [vmem:[%s3898_s8 + $0x2c0] sm:$0xff] }
 0x143   : > { %2936 = vmatprep.subr.mxu0 %v1188_v44  ;;  %1863 = vmatmul.mubr.f32.gmra.mxu1 %v1000_v45  ;;  %v877_v42 = vld [vmem:[%s3898_s8 + $0x2d8] sm:$0xff]  ;;  %v1260_v44 = vld [vmem:[%s3896_s7 + $0x6d0] sm:$0xff] }
 0x144   : > { %2937 = vmatpush3.msra.mxu0 %v1172_v46  ;;  %3016 = vmatprep.subr.mxu1 %v1220_v47  ;;  %v876_v45 = vld [vmem:[%s3898_s8 + $0x2d0] sm:$0xff] }
 0x145   : > { %1722 = vmatprep.mubr.f32.mxu0 %v1015_v48  ;;  %3017 = vmatpush3.msra.mxu1 %v1204_v49  ;;  %v1244_v46 = vld [vmem:[%s3896_s7 + $0x650] sm:$0xff]  ;;  %v891_v48 = vld [vmem:[%s3898_s8 + $0x348] sm:$0xff] }
 0x146   : > { %1867 = vmatprep.mubr.f32.mxu1 %v1017_v50  ;;  %1723 = vmatmul.mubr.f32.gmra.mxu0 %v1014_v51  ;;  %v1292_v47 = vld [vmem:[%s3896_s7 + $0x7d0] sm:$0xff]  ;;  %v893_v50 = vld [vmem:[%s3898_s8 + $0x358] sm:$0xff]  ;;  %v890_v51 = vld [vmem:[%s3898_s8 + $0x340] sm:$0xff] }
 0x147   : > { %2938 = vmatprep.subr.mxu0 %v1187_v52  ;;  %1868 = vmatmul.mubr.f32.gmra.mxu1 %v1016_v53  ;;  %v1276_v49 = vld [vmem:[%s3896_s7 + $0x750] sm:$0xff]  ;;  %v1259_v52 = vld [vmem:[%s3896_s7 + $0x6c8] sm:$0xff] }
 0x148   : > { %2939 = vmatpush3.msra.mxu0 %v1171_v54  ;;  %3018 = vmatprep.subr.mxu1 %v1219_v55  ;;  %v892_v53 = vld [vmem:[%s3898_s8 + $0x350] sm:$0xff]  ;;  %v1243_v54 = vld [vmem:[%s3896_s7 + $0x648] sm:$0xff] }
 0x149   : > { %1727 = vmatprep.mubr.f32.mxu0 %v1031_v56  ;;  %3019 = vmatpush3.msra.mxu1 %v1203_v57  ;;  %v1291_v55 = vld [vmem:[%s3896_s7 + $0x7c8] sm:$0xff] }
 0x14a   : > { %1872 = vmatprep.mubr.f32.mxu1 %v1033_v58  ;;  %1728 = vmatmul.mubr.f32.gmra.mxu0 %v1030_v59  ;;  %v907_v56 = vld [vmem:[%s3898_s8 + $0x3c8] sm:$0xff]  ;;  %v909_v58 = vld [vmem:[%s3898_s8 + $0x3d8] sm:$0xff]  ;;  %v906_v59 = vld [vmem:[%s3898_s8 + $0x3c0] sm:$0xff] }
 0x14b   : > { %2940 = vmatprep.subr.mxu0 %v1186_v60  ;;  %1873 = vmatmul.mubr.f32.gmra.mxu1 %v1032_v61  ;;  %v1275_v57 = vld [vmem:[%s3896_s7 + $0x748] sm:$0xff]  ;;  %v1258_v60 = vld [vmem:[%s3896_s7 + $0x6c0] sm:$0xff]  ;;  %v908_v61 = vld [vmem:[%s3898_s8 + $0x3d0] sm:$0xff] }
 0x14c   : > { %2941 = vmatpush3.msra.mxu0 %v1170_v62  ;;  %3020 = vmatprep.subr.mxu1 %v1218_v63  ;;  %v1242_v62 = vld [vmem:[%s3896_s7 + $0x640] sm:$0xff] }
 0x14d   : > { %1942 = vmatprep.mubr.f32.mxu0 %v795_v0  ;;  %3021 = vmatpush3.msra.mxu1 %v1202_v1  ;;  %v1290_v63 = vld [vmem:[%s3896_s7 + $0x7c0] sm:$0xff]  ;;  %v923_v0 = vld [vmem:[%s3898_s8 + $0x448] sm:$0xff] }
 0x14e   : > { %2087 = vmatprep.mubr.f32.mxu1 %v797_v2  ;;  %1943 = vmatmul.mubr.f32.vlgmr.msra.gmra.mxu0 %v794_v3  ;;  %v1274_v1 = vld [vmem:[%s3896_s7 + $0x740] sm:$0xff]  ;;  %v925_v2 = vld [vmem:[%s3898_s8 + $0x458] sm:$0xff] }
 0x14f   : > { %3070 = vmatprep.subr.mxu0 %v1265_v4  ;;  %2088 = vmatmul.mubr.f32.vlgmr.msra.gmra.mxu1 %v796_v5  ;;  %v922_v3 = vld [vmem:[%s3898_s8 + $0x440] sm:$0xff]  ;;  %v1257_v4 = vld [vmem:[%s3896_s7 + $0x6b8] sm:$0xff]  ;;  %v924_v5 = vld [vmem:[%s3898_s8 + $0x450] sm:$0xff] }
 0x150   : > { %3071 = vmatpush3.msra.mxu0 %v1249_v6  ;;  %3150 = vmatprep.subr.mxu1 %v1297_v7  ;;  %v1241_v6 = vld [vmem:[%s3896_s7 + $0x638] sm:$0xff] }
 0x151   : > { %1947 = vmatprep.mubr.f32.mxu0 %v811_v8  ;;  %3151 = vmatpush3.msra.mxu1 %v1281_v9  ;;  %v1289_v7 = vld [vmem:[%s3896_s7 + $0x7b8] sm:$0xff]  ;;  %v939_v8 = vld [vmem:[%s3898_s8 + $0x4c8] sm:$0xff] }
 0x152   : > { %2092 = vmatprep.mubr.f32.mxu1 %v813_v10  ;;  %1948 = vmatmul.mubr.f32.gmra.mxu0 %v810_v11  ;;  %v1273_v9 = vld [vmem:[%s3896_s7 + $0x738] sm:$0xff]  ;;  %v938_v11 = vld [vmem:[%s3898_s8 + $0x4c0] sm:$0xff] }
 0x153   : > { %3072 = vmatprep.subr.mxu0 %v1264_v12  ;;  %2093 = vmatmul.mubr.f32.gmra.mxu1 %v812_v13  ;;  %v941_v10 = vld [vmem:[%s3898_s8 + $0x4d8] sm:$0xff]  ;;  %v1256_v12 = vld [vmem:[%s3896_s7 + $0x6b0] sm:$0xff] }
 0x154   : > { %3073 = vmatpush3.msra.mxu0 %v1248_v14  ;;  %3152 = vmatprep.subr.mxu1 %v1296_v15  ;;  %v940_v13 = vld [vmem:[%s3898_s8 + $0x4d0] sm:$0xff] }
 0x155   : > { %1952 = vmatprep.mubr.f32.mxu0 %v827_v16  ;;  %3153 = vmatpush3.msra.mxu1 %v1280_v17  ;;  %v1240_v14 = vld [vmem:[%s3896_s7 + $0x630] sm:$0xff]  ;;  %v955_v16 = vld [vmem:[%s3898_s8 + $0x548] sm:$0xff] }
 0x156   : > { %2097 = vmatprep.mubr.f32.mxu1 %v829_v18  ;;  %1953 = vmatmul.mubr.f32.gmra.mxu0 %v826_v19  ;;  %v1288_v15 = vld [vmem:[%s3896_s7 + $0x7b0] sm:$0xff]  ;;  %v957_v18 = vld [vmem:[%s3898_s8 + $0x558] sm:$0xff]  ;;  %v954_v19 = vld [vmem:[%s3898_s8 + $0x540] sm:$0xff] }
 0x157   : > { %3074 = vmatprep.subr.mxu0 %v1263_v20  ;;  %2098 = vmatmul.mubr.f32.gmra.mxu1 %v828_v21  ;;  %v1272_v17 = vld [vmem:[%s3896_s7 + $0x730] sm:$0xff]  ;;  %v1255_v20 = vld [vmem:[%s3896_s7 + $0x6a8] sm:$0xff] }
 0x158   : > { %3075 = vmatpush3.msra.mxu0 %v1247_v22  ;;  %3154 = vmatprep.subr.mxu1 %v1295_v23  ;;  %v956_v21 = vld [vmem:[%s3898_s8 + $0x550] sm:$0xff]  ;;  %v1239_v22 = vld [vmem:[%s3896_s7 + $0x628] sm:$0xff] }
 0x159   : > { %1957 = vmatprep.mubr.f32.mxu0 %v843_v24  ;;  %3155 = vmatpush3.msra.mxu1 %v1279_v25  ;;  %v1287_v23 = vld [vmem:[%s3896_s7 + $0x7a8] sm:$0xff] }
 0x15a   : > { %2102 = vmatprep.mubr.f32.mxu1 %v845_v26  ;;  %1958 = vmatmul.mubr.f32.gmra.mxu0 %v842_v27  ;;  %v971_v24 = vld [vmem:[%s3898_s8 + $0x5c8] sm:$0xff]  ;;  %v973_v26 = vld [vmem:[%s3898_s8 + $0x5d8] sm:$0xff]  ;;  %v970_v27 = vld [vmem:[%s3898_s8 + $0x5c0] sm:$0xff] }
 0x15b   : > { %3076 = vmatprep.subr.mxu0 %v1262_v28  ;;  %2103 = vmatmul.mubr.f32.gmra.mxu1 %v844_v29  ;;  %v1271_v25 = vld [vmem:[%s3896_s7 + $0x728] sm:$0xff]  ;;  %v1254_v28 = vld [vmem:[%s3896_s7 + $0x6a0] sm:$0xff]  ;;  %v972_v29 = vld [vmem:[%s3898_s8 + $0x5d0] sm:$0xff] }
 0x15c   : > { %3077 = vmatpush3.msra.mxu0 %v1246_v30  ;;  %3156 = vmatprep.subr.mxu1 %v1294_v31  ;;  %v1238_v30 = vld [vmem:[%s3896_s7 + $0x620] sm:$0xff] }
 0x15d   : > { %1962 = vmatprep.mubr.f32.mxu0 %v859_v32  ;;  %3157 = vmatpush3.msra.mxu1 %v1278_v33  ;;  %v1286_v31 = vld [vmem:[%s3896_s7 + $0x7a0] sm:$0xff]  ;;  %v987_v32 = vld [vmem:[%s3898_s8 + $0x648] sm:$0xff] }
 0x15e   : > { %2107 = vmatprep.mubr.f32.mxu1 %v861_v34  ;;  %1963 = vmatmul.mubr.f32.gmra.mxu0 %v858_v35  ;;  %v1270_v33 = vld [vmem:[%s3896_s7 + $0x720] sm:$0xff]  ;;  %v989_v34 = vld [vmem:[%s3898_s8 + $0x658] sm:$0xff] }
 0x15f   : > { %3078 = vmatprep.subr.mxu0 %v1261_v36  ;;  %2108 = vmatmul.mubr.f32.gmra.mxu1 %v860_v37  ;;  %v986_v35 = vld [vmem:[%s3898_s8 + $0x640] sm:$0xff]  ;;  %v1253_v36 = vld [vmem:[%s3896_s7 + $0x698] sm:$0xff]  ;;  %v988_v37 = vld [vmem:[%s3898_s8 + $0x650] sm:$0xff] }
 0x160   : > { %3079 = vmatpush3.msra.mxu0 %v1245_v38  ;;  %3158 = vmatprep.subr.mxu1 %v1293_v39  ;;  %v1237_v38 = vld [vmem:[%s3896_s7 + $0x618] sm:$0xff] }
 0x161   : > { %1967 = vmatprep.mubr.f32.mxu0 %v875_v40  ;;  %3159 = vmatpush3.msra.mxu1 %v1277_v41  ;;  %v1285_v39 = vld [vmem:[%s3896_s7 + $0x798] sm:$0xff]  ;;  %v1003_v40 = vld [vmem:[%s3898_s8 + $0x6c8] sm:$0xff] }
 0x162   : > { %2112 = vmatprep.mubr.f32.mxu1 %v877_v42  ;;  %1968 = vmatmul.mubr.f32.gmra.mxu0 %v874_v43  ;;  %v1269_v41 = vld [vmem:[%s3896_s7 + $0x718] sm:$0xff]  ;;  %v1002_v43 = vld [vmem:[%s3898_s8 + $0x6c0] sm:$0xff] }
 0x163   : > { %3080 = vmatprep.subr.mxu0 %v1260_v44  ;;  %2113 = vmatmul.mubr.f32.gmra.mxu1 %v876_v45  ;;  %v1005_v42 = vld [vmem:[%s3898_s8 + $0x6d8] sm:$0xff]  ;;  %v1252_v44 = vld [vmem:[%s3896_s7 + $0x690] sm:$0xff] }
 0x164   : > { %3081 = vmatpush3.msra.mxu0 %v1244_v46  ;;  %3160 = vmatprep.subr.mxu1 %v1292_v47  ;;  %v1004_v45 = vld [vmem:[%s3898_s8 + $0x6d0] sm:$0xff] }
 0x165   : > { %1972 = vmatprep.mubr.f32.mxu0 %v891_v48  ;;  %3161 = vmatpush3.msra.mxu1 %v1276_v49  ;;  %v1236_v46 = vld [vmem:[%s3896_s7 + $0x610] sm:$0xff]  ;;  %v1019_v48 = vld [vmem:[%s3898_s8 + $0x748] sm:$0xff] }
 0x166   : > { %2117 = vmatprep.mubr.f32.mxu1 %v893_v50  ;;  %1973 = vmatmul.mubr.f32.gmra.mxu0 %v890_v51  ;;  %v1284_v47 = vld [vmem:[%s3896_s7 + $0x790] sm:$0xff]  ;;  %v1021_v50 = vld [vmem:[%s3898_s8 + $0x758] sm:$0xff]  ;;  %v1018_v51 = vld [vmem:[%s3898_s8 + $0x740] sm:$0xff] }
 0x167   : > { %3082 = vmatprep.subr.mxu0 %v1259_v52  ;;  %2118 = vmatmul.mubr.f32.gmra.mxu1 %v892_v53  ;;  %v1268_v49 = vld [vmem:[%s3896_s7 + $0x710] sm:$0xff]  ;;  %v1251_v52 = vld [vmem:[%s3896_s7 + $0x688] sm:$0xff] }
 0x168   : > { %3083 = vmatpush3.msra.mxu0 %v1243_v54  ;;  %3162 = vmatprep.subr.mxu1 %v1291_v55  ;;  %v1020_v53 = vld [vmem:[%s3898_s8 + $0x750] sm:$0xff]  ;;  %v1235_v54 = vld [vmem:[%s3896_s7 + $0x608] sm:$0xff] }
 0x169   : > { %1977 = vmatprep.mubr.f32.mxu0 %v907_v56  ;;  %3163 = vmatpush3.msra.mxu1 %v1275_v57  ;;  %v1283_v55 = vld [vmem:[%s3896_s7 + $0x788] sm:$0xff] }
 0x16a   : > { %2122 = vmatprep.mubr.f32.mxu1 %v909_v58  ;;  %1978 = vmatmul.mubr.f32.gmra.mxu0 %v906_v59  ;;  %v1035_v56 = vld [vmem:[%s3898_s8 + $0x7c8] sm:$0xff]  ;;  %v1037_v58 = vld [vmem:[%s3898_s8 + $0x7d8] sm:$0xff]  ;;  %v1034_v59 = vld [vmem:[%s3898_s8 + $0x7c0] sm:$0xff] }
 0x16b   : > { %3084 = vmatprep.subr.mxu0 %v1258_v60  ;;  %2123 = vmatmul.mubr.f32.gmra.mxu1 %v908_v61  ;;  %v1267_v57 = vld [vmem:[%s3896_s7 + $0x708] sm:$0xff]  ;;  %v1250_v60 = vld [vmem:[%s3896_s7 + $0x680] sm:$0xff]  ;;  %v1036_v61 = vld [vmem:[%s3898_s8 + $0x7d0] sm:$0xff] }
 0x16c   : > { %3085 = vmatpush3.msra.mxu0 %v1242_v62  ;;  %3164 = vmatprep.subr.mxu1 %v1290_v63  ;;  %v1234_v62 = vld [vmem:[%s3896_s7 + $0x600] sm:$0xff] }
 0x16d   : > { %1982 = vmatprep.mubr.f32.mxu0 %v923_v0  ;;  %3165 = vmatpush3.msra.mxu1 %v1274_v1  ;;  %v1282_v63 = vld [vmem:[%s3896_s7 + $0x780] sm:$0xff]  ;;  %v799_v0 = vld [vmem:[%s3898_s8 + $0x68] sm:$0xff] }
 0x16e   : > { %2127 = vmatprep.mubr.f32.mxu1 %v925_v2  ;;  %1983 = vmatmul.mubr.f32.gmra.mxu0 %v922_v3  ;;  %v1266_v1 = vld [vmem:[%s3896_s7 + $0x700] sm:$0xff]  ;;  %v801_v2 = vld [vmem:[%s3898_s8 + $0x78] sm:$0xff] }
 0x16f   : > { %3086 = vmatprep.subr.mxu0 %v1257_v4  ;;  %2128 = vmatmul.mubr.f32.gmra.mxu1 %v924_v5  ;;  %v798_v3 = vld [vmem:[%s3898_s8 + $0x60] sm:$0xff]  ;;  %v800_v4 = vld [vmem:[%s3898_s8 + $0x70] sm:$0xff]  ;;  %v815_v5 = vld [vmem:[%s3898_s8 + $0xe8] sm:$0xff] }
 0x170   : > { %3087 = vmatpush3.msra.mxu0 %v1241_v6  ;;  %3166 = vmatprep.subr.mxu1 %v1289_v7  ;;  %v817_v6 = vld [vmem:[%s3898_s8 + $0xf8] sm:$0xff] }
 0x171   : > { %1987 = vmatprep.mubr.f32.mxu0 %v939_v8  ;;  %3167 = vmatpush3.msra.mxu1 %v1273_v9  ;;  %v814_v9 = vld [vmem:[%s3898_s8 + $0xe0] sm:$0xff] }
 0x172   : > { %2132 = vmatprep.mubr.f32.mxu1 %v941_v10  ;;  %1988 = vmatmul.mubr.f32.gmra.mxu0 %v938_v11 }
 0x173   : > { %3088 = vmatprep.subr.mxu0 %v1256_v12  ;;  %2133 = vmatmul.mubr.f32.gmra.mxu1 %v940_v13  ;;  %v816_v12 = vld [vmem:[%s3898_s8 + $0xf0] sm:$0xff]  ;;  %v831_v13 = vld [vmem:[%s3898_s8 + $0x168] sm:$0xff] }
 0x174   : > { %3089 = vmatpush3.msra.mxu0 %v1240_v14  ;;  %3168 = vmatprep.subr.mxu1 %v1288_v15 }
 0x175   : > { %1992 = vmatprep.mubr.f32.mxu0 %v955_v16  ;;  %3169 = vmatpush3.msra.mxu1 %v1272_v17  ;;  %v833_v16 = vld [vmem:[%s3898_s8 + $0x178] sm:$0xff] }
 0x176   : > { %2137 = vmatprep.mubr.f32.mxu1 %v957_v18  ;;  %1993 = vmatmul.mubr.f32.gmra.mxu0 %v954_v19 }
 0x177   : > { %3090 = vmatprep.subr.mxu0 %v1255_v20  ;;  %2138 = vmatmul.mubr.f32.gmra.mxu1 %v956_v21  ;;  %v830_v20 = vld [vmem:[%s3898_s8 + $0x160] sm:$0xff] }
 0x178   : > { %3091 = vmatpush3.msra.mxu0 %v1239_v22  ;;  %3170 = vmatprep.subr.mxu1 %v1287_v23  ;;  %v832_v23 = vld [vmem:[%s3898_s8 + $0x170] sm:$0xff] }
 0x179   : > { %1997 = vmatprep.mubr.f32.mxu0 %v971_v24  ;;  %3171 = vmatpush3.msra.mxu1 %v1271_v25  ;;  %v847_v24 = vld [vmem:[%s3898_s8 + $0x1e8] sm:$0xff] }
 0x17a   : > { %2142 = vmatprep.mubr.f32.mxu1 %v973_v26  ;;  %1998 = vmatmul.mubr.f32.gmra.mxu0 %v970_v27  ;;  %v849_v27 = vld [vmem:[%s3898_s8 + $0x1f8] sm:$0xff] }
 0x17b   : > { %3092 = vmatprep.subr.mxu0 %v1254_v28  ;;  %2143 = vmatmul.mubr.f32.gmra.mxu1 %v972_v29 }
 0x17c   : > { %3093 = vmatpush3.msra.mxu0 %v1238_v30  ;;  %3172 = vmatprep.subr.mxu1 %v1286_v31  ;;  %v846_v31 = vld [vmem:[%s3898_s8 + $0x1e0] sm:$0xff] }
 0x17d   : > { %2002 = vmatprep.mubr.f32.mxu0 %v987_v32  ;;  %3173 = vmatpush3.msra.mxu1 %v1270_v33 }
 0x17e   : > { %2147 = vmatprep.mubr.f32.mxu1 %v989_v34  ;;  %2003 = vmatmul.mubr.f32.gmra.mxu0 %v986_v35  ;;  %v848_v34 = vld [vmem:[%s3898_s8 + $0x1f0] sm:$0xff]  ;;  %v863_v35 = vld [vmem:[%s3898_s8 + $0x268] sm:$0xff] }
 0x17f   : > { %3094 = vmatprep.subr.mxu0 %v1253_v36  ;;  %2148 = vmatmul.mubr.f32.gmra.mxu1 %v988_v37 }
 0x180   : > { %3095 = vmatpush3.msra.mxu0 %v1237_v38  ;;  %3174 = vmatprep.subr.mxu1 %v1285_v39  ;;  %v865_v38 = vld [vmem:[%s3898_s8 + $0x278] sm:$0xff] }
 0x181   : > { %2007 = vmatprep.mubr.f32.mxu0 %v1003_v40  ;;  %3175 = vmatpush3.msra.mxu1 %v1269_v41 }
 0x182   : > { %2152 = vmatprep.mubr.f32.mxu1 %v1005_v42  ;;  %2008 = vmatmul.mubr.f32.gmra.mxu0 %v1002_v43  ;;  %v862_v42 = vld [vmem:[%s3898_s8 + $0x260] sm:$0xff] }
 0x183   : > { %3096 = vmatprep.subr.mxu0 %v1252_v44  ;;  %2153 = vmatmul.mubr.f32.gmra.mxu1 %v1004_v45  ;;  %v864_v45 = vld [vmem:[%s3898_s8 + $0x270] sm:$0xff] }
 0x184   : > { %3097 = vmatpush3.msra.mxu0 %v1236_v46  ;;  %3176 = vmatprep.subr.mxu1 %v1284_v47  ;;  %v879_v46 = vld [vmem:[%s3898_s8 + $0x2e8] sm:$0xff] }
 0x185   : > { %2012 = vmatprep.mubr.f32.mxu0 %v1019_v48  ;;  %3177 = vmatpush3.msra.mxu1 %v1268_v49  ;;  %v881_v49 = vld [vmem:[%s3898_s8 + $0x2f8] sm:$0xff] }
 0x186   : > { %2157 = vmatprep.mubr.f32.mxu1 %v1021_v50  ;;  %2013 = vmatmul.mubr.f32.gmra.mxu0 %v1018_v51 }
 0x187   : > { %3098 = vmatprep.subr.mxu0 %v1251_v52  ;;  %2158 = vmatmul.mubr.f32.gmra.mxu1 %v1020_v53  ;;  %v878_v53 = vld [vmem:[%s3898_s8 + $0x2e0] sm:$0xff] }
 0x188   : > { %3099 = vmatpush3.msra.mxu0 %v1235_v54  ;;  %3178 = vmatprep.subr.mxu1 %v1283_v55 }
 0x189   : > { %2017 = vmatprep.mubr.f32.mxu0 %v1035_v56  ;;  %3179 = vmatpush3.msra.mxu1 %v1267_v57  ;;  %v880_v56 = vld [vmem:[%s3898_s8 + $0x2f0] sm:$0xff]  ;;  %v895_v57 = vld [vmem:[%s3898_s8 + $0x368] sm:$0xff] }
 0x18a   : > { %2162 = vmatprep.mubr.f32.mxu1 %v1037_v58  ;;  %2018 = vmatmul.mubr.f32.gmra.mxu0 %v1034_v59 }
 0x18b   : > { %3100 = vmatprep.subr.mxu0 %v1250_v60  ;;  %2163 = vmatmul.mubr.f32.gmra.mxu1 %v1036_v61  ;;  %v897_v60 = vld [vmem:[%s3898_s8 + $0x378] sm:$0xff] }
 0x18c   : > { %3101 = vmatpush3.msra.mxu0 %v1234_v62  ;;  %3180 = vmatprep.subr.mxu1 %v1282_v63 }
 0x18d   : > { %2232 = vmatprep.mubr.f32.mxu0 %v799_v0  ;;  %3181 = vmatpush3.msra.mxu1 %v1266_v1  ;;  %v894_v0 = vld [vmem:[%s3898_s8 + $0x360] sm:$0xff] }
 0x18e   : > { %2377 = vmatprep.mubr.f32.mxu1 %v801_v2  ;;  %v2622_v7 = vpop.f32.mrf.mxu0  ;;  %2233 = vmatmul.mubr.f32.vlgmr.msra.gmra.mxu0 %v798_v3  ;;  %v896_v3 = vld [vmem:[%s3898_s8 + $0x370] sm:$0xff] }
 0x18f   : > { %v2702_v8 = vpop.f32.mrf.mxu1  ;;  %2378 = vmatmul.mubr.f32.vlgmr.msra.gmra.mxu1 %v800_v4  ;;  %2237 = vmatprep.mubr.f32.mxu0 %v815_v5  ;;  %v911_v4 = vld [vmem:[%s3898_s8 + $0x3e8] sm:$0xff] }
 0x190   : > { %v2623_v10 = vpop.f32.mrf.mxu0  ;;  %2382 = vmatprep.mubr.f32.mxu1 %v817_v6 }
 0x191   : > { %v2703_v11 = vpop.f32.mrf.mxu1  ;;  %v2624_v14 = vadd.f32 %v2623_v10, %v2622_v7  ;;  %v913_v7 = vld [vmem:[%s3898_s8 + $0x3f8] sm:$0xff] }
 0x192   : > { %v2704_v15 = vadd.f32 %v2703_v11, %v2702_v8  ;;  %v2625_v17 = vpop.f32.mrf.mxu0  ;;  %2238 = vmatmul.mubr.f32.gmra.mxu0 %v814_v9  ;;  %v910_v11 = vld [vmem:[%s3898_s8 + $0x3e0] sm:$0xff] }
 0x193   : > { %v2705_v18 = vpop.f32.mrf.mxu1  ;;  %2383 = vmatmul.mubr.f32.gmra.mxu1 %v816_v12  ;;  %2242 = vmatprep.mubr.f32.mxu0 %v831_v13 }
 0x194   : > { %v4410_v19 = vadd.f32 %v2704_v15, %v2624_v14  ;;  %v2626_v21 = vpop.f32.mrf.mxu0  ;;  %2387 = vmatprep.mubr.f32.mxu1 %v833_v16  ;;  %v912_v14 = vld [vmem:[%s3898_s8 + $0x3f0] sm:$0xff]  ;;  %v927_v15 = vld [vmem:[%s3898_s8 + $0x468] sm:$0xff] }
 0x195   : > { %v2706_v22 = vpop.f32.mrf.mxu1  ;;  %v2627_v25 = vadd.f32 %v2626_v21, %v2625_v17 }
 0x196   : > { %v2707_v26 = vadd.f32 %v2706_v22, %v2705_v18  ;;  %v2628_v28 = vpop.f32.mrf.mxu0  ;;  %2243 = vmatmul.mubr.f32.gmra.mxu0 %v830_v20  ;;  %v929_v18 = vld [vmem:[%s3898_s8 + $0x478] sm:$0xff] }
 0x197   : > { %v2708_v29 = vpop.f32.mrf.mxu1  ;;  %2388 = vmatmul.mubr.f32.gmra.mxu1 %v832_v23  ;;  %2247 = vmatprep.mubr.f32.mxu0 %v847_v24  ;;  %v926_v23 = vld [vmem:[%s3898_s8 + $0x460] sm:$0xff] }
 0x198   : > { %v4416_v30 = vadd.f32 %v2707_v26, %v2627_v25  ;;  %v2629_v32 = vpop.f32.mrf.mxu0  ;;  %2392 = vmatprep.mubr.f32.mxu1 %v849_v27  ;;  %v928_v26 = vld [vmem:[%s3898_s8 + $0x470] sm:$0xff]  ;;  %v943_v27 = vld [vmem:[%s3898_s8 + $0x4e8] sm:$0xff] }
 0x199   : > { %v2709_v33 = vpop.f32.mrf.mxu1  ;;  %v2630_v36 = vadd.f32 %v2629_v32, %v2628_v28 }
 0x19a   : > { %v2710_v37 = vadd.f32 %v2709_v33, %v2708_v29  ;;  %v2631_v39 = vpop.f32.mrf.mxu0  ;;  %2248 = vmatmul.mubr.f32.gmra.mxu0 %v846_v31  ;;  %v945_v31 = vld [vmem:[%s3898_s8 + $0x4f8] sm:$0xff] }
 0x19b   : > { %v2711_v40 = vpop.f32.mrf.mxu1  ;;  %2393 = vmatmul.mubr.f32.gmra.mxu1 %v848_v34  ;;  %2252 = vmatprep.mubr.f32.mxu0 %v863_v35  ;;  %v942_v35 = vld [vmem:[%s3898_s8 + $0x4e0] sm:$0xff] }
 0x19c   : > { %v4422_v41 = vadd.f32 %v2710_v37, %v2630_v36  ;;  %v2632_v43 = vpop.f32.mrf.mxu0  ;;  %2397 = vmatprep.mubr.f32.mxu1 %v865_v38  ;;  %v944_v38 = vld [vmem:[%s3898_s8 + $0x4f0] sm:$0xff] }
 0x19d   : > { %v2712_v44 = vpop.f32.mrf.mxu1  ;;  %v2633_v47 = vadd.f32 %v2632_v43, %v2631_v39  ;;  %v959_v39 = vld [vmem:[%s3898_s8 + $0x568] sm:$0xff]  ;;  %v961_v43 = vld [vmem:[%s3898_s8 + $0x578] sm:$0xff] }
 0x19e   : > { %v2713_v48 = vadd.f32 %v2712_v44, %v2711_v40  ;;  %v2634_v50 = vpop.f32.mrf.mxu0  ;;  %2253 = vmatmul.mubr.f32.gmra.mxu0 %v862_v42 }
 0x19f   : > { %v2714_v51 = vpop.f32.mrf.mxu1  ;;  %2398 = vmatmul.mubr.f32.gmra.mxu1 %v864_v45  ;;  %2257 = vmatprep.mubr.f32.mxu0 %v879_v46 }
 0x1a0   : > { %v4428_v52 = vadd.f32 %v2713_v48, %v2633_v47  ;;  %v2635_v54 = vpop.f32.mrf.mxu0  ;;  %2402 = vmatprep.mubr.f32.mxu1 %v881_v49  ;;  %v958_v47 = vld [vmem:[%s3898_s8 + $0x560] sm:$0xff] }
 0x1a1   : > { %v2715_v55 = vpop.f32.mrf.mxu1  ;;  %v2636_v58 = vadd.f32 %v2635_v54, %v2634_v50  ;;  %v960_v50 = vld [vmem:[%s3898_s8 + $0x570] sm:$0xff] }
 0x1a2   : > { %v2716_v59 = vadd.f32 %v2715_v55, %v2714_v51  ;;  %v2637_v61 = vpop.f32.mrf.mxu0  ;;  %2258 = vmatmul.mubr.f32.gmra.mxu0 %v878_v53  ;;  %v975_v51 = vld [vmem:[%s3898_s8 + $0x5e8] sm:$0xff]  ;;  %v977_v55 = vld [vmem:[%s3898_s8 + $0x5f8] sm:$0xff] }
 0x1a3   : > { %v2717_v62 = vpop.f32.mrf.mxu1  ;;  %2403 = vmatmul.mubr.f32.gmra.mxu1 %v880_v56  ;;  %2262 = vmatprep.mubr.f32.mxu0 %v895_v57 }
 0x1a4   : > { %v4434_v63 = vadd.f32 %v2716_v59, %v2636_v58  ;;  %v2638_v1 = vpop.f32.mrf.mxu0  ;;  %2407 = vmatprep.mubr.f32.mxu1 %v897_v60  ;;  %v974_v59 = vld [vmem:[%s3898_s8 + $0x5e0] sm:$0xff] }
 0x1a5   : > { %v2718_v2 = vpop.f32.mrf.mxu1  ;;  %v2639_v5 = vadd.f32 %v2638_v1, %v2637_v61 }
 0x1a6   : > { %v2719_v6 = vadd.f32 %v2718_v2, %v2717_v62  ;;  %v2640_v8 = vpop.f32.mrf.mxu0  ;;  %2263 = vmatmul.mubr.f32.gmra.mxu0 %v894_v0  ;;  %v976_v62 = vld [vmem:[%s3898_s8 + $0x5f0] sm:$0xff]  ;;  %v991_v0 = vld [vmem:[%s3898_s8 + $0x668] sm:$0xff] }
 0x1a7   : > { %v2720_v9 = vpop.f32.mrf.mxu1  ;;  %2408 = vmatmul.mubr.f32.gmra.mxu1 %v896_v3  ;;  %2267 = vmatprep.mubr.f32.mxu0 %v911_v4  ;;  %v993_v3 = vld [vmem:[%s3898_s8 + $0x678] sm:$0xff] }
 0x1a8   : > { %v4440_v10 = vadd.f32 %v2719_v6, %v2639_v5  ;;  %v2641_v12 = vpop.f32.mrf.mxu0  ;;  %2412 = vmatprep.mubr.f32.mxu1 %v913_v7  ;;  %v990_v7 = vld [vmem:[%s3898_s8 + $0x660] sm:$0xff] }
 0x1a9   : > { %v2721_v13 = vpop.f32.mrf.mxu1  ;;  %v2642_v16 = vadd.f32 %v2641_v12, %v2640_v8  ;;  %v1007_v12 = vld [vmem:[%s3898_s8 + $0x6e8] sm:$0xff] }
 0x1aa   : > { %v2722_v17 = vadd.f32 %v2721_v13, %v2720_v9  ;;  %v2643_v20 = vpop.f32.mrf.mxu0  ;;  %2268 = vmatmul.mubr.f32.gmra.mxu0 %v910_v11  ;;  %v992_v11 = vld [vmem:[%s3898_s8 + $0x670] sm:$0xff] }
 0x1ab   : > { %v2723_v21 = vpop.f32.mrf.mxu1  ;;  %2413 = vmatmul.mubr.f32.gmra.mxu1 %v912_v14  ;;  %2272 = vmatprep.mubr.f32.mxu0 %v927_v15  ;;  %v1009_v15 = vld [vmem:[%s3898_s8 + $0x6f8] sm:$0xff] }
 0x1ac   : > { %v4446_v22 = vadd.f32 %v2722_v17, %v2642_v16  ;;  %v2644_v24 = vpop.f32.mrf.mxu0  ;;  %2417 = vmatprep.mubr.f32.mxu1 %v929_v18 }
 0x1ad   : > { %v2724_v25 = vpop.f32.mrf.mxu1  ;;  %v2645_v28 = vadd.f32 %v2644_v24, %v2643_v20  ;;  %v1006_v20 = vld [vmem:[%s3898_s8 + $0x6e0] sm:$0xff]  ;;  %v1008_v24 = vld [vmem:[%s3898_s8 + $0x6f0] sm:$0xff] }
 0x1ae   : > { %v2725_v29 = vadd.f32 %v2724_v25, %v2723_v21  ;;  %v2646_v32 = vpop.f32.mrf.mxu0  ;;  %2273 = vmatmul.mubr.f32.gmra.mxu0 %v926_v23  ;;  %v1023_v25 = vld [vmem:[%s3898_s8 + $0x768] sm:$0xff] }
 0x1af   : > { %v2726_v33 = vpop.f32.mrf.mxu1  ;;  %2418 = vmatmul.mubr.f32.gmra.mxu1 %v928_v26  ;;  %2277 = vmatprep.mubr.f32.mxu0 %v943_v27 }
 0x1b0   : > { %v4452_v34 = vadd.f32 %v2725_v29, %v2645_v28  ;;  %v2647_v36 = vpop.f32.mrf.mxu0  ;;  %2422 = vmatprep.mubr.f32.mxu1 %v945_v31  ;;  %v1025_v28 = vld [vmem:[%s3898_s8 + $0x778] sm:$0xff] }
 0x1b1   : > { %v2727_v37 = vpop.f32.mrf.mxu1  ;;  %v2648_v40 = vadd.f32 %v2647_v36, %v2646_v32 }
 0x1b2   : > { %v2728_v42 = vadd.f32 %v2727_v37, %v2726_v33  ;;  %v2649_v44 = vpop.f32.mrf.mxu0  ;;  %2278 = vmatmul.mubr.f32.gmra.mxu0 %v942_v35  ;;  %v1022_v33 = vld [vmem:[%s3898_s8 + $0x760] sm:$0xff]  ;;  %v1024_v37 = vld [vmem:[%s3898_s8 + $0x770] sm:$0xff] }
 0x1b3   : > { %v2729_v45 = vpop.f32.mrf.mxu1  ;;  %2423 = vmatmul.mubr.f32.gmra.mxu1 %v944_v38  ;;  %2282 = vmatprep.mubr.f32.mxu0 %v959_v39  ;;  %v1039_v38 = vld [vmem:[%s3898_s8 + $0x7e8] sm:$0xff] }
 0x1b4   : > { %v4458_v46 = vadd.f32 %v2728_v42, %v2648_v40  ;;  %v2650_v48 = vpop.f32.mrf.mxu0  ;;  %2427 = vmatprep.mubr.f32.mxu1 %v961_v43  ;;  %v1041_v42 = vld [vmem:[%s3898_s8 + $0x7f8] sm:$0xff] }
 0x1b5   : > { %v2730_v49 = vpop.f32.mrf.mxu1  ;;  %v2651_v53 = vadd.f32 %v2650_v48, %v2649_v44 }
 0x1b6   : > { %v2731_v54 = vadd.f32 %v2730_v49, %v2729_v45  ;;  %v2652_v56 = vpop.f32.mrf.mxu0  ;;  %2283 = vmatmul.mubr.f32.gmra.mxu0 %v958_v47  ;;  %v1038_v47 = vld [vmem:[%s3898_s8 + $0x7e0] sm:$0xff] }
 0x1b7   : > { %v2732_v57 = vpop.f32.mrf.mxu1  ;;  %2428 = vmatmul.mubr.f32.gmra.mxu1 %v960_v50  ;;  %2287 = vmatprep.mubr.f32.mxu0 %v975_v51  ;;  %v1040_v50 = vld [vmem:[%s3898_s8 + $0x7f0] sm:$0xff] }
 0x1b8   : > { %v4464_v58 = vadd.f32 %v2731_v54, %v2651_v53  ;;  %v2653_v60 = vpop.f32.mrf.mxu0  ;;  %2432 = vmatprep.mubr.f32.mxu1 %v977_v55 }
 0x1b9   : > { %v2733_v61 = vpop.f32.mrf.mxu1  ;;  %v2654_v1 = vadd.f32 %v2653_v60, %v2652_v56 }
 0x1ba   : > { %v2734_v2 = vadd.f32 %v2733_v61, %v2732_v57  ;;  %v2655_v4 = vpop.f32.mrf.mxu0  ;;  %2288 = vmatmul.mubr.f32.gmra.mxu0 %v974_v59 }
 0x1bb   : > { %v2735_v5 = vpop.f32.mrf.mxu1  ;;  %2433 = vmatmul.mubr.f32.gmra.mxu1 %v976_v62  ;;  %2292 = vmatprep.mubr.f32.mxu0 %v991_v0 }
 0x1bc   : > { %v4470_v6 = vadd.f32 %v2734_v2, %v2654_v1  ;;  %v2656_v8 = vpop.f32.mrf.mxu0  ;;  %2437 = vmatprep.mubr.f32.mxu1 %v993_v3 }
 0x1bd   : > { %v2736_v9 = vpop.f32.mrf.mxu1  ;;  %v2657_v13 = vadd.f32 %v2656_v8, %v2655_v4 }
 0x1be   : > { %v2737_v14 = vadd.f32 %v2736_v9, %v2735_v5  ;;  %v2658_v16 = vpop.f32.mrf.mxu0  ;;  %2293 = vmatmul.mubr.f32.gmra.mxu0 %v990_v7 }
 0x1bf   : > { %v2738_v17 = vpop.f32.mrf.mxu1  ;;  %2438 = vmatmul.mubr.f32.gmra.mxu1 %v992_v11  ;;  %2297 = vmatprep.mubr.f32.mxu0 %v1007_v12 }
 0x1c0   : > { %v4476_v18 = vadd.f32 %v2737_v14, %v2657_v13  ;;  %v2659_v21 = vpop.f32.mrf.mxu0  ;;  %2442 = vmatprep.mubr.f32.mxu1 %v1009_v15 }
 0x1c1   : > { %v2739_v23 = vpop.f32.mrf.mxu1  ;;  %v2660_v26 = vadd.f32 %v2659_v21, %v2658_v16 }
 0x1c2   : > { %v2740_v27 = vadd.f32 %v2739_v23, %v2738_v17  ;;  %v2661_v29 = vpop.f32.mrf.mxu0  ;;  %2298 = vmatmul.mubr.f32.gmra.mxu0 %v1006_v20 }
 0x1c3   : > { %v2741_v31 = vpop.f32.mrf.mxu1  ;;  %2443 = vmatmul.mubr.f32.gmra.mxu1 %v1008_v24  ;;  %2302 = vmatprep.mubr.f32.mxu0 %v1023_v25 }
 0x1c4   : > { %v4482_v32 = vadd.f32 %v2740_v27, %v2660_v26  ;;  %v2662_v35 = vpop.f32.mrf.mxu0  ;;  %2447 = vmatprep.mubr.f32.mxu1 %v1025_v28 }
 0x1c5   : > { %v2742_v36 = vpop.f32.mrf.mxu1  ;;  %v2663_v39 = vadd.f32 %v2662_v35, %v2661_v29 }
 0x1c6   : > { %v2743_v40 = vadd.f32 %v2742_v36, %v2741_v31  ;;  %v2664_v43 = vpop.f32.mrf.mxu0  ;;  %2303 = vmatmul.mubr.f32.gmra.mxu0 %v1022_v33 }
 0x1c7   : > { %v2744_v44 = vpop.f32.mrf.mxu1  ;;  %2448 = vmatmul.mubr.f32.gmra.mxu1 %v1024_v37  ;;  %2307 = vmatprep.mubr.f32.mxu0 %v1039_v38 }
 0x1c8   : > { %v4488_v45 = vadd.f32 %v2743_v40, %v2663_v39  ;;  %v2665_v48 = vpop.f32.mrf.mxu0  ;;  %2452 = vmatprep.mubr.f32.mxu1 %v1041_v42 }
 0x1c9   : > { %v2745_v49 = vpop.f32.mrf.mxu1  ;;  %v2666_v51 = vadd.f32 %v2665_v48, %v2664_v43 }
 0x1ca   : > { %v2746_v53 = vadd.f32 %v2745_v49, %v2744_v44  ;;  %v2667_v54 = vpop.f32.mrf.mxu0  ;;  %2308 = vmatmul.mubr.f32.gmra.mxu0 %v1038_v47 }
 0x1cb   : > { %v2747_v55 = vpop.f32.mrf.mxu1  ;;  %2453 = vmatmul.mubr.f32.gmra.mxu1 %v1040_v50 }
 0x1cc   : > { %v4492_v56 = vadd.f32 %v2746_v53, %v2666_v51  ;;  %v2668_v57 = vpop.f32.mrf.mxu0 }
 0x1cd   : > { %v2748_v59 = vpop.f32.mrf.mxu1  ;;  %v2669_v60 = vadd.f32 %v2668_v57, %v2667_v54 }
 0x1ce   : > { %v2749_v61 = vadd.f32 %v2748_v59, %v2747_v55  ;;  %v2782_v62 = vpop.f32.mrf.mxu0 }
 0x1cf   : > { %v2862_v1 = vpop.f32.mrf.mxu1 }
 0x1d0   : > { %v4494_v0 = vadd.f32 %v2749_v61, %v2669_v60  ;;  %v2783_v2 = vpop.f32.mrf.mxu0 }
 0x1d1   : > { %v2784_v3 = vadd.f32 %v2783_v2, %v2782_v62  ;;  %v2863_v4 = vpop.f32.mrf.mxu1 }
 0x1d2   : > { %v2864_v5 = vadd.f32 %v2863_v4, %v2862_v1  ;;  %v2785_v7 = vpop.f32.mrf.mxu0 }
 0x1d3   : > { %v1655_v8 = vadd.f32 %v2784_v3, %v4410_v19  ;;  %v2865_v9 = vpop.f32.mrf.mxu1 }
 0x1d4   : > { %v2786_v11 = vpop.f32.mrf.mxu0 }
 0x1d5   : > { %v4497_v12 = vadd.f32 %v2864_v5, %v1655_v8  ;;  %v2787_v13 = vadd.f32 %v2786_v11, %v2785_v7  ;;  %v2866_v14 = vpop.f32.mrf.mxu1 }
 0x1d6   : > { %v2867_v15 = vadd.f32 %v2866_v14, %v2865_v9  ;;  %v2788_v16 = vpop.f32.mrf.mxu0 }
 0x1d7   : > { %v1660_v17 = vadd.f32 %v2787_v13, %v4416_v30  ;;  %v2868_v20 = vpop.f32.mrf.mxu1 }
 0x1d8   : > { %v2789_v21 = vpop.f32.mrf.mxu0 }
 0x1d9   : > { %v4500_v23 = vadd.f32 %v2867_v15, %v1660_v17  ;;  %v2790_v24 = vadd.f32 %v2789_v21, %v2788_v16  ;;  %v2869_v25 = vpop.f32.mrf.mxu1 }
 0x1da   : > { %v2870_v26 = vadd.f32 %v2869_v25, %v2868_v20  ;;  %v2791_v27 = vpop.f32.mrf.mxu0 }
 0x1db   : > { %v1665_v19 = vadd.f32 %v2790_v24, %v4422_v41  ;;  %v2871_v28 = vpop.f32.mrf.mxu1 }
 0x1dc   : > { %v2792_v29 = vpop.f32.mrf.mxu0 }
 0x1dd   : > { %v4503_v31 = vadd.f32 %v2870_v26, %v1665_v19  ;;  %v2793_v33 = vadd.f32 %v2792_v29, %v2791_v27  ;;  %v2872_v35 = vpop.f32.mrf.mxu1 }
 0x1de   : > { %v2873_v36 = vadd.f32 %v2872_v35, %v2871_v28  ;;  %v2794_v37 = vpop.f32.mrf.mxu0 }
 0x1df   : > { %v1670_v30 = vadd.f32 %v2793_v33, %v4428_v52  ;;  %v2874_v38 = vpop.f32.mrf.mxu1 }
 0x1e0   : > { %v2795_v39 = vpop.f32.mrf.mxu0 }
 0x1e1   : > { %v4506_v40 = vadd.f32 %v2873_v36, %v1670_v30  ;;  %v2796_v42 = vadd.f32 %v2795_v39, %v2794_v37  ;;  %v2875_v43 = vpop.f32.mrf.mxu1 }
 0x1e2   : > { %v2876_v44 = vadd.f32 %v2875_v43, %v2874_v38  ;;  %v2797_v47 = vpop.f32.mrf.mxu0 }
 0x1e3   : > { %v1675_v41 = vadd.f32 %v2796_v42, %v4434_v63  ;;  %v2877_v48 = vpop.f32.mrf.mxu1 }
 0x1e4   : > { %v2798_v49 = vpop.f32.mrf.mxu0 }
 0x1e5   : > { %v4509_v50 = vadd.f32 %v2876_v44, %v1675_v41  ;;  %v2799_v51 = vadd.f32 %v2798_v49, %v2797_v47  ;;  %v2878_v53 = vpop.f32.mrf.mxu1 }
 0x1e6   : > { %v2879_v54 = vadd.f32 %v2878_v53, %v2877_v48  ;;  %v2800_v55 = vpop.f32.mrf.mxu0 }
 0x1e7   : > { %v1680_v52 = vadd.f32 %v2799_v51, %v4440_v10  ;;  %v2880_v57 = vpop.f32.mrf.mxu1 }
 0x1e8   : > { %v2801_v59 = vpop.f32.mrf.mxu0 }
 0x1e9   : > { %v4512_v60 = vadd.f32 %v2879_v54, %v1680_v52  ;;  %v2802_v61 = vadd.f32 %v2801_v59, %v2800_v55  ;;  %v2881_v62 = vpop.f32.mrf.mxu1 }
 0x1ea   : > { %v2882_v1 = vadd.f32 %v2881_v62, %v2880_v57  ;;  %v2803_v2 = vpop.f32.mrf.mxu0 }
 0x1eb   : > { %v1685_v63 = vadd.f32 %v2802_v61, %v4446_v22  ;;  %v2883_v3 = vpop.f32.mrf.mxu1 }
 0x1ec   : > { %v2804_v4 = vpop.f32.mrf.mxu0 }
 0x1ed   : > { %v4515_v5 = vadd.f32 %v2882_v1, %v1685_v63  ;;  %v2805_v7 = vadd.f32 %v2804_v4, %v2803_v2  ;;  %v2884_v8 = vpop.f32.mrf.mxu1 }
 0x1ee   : > { %v2885_v9 = vadd.f32 %v2884_v8, %v2883_v3  ;;  %v2806_v11 = vpop.f32.mrf.mxu0 }
 0x1ef   : > { %v1690_v10 = vadd.f32 %v2805_v7, %v4452_v34  ;;  %v2886_v13 = vpop.f32.mrf.mxu1 }
 0x1f0   : > { %v2807_v14 = vpop.f32.mrf.mxu0 }
 0x1f1   : > { %v4518_v15 = vadd.f32 %v2885_v9, %v1690_v10  ;;  %v2808_v16 = vadd.f32 %v2807_v14, %v2806_v11  ;;  %v2887_v17 = vpop.f32.mrf.mxu1 }
 0x1f2   : > { %v2888_v20 = vadd.f32 %v2887_v17, %v2886_v13  ;;  %v2809_v21 = vpop.f32.mrf.mxu0 }
 0x1f3   : > { %v1695_v22 = vadd.f32 %v2808_v16, %v4458_v46  ;;  %v2889_v24 = vpop.f32.mrf.mxu1 }
 0x1f4   : > { %v2810_v25 = vpop.f32.mrf.mxu0 }
 0x1f5   : > { %v4521_v26 = vadd.f32 %v2888_v20, %v1695_v22  ;;  %v2811_v27 = vadd.f32 %v2810_v25, %v2809_v21  ;;  %v2890_v19 = vpop.f32.mrf.mxu1 }
 0x1f6   : > { %v2891_v28 = vadd.f32 %v2890_v19, %v2889_v24  ;;  %v2812_v29 = vpop.f32.mrf.mxu0 }
 0x1f7   : > { %v1700_v34 = vadd.f32 %v2811_v27, %v4464_v58  ;;  %v2892_v33 = vpop.f32.mrf.mxu1 }
 0x1f8   : > { %v2813_v35 = vpop.f32.mrf.mxu0 }
 0x1f9   : > { %v4524_v36 = vadd.f32 %v2891_v28, %v1700_v34  ;;  %v2814_v37 = vadd.f32 %v2813_v35, %v2812_v29  ;;  %v2893_v30 = vpop.f32.mrf.mxu1 }
 0x1fa   : > { %v2894_v38 = vadd.f32 %v2893_v30, %v2892_v33  ;;  %v2815_v39 = vpop.f32.mrf.mxu0 }
 0x1fb   : > { %v1705_v46 = vadd.f32 %v2814_v37, %v4470_v6  ;;  %v2895_v42 = vpop.f32.mrf.mxu1 }
 0x1fc   : > { %v2816_v43 = vpop.f32.mrf.mxu0 }
 0x1fd   : > { %v4527_v44 = vadd.f32 %v2894_v38, %v1705_v46  ;;  %v2817_v47 = vadd.f32 %v2816_v43, %v2815_v39  ;;  %v2896_v41 = vpop.f32.mrf.mxu1 }
 0x1fe   : > { %v2897_v48 = vadd.f32 %v2896_v41, %v2895_v42  ;;  %v2818_v49 = vpop.f32.mrf.mxu0 }
 0x1ff   : > { %4855 = vst [vmem:[#allocation3_spill] sm:$0xff] %v4527_v44  ;;  %v1710_v58 = vadd.f32 %v2817_v47, %v4476_v18  ;;  %v2898_v51 = vpop.f32.mrf.mxu1 }
 0x200   : > { %v2819_v53 = vpop.f32.mrf.mxu0 }
 0x201   : > { %v4530_v54 = vadd.f32 %v2897_v48, %v1710_v58  ;;  %v2820_v55 = vadd.f32 %v2819_v53, %v2818_v49  ;;  %v2899_v52 = vpop.f32.mrf.mxu1 }
 0x202   : > { %v2900_v57 = vadd.f32 %v2899_v52, %v2898_v51  ;;  %v2821_v59 = vpop.f32.mrf.mxu0 }
 0x203   : > { %4856 = vst [vmem:[#allocation4_spill] sm:$0xff] %v4530_v54  ;;  %v1715_v6 = vadd.f32 %v2820_v55, %v4482_v32  ;;  %v2901_v61 = vpop.f32.mrf.mxu1 }
 0x204   : > { %v2822_v62 = vpop.f32.mrf.mxu0 }
 0x205   : > { %v4533_v1 = vadd.f32 %v2900_v57, %v1715_v6  ;;  %v2823_v2 = vadd.f32 %v2822_v62, %v2821_v59  ;;  %v2902_v63 = vpop.f32.mrf.mxu1 }
 0x206   : > { %v2903_v3 = vadd.f32 %v2902_v63, %v2901_v61  ;;  %v2824_v4 = vpop.f32.mrf.mxu0 }
 0x207   : > { %4857 = vst [vmem:[#allocation5_spill] sm:$0xff] %v4533_v1  ;;  %v1720_v18 = vadd.f32 %v2823_v2, %v4488_v45  ;;  %v2904_v7 = vpop.f32.mrf.mxu1 }
 0x208   : > { %v2825_v8 = vpop.f32.mrf.mxu0 }
 0x209   : > { %v4536_v9 = vadd.f32 %v2903_v3, %v1720_v18  ;;  %v2826_v11 = vadd.f32 %v2825_v8, %v2824_v4  ;;  %v2905_v10 = vpop.f32.mrf.mxu1 }
 0x20a   : > { %v2906_v13 = vadd.f32 %v2905_v10, %v2904_v7  ;;  %v2827_v14 = vpop.f32.mrf.mxu0 }
 0x20b   : > { %4858 = vst [vmem:[#allocation6_spill] sm:$0xff] %v4536_v9  ;;  %v1725_v32 = vadd.f32 %v2826_v11, %v4492_v56  ;;  %v2907_v16 = vpop.f32.mrf.mxu1 }
 0x20c   : > { %v2828_v17 = vpop.f32.mrf.mxu0 }
 0x20d   : > { %v4539_v20 = vadd.f32 %v2906_v13, %v1725_v32  ;;  %v2829_v21 = vadd.f32 %v2828_v17, %v2827_v14  ;;  %v2908_v22 = vpop.f32.mrf.mxu1 }
 0x20e   : > { %v2909_v24 = vadd.f32 %v2908_v22, %v2907_v16  ;;  %v2942_v25 = vpop.f32.mrf.mxu0 }
 0x20f   : > { %4859 = vst [vmem:[#allocation7_spill] sm:$0xff] %v4539_v20  ;;  %v1730_v45 = vadd.f32 %v2829_v21, %v4494_v0  ;;  %v4542_v27 = vpop.f32.mrf.mxu1 }
 0x210   : > { %v2943_v19 = vpop.f32.mrf.mxu0 }
 0x211   : > { %v4544_v28 = vadd.f32 %v2909_v24, %v1730_v45  ;;  %v4546_v29 = vpop.f32.mrf.mxu1 }
 0x212   : > { %v2945_v34 = vpop.f32.mrf.mxu0 }
 0x213   : > { %4860 = vst [vmem:[#allocation8_spill] sm:$0xff] %v4544_v28  ;;  %v4548_v33 = vpop.f32.mrf.mxu1 }
 0x214   : > { %v2946_v56 = vpop.f32.mrf.mxu0 }
 0x215   : > { %v4550_v35 = vpop.f32.mrf.mxu1 }
 0x216   : > { %v4552_v37 = vpop.f32.mrf.mxu0 }
 0x217   : > { %v4554_v30 = vpop.f32.mrf.mxu1 }
 0x218   : > { %v4556_v38 = vpop.f32.mrf.mxu0 }
 0x219   : > { %v4558_v0 = vpop.f32.mrf.mxu1 }
 0x21a   : > { %v4560_v39 = vpop.f32.mrf.mxu0 }
 0x21b   : > { %v4562_v46 = vpop.f32.mrf.mxu1 }
 0x21c   : > { %v4564_v42 = vpop.f32.mrf.mxu0 }
 0x21d   : > { %v4566_v43 = vpop.f32.mrf.mxu1 }
 0x21e   : > { %v4568_v47 = vpop.f32.mrf.mxu0 }
 0x21f   : > { %v4570_v41 = vpop.f32.mrf.mxu1 }
 0x220   : > { %v4572_v48 = vpop.f32.mrf.mxu0 }
 0x221   : > { %v4574_v49 = vpop.f32.mrf.mxu1 }
 0x222   : > { %v4576_v58 = vpop.f32.mrf.mxu0 }
 0x223   : > { %v4578_v51 = vpop.f32.mrf.mxu1 }
 0x224   : > { %v4580_v53 = vpop.f32.mrf.mxu0 }
 0x225   : > { %v4582_v55 = vpop.f32.mrf.mxu1 }
 0x226   : > { %v4584_v52 = vpop.f32.mrf.mxu0 }
 0x227   : > { %v4586_v57 = vpop.f32.mrf.mxu1 }
 0x228   : > { %v4588_v59 = vpop.f32.mrf.mxu0 }
 0x229   : > { %v4590_v6 = vpop.f32.mrf.mxu1 }
 0x22a   : > { %v4592_v61 = vpop.f32.mrf.mxu0 }
 0x22b   : > { %v4594_v62 = vpop.f32.mrf.mxu1 }
 0x22c   : > { %v4596_v2 = vpop.f32.mrf.mxu0 }
 0x22d   : > { %v4598_v63 = vpop.f32.mrf.mxu1 }
 0x22e   : > { %v4600_v3 = vpop.f32.mrf.mxu0 }
 0x22f   : > { %v4602_v4 = vpop.f32.mrf.mxu1 }
 0x230   : > { %v4604_v18 = vpop.f32.mrf.mxu0 }
 0x231   : > { %v4606_v7 = vpop.f32.mrf.mxu1 }
 0x232   : > { %v4608_v8 = vpop.f32.mrf.mxu0 }
 0x233   : > { %v4610_v11 = vpop.f32.mrf.mxu1 }
 0x234   : > { %v4612_v10 = vpop.f32.mrf.mxu0 }
 0x235   : > { %v4614_v13 = vpop.f32.mrf.mxu1 }
 0x236   : > { %v4616_v14 = vpop.f32.mrf.mxu0 }
 0x237   : > { %v4618_v32 = vpop.f32.mrf.mxu1 }
 0x238   : > { %4861 = vst [vmem:[#allocation9_spill] sm:$0xff] %v4618_v32  ;;  %v4620_v16 = vpop.f32.mrf.mxu0 }
 0x239   : > { %v4622_v17 = vpop.f32.mrf.mxu1 }
 0x23a   : > { %4862 = vst [vmem:[#allocation10_spill] sm:$0xff] %v4622_v17  ;;  %v4624_v21 = vpop.f32.mrf.mxu0 }
 0x23b   : > { %4863 = vst [vmem:[#allocation11_spill] sm:$0xff] %v4624_v21  ;;  %v4626_v22 = vpop.f32.mrf.mxu1 }
 0x23c   : > { %4864 = vst [vmem:[#allocation12_spill] sm:$0xff] %v4626_v22  ;;  %v4628_v24 = vpop.f32.mrf.mxu0 }
 0x23d   : > { %4865 = vst [vmem:[#allocation13_spill] sm:$0xff] %v4628_v24  ;;  %v4630_v45 = vpop.f32.mrf.mxu1 }
 0x23e   : > { %4866 = vst [vmem:[#allocation14_spill] sm:$0xff] %v4630_v45  ;;  %v4632_v28 = vpop.f32.mrf.mxu0 }
 0x23f   : > { %4867 = vst [vmem:[#allocation15_spill] sm:$0xff] %v4632_v28  ;;  %v4634_v20 = vpop.f32.mrf.mxu1  ;;  %v2944_v28 = vadd.f32 %v2943_v19, %v2942_v25 }
 0x240   : > { %4868 = vst [vmem:[#allocation16_spill] sm:$0xff] %v4634_v20  ;;  %v4636_v9 = vpop.f32.mrf.mxu0 }
 0x241   : > { %4869 = vst [vmem:[#allocation17_spill] sm:$0xff] %v4636_v9  ;;  %v4638_v1 = vpop.f32.mrf.mxu1 }
 0x242   : > { %4870 = vst [vmem:[#allocation18_spill] sm:$0xff] %v4638_v1  ;;  %v4640_v54 = vpop.f32.mrf.mxu0 }
 0x243   : > { %4871 = vst [vmem:[#allocation19_spill] sm:$0xff] %v4640_v54  ;;  %v4642_v32 = vpop.f32.mrf.mxu1  ;;  %v2947_v54 = vadd.f32 %v2946_v56, %v2945_v34  ;;  %v3027_v56 = vadd.f32 %v4550_v35, %v4548_v33 }
 0x244   : > { %4872 = vst [vmem:[#allocation20_spill] sm:$0xff] %v4642_v32  ;;  %v4644_v17 = vpop.f32.mrf.mxu0  ;;  %v1945_v32 = vadd.f32 %v2944_v28, %v4497_v12 }
 0x245   : > { %4873 = vst [vmem:[#allocation21_spill] sm:$0xff] %v4644_v17  ;;  %v4646_v21 = vpop.f32.mrf.mxu1  ;;  %v1950_v25 = vadd.f32 %v2947_v54, %v4500_v23 }
 0x246   : > { %4874 = vst [vmem:[#allocation22_spill] sm:$0xff] %v4646_v21  ;;  %v4648_v22 = vpop.f32.mrf.mxu0 }
 0x247   : > { %4875 = vst [vmem:[#allocation23_spill] sm:$0xff] %v4648_v22  ;;  %v4650_v24 = vpop.f32.mrf.mxu1 }
 0x248   : > { %4876 = vst [vmem:[#allocation24_spill] sm:$0xff] %v4650_v24  ;;  %v4652_v45 = vpop.f32.mrf.mxu0  ;;  %v3024_v24 = vadd.f32 %v4546_v29, %v4542_v27  ;;  %v770_v27 = vld [vmem:[%s4854_s3] sm:$0xff]  ;;  %v2953_v29 = vadd.f32 %v4564_v42, %v4560_v39 }
 0x249   : > { %4877 = vst [vmem:[#allocation25_spill] sm:$0xff] %v4652_v45  ;;  %v4654_v20 = vpop.f32.mrf.mxu1  ;;  %v2095_v45 = vadd.f32 %v3027_v56, %v1950_v25 }
 0x24a   : > { %4878 = vst [vmem:[#allocation26_spill] sm:$0xff] %v4654_v20  ;;  %v4656_v9 = vpop.f32.mrf.mxu0  ;;  %v2090_v20 = vadd.f32 %v3024_v24, %v1945_v32  ;;  %v2956_v24 = vadd.f32 %v4572_v48, %v4568_v47  ;;  %v1960_v42 = vadd.f32 %v2953_v29, %v4506_v40  ;;  %v772_v40 = vld [vmem:[%s4854_s3 + $0x10] sm:$0xff] }
 0x24b   : > { %4879 = vst [vmem:[#allocation27_spill] sm:$0xff] %v4656_v9  ;;  %v4658_v1 = vpop.f32.mrf.mxu1  ;;  %v2950_v9 = vadd.f32 %v4556_v38, %v4552_v37 }
 0x24c   : > { %4880 = vst [vmem:[#allocation28_spill] sm:$0xff] %v4658_v1  ;;  %v4660_v44 = vpop.f32.mrf.mxu0 }
 0x24d   : > { %4881 = vst [vmem:[#allocation29_spill] sm:$0xff] %v4660_v44  ;;  %v4663_v17 = vpop.f32.mrf.mxu1  ;;  %v1955_v54 = vadd.f32 %v2950_v9, %v4503_v31  ;;  %v771_v31 = vld [vmem:[%s4854_s3 + $0x8] sm:$0xff] }
 0x24e   : > { %4882 = vst [vmem:[#allocation30_spill] sm:$0xff] %v4663_v17  ;;  %v3102_v21 = vpop.f32.mrf.mxu0 }
 0x24f   : > { %v3182_v22 = vpop.f32.mrf.mxu1 }
 0x250   : > { %v3103_v19 = vpop.f32.mrf.mxu0 }
 0x251   : > { %v3104_v1 = vadd.f32 %v3103_v19, %v3102_v21  ;;  %v3183_v34 = vpop.f32.mrf.mxu1 }
 0x252   : > { %v3105_v12 = vpop.f32.mrf.mxu0  ;;  %v3184_v17 = vadd.f32 %v3183_v34, %v3182_v22  ;;  %v1965_v34 = vadd.f32 %v2956_v24, %v4509_v50 }
 0x253   : > { %v2235_v28 = vadd.f32 %v3104_v1, %v2090_v20  ;;  %v3185_v44 = vpop.f32.mrf.mxu1  ;;  %v3030_v1 = vadd.f32 %v4558_v0, %v4554_v30 }
 0x254   : > { %v3106_v23 = vpop.f32.mrf.mxu0 }
 0x255   : > { %v2380_v37 = vadd.f32 %v3184_v17, %v2235_v28  ;;  %v3107_v38 = vadd.f32 %v3106_v23, %v3105_v12  ;;  %v3186_v32 = vpop.f32.mrf.mxu1  ;;  %v2100_v39 = vadd.f32 %v3030_v1, %v1955_v54  ;;  %v2959_v28 = vadd.f32 %v4580_v53, %v4576_v58  ;;  %v773_v58 = vld [vmem:[%s4854_s3 + $0x18] sm:$0xff] }
 0x256   : > { %v3108_v21 = vpop.f32.mrf.mxu0  ;;  %v3187_v35 = vadd.f32 %v3186_v32, %v3185_v44  ;;  %v3036_v23 = vadd.f32 %v4574_v49, %v4570_v41  ;;  %v2962_v1 = vadd.f32 %v4588_v59, %v4584_v52  ;;  %v774_v52 = vld [vmem:[%s4854_s3 + $0x20] sm:$0xff] }
 0x257   : > { %v2458_v20 = vadd.f32 %v2380_v37, %v770_v27  ;;  %v2240_v33 = vadd.f32 %v3107_v38, %v2095_v45  ;;  %v3188_v22 = vpop.f32.mrf.mxu1  ;;  %v3033_v45 = vadd.f32 %v4566_v43, %v4562_v46 }
 0x258   : > { %v3109_v9 = vpop.f32.mrf.mxu0  ;;  %v2110_v32 = vadd.f32 %v3036_v23, %v1965_v34  ;;  %v2971_v23 = vadd.f32 %v4612_v10, %v4608_v8  ;;  %v777_v8 = vld [vmem:[%s4854_s3 + $0x38] sm:$0xff] }
 0x259   : > { %2474 = vst [vmem:[%s4854_s3] sm:$0xff] %v2458_v20  ;;  %v2385_v30 = vadd.f32 %v3187_v35, %v2240_v33  ;;  %v3110_v0 = vadd.f32 %v3109_v9, %v3108_v21  ;;  %v3189_v17 = vpop.f32.mrf.mxu1  ;;  %v2105_v12 = vadd.f32 %v3033_v45, %v1960_v42  ;;  %v1970_v21 = vadd.f32 %v2959_v28, %v4512_v60 }
 0x25a   : > { %v3111_v44 = vpop.f32.mrf.mxu0  ;;  %v3190_v25 = vadd.f32 %v3189_v17, %v3188_v22  ;;  %v3039_v35 = vadd.f32 %v4582_v55, %v4578_v51  ;;  %v2965_v60 = vadd.f32 %v4596_v2, %v4592_v61  ;;  %v1975_v42 = vadd.f32 %v2962_v1, %v4515_v5  ;;  %v775_v5 = vld [vmem:[%s4854_s3 + $0x28] sm:$0xff] }
 0x25b   : > { %v2459_v47 = vadd.f32 %v2385_v30, %v771_v31  ;;  %v2245_v48 = vadd.f32 %v3110_v0, %v2100_v39  ;;  %v3191_v19 = vpop.f32.mrf.mxu1  ;;  %v3042_v17 = vadd.f32 %v4590_v6, %v4586_v57 }
 0x25c   : > { %v3112_v56 = vpop.f32.mrf.mxu0  ;;  %v2115_v39 = vadd.f32 %v3039_v35, %v1970_v21  ;;  %v1990_v21 = vadd.f32 %v2971_v23, %v4524_v36  ;;  %v4883_v35 = vld [vmem:[#allocation3_spill] sm:$0xff] }
 0x25d   : > { %2475 = vst [vmem:[%s4854_s3 + $0x8] sm:$0xff] %v2459_v47  ;;  %v2390_v46 = vadd.f32 %v3190_v25, %v2245_v48  ;;  %v3113_v43 = vadd.f32 %v3112_v56, %v3111_v44  ;;  %v3192_v27 = vpop.f32.mrf.mxu1  ;;  %v1980_v47 = vadd.f32 %v2965_v60, %v4518_v15  ;;  %v2120_v25 = vadd.f32 %v3042_v17, %v1975_v42  ;;  %v778_v36 = vld [vmem:[%s4854_s3 + $0x40] sm:$0xff]  ;;  %v4885_v60 = vld [vmem:[#allocation13_spill] sm:$0xff]  ;;  %v4887_v42 = vld [vmem:[#allocation10_spill] sm:$0xff] }
 0x25e   : > { %v3114_v50 = vpop.f32.mrf.mxu0  ;;  %v3193_v37 = vadd.f32 %v3192_v27, %v3191_v19  ;;  %v2968_v19 = vadd.f32 %v4604_v18, %v4600_v3  ;;  %v776_v3 = vld [vmem:[%s4854_s3 + $0x30] sm:$0xff] }
 0x25f   : > { %v2460_v54 = vadd.f32 %v2390_v46, %v772_v40  ;;  %v2250_v29 = vadd.f32 %v3113_v43, %v2105_v12  ;;  %v3194_v38 = vpop.f32.mrf.mxu1  ;;  %v3045_v40 = vadd.f32 %v4598_v63, %v4594_v62 }
 0x260   : > { %v3115_v53 = vpop.f32.mrf.mxu0  ;;  %v1985_v27 = vadd.f32 %v2968_v19, %v4521_v26  ;;  %v2974_v26 = vadd.f32 %v4620_v16, %v4616_v14 }
 0x261   : > { %2476 = vst [vmem:[%s4854_s3 + $0x10] sm:$0xff] %v2460_v54  ;;  %v2395_v41 = vadd.f32 %v3193_v37, %v2250_v29  ;;  %v3116_v49 = vadd.f32 %v3115_v53, %v3114_v50  ;;  %v3195_v20 = vpop.f32.mrf.mxu1  ;;  %v2125_v43 = vadd.f32 %v3045_v40, %v1980_v47  ;;  %v3048_v29 = vadd.f32 %v4606_v7, %v4602_v4  ;;  %v4888_v47 = vld [vmem:[#allocation4_spill] sm:$0xff] }
 0x262   : > { %v3117_v33 = vpop.f32.mrf.mxu0  ;;  %v3196_v31 = vadd.f32 %v3195_v20, %v3194_v38 }
 0x263   : > { %v2461_v22 = vadd.f32 %v2395_v41, %v773_v58  ;;  %v2255_v24 = vadd.f32 %v3116_v49, %v2110_v32  ;;  %v3197_v9 = vpop.f32.mrf.mxu1  ;;  %v2130_v53 = vadd.f32 %v3048_v29, %v1985_v27  ;;  %v3051_v49 = vadd.f32 %v4614_v13, %v4610_v11  ;;  %v4894_v27 = vld [vmem:[#allocation21_spill] sm:$0xff] }
 0x264   : > { %v3118_v59 = vpop.f32.mrf.mxu0 }
 0x265   : > { %2477 = vst [vmem:[%s4854_s3 + $0x18] sm:$0xff] %v2461_v22  ;;  %v2400_v51 = vadd.f32 %v3196_v31, %v2255_v24  ;;  %v3119_v55 = vadd.f32 %v3118_v59, %v3117_v33  ;;  %v3198_v30 = vpop.f32.mrf.mxu1  ;;  %v1995_v22 = vadd.f32 %v2974_v26, %v4883_v35  ;;  %v2135_v31 = vadd.f32 %v3051_v49, %v1990_v21  ;;  %v4896_v26 = vld [vmem:[#allocation16_spill] sm:$0xff]  ;;  %v781_v49 = vld [vmem:[%s4854_s3 + $0x58] sm:$0xff] }
 0x266   : > { %v3120_v0 = vpop.f32.mrf.mxu0  ;;  %v3199_v44 = vadd.f32 %v3198_v30, %v3197_v9  ;;  %v4884_v9 = vld [vmem:[#allocation11_spill] sm:$0xff] }
 0x267   : > { %v2462_v61 = vadd.f32 %v2400_v51, %v774_v52  ;;  %v2260_v2 = vadd.f32 %v3119_v55, %v2115_v39  ;;  %v3200_v45 = vpop.f32.mrf.mxu1  ;;  %v2977_v52 = vadd.f32 %v4885_v60, %v4884_v9  ;;  %v4886_v39 = vld [vmem:[#allocation9_spill] sm:$0xff]  ;;  %v4902_v9 = vld [vmem:[#allocation22_spill] sm:$0xff] }
 0x268   : > { %v3121_v48 = vpop.f32.mrf.mxu0  ;;  %v3054_v51 = vadd.f32 %v4887_v42, %v4886_v39 }
 0x269   : > { %2478 = vst [vmem:[%s4854_s3 + $0x20] sm:$0xff] %v2462_v61  ;;  %v2405_v57 = vadd.f32 %v3199_v44, %v2260_v2  ;;  %v3122_v6 = vadd.f32 %v3121_v48, %v3120_v0  ;;  %v3201_v34 = vpop.f32.mrf.mxu1  ;;  %v779_v44 = vld [vmem:[%s4854_s3 + $0x48] sm:$0xff]  ;;  %v4889_v48 = vld [vmem:[#allocation15_spill] sm:$0xff] }
 0x26a   : > { %v3123_v15 = vpop.f32.mrf.mxu0  ;;  %v3202_v28 = vadd.f32 %v3201_v34, %v3200_v45  ;;  %v2140_v2 = vadd.f32 %v3054_v51, %v1995_v22  ;;  %v782_v51 = vld [vmem:[%s4854_s3 + $0x60] sm:$0xff] }
 0x26b   : > { %v2463_v56 = vadd.f32 %v2405_v57, %v775_v5  ;;  %v2265_v12 = vadd.f32 %v3122_v6, %v2120_v25  ;;  %v3203_v46 = vpop.f32.mrf.mxu1  ;;  %v2000_v5 = vadd.f32 %v2977_v52, %v4888_v47  ;;  %v4890_v25 = vld [vmem:[#allocation17_spill] sm:$0xff] }
 0x26c   : > { %v3124_v18 = vpop.f32.mrf.mxu0  ;;  %v2980_v19 = vadd.f32 %v4890_v25, %v4889_v48  ;;  %v4906_v48 = vld [vmem:[#allocation24_spill] sm:$0xff]  ;;  %v4907_v25 = vld [vmem:[#allocation26_spill] sm:$0xff] }
 0x26d   : > { %2479 = vst [vmem:[%s4854_s3 + $0x28] sm:$0xff] %v2463_v56  ;;  %v2410_v62 = vadd.f32 %v3202_v28, %v2265_v12  ;;  %v3125_v63 = vadd.f32 %v3124_v18, %v3123_v15  ;;  %v3204_v50 = vpop.f32.mrf.mxu1  ;;  %v4891_v15 = vld [vmem:[#allocation12_spill] sm:$0xff]  ;;  %v4892_v56 = vld [vmem:[#allocation14_spill] sm:$0xff]  ;;  %v4893_v18 = vld [vmem:[#allocation19_spill] sm:$0xff] }
 0x26e   : > { %v3126_v54 = vpop.f32.mrf.mxu0  ;;  %v3205_v32 = vadd.f32 %v3204_v50, %v3203_v46  ;;  %v3057_v12 = vadd.f32 %v4892_v56, %v4891_v15  ;;  %v2983_v23 = vadd.f32 %v4894_v27, %v4893_v18  ;;  %v783_v15 = vld [vmem:[%s4854_s3 + $0x68] sm:$0xff] }
 0x26f   : > { %v2464_v37 = vadd.f32 %v2410_v62, %v776_v3  ;;  %v2270_v38 = vadd.f32 %v3125_v63, %v2125_v43  ;;  %v3206_v58 = vpop.f32.mrf.mxu1  ;;  %v780_v62 = vld [vmem:[%s4854_s3 + $0x50] sm:$0xff] }
 0x270   : > { %v3127_v10 = vpop.f32.mrf.mxu0  ;;  %v2145_v50 = vadd.f32 %v3057_v12, %v2000_v5 }
 0x271   : > { %2480 = vst [vmem:[%s4854_s3 + $0x30] sm:$0xff] %v2464_v37  ;;  %v2415_v4 = vadd.f32 %v3205_v32, %v2270_v38  ;;  %v3128_v7 = vadd.f32 %v3127_v10, %v3126_v54  ;;  %v3207_v1 = vpop.f32.mrf.mxu1  ;;  %v4895_v54 = vld [vmem:[#allocation5_spill] sm:$0xff] }
 0x272   : > { %v3129_v41 = vpop.f32.mrf.mxu0  ;;  %v3208_v20 = vadd.f32 %v3207_v1, %v3206_v58  ;;  %v2005_v29 = vadd.f32 %v2980_v19, %v4895_v54  ;;  %v4898_v1 = vld [vmem:[#allocation6_spill] sm:$0xff]  ;;  %v3066_v19 = vadd.f32 %v4907_v25, %v4906_v48 }
 0x273   : > { %v2465_v14 = vadd.f32 %v2415_v4, %v777_v8  ;;  %v2275_v16 = vadd.f32 %v3128_v7, %v2130_v53  ;;  %v3209_v33 = vpop.f32.mrf.mxu1  ;;  %v4897_v8 = vld [vmem:[#allocation18_spill] sm:$0xff] }
 0x274   : > { %v3130_v24 = vpop.f32.mrf.mxu0  ;;  %v3060_v10 = vadd.f32 %v4897_v8, %v4896_v26 }
 0x275   : > { %2481 = vst [vmem:[%s4854_s3 + $0x38] sm:$0xff] %v2465_v14  ;;  %v2420_v11 = vadd.f32 %v3208_v20, %v2275_v16  ;;  %v3131_v13 = vadd.f32 %v3130_v24, %v3129_v41  ;;  %v3210_v59 = vpop.f32.mrf.mxu1  ;;  %v2010_v41 = vadd.f32 %v2983_v23, %v4898_v1  ;;  %v4899_v20 = vld [vmem:[#allocation23_spill] sm:$0xff]  ;;  %v4909_v23 = vld [vmem:[#allocation28_spill] sm:$0xff] }
 0x276   : > { %v3132_v55 = vpop.f32.mrf.mxu0  ;;  %v3211_v17 = vadd.f32 %v3210_v59, %v3209_v33  ;;  %v2150_v16 = vadd.f32 %v3060_v10, %v2005_v29  ;;  %v4900_v33 = vld [vmem:[#allocation25_spill] sm:$0xff] }
 0x277   : > { %v2466_v30 = vadd.f32 %v2420_v11, %v778_v36  ;;  %v2280_v0 = vadd.f32 %v3131_v13, %v2135_v31  ;;  %v3212_v61 = vpop.f32.mrf.mxu1  ;;  %v2986_v35 = vadd.f32 %v4900_v33, %v4899_v20  ;;  %v4901_v31 = vld [vmem:[#allocation20_spill] sm:$0xff] }
 0x278   : > { %v3133_v45 = vpop.f32.mrf.mxu0  ;;  %v3063_v60 = vadd.f32 %v4902_v9, %v4901_v31 }
 0x279   : > { %2482 = vst [vmem:[%s4854_s3 + $0x40] sm:$0xff] %v2466_v30  ;;  %v2425_v57 = vadd.f32 %v3211_v17, %v2280_v0  ;;  %v3134_v6 = vadd.f32 %v3133_v45, %v3132_v55  ;;  %v3213_v34 = vpop.f32.mrf.mxu1  ;;  %v4903_v30 = vld [vmem:[#allocation7_spill] sm:$0xff] }
 0x27a   : > { %v3135_v40 = vpop.f32.mrf.mxu0  ;;  %v3214_v43 = vadd.f32 %v3213_v34, %v3212_v61  ;;  %v2155_v42 = vadd.f32 %v3063_v60, %v2010_v41  ;;  %v2015_v0 = vadd.f32 %v2986_v35, %v4903_v30  ;;  %v4904_v17 = vld [vmem:[#allocation27_spill] sm:$0xff]  ;;  %v4905_v61 = vld [vmem:[#allocation29_spill] sm:$0xff] }
 0x27b   : > { %v2467_v28 = vadd.f32 %v2425_v57, %v779_v44  ;;  %v2285_v46 = vadd.f32 %v3134_v6, %v2140_v2  ;;  %v3215_v3 = vpop.f32.mrf.mxu1  ;;  %v2989_v2 = vadd.f32 %v4905_v61, %v4904_v17 }
 0x27c   : > { %v3136_v63 = vpop.f32.mrf.mxu0  ;;  %v2160_v12 = vadd.f32 %v3066_v19, %v2015_v0 }
 0x27d   : > { %2483 = vst [vmem:[%s4854_s3 + $0x48] sm:$0xff] %v2467_v28  ;;  %v2430_v37 = vadd.f32 %v3214_v43, %v2285_v46  ;;  %v3137_v38 = vadd.f32 %v3136_v63, %v3135_v40  ;;  %v3216_v32 = vpop.f32.mrf.mxu1  ;;  %v4908_v28 = vld [vmem:[#allocation8_spill] sm:$0xff] }
 0x27e   : > { %v3138_v58 = vpop.f32.mrf.mxu0  ;;  %v3217_v4 = vadd.f32 %v3216_v32, %v3215_v3  ;;  %v2020_v46 = vadd.f32 %v2989_v2, %v4908_v28 }
 0x27f   : > { %v2468_v53 = vadd.f32 %v2430_v37, %v780_v62  ;;  %v2290_v21 = vadd.f32 %v3137_v38, %v2145_v50  ;;  %v3218_v7 = vpop.f32.mrf.mxu1  ;;  %v4910_v62 = vld [vmem:[#allocation30_spill] sm:$0xff]  ;;  %v784_v38 = vld [vmem:[%s4854_s3 + $0x70] sm:$0xff] }
 0x280   : > { %v3139_v14 = vpop.f32.mrf.mxu0  ;;  %v3069_v63 = vadd.f32 %v4910_v62, %v4909_v23 }
 0x281   : > { %2484 = vst [vmem:[%s4854_s3 + $0x50] sm:$0xff] %v2468_v53  ;;  %v2435_v22 = vadd.f32 %v3217_v4, %v2290_v21  ;;  %v3140_v36 = vadd.f32 %v3139_v14, %v3138_v58  ;;  %v3219_v24 = vpop.f32.mrf.mxu1 }
 0x282   : > { %v3141_v52 = vpop.f32.mrf.mxu0  ;;  %v3220_v59 = vadd.f32 %v3219_v24, %v3218_v7  ;;  %v2165_v58 = vadd.f32 %v3069_v63, %v2020_v46  ;;  %v785_v7 = vld [vmem:[%s4854_s3 + $0x78] sm:$0xff] }
 0x283   : > { %v2469_v11 = vadd.f32 %v2435_v22, %v781_v49  ;;  %v2295_v13 = vadd.f32 %v3140_v36, %v2150_v16  ;;  %v3221_v39 = vpop.f32.mrf.mxu1 }
 0x284   : > { %v3142_v55 = vpop.f32.mrf.mxu0 }
 0x285   : > { %2485 = vst [vmem:[%s4854_s3 + $0x58] sm:$0xff] %v2469_v11  ;;  %v2440_v44 = vadd.f32 %v3220_v59, %v2295_v13  ;;  %v3143_v45 = vadd.f32 %v3142_v55, %v3141_v52  ;;  %v3222_v47 = vpop.f32.mrf.mxu1 }
 0x286   : > { %v3144_v5 = vpop.f32.mrf.mxu0  ;;  %v3223_v34 = vadd.f32 %v3222_v47, %v3221_v39 }
 0x287   : > { %v2470_v57 = vadd.f32 %v2440_v44, %v782_v51  ;;  %v2300_v6 = vadd.f32 %v3143_v45, %v2155_v42  ;;  %v3224_v40 = vpop.f32.mrf.mxu1 }
 0x288   : > { %v3145_v56 = vpop.f32.mrf.mxu0 }
 0x289   : > { %2486 = vst [vmem:[%s4854_s3 + $0x60] sm:$0xff] %v2470_v57  ;;  %v2445_v43 = vadd.f32 %v3223_v34, %v2300_v6  ;;  %v3146_v3 = vadd.f32 %v3145_v56, %v3144_v5  ;;  %v3225_v18 = vpop.f32.mrf.mxu1 }
 0x28a   : > { %v3147_v27 = vpop.f32.mrf.mxu0  ;;  %v3226_v29 = vadd.f32 %v3225_v18, %v3224_v40 }
 0x28b   : > { %v2471_v50 = vadd.f32 %v2445_v43, %v783_v15  ;;  %v2305_v54 = vadd.f32 %v3146_v3, %v2160_v12  ;;  %v3227_v37 = vpop.f32.mrf.mxu1 }
 0x28c   : > { %v3148_v32 = vpop.f32.mrf.mxu0 }
 0x28d   : > { %2487 = vst [vmem:[%s4854_s3 + $0x68] sm:$0xff] %v2471_v50  ;;  %v2450_v26 = vadd.f32 %v3226_v29, %v2305_v54  ;;  %v3149_v8 = vadd.f32 %v3148_v32, %v3147_v27  ;;  %v3228_v10 = vpop.f32.mrf.mxu1 }
 0x28e   : > { %v3229_v4 = vadd.f32 %v3228_v10, %v3227_v37 }
 0x28f   : > { %v2472_v53 = vadd.f32 %v2450_v26, %v784_v38  ;;  %v2310_v21 = vadd.f32 %v3149_v8, %v2165_v58 }
 0x291   : > { %2488 = vst [vmem:[%s4854_s3 + $0x70] sm:$0xff] %v2472_v53  ;;  %v2455_v1 = vadd.f32 %v3229_v4, %v2310_v21 }
 0x293   : > { %v2473_v41 = vadd.f32 %v2455_v1, %v785_v7 }
 0x295   : > { %2489 = vst [vmem:[%s4854_s3 + $0x78] sm:$0xff] %v2473_v41 }
 0x296 PF: > { %s13_s16 = sadd.s32 1, %s3308_s16   ;;  %s4911_s12 = smov %s3296_s13 }
 0x297   : > { %p10_p11 = scmp.ge.s32.totalorder %s13_s16, 4   ;;  %s4912_s13 = smov %s3365_s20 }
 0x298   : > { %s4913_s14 = smov %s3304_s15  ;;  %s4914_s15 = smov %s4916_s17 }
 0x299   :  { %12 = sbr.rel (!%p10_p11) target bundleno = 3 (0x3), region = 97 }

// kernel: teacher_forward.5
= control target key start
LH: loop header
LB: loop body
LE: loop exit
PB: predicated region body
PF: predicated region fallthrough
CT: control target
= control target key end

     0   :  { %s3322_s0 = inlined_call_operand.vmem [shape: f32[8,2048], index: 0, kind: input, shape index: {}]   ;;  %s3323_s1 = inlined_call_operand.vmem [shape: f32[2048,128], index: 1, kind: input, shape index: {}]   ;;  %s3324_s2 = inlined_call_operand.vmem [shape: f32[1,128], index: 2, kind: input, shape index: {}]   ;;  %s3325_s3 = inlined_call_operand.vmem [shape: f32[4,128,256], index: 3, kind: input, shape index: {}]   ;;  %s3326_s4 = inlined_call_operand.vmem [shape: f32[1,256], index: 4, kind: input, shape index: {}]   ;;  %s3327_s5 = inlined_call_operand.vmem [shape: f32[1,256], index: 5, kind: input, shape index: {}]   ;;  %s3328_s6 = inlined_call_operand.vmem [shape: f32[1,256], index: 6, kind: input, shape index: {}]   ;;  %s3329_s7 = inlined_call_operand.vmem [shape: f32[256,128], index: 7, kind: input, shape index: {}]   ;;  %s3330_s8 = inlined_call_operand.hbm [shape: f32[2,128], index: 8, kind: output, shape index: {}]  }
   0x1   :  { %v77_v0 = vld [vmem:[%s3323_s1 + $0xf8] sm:$0xff]  ;;  %v76_v4 = vld [vmem:[%s3323_s1 + $0xf0] sm:$0xff]  ;;  %v75_v8 = vld [vmem:[%s3323_s1 + $0xe8] sm:$0xff] }
   0x2   :  { %v109_v1 = vld [vmem:[%s3323_s1 + $0x1f8] sm:$0xff]  ;;  %1597 = vmatprep.subr.mxu0 %v77_v0  ;;  %v108_v5 = vld [vmem:[%s3323_s1 + $0x1f0] sm:$0xff]  ;;  %v107_v9 = vld [vmem:[%s3323_s1 + $0x1e8] sm:$0xff] }
   0x3   :  { %v61_v2 = vld [vmem:[%s3323_s1 + $0x78] sm:$0xff]  ;;  %1632 = vmatprep.subr.mxu1 %v109_v1  ;;  %v60_v6 = vld [vmem:[%s3323_s1 + $0x70] sm:$0xff]  ;;  %v59_v10 = vld [vmem:[%s3323_s1 + $0x68] sm:$0xff] }
   0x4   :  { %v93_v3 = vld [vmem:[%s3323_s1 + $0x178] sm:$0xff]  ;;  %1598 = vmatpush3.msra.mxu0 %v61_v2  ;;  %v92_v7 = vld [vmem:[%s3323_s1 + $0x170] sm:$0xff]  ;;  %v91_v11 = vld [vmem:[%s3323_s1 + $0x168] sm:$0xff] }
   0x5   :  { %1633 = vmatpush3.msra.mxu1 %v93_v3  ;;  %1599 = vmatprep.subr.mxu0 %v76_v4  ;;  %v74_v12 = vld [vmem:[%s3323_s1 + $0xe0] sm:$0xff]  ;;  %v73_v16 = vld [vmem:[%s3323_s1 + $0xd8] sm:$0xff]  ;;  %v72_v20 = vld [vmem:[%s3323_s1 + $0xd0] sm:$0xff] }
   0x6   :  { %1634 = vmatprep.subr.mxu1 %v108_v5  ;;  %1600 = vmatpush3.msra.mxu0 %v60_v6  ;;  %v106_v13 = vld [vmem:[%s3323_s1 + $0x1e0] sm:$0xff]  ;;  %v105_v17 = vld [vmem:[%s3323_s1 + $0x1d8] sm:$0xff]  ;;  %v104_v21 = vld [vmem:[%s3323_s1 + $0x1d0] sm:$0xff] }
   0x7   :  { %1635 = vmatpush3.msra.mxu1 %v92_v7  ;;  %1601 = vmatprep.subr.mxu0 %v75_v8  ;;  %v58_v14 = vld [vmem:[%s3323_s1 + $0x60] sm:$0xff]  ;;  %v57_v18 = vld [vmem:[%s3323_s1 + $0x58] sm:$0xff]  ;;  %v56_v22 = vld [vmem:[%s3323_s1 + $0x50] sm:$0xff] }
   0x8   :  { %1636 = vmatprep.subr.mxu1 %v107_v9  ;;  %v90_v15 = vld [vmem:[%s3323_s1 + $0x160] sm:$0xff]  ;;  %1602 = vmatpush3.msra.mxu0 %v59_v10  ;;  %v89_v19 = vld [vmem:[%s3323_s1 + $0x158] sm:$0xff]  ;;  %v88_v23 = vld [vmem:[%s3323_s1 + $0x150] sm:$0xff] }
   0x9   :  { %1637 = vmatpush3.msra.mxu1 %v91_v11  ;;  %1603 = vmatprep.subr.mxu0 %v74_v12  ;;  %v71_v24 = vld [vmem:[%s3323_s1 + $0xc8] sm:$0xff]  ;;  %v70_v28 = vld [vmem:[%s3323_s1 + $0xc0] sm:$0xff]  ;;  %v69_v32 = vld [vmem:[%s3323_s1 + $0xb8] sm:$0xff] }
   0xa   :  { %1638 = vmatprep.subr.mxu1 %v106_v13  ;;  %1604 = vmatpush3.msra.mxu0 %v58_v14  ;;  %v103_v25 = vld [vmem:[%s3323_s1 + $0x1c8] sm:$0xff]  ;;  %v102_v29 = vld [vmem:[%s3323_s1 + $0x1c0] sm:$0xff]  ;;  %v101_v33 = vld [vmem:[%s3323_s1 + $0x1b8] sm:$0xff] }
   0xb   :  { %1639 = vmatpush3.msra.mxu1 %v90_v15  ;;  %1605 = vmatprep.subr.mxu0 %v73_v16  ;;  %v55_v26 = vld [vmem:[%s3323_s1 + $0x48] sm:$0xff]  ;;  %v54_v30 = vld [vmem:[%s3323_s1 + $0x40] sm:$0xff]  ;;  %v53_v34 = vld [vmem:[%s3323_s1 + $0x38] sm:$0xff] }
   0xc   :  { %1640 = vmatprep.subr.mxu1 %v105_v17  ;;  %1606 = vmatpush3.msra.mxu0 %v57_v18  ;;  %v87_v27 = vld [vmem:[%s3323_s1 + $0x148] sm:$0xff]  ;;  %v86_v31 = vld [vmem:[%s3323_s1 + $0x140] sm:$0xff]  ;;  %v85_v35 = vld [vmem:[%s3323_s1 + $0x138] sm:$0xff] }
   0xd   :  { %1641 = vmatpush3.msra.mxu1 %v89_v19  ;;  %1607 = vmatprep.subr.mxu0 %v72_v20  ;;  %v68_v36 = vld [vmem:[%s3323_s1 + $0xb0] sm:$0xff]  ;;  %v67_v40 = vld [vmem:[%s3323_s1 + $0xa8] sm:$0xff]  ;;  %v66_v44 = vld [vmem:[%s3323_s1 + $0xa0] sm:$0xff] }
   0xe   :  { %1642 = vmatprep.subr.mxu1 %v104_v21  ;;  %1608 = vmatpush3.msra.mxu0 %v56_v22  ;;  %v100_v37 = vld [vmem:[%s3323_s1 + $0x1b0] sm:$0xff]  ;;  %v99_v41 = vld [vmem:[%s3323_s1 + $0x1a8] sm:$0xff]  ;;  %v98_v45 = vld [vmem:[%s3323_s1 + $0x1a0] sm:$0xff] }
   0xf   :  { %1643 = vmatpush3.msra.mxu1 %v88_v23  ;;  %1609 = vmatprep.subr.mxu0 %v71_v24  ;;  %v52_v38 = vld [vmem:[%s3323_s1 + $0x30] sm:$0xff]  ;;  %v51_v42 = vld [vmem:[%s3323_s1 + $0x28] sm:$0xff]  ;;  %v50_v46 = vld [vmem:[%s3323_s1 + $0x20] sm:$0xff] }
  0x10   :  { %1644 = vmatprep.subr.mxu1 %v103_v25  ;;  %1610 = vmatpush3.msra.mxu0 %v55_v26  ;;  %v84_v39 = vld [vmem:[%s3323_s1 + $0x130] sm:$0xff]  ;;  %v83_v43 = vld [vmem:[%s3323_s1 + $0x128] sm:$0xff]  ;;  %v82_v47 = vld [vmem:[%s3323_s1 + $0x120] sm:$0xff] }
  0x11   :  { %1645 = vmatpush3.msra.mxu1 %v87_v27  ;;  %1611 = vmatprep.subr.mxu0 %v70_v28  ;;  %v65_v48 = vld [vmem:[%s3323_s1 + $0x98] sm:$0xff]  ;;  %v64_v52 = vld [vmem:[%s3323_s1 + $0x90] sm:$0xff]  ;;  %v63_v56 = vld [vmem:[%s3323_s1 + $0x88] sm:$0xff] }
  0x12   :  { %1646 = vmatprep.subr.mxu1 %v102_v29  ;;  %1612 = vmatpush3.msra.mxu0 %v54_v30  ;;  %v97_v49 = vld [vmem:[%s3323_s1 + $0x198] sm:$0xff]  ;;  %v96_v53 = vld [vmem:[%s3323_s1 + $0x190] sm:$0xff]  ;;  %v95_v57 = vld [vmem:[%s3323_s1 + $0x188] sm:$0xff] }
  0x13   :  { %1647 = vmatpush3.msra.mxu1 %v86_v31  ;;  %1613 = vmatprep.subr.mxu0 %v69_v32  ;;  %v49_v50 = vld [vmem:[%s3323_s1 + $0x18] sm:$0xff]  ;;  %v48_v54 = vld [vmem:[%s3323_s1 + $0x10] sm:$0xff]  ;;  %v47_v58 = vld [vmem:[%s3323_s1 + $0x8] sm:$0xff] }
  0x14   :  { %1648 = vmatprep.subr.mxu1 %v101_v33  ;;  %1614 = vmatpush3.msra.mxu0 %v53_v34  ;;  %v81_v51 = vld [vmem:[%s3323_s1 + $0x118] sm:$0xff]  ;;  %v80_v55 = vld [vmem:[%s3323_s1 + $0x110] sm:$0xff]  ;;  %v79_v59 = vld [vmem:[%s3323_s1 + $0x108] sm:$0xff] }
  0x15   :  { %1649 = vmatpush3.msra.mxu1 %v85_v35  ;;  %1615 = vmatprep.subr.mxu0 %v68_v36  ;;  %v62_v60 = vld [vmem:[%s3323_s1 + $0x80] sm:$0xff]  ;;  %v31_v63 = vld [vmem:[%s3322_s0 + $0x8] sm:$0xff]  ;;  %v33_v2 = vld [vmem:[%s3322_s0 + $0x18] sm:$0xff] }
  0x16   :  { %1650 = vmatprep.subr.mxu1 %v100_v37  ;;  %1616 = vmatpush3.msra.mxu0 %v52_v38  ;;  %v94_v61 = vld [vmem:[%s3323_s1 + $0x180] sm:$0xff]  ;;  %v141_v3 = vld [vmem:[%s3323_s1 + $0x2f8] sm:$0xff]  ;;  %v32_v5 = vld [vmem:[%s3322_s0 + $0x10] sm:$0xff] }
  0x17   :  { %1651 = vmatpush3.msra.mxu1 %v84_v39  ;;  %1617 = vmatprep.subr.mxu0 %v67_v40  ;;  %v46_v62 = vld [vmem:[%s3323_s1] sm:$0xff]  ;;  %v173_v4 = vld [vmem:[%s3323_s1 + $0x3f8] sm:$0xff]  ;;  %v140_v8 = vld [vmem:[%s3323_s1 + $0x2f0] sm:$0xff] }
  0x18   :  { %1652 = vmatprep.subr.mxu1 %v99_v41  ;;  %1618 = vmatpush3.msra.mxu0 %v51_v42  ;;  %v78_v0 = vld [vmem:[%s3323_s1 + $0x100] sm:$0xff]  ;;  %v125_v6 = vld [vmem:[%s3323_s1 + $0x278] sm:$0xff]  ;;  %v172_v9 = vld [vmem:[%s3323_s1 + $0x3f0] sm:$0xff] }
  0x19   :  { %1653 = vmatpush3.msra.mxu1 %v83_v43  ;;  %1619 = vmatprep.subr.mxu0 %v66_v44  ;;  %v30_v1 = vld [vmem:[%s3322_s0] sm:$0xff]  ;;  %v157_v7 = vld [vmem:[%s3323_s1 + $0x378] sm:$0xff]  ;;  %v124_v10 = vld [vmem:[%s3323_s1 + $0x270] sm:$0xff] }
  0x1a   :  { %1654 = vmatprep.subr.mxu1 %v98_v45  ;;  %1620 = vmatpush3.msra.mxu0 %v50_v46  ;;  %v156_v11 = vld [vmem:[%s3323_s1 + $0x370] sm:$0xff]  ;;  %v139_v12 = vld [vmem:[%s3323_s1 + $0x2e8] sm:$0xff]  ;;  %v138_v16 = vld [vmem:[%s3323_s1 + $0x2e0] sm:$0xff] }
  0x1b   :  { %1655 = vmatpush3.msra.mxu1 %v82_v47  ;;  %1621 = vmatprep.subr.mxu0 %v65_v48  ;;  %v171_v13 = vld [vmem:[%s3323_s1 + $0x3e8] sm:$0xff]  ;;  %v170_v17 = vld [vmem:[%s3323_s1 + $0x3e0] sm:$0xff]  ;;  %v137_v20 = vld [vmem:[%s3323_s1 + $0x2d8] sm:$0xff] }
  0x1c   :  { %1656 = vmatprep.subr.mxu1 %v97_v49  ;;  %1622 = vmatpush3.msra.mxu0 %v49_v50  ;;  %v123_v14 = vld [vmem:[%s3323_s1 + $0x268] sm:$0xff]  ;;  %v122_v18 = vld [vmem:[%s3323_s1 + $0x260] sm:$0xff]  ;;  %v169_v21 = vld [vmem:[%s3323_s1 + $0x3d8] sm:$0xff] }
  0x1d   :  { %1657 = vmatpush3.msra.mxu1 %v81_v51  ;;  %1623 = vmatprep.subr.mxu0 %v64_v52  ;;  %v155_v15 = vld [vmem:[%s3323_s1 + $0x368] sm:$0xff]  ;;  %v154_v19 = vld [vmem:[%s3323_s1 + $0x360] sm:$0xff]  ;;  %v121_v22 = vld [vmem:[%s3323_s1 + $0x258] sm:$0xff] }
  0x1e   :  { %1658 = vmatprep.subr.mxu1 %v96_v53  ;;  %1624 = vmatpush3.msra.mxu0 %v48_v54  ;;  %v153_v23 = vld [vmem:[%s3323_s1 + $0x358] sm:$0xff]  ;;  %v136_v24 = vld [vmem:[%s3323_s1 + $0x2d0] sm:$0xff]  ;;  %v135_v28 = vld [vmem:[%s3323_s1 + $0x2c8] sm:$0xff] }
  0x1f   :  { %1659 = vmatpush3.msra.mxu1 %v80_v55  ;;  %1625 = vmatprep.subr.mxu0 %v63_v56  ;;  %v168_v25 = vld [vmem:[%s3323_s1 + $0x3d0] sm:$0xff]  ;;  %v167_v29 = vld [vmem:[%s3323_s1 + $0x3c8] sm:$0xff]  ;;  %v134_v32 = vld [vmem:[%s3323_s1 + $0x2c0] sm:$0xff] }
  0x20   :  { %1660 = vmatprep.subr.mxu1 %v95_v57  ;;  %1626 = vmatpush3.msra.mxu0 %v47_v58  ;;  %v120_v26 = vld [vmem:[%s3323_s1 + $0x250] sm:$0xff]  ;;  %v119_v30 = vld [vmem:[%s3323_s1 + $0x248] sm:$0xff]  ;;  %v166_v33 = vld [vmem:[%s3323_s1 + $0x3c0] sm:$0xff] }
  0x21   :  { %1661 = vmatpush3.msra.mxu1 %v79_v59  ;;  %1627 = vmatprep.subr.mxu0 %v62_v60  ;;  %v152_v27 = vld [vmem:[%s3323_s1 + $0x350] sm:$0xff]  ;;  %v151_v31 = vld [vmem:[%s3323_s1 + $0x348] sm:$0xff]  ;;  %v118_v34 = vld [vmem:[%s3323_s1 + $0x240] sm:$0xff] }
  0x22   :  { %1662 = vmatprep.subr.mxu1 %v94_v61  ;;  %1628 = vmatpush3.msra.mxu0 %v46_v62  ;;  %v150_v35 = vld [vmem:[%s3323_s1 + $0x340] sm:$0xff]  ;;  %v133_v36 = vld [vmem:[%s3323_s1 + $0x2b8] sm:$0xff]  ;;  %v132_v40 = vld [vmem:[%s3323_s1 + $0x2b0] sm:$0xff] }
  0x23   :  { %373 = vmatprep.mubr.f32.mxu0 %v31_v63  ;;  %1663 = vmatpush3.msra.mxu1 %v78_v0  ;;  %v165_v37 = vld [vmem:[%s3323_s1 + $0x3b8] sm:$0xff]  ;;  %v164_v41 = vld [vmem:[%s3323_s1 + $0x3b0] sm:$0xff]  ;;  %v131_v44 = vld [vmem:[%s3323_s1 + $0x2a8] sm:$0xff] }
  0x24   :  { %374 = vmatmul.mubr.f32.vlgmr.msra.gmra.mxu0 %v30_v1  ;;  %443 = vmatprep.mubr.f32.mxu1 %v33_v2  ;;  %v117_v38 = vld [vmem:[%s3323_s1 + $0x238] sm:$0xff]  ;;  %v116_v42 = vld [vmem:[%s3323_s1 + $0x230] sm:$0xff]  ;;  %v163_v45 = vld [vmem:[%s3323_s1 + $0x3a8] sm:$0xff] }
  0x25   :  { %1667 = vmatprep.subr.mxu0 %v141_v3  ;;  %1702 = vmatprep.subr.mxu1 %v173_v4  ;;  %v149_v39 = vld [vmem:[%s3323_s1 + $0x338] sm:$0xff]  ;;  %v148_v43 = vld [vmem:[%s3323_s1 + $0x330] sm:$0xff]  ;;  %v115_v46 = vld [vmem:[%s3323_s1 + $0x228] sm:$0xff] }
  0x26   :  { %444 = vmatmul.mubr.f32.vlgmr.msra.gmra.mxu1 %v32_v5  ;;  %1668 = vmatpush3.msra.mxu0 %v125_v6  ;;  %v147_v47 = vld [vmem:[%s3323_s1 + $0x328] sm:$0xff]  ;;  %v130_v48 = vld [vmem:[%s3323_s1 + $0x2a0] sm:$0xff]  ;;  %v129_v52 = vld [vmem:[%s3323_s1 + $0x298] sm:$0xff] }
  0x27   :  { %1703 = vmatpush3.msra.mxu1 %v157_v7  ;;  %1669 = vmatprep.subr.mxu0 %v140_v8  ;;  %v162_v49 = vld [vmem:[%s3323_s1 + $0x3a0] sm:$0xff]  ;;  %v161_v53 = vld [vmem:[%s3323_s1 + $0x398] sm:$0xff]  ;;  %v128_v56 = vld [vmem:[%s3323_s1 + $0x290] sm:$0xff] }
  0x28   :  { %1704 = vmatprep.subr.mxu1 %v172_v9  ;;  %1670 = vmatpush3.msra.mxu0 %v124_v10  ;;  %v114_v50 = vld [vmem:[%s3323_s1 + $0x220] sm:$0xff]  ;;  %v113_v54 = vld [vmem:[%s3323_s1 + $0x218] sm:$0xff]  ;;  %v160_v57 = vld [vmem:[%s3323_s1 + $0x390] sm:$0xff] }
  0x29   :  { %1705 = vmatpush3.msra.mxu1 %v156_v11  ;;  %1671 = vmatprep.subr.mxu0 %v139_v12  ;;  %v146_v51 = vld [vmem:[%s3323_s1 + $0x320] sm:$0xff]  ;;  %v145_v55 = vld [vmem:[%s3323_s1 + $0x318] sm:$0xff]  ;;  %v112_v58 = vld [vmem:[%s3323_s1 + $0x210] sm:$0xff] }
  0x2a   :  { %1706 = vmatprep.subr.mxu1 %v171_v13  ;;  %1672 = vmatpush3.msra.mxu0 %v123_v14  ;;  %v144_v59 = vld [vmem:[%s3323_s1 + $0x310] sm:$0xff]  ;;  %v127_v60 = vld [vmem:[%s3323_s1 + $0x288] sm:$0xff]  ;;  %v126_v0 = vld [vmem:[%s3323_s1 + $0x280] sm:$0xff] }
  0x2b   :  { %1707 = vmatpush3.msra.mxu1 %v155_v15  ;;  %1673 = vmatprep.subr.mxu0 %v138_v16  ;;  %v159_v61 = vld [vmem:[%s3323_s1 + $0x388] sm:$0xff]  ;;  %v158_v1 = vld [vmem:[%s3323_s1 + $0x380] sm:$0xff]  ;;  %v37_v6 = vld [vmem:[%s3322_s0 + $0x38] sm:$0xff] }
  0x2c   :  { %1708 = vmatprep.subr.mxu1 %v170_v17  ;;  %1674 = vmatpush3.msra.mxu0 %v122_v18  ;;  %v111_v62 = vld [vmem:[%s3323_s1 + $0x208] sm:$0xff]  ;;  %v110_v2 = vld [vmem:[%s3323_s1 + $0x200] sm:$0xff]  ;;  %v205_v7 = vld [vmem:[%s3323_s1 + $0x4f8] sm:$0xff] }
  0x2d   :  { %1709 = vmatpush3.msra.mxu1 %v154_v19  ;;  %1675 = vmatprep.subr.mxu0 %v137_v20  ;;  %v143_v63 = vld [vmem:[%s3323_s1 + $0x308] sm:$0xff]  ;;  %v142_v4 = vld [vmem:[%s3323_s1 + $0x300] sm:$0xff]  ;;  %v237_v8 = vld [vmem:[%s3323_s1 + $0x5f8] sm:$0xff] }
  0x2e   :  { %1710 = vmatprep.subr.mxu1 %v169_v21  ;;  %1676 = vmatpush3.msra.mxu0 %v121_v22  ;;  %v35_v3 = vld [vmem:[%s3322_s0 + $0x28] sm:$0xff]  ;;  %v34_v5 = vld [vmem:[%s3322_s0 + $0x20] sm:$0xff]  ;;  %v36_v9 = vld [vmem:[%s3322_s0 + $0x30] sm:$0xff] }
  0x2f   :  { %1711 = vmatpush3.msra.mxu1 %v153_v23  ;;  %1677 = vmatprep.subr.mxu0 %v136_v24  ;;  %v189_v10 = vld [vmem:[%s3323_s1 + $0x478] sm:$0xff]  ;;  %v204_v12 = vld [vmem:[%s3323_s1 + $0x4f0] sm:$0xff]  ;;  %v203_v16 = vld [vmem:[%s3323_s1 + $0x4e8] sm:$0xff] }
  0x30   :  { %1712 = vmatprep.subr.mxu1 %v168_v25  ;;  %1678 = vmatpush3.msra.mxu0 %v120_v26  ;;  %v221_v11 = vld [vmem:[%s3323_s1 + $0x578] sm:$0xff]  ;;  %v236_v13 = vld [vmem:[%s3323_s1 + $0x5f0] sm:$0xff]  ;;  %v235_v17 = vld [vmem:[%s3323_s1 + $0x5e8] sm:$0xff] }
  0x31   :  { %1713 = vmatpush3.msra.mxu1 %v152_v27  ;;  %1679 = vmatprep.subr.mxu0 %v135_v28  ;;  %v188_v14 = vld [vmem:[%s3323_s1 + $0x470] sm:$0xff]  ;;  %v187_v18 = vld [vmem:[%s3323_s1 + $0x468] sm:$0xff]  ;;  %v202_v20 = vld [vmem:[%s3323_s1 + $0x4e0] sm:$0xff] }
  0x32   :  { %1714 = vmatprep.subr.mxu1 %v167_v29  ;;  %1680 = vmatpush3.msra.mxu0 %v119_v30  ;;  %v220_v15 = vld [vmem:[%s3323_s1 + $0x570] sm:$0xff]  ;;  %v219_v19 = vld [vmem:[%s3323_s1 + $0x568] sm:$0xff]  ;;  %v234_v21 = vld [vmem:[%s3323_s1 + $0x5e0] sm:$0xff] }
  0x33   :  { %1715 = vmatpush3.msra.mxu1 %v151_v31  ;;  %1681 = vmatprep.subr.mxu0 %v134_v32  ;;  %v186_v22 = vld [vmem:[%s3323_s1 + $0x460] sm:$0xff]  ;;  %v201_v24 = vld [vmem:[%s3323_s1 + $0x4d8] sm:$0xff]  ;;  %v200_v28 = vld [vmem:[%s3323_s1 + $0x4d0] sm:$0xff] }
  0x34   :  { %1716 = vmatprep.subr.mxu1 %v166_v33  ;;  %1682 = vmatpush3.msra.mxu0 %v118_v34  ;;  %v218_v23 = vld [vmem:[%s3323_s1 + $0x560] sm:$0xff]  ;;  %v233_v25 = vld [vmem:[%s3323_s1 + $0x5d8] sm:$0xff]  ;;  %v232_v29 = vld [vmem:[%s3323_s1 + $0x5d0] sm:$0xff] }
  0x35   :  { %1717 = vmatpush3.msra.mxu1 %v150_v35  ;;  %1683 = vmatprep.subr.mxu0 %v133_v36  ;;  %v185_v26 = vld [vmem:[%s3323_s1 + $0x458] sm:$0xff]  ;;  %v184_v30 = vld [vmem:[%s3323_s1 + $0x450] sm:$0xff]  ;;  %v199_v32 = vld [vmem:[%s3323_s1 + $0x4c8] sm:$0xff] }
  0x36   :  { %1718 = vmatprep.subr.mxu1 %v165_v37  ;;  %1684 = vmatpush3.msra.mxu0 %v117_v38  ;;  %v217_v27 = vld [vmem:[%s3323_s1 + $0x558] sm:$0xff]  ;;  %v216_v31 = vld [vmem:[%s3323_s1 + $0x550] sm:$0xff]  ;;  %v231_v33 = vld [vmem:[%s3323_s1 + $0x5c8] sm:$0xff] }
  0x37   :  { %1719 = vmatpush3.msra.mxu1 %v149_v39  ;;  %1685 = vmatprep.subr.mxu0 %v132_v40  ;;  %v183_v34 = vld [vmem:[%s3323_s1 + $0x448] sm:$0xff]  ;;  %v198_v36 = vld [vmem:[%s3323_s1 + $0x4c0] sm:$0xff]  ;;  %v197_v40 = vld [vmem:[%s3323_s1 + $0x4b8] sm:$0xff] }
  0x38   :  { %1720 = vmatprep.subr.mxu1 %v164_v41  ;;  %1686 = vmatpush3.msra.mxu0 %v116_v42  ;;  %v215_v35 = vld [vmem:[%s3323_s1 + $0x548] sm:$0xff]  ;;  %v230_v37 = vld [vmem:[%s3323_s1 + $0x5c0] sm:$0xff]  ;;  %v229_v41 = vld [vmem:[%s3323_s1 + $0x5b8] sm:$0xff] }
  0x39   :  { %1721 = vmatpush3.msra.mxu1 %v148_v43  ;;  %1687 = vmatprep.subr.mxu0 %v131_v44  ;;  %v182_v38 = vld [vmem:[%s3323_s1 + $0x440] sm:$0xff]  ;;  %v181_v42 = vld [vmem:[%s3323_s1 + $0x438] sm:$0xff]  ;;  %v196_v44 = vld [vmem:[%s3323_s1 + $0x4b0] sm:$0xff] }
  0x3a   :  { %1722 = vmatprep.subr.mxu1 %v163_v45  ;;  %1688 = vmatpush3.msra.mxu0 %v115_v46  ;;  %v214_v39 = vld [vmem:[%s3323_s1 + $0x540] sm:$0xff]  ;;  %v213_v43 = vld [vmem:[%s3323_s1 + $0x538] sm:$0xff]  ;;  %v228_v45 = vld [vmem:[%s3323_s1 + $0x5b0] sm:$0xff] }
  0x3b   :  { %1723 = vmatpush3.msra.mxu1 %v147_v47  ;;  %1689 = vmatprep.subr.mxu0 %v130_v48  ;;  %v180_v46 = vld [vmem:[%s3323_s1 + $0x430] sm:$0xff]  ;;  %v195_v48 = vld [vmem:[%s3323_s1 + $0x4a8] sm:$0xff] }
  0x3c   :  { %1724 = vmatprep.subr.mxu1 %v162_v49  ;;  %1690 = vmatpush3.msra.mxu0 %v114_v50  ;;  %v212_v47 = vld [vmem:[%s3323_s1 + $0x530] sm:$0xff]  ;;  %v227_v49 = vld [vmem:[%s3323_s1 + $0x5a8] sm:$0xff] }
  0x3d   :  { %1725 = vmatpush3.msra.mxu1 %v146_v51  ;;  %1691 = vmatprep.subr.mxu0 %v129_v52  ;;  %v179_v50 = vld [vmem:[%s3323_s1 + $0x428] sm:$0xff]  ;;  %v194_v52 = vld [vmem:[%s3323_s1 + $0x4a0] sm:$0xff] }
  0x3e   :  { %1726 = vmatprep.subr.mxu1 %v161_v53  ;;  %1692 = vmatpush3.msra.mxu0 %v113_v54  ;;  %v211_v51 = vld [vmem:[%s3323_s1 + $0x528] sm:$0xff]  ;;  %v226_v53 = vld [vmem:[%s3323_s1 + $0x5a0] sm:$0xff] }
  0x3f   :  { %1727 = vmatpush3.msra.mxu1 %v145_v55  ;;  %1693 = vmatprep.subr.mxu0 %v128_v56  ;;  %v178_v54 = vld [vmem:[%s3323_s1 + $0x420] sm:$0xff]  ;;  %v193_v56 = vld [vmem:[%s3323_s1 + $0x498] sm:$0xff] }
  0x40   :  { %1728 = vmatprep.subr.mxu1 %v160_v57  ;;  %1694 = vmatpush3.msra.mxu0 %v112_v58  ;;  %v210_v55 = vld [vmem:[%s3323_s1 + $0x520] sm:$0xff]  ;;  %v225_v57 = vld [vmem:[%s3323_s1 + $0x598] sm:$0xff] }
  0x41   :  { %1729 = vmatpush3.msra.mxu1 %v144_v59  ;;  %1695 = vmatprep.subr.mxu0 %v127_v60 }
  0x42   :  { %1730 = vmatprep.subr.mxu1 %v159_v61  ;;  %1696 = vmatpush3.msra.mxu0 %v111_v62 }
  0x43   :  { %1731 = vmatpush3.msra.mxu1 %v143_v63  ;;  %1697 = vmatprep.subr.mxu0 %v126_v0 }
  0x44   :  { %1732 = vmatprep.subr.mxu1 %v158_v1  ;;  %1698 = vmatpush3.msra.mxu0 %v110_v2 }
  0x45   :  { %513 = vmatprep.mubr.f32.mxu0 %v35_v3  ;;  %1733 = vmatpush3.msra.mxu1 %v142_v4 }
  0x46   :  { %514 = vmatmul.mubr.f32.vlgmr.msra.gmra.mxu0 %v34_v5  ;;  %583 = vmatprep.mubr.f32.mxu1 %v37_v6 }
  0x47   :  { %1737 = vmatprep.subr.mxu0 %v205_v7  ;;  %1772 = vmatprep.subr.mxu1 %v237_v8 }
  0x48   :  { %584 = vmatmul.mubr.f32.vlgmr.msra.gmra.mxu1 %v36_v9  ;;  %1738 = vmatpush3.msra.mxu0 %v189_v10 }
  0x49   :  { %1773 = vmatpush3.msra.mxu1 %v221_v11  ;;  %1739 = vmatprep.subr.mxu0 %v204_v12 }
  0x4a   :  { %1774 = vmatprep.subr.mxu1 %v236_v13  ;;  %1740 = vmatpush3.msra.mxu0 %v188_v14 }
  0x4b   :  { %1775 = vmatpush3.msra.mxu1 %v220_v15  ;;  %1741 = vmatprep.subr.mxu0 %v203_v16 }
  0x4c   :  { %1776 = vmatprep.subr.mxu1 %v235_v17  ;;  %1742 = vmatpush3.msra.mxu0 %v187_v18 }
  0x4d   :  { %1777 = vmatpush3.msra.mxu1 %v219_v19  ;;  %1743 = vmatprep.subr.mxu0 %v202_v20 }
  0x4e   :  { %1778 = vmatprep.subr.mxu1 %v234_v21  ;;  %1744 = vmatpush3.msra.mxu0 %v186_v22 }
  0x4f   :  { %1779 = vmatpush3.msra.mxu1 %v218_v23  ;;  %1745 = vmatprep.subr.mxu0 %v201_v24 }
  0x50   :  { %1780 = vmatprep.subr.mxu1 %v233_v25  ;;  %1746 = vmatpush3.msra.mxu0 %v185_v26 }
  0x51   :  { %1781 = vmatpush3.msra.mxu1 %v217_v27  ;;  %1747 = vmatprep.subr.mxu0 %v200_v28 }
  0x52   :  { %1782 = vmatprep.subr.mxu1 %v232_v29  ;;  %1748 = vmatpush3.msra.mxu0 %v184_v30 }
  0x53   :  { %1783 = vmatpush3.msra.mxu1 %v216_v31  ;;  %1749 = vmatprep.subr.mxu0 %v199_v32 }
  0x54   :  { %1784 = vmatprep.subr.mxu1 %v231_v33  ;;  %1750 = vmatpush3.msra.mxu0 %v183_v34 }
  0x55   :  { %1785 = vmatpush3.msra.mxu1 %v215_v35  ;;  %1751 = vmatprep.subr.mxu0 %v198_v36 }
  0x56   :  { %1786 = vmatprep.subr.mxu1 %v230_v37  ;;  %1752 = vmatpush3.msra.mxu0 %v182_v38 }
  0x57   :  { %1787 = vmatpush3.msra.mxu1 %v214_v39  ;;  %1753 = vmatprep.subr.mxu0 %v197_v40 }
  0x58   :  { %1788 = vmatprep.subr.mxu1 %v229_v41  ;;  %1754 = vmatpush3.msra.mxu0 %v181_v42 }
  0x59   :  { %1789 = vmatpush3.msra.mxu1 %v213_v43  ;;  %1755 = vmatprep.subr.mxu0 %v196_v44 }
  0x5a   :  { %1790 = vmatprep.subr.mxu1 %v228_v45  ;;  %1756 = vmatpush3.msra.mxu0 %v180_v46 }
  0x5b   :  { %1791 = vmatpush3.msra.mxu1 %v212_v47  ;;  %1757 = vmatprep.subr.mxu0 %v195_v48 }
  0x5c   :  { %1792 = vmatprep.subr.mxu1 %v227_v49  ;;  %1758 = vmatpush3.msra.mxu0 %v179_v50 }
  0x5d   :  { %1793 = vmatpush3.msra.mxu1 %v211_v51 }
  0x5e   :  { %13 = vsyncpa [#allocation3], 0  ;;  %1759 = vmatprep.subr.mxu0 %v194_v52  ;;  %1794 = vmatprep.subr.mxu1 %v226_v53  ;;  %v177_v58 = vld [vmem:[%s3323_s1 + $0x418] sm:$0xff]  ;;  %v192_v60 = vld [vmem:[%s3323_s1 + $0x490] sm:$0xff]  ;;  %vm1309_vm0 = vcmask 1041408  }
  0x5f   :  { %v209_v59 = vld [vmem:[%s3323_s1 + $0x518] sm:$0xff]  ;;  %1760 = vmatpush3.msra.mxu0 %v178_v54  ;;  %1795 = vmatpush3.msra.mxu1 %v210_v55  ;;  %v224_v61 = vld [vmem:[%s3323_s1 + $0x590] sm:$0xff]  ;;  %v191_v0 = vld [vmem:[%s3323_s1 + $0x488] sm:$0xff] }
  0x60   :  { %1761 = vmatprep.subr.mxu0 %v193_v56  ;;  %1796 = vmatprep.subr.mxu1 %v225_v57  ;;  %v176_v62 = vld [vmem:[%s3323_s1 + $0x410] sm:$0xff]  ;;  %v223_v1 = vld [vmem:[%s3323_s1 + $0x588] sm:$0xff]  ;;  %v190_v4 = vld [vmem:[%s3323_s1 + $0x480] sm:$0xff] }
  0x61   :  { %v208_v63 = vld [vmem:[%s3323_s1 + $0x510] sm:$0xff]  ;;  %1762 = vmatpush3.msra.mxu0 %v177_v58  ;;  %1797 = vmatpush3.msra.mxu1 %v209_v59  ;;  %v175_v2 = vld [vmem:[%s3323_s1 + $0x408] sm:$0xff]  ;;  %v222_v5 = vld [vmem:[%s3323_s1 + $0x580] sm:$0xff] }
  0x62   :  { %1763 = vmatprep.subr.mxu0 %v192_v60  ;;  %1798 = vmatprep.subr.mxu1 %v224_v61  ;;  %v207_v3 = vld [vmem:[%s3323_s1 + $0x508] sm:$0xff]  ;;  %v174_v6 = vld [vmem:[%s3323_s1 + $0x400] sm:$0xff]  ;;  %v41_v10 = vld [vmem:[%s3322_s0 + $0x58] sm:$0xff] }
  0x63   :  { %1764 = vmatpush3.msra.mxu0 %v176_v62  ;;  %1799 = vmatpush3.msra.mxu1 %v208_v63  ;;  %v39_v7 = vld [vmem:[%s3322_s0 + $0x48] sm:$0xff]  ;;  %v206_v8 = vld [vmem:[%s3323_s1 + $0x500] sm:$0xff]  ;;  %v269_v11 = vld [vmem:[%s3323_s1 + $0x6f8] sm:$0xff] }
  0x64   :  { %1765 = vmatprep.subr.mxu0 %v191_v0  ;;  %1800 = vmatprep.subr.mxu1 %v223_v1  ;;  %v38_v9 = vld [vmem:[%s3322_s0 + $0x40] sm:$0xff]  ;;  %v301_v12 = vld [vmem:[%s3323_s1 + $0x7f8] sm:$0xff]  ;;  %v40_v13 = vld [vmem:[%s3322_s0 + $0x50] sm:$0xff] }
  0x65   :  { %1766 = vmatpush3.msra.mxu0 %v175_v2  ;;  %1801 = vmatpush3.msra.mxu1 %v207_v3  ;;  %v253_v14 = vld [vmem:[%s3323_s1 + $0x678] sm:$0xff]  ;;  %v268_v16 = vld [vmem:[%s3323_s1 + $0x6f0] sm:$0xff]  ;;  %v267_v20 = vld [vmem:[%s3323_s1 + $0x6e8] sm:$0xff] }
  0x66   :  { %1767 = vmatprep.subr.mxu0 %v190_v4  ;;  %1802 = vmatprep.subr.mxu1 %v222_v5  ;;  %v285_v15 = vld [vmem:[%s3323_s1 + $0x778] sm:$0xff]  ;;  %v300_v17 = vld [vmem:[%s3323_s1 + $0x7f0] sm:$0xff]  ;;  %v299_v21 = vld [vmem:[%s3323_s1 + $0x7e8] sm:$0xff] }
  0x67   :  { %1768 = vmatpush3.msra.mxu0 %v174_v6  ;;  %653 = vmatprep.mubr.f32.mxu0 %v39_v7  ;;  %v252_v18 = vld [vmem:[%s3323_s1 + $0x670] sm:$0xff]  ;;  %v251_v22 = vld [vmem:[%s3323_s1 + $0x668] sm:$0xff]  ;;  %v266_v24 = vld [vmem:[%s3323_s1 + $0x6e0] sm:$0xff] }
  0x68   :  { %1803 = vmatpush3.msra.mxu1 %v206_v8  ;;  %654 = vmatmul.mubr.f32.vlgmr.msra.gmra.mxu0 %v38_v9  ;;  %v284_v19 = vld [vmem:[%s3323_s1 + $0x770] sm:$0xff]  ;;  %v283_v23 = vld [vmem:[%s3323_s1 + $0x768] sm:$0xff]  ;;  %v298_v25 = vld [vmem:[%s3323_s1 + $0x7e0] sm:$0xff] }
  0x69   :  { %723 = vmatprep.mubr.f32.mxu1 %v41_v10  ;;  %1807 = vmatprep.subr.mxu0 %v269_v11  ;;  %v250_v26 = vld [vmem:[%s3323_s1 + $0x660] sm:$0xff]  ;;  %v265_v28 = vld [vmem:[%s3323_s1 + $0x6d8] sm:$0xff]  ;;  %v264_v32 = vld [vmem:[%s3323_s1 + $0x6d0] sm:$0xff] }
  0x6a   :  { %1842 = vmatprep.subr.mxu1 %v301_v12  ;;  %724 = vmatmul.mubr.f32.vlgmr.msra.gmra.mxu1 %v40_v13  ;;  %v282_v27 = vld [vmem:[%s3323_s1 + $0x760] sm:$0xff]  ;;  %v297_v29 = vld [vmem:[%s3323_s1 + $0x7d8] sm:$0xff]  ;;  %v296_v33 = vld [vmem:[%s3323_s1 + $0x7d0] sm:$0xff] }
  0x6b   :  { %1808 = vmatpush3.msra.mxu0 %v253_v14  ;;  %1843 = vmatpush3.msra.mxu1 %v285_v15  ;;  %v249_v30 = vld [vmem:[%s3323_s1 + $0x658] sm:$0xff]  ;;  %v248_v34 = vld [vmem:[%s3323_s1 + $0x650] sm:$0xff]  ;;  %v263_v36 = vld [vmem:[%s3323_s1 + $0x6c8] sm:$0xff] }
  0x6c   :  { %1809 = vmatprep.subr.mxu0 %v268_v16  ;;  %1844 = vmatprep.subr.mxu1 %v300_v17  ;;  %v281_v31 = vld [vmem:[%s3323_s1 + $0x758] sm:$0xff]  ;;  %v280_v35 = vld [vmem:[%s3323_s1 + $0x750] sm:$0xff]  ;;  %v295_v37 = vld [vmem:[%s3323_s1 + $0x7c8] sm:$0xff] }
  0x6d   :  { %1810 = vmatpush3.msra.mxu0 %v252_v18  ;;  %1845 = vmatpush3.msra.mxu1 %v284_v19  ;;  %v247_v38 = vld [vmem:[%s3323_s1 + $0x648] sm:$0xff]  ;;  %v262_v40 = vld [vmem:[%s3323_s1 + $0x6c0] sm:$0xff]  ;;  %v261_v44 = vld [vmem:[%s3323_s1 + $0x6b8] sm:$0xff] }
  0x6e   :  { %1811 = vmatprep.subr.mxu0 %v267_v20  ;;  %1846 = vmatprep.subr.mxu1 %v299_v21  ;;  %v279_v39 = vld [vmem:[%s3323_s1 + $0x748] sm:$0xff]  ;;  %v294_v41 = vld [vmem:[%s3323_s1 + $0x7c0] sm:$0xff]  ;;  %v293_v45 = vld [vmem:[%s3323_s1 + $0x7b8] sm:$0xff] }
  0x6f   :  { %1812 = vmatpush3.msra.mxu0 %v251_v22  ;;  %1847 = vmatpush3.msra.mxu1 %v283_v23  ;;  %v246_v42 = vld [vmem:[%s3323_s1 + $0x640] sm:$0xff]  ;;  %v245_v46 = vld [vmem:[%s3323_s1 + $0x638] sm:$0xff]  ;;  %v260_v48 = vld [vmem:[%s3323_s1 + $0x6b0] sm:$0xff] }
  0x70   :  { %1813 = vmatprep.subr.mxu0 %v266_v24  ;;  %1848 = vmatprep.subr.mxu1 %v298_v25  ;;  %v278_v43 = vld [vmem:[%s3323_s1 + $0x740] sm:$0xff]  ;;  %v277_v47 = vld [vmem:[%s3323_s1 + $0x738] sm:$0xff]  ;;  %v292_v49 = vld [vmem:[%s3323_s1 + $0x7b0] sm:$0xff] }
  0x71   :  { %1814 = vmatpush3.msra.mxu0 %v250_v26  ;;  %1849 = vmatpush3.msra.mxu1 %v282_v27  ;;  %v244_v50 = vld [vmem:[%s3323_s1 + $0x630] sm:$0xff]  ;;  %v259_v52 = vld [vmem:[%s3323_s1 + $0x6a8] sm:$0xff]  ;;  %v258_v56 = vld [vmem:[%s3323_s1 + $0x6a0] sm:$0xff] }
  0x72   :  { %1815 = vmatprep.subr.mxu0 %v265_v28  ;;  %1850 = vmatprep.subr.mxu1 %v297_v29  ;;  %v276_v51 = vld [vmem:[%s3323_s1 + $0x730] sm:$0xff]  ;;  %v291_v53 = vld [vmem:[%s3323_s1 + $0x7a8] sm:$0xff]  ;;  %v290_v57 = vld [vmem:[%s3323_s1 + $0x7a0] sm:$0xff] }
  0x73   :  { %1816 = vmatpush3.msra.mxu0 %v249_v30  ;;  %1851 = vmatpush3.msra.mxu1 %v281_v31  ;;  %v243_v54 = vld [vmem:[%s3323_s1 + $0x628] sm:$0xff]  ;;  %v242_v58 = vld [vmem:[%s3323_s1 + $0x620] sm:$0xff]  ;;  %v257_v60 = vld [vmem:[%s3323_s1 + $0x698] sm:$0xff] }
  0x74   :  { %1817 = vmatprep.subr.mxu0 %v264_v32  ;;  %1852 = vmatprep.subr.mxu1 %v296_v33  ;;  %v275_v55 = vld [vmem:[%s3323_s1 + $0x728] sm:$0xff]  ;;  %v274_v59 = vld [vmem:[%s3323_s1 + $0x720] sm:$0xff]  ;;  %v289_v61 = vld [vmem:[%s3323_s1 + $0x798] sm:$0xff] }
  0x75   :  { %1818 = vmatpush3.msra.mxu0 %v248_v34  ;;  %1853 = vmatpush3.msra.mxu1 %v280_v35  ;;  %v241_v62 = vld [vmem:[%s3323_s1 + $0x618] sm:$0xff]  ;;  %v256_v0 = vld [vmem:[%s3323_s1 + $0x690] sm:$0xff]  ;;  %v255_v4 = vld [vmem:[%s3323_s1 + $0x688] sm:$0xff] }
  0x76   :  { %1819 = vmatprep.subr.mxu0 %v263_v36  ;;  %1854 = vmatprep.subr.mxu1 %v295_v37  ;;  %v273_v63 = vld [vmem:[%s3323_s1 + $0x718] sm:$0xff]  ;;  %v288_v1 = vld [vmem:[%s3323_s1 + $0x790] sm:$0xff]  ;;  %v287_v5 = vld [vmem:[%s3323_s1 + $0x788] sm:$0xff] }
  0x77   :  { %1820 = vmatpush3.msra.mxu0 %v247_v38  ;;  %1855 = vmatpush3.msra.mxu1 %v279_v39  ;;  %v240_v2 = vld [vmem:[%s3323_s1 + $0x610] sm:$0xff]  ;;  %v239_v6 = vld [vmem:[%s3323_s1 + $0x608] sm:$0xff]  ;;  %v254_v8 = vld [vmem:[%s3323_s1 + $0x680] sm:$0xff] }
  0x78   :  { %1821 = vmatprep.subr.mxu0 %v262_v40  ;;  %1856 = vmatprep.subr.mxu1 %v294_v41  ;;  %v272_v3 = vld [vmem:[%s3323_s1 + $0x710] sm:$0xff]  ;;  %v271_v7 = vld [vmem:[%s3323_s1 + $0x708] sm:$0xff]  ;;  %v286_v9 = vld [vmem:[%s3323_s1 + $0x780] sm:$0xff] }
  0x79   :  { %1822 = vmatpush3.msra.mxu0 %v246_v42  ;;  %1857 = vmatpush3.msra.mxu1 %v278_v43  ;;  %v238_v10 = vld [vmem:[%s3323_s1 + $0x600] sm:$0xff]  ;;  %v43_v11 = vld [vmem:[%s3322_s0 + $0x68] sm:$0xff]  ;;  %v45_v13 = vld [vmem:[%s3322_s0 + $0x78] sm:$0xff] }
  0x7a   :  { %1823 = vmatprep.subr.mxu0 %v261_v44  ;;  %1858 = vmatprep.subr.mxu1 %v293_v45  ;;  %v270_v12 = vld [vmem:[%s3323_s1 + $0x700] sm:$0xff]  ;;  %v44_v15 = vld [vmem:[%s3322_s0 + $0x70] sm:$0xff]  ;;  %v900_v16 = vld [vmem:[%s3325_s3 + $0xf8] sm:$0xff] }
  0x7b   :  { %1824 = vmatpush3.msra.mxu0 %v245_v46  ;;  %1859 = vmatpush3.msra.mxu1 %v277_v47  ;;  %v42_v14 = vld [vmem:[%s3322_s0 + $0x60] sm:$0xff]  ;;  %v899_v17 = vld [vmem:[%s3325_s3 + $0xf0] sm:$0xff]  ;;  %v1532_v18 = vld [vmem:[%s3325_s3 + $0x1f8] sm:$0xff] }
  0x7c   :  { %1825 = vmatprep.subr.mxu0 %v260_v48  ;;  %1860 = vmatprep.subr.mxu1 %v292_v49  ;;  %v898_v19 = vld [vmem:[%s3325_s3 + $0xe8] sm:$0xff]  ;;  %v1531_v20 = vld [vmem:[%s3325_s3 + $0x1f0] sm:$0xff]  ;;  %v897_v21 = vld [vmem:[%s3325_s3 + $0xe0] sm:$0xff] }
  0x7d   :  { %1826 = vmatpush3.msra.mxu0 %v244_v50  ;;  %1861 = vmatpush3.msra.mxu1 %v276_v51  ;;  %v1530_v22 = vld [vmem:[%s3325_s3 + $0x1e8] sm:$0xff]  ;;  %v896_v23 = vld [vmem:[%s3325_s3 + $0xd8] sm:$0xff]  ;;  %v1529_v24 = vld [vmem:[%s3325_s3 + $0x1e0] sm:$0xff] }
  0x7e   :  { %1827 = vmatprep.subr.mxu0 %v259_v52  ;;  %1862 = vmatprep.subr.mxu1 %v291_v53  ;;  %v895_v25 = vld [vmem:[%s3325_s3 + $0xd0] sm:$0xff]  ;;  %v1528_v26 = vld [vmem:[%s3325_s3 + $0x1d8] sm:$0xff]  ;;  %v894_v27 = vld [vmem:[%s3325_s3 + $0xc8] sm:$0xff] }
  0x7f   :  { %1828 = vmatpush3.msra.mxu0 %v243_v54  ;;  %1863 = vmatpush3.msra.mxu1 %v275_v55  ;;  %v1527_v28 = vld [vmem:[%s3325_s3 + $0x1d0] sm:$0xff]  ;;  %v1526_v29 = vld [vmem:[%s3325_s3 + $0x1c8] sm:$0xff]  ;;  %v893_v30 = vld [vmem:[%s3325_s3 + $0xc0] sm:$0xff] }
  0x80   :  { %1829 = vmatprep.subr.mxu0 %v258_v56  ;;  %1864 = vmatprep.subr.mxu1 %v290_v57  ;;  %v1525_v31 = vld [vmem:[%s3325_s3 + $0x1c0] sm:$0xff]  ;;  %v892_v32 = vld [vmem:[%s3325_s3 + $0xb8] sm:$0xff]  ;;  %v891_v34 = vld [vmem:[%s3325_s3 + $0xb0] sm:$0xff] }
  0x81   :  { %1830 = vmatpush3.msra.mxu0 %v242_v58  ;;  %1865 = vmatpush3.msra.mxu1 %v274_v59  ;;  %v1524_v33 = vld [vmem:[%s3325_s3 + $0x1b8] sm:$0xff]  ;;  %v1523_v35 = vld [vmem:[%s3325_s3 + $0x1b0] sm:$0xff]  ;;  %v890_v36 = vld [vmem:[%s3325_s3 + $0xa8] sm:$0xff] }
  0x82   :  { %1831 = vmatprep.subr.mxu0 %v257_v60  ;;  %1866 = vmatprep.subr.mxu1 %v289_v61  ;;  %v1522_v37 = vld [vmem:[%s3325_s3 + $0x1a8] sm:$0xff]  ;;  %v889_v38 = vld [vmem:[%s3325_s3 + $0xa0] sm:$0xff]  ;;  %v888_v40 = vld [vmem:[%s3325_s3 + $0x98] sm:$0xff] }
  0x83   :  { %1832 = vmatpush3.msra.mxu0 %v241_v62  ;;  %1867 = vmatpush3.msra.mxu1 %v273_v63  ;;  %v1521_v39 = vld [vmem:[%s3325_s3 + $0x1a0] sm:$0xff]  ;;  %v1520_v41 = vld [vmem:[%s3325_s3 + $0x198] sm:$0xff]  ;;  %v887_v42 = vld [vmem:[%s3325_s3 + $0x90] sm:$0xff] }
  0x84   :  { %1833 = vmatprep.subr.mxu0 %v256_v0  ;;  %1868 = vmatprep.subr.mxu1 %v288_v1  ;;  %v1519_v43 = vld [vmem:[%s3325_s3 + $0x190] sm:$0xff]  ;;  %v886_v44 = vld [vmem:[%s3325_s3 + $0x88] sm:$0xff]  ;;  %v885_v46 = vld [vmem:[%s3325_s3 + $0x80] sm:$0xff] }
  0x85   :  { %1834 = vmatpush3.msra.mxu0 %v240_v2  ;;  %1869 = vmatpush3.msra.mxu1 %v272_v3  ;;  %v1518_v45 = vld [vmem:[%s3325_s3 + $0x188] sm:$0xff]  ;;  %v1517_v47 = vld [vmem:[%s3325_s3 + $0x180] sm:$0xff]  ;;  %v884_v48 = vld [vmem:[%s3325_s3 + $0x78] sm:$0xff] }
  0x86   :  { %1835 = vmatprep.subr.mxu0 %v255_v4  ;;  %1870 = vmatprep.subr.mxu1 %v287_v5  ;;  %v1516_v49 = vld [vmem:[%s3325_s3 + $0x178] sm:$0xff]  ;;  %v883_v50 = vld [vmem:[%s3325_s3 + $0x70] sm:$0xff]  ;;  %v882_v52 = vld [vmem:[%s3325_s3 + $0x68] sm:$0xff] }
  0x87   :  { %1836 = vmatpush3.msra.mxu0 %v239_v6  ;;  %1871 = vmatpush3.msra.mxu1 %v271_v7  ;;  %v1515_v51 = vld [vmem:[%s3325_s3 + $0x170] sm:$0xff]  ;;  %v1514_v53 = vld [vmem:[%s3325_s3 + $0x168] sm:$0xff]  ;;  %v881_v54 = vld [vmem:[%s3325_s3 + $0x60] sm:$0xff] }
  0x88   :  { %1837 = vmatprep.subr.mxu0 %v254_v8  ;;  %1872 = vmatprep.subr.mxu1 %v286_v9  ;;  %v1513_v55 = vld [vmem:[%s3325_s3 + $0x160] sm:$0xff]  ;;  %v880_v56 = vld [vmem:[%s3325_s3 + $0x58] sm:$0xff]  ;;  %v879_v58 = vld [vmem:[%s3325_s3 + $0x50] sm:$0xff] }
  0x89   :  { %1838 = vmatpush3.msra.mxu0 %v238_v10  ;;  %793 = vmatprep.mubr.f32.mxu0 %v43_v11  ;;  %v1512_v57 = vld [vmem:[%s3325_s3 + $0x158] sm:$0xff]  ;;  %v1511_v59 = vld [vmem:[%s3325_s3 + $0x150] sm:$0xff]  ;;  %v878_v60 = vld [vmem:[%s3325_s3 + $0x48] sm:$0xff] }
  0x8a   :  { %1873 = vmatpush3.msra.mxu1 %v270_v12  ;;  %863 = vmatprep.mubr.f32.mxu1 %v45_v13  ;;  %v877_v61 = vld [vmem:[%s3325_s3 + $0x40] sm:$0xff]  ;;  %v1510_v62 = vld [vmem:[%s3325_s3 + $0x148] sm:$0xff]  ;;  %v876_v63 = vld [vmem:[%s3325_s3 + $0x38] sm:$0xff] }
  0x8b   :  { %794 = vmatmul.mubr.f32.vlgmr.msra.gmra.mxu0 %v42_v14  ;;  %864 = vmatmul.mubr.f32.vlgmr.msra.gmra.mxu1 %v44_v15  ;;  %v1509_v0 = vld [vmem:[%s3325_s3 + $0x140] sm:$0xff]  ;;  %v875_v1 = vld [vmem:[%s3325_s3 + $0x30] sm:$0xff]  ;;  %v1508_v2 = vld [vmem:[%s3325_s3 + $0x138] sm:$0xff] }
  0x8c   :  { %1008 = vmatprep.subr.mxu1 %v900_v16  ;;  %937 = vmatprep.subr.mxu0 %v1532_v18  ;;  %v874_v3 = vld [vmem:[%s3325_s3 + $0x28] sm:$0xff]  ;;  %v1507_v4 = vld [vmem:[%s3325_s3 + $0x130] sm:$0xff]  ;;  %v873_v5 = vld [vmem:[%s3325_s3 + $0x20] sm:$0xff] }
  0x8d   :  { %1009 = vmatpush1.msra.mxu1 %v899_v17  ;;  %938 = vmatpush1.msra.mxu0 %v1531_v20  ;;  %v1506_v6 = vld [vmem:[%s3325_s3 + $0x128] sm:$0xff]  ;;  %v872_v7 = vld [vmem:[%s3325_s3 + $0x18] sm:$0xff]  ;;  %v1505_v8 = vld [vmem:[%s3325_s3 + $0x120] sm:$0xff]  ;;  %v1940_v17 = vmov 0.0  }
  0x8e   :  { %1010 = vmatprep.subr.mxu1 %v898_v19  ;;  %939 = vmatprep.subr.mxu0 %v1530_v22  ;;  %v871_v9 = vld [vmem:[%s3325_s3 + $0x10] sm:$0xff]  ;;  %v1504_v10 = vld [vmem:[%s3325_s3 + $0x118] sm:$0xff]  ;;  %v870_v11 = vld [vmem:[%s3325_s3 + $0x8] sm:$0xff] }
  0x8f   :  { %1011 = vmatpush1.msra.mxu1 %v897_v21  ;;  %940 = vmatpush1.msra.mxu0 %v1529_v24  ;;  %v1503_v12 = vld [vmem:[%s3325_s3 + $0x110] sm:$0xff]  ;;  %v869_v13 = vld [vmem:[%s3325_s3] sm:$0xff]  ;;  %v1502_v14 = vld [vmem:[%s3325_s3 + $0x108] sm:$0xff] }
  0x90   :  { %1012 = vmatprep.subr.mxu1 %v896_v23  ;;  %941 = vmatprep.subr.mxu0 %v1528_v26  ;;  %v1596_v15 = vld [vmem:[%s3325_s3 + $0x3f8] sm:$0xff]  ;;  %v1501_v16 = vld [vmem:[%s3325_s3 + $0x100] sm:$0xff] }
  0x91   :  { %1013 = vmatpush1.msra.mxu1 %v895_v25  ;;  %942 = vmatpush1.msra.mxu0 %v1527_v28  ;;  %v1564_v18 = vld [vmem:[%s3325_s3 + $0x2f8] sm:$0xff]  ;;  %v1500_v24 = vld [vmem:[%s3324_s2] ss:$0 sm:$0xff] }
  0x92   :  { %1014 = vmatprep.subr.mxu1 %v894_v27  ;;  %943 = vmatprep.subr.mxu0 %v1526_v29 }
  0x93   :  { %1015 = vmatpush1.msra.mxu1 %v893_v30  ;;  %944 = vmatpush1.msra.mxu0 %v1525_v31 }
  0x94   :  { %1016 = vmatprep.subr.mxu1 %v892_v32  ;;  %945 = vmatprep.subr.mxu0 %v1524_v33 }
  0x95   :  { %1017 = vmatpush1.msra.mxu1 %v891_v34  ;;  %946 = vmatpush1.msra.mxu0 %v1523_v35 }
  0x96   :  { %1018 = vmatprep.subr.mxu1 %v890_v36  ;;  %947 = vmatprep.subr.mxu0 %v1522_v37 }
  0x97   :  { %1019 = vmatpush1.msra.mxu1 %v889_v38  ;;  %948 = vmatpush1.msra.mxu0 %v1521_v39 }
  0x98   :  { %1020 = vmatprep.subr.mxu1 %v888_v40  ;;  %949 = vmatprep.subr.mxu0 %v1520_v41 }
  0x99   :  { %1021 = vmatpush1.msra.mxu1 %v887_v42  ;;  %950 = vmatpush1.msra.mxu0 %v1519_v43 }
  0x9a   :  { %1022 = vmatprep.subr.mxu1 %v886_v44  ;;  %951 = vmatprep.subr.mxu0 %v1518_v45 }
  0x9b   :  { %1023 = vmatpush1.msra.mxu1 %v885_v46  ;;  %952 = vmatpush1.msra.mxu0 %v1517_v47 }
  0x9c   :  { %1024 = vmatprep.subr.mxu1 %v884_v48  ;;  %953 = vmatprep.subr.mxu0 %v1516_v49 }
  0x9d   :  { %1025 = vmatpush1.msra.mxu1 %v883_v50  ;;  %954 = vmatpush1.msra.mxu0 %v1515_v51 }
  0x9e   :  { %1026 = vmatprep.subr.mxu1 %v882_v52  ;;  %955 = vmatprep.subr.mxu0 %v1514_v53  ;;  %v1595_v52 = vld [vmem:[%s3325_s3 + $0x3f0] sm:$0xff]  ;;  %v1594_v53 = vld [vmem:[%s3325_s3 + $0x3e8] sm:$0xff] }
  0x9f   :  { %1027 = vmatpush1.msra.mxu1 %v881_v54  ;;  %956 = vmatpush1.msra.mxu0 %v1513_v55  ;;  %v1563_v55 = vld [vmem:[%s3325_s3 + $0x2f0] sm:$0xff] }
  0xa0   :  { %1028 = vmatprep.subr.mxu1 %v880_v56  ;;  %957 = vmatprep.subr.mxu0 %v1512_v57  ;;  %v1593_v56 = vld [vmem:[%s3325_s3 + $0x3e0] sm:$0xff]  ;;  %v1562_v57 = vld [vmem:[%s3325_s3 + $0x2e8] sm:$0xff] }
  0xa1   :  { %1029 = vmatpush1.msra.mxu1 %v879_v58  ;;  %958 = vmatpush1.msra.mxu0 %v1511_v59  ;;  %v1592_v58 = vld [vmem:[%s3325_s3 + $0x3d8] sm:$0xff]  ;;  %v1561_v59 = vld [vmem:[%s3325_s3 + $0x2e0] sm:$0xff] }
  0xa2   :  { %1030 = vmatprep.subr.mxu1 %v878_v60  ;;  %959 = vmatprep.subr.mxu0 %v1510_v62  ;;  %v1591_v60 = vld [vmem:[%s3325_s3 + $0x3d0] sm:$0xff]  ;;  %v1590_v62 = vld [vmem:[%s3325_s3 + $0x3c8] sm:$0xff] }
  0xa3   :  { %1031 = vmatpush1.msra.mxu1 %v877_v61  ;;  %960 = vmatpush1.msra.mxu0 %v1509_v0  ;;  %v1560_v61 = vld [vmem:[%s3325_s3 + $0x2d8] sm:$0xff]  ;;  %v1589_v0 = vld [vmem:[%s3325_s3 + $0x3c0] sm:$0xff] }
  0xa4   :  { %1032 = vmatprep.subr.mxu1 %v876_v63  ;;  %961 = vmatprep.subr.mxu0 %v1508_v2  ;;  %v1559_v63 = vld [vmem:[%s3325_s3 + $0x2d0] sm:$0xff]  ;;  %v1588_v2 = vld [vmem:[%s3325_s3 + $0x3b8] sm:$0xff] }
  0xa5   :  { %1033 = vmatpush1.msra.mxu1 %v875_v1  ;;  %962 = vmatpush1.msra.mxu0 %v1507_v4  ;;  %v1558_v1 = vld [vmem:[%s3325_s3 + $0x2c8] sm:$0xff]  ;;  %v1587_v4 = vld [vmem:[%s3325_s3 + $0x3b0] sm:$0xff] }
  0xa6   :  { %1034 = vmatprep.subr.mxu1 %v874_v3  ;;  %963 = vmatprep.subr.mxu0 %v1506_v6  ;;  %v1557_v3 = vld [vmem:[%s3325_s3 + $0x2c0] sm:$0xff]  ;;  %v1586_v6 = vld [vmem:[%s3325_s3 + $0x3a8] sm:$0xff] }
  0xa7   :  { %1035 = vmatpush1.msra.mxu1 %v873_v5  ;;  %964 = vmatpush1.msra.mxu0 %v1505_v8  ;;  %v1556_v5 = vld [vmem:[%s3325_s3 + $0x2b8] sm:$0xff]  ;;  %v1585_v8 = vld [vmem:[%s3325_s3 + $0x3a0] sm:$0xff] }
  0xa8   :  { %1036 = vmatprep.subr.mxu1 %v872_v7  ;;  %965 = vmatprep.subr.mxu0 %v1504_v10  ;;  %v1555_v7 = vld [vmem:[%s3325_s3 + $0x2b0] sm:$0xff]  ;;  %v1584_v10 = vld [vmem:[%s3325_s3 + $0x398] sm:$0xff] }
  0xa9   :  { %1037 = vmatpush1.msra.mxu1 %v871_v9  ;;  %966 = vmatpush1.msra.mxu0 %v1503_v12  ;;  %v1554_v9 = vld [vmem:[%s3325_s3 + $0x2a8] sm:$0xff]  ;;  %v1583_v12 = vld [vmem:[%s3325_s3 + $0x390] sm:$0xff] }
  0xaa   :  { %1038 = vmatprep.subr.mxu1 %v870_v11  ;;  %967 = vmatprep.subr.mxu0 %v1502_v14  ;;  %v1553_v11 = vld [vmem:[%s3325_s3 + $0x2a0] sm:$0xff]  ;;  %v1582_v14 = vld [vmem:[%s3325_s3 + $0x388] sm:$0xff] }
  0xab   :  { %1039 = vmatpush1.msra.mxu1 %v869_v13  ;;  %1072 = vmatprep.mubr.f32.mxu1 %v1940_v17  ;;  %v1552_v13 = vld [vmem:[%s3325_s3 + $0x298] sm:$0xff] }
  0xac   :  { %1222 = vmatprep.subr.mxu1 %v1596_v15  ;;  %968 = vmatpush1.msra.mxu0 %v1501_v16  ;;  %v1551_v15 = vld [vmem:[%s3325_s3 + $0x290] sm:$0xff]  ;;  %v1581_v16 = vld [vmem:[%s3325_s3 + $0x380] sm:$0xff] }
  0xad   :  { %1001 = vmatprep.mubr.f32.mxu0 %v1940_v17  ;;  %1114 = vmatprep.subr.mxu0 %v1564_v18  ;;  %v1550_v18 = vld [vmem:[%s3325_s3 + $0x288] sm:$0xff] }
  0xe4   :  { %v1629_v19 = vpop.f32.mrf.mxu0 }
  0xe6   :  { %v1664_v20 = vpop.f32.mrf.mxu1  ;;  %v1630_v21 = vpop.f32.mrf.mxu0 }
  0xe7   :  { %v1631_v23 = vadd.f32 %v1630_v21, %v1629_v19  ;;  %v1580_v19 = vld [vmem:[%s3325_s3 + $0x378] sm:$0xff]  ;;  %v1579_v21 = vld [vmem:[%s3325_s3 + $0x370] sm:$0xff] }
  0xe8   :  { %v1665_v25 = vpop.f32.mrf.mxu1 }
  0xe9   :  { %v376_v28 = vadd.f32 %v1631_v23, %v1500_v24  ;;  %v1666_v29 = vadd.f32 %v1665_v25, %v1664_v20  ;;  %v1549_v20 = vld [vmem:[%s3325_s3 + $0x280] sm:$0xff]  ;;  %v1578_v23 = vld [vmem:[%s3325_s3 + $0x368] sm:$0xff]  ;;  %v1547_v24 = vld [vmem:[%s3325_s3 + $0x270] sm:$0xff] }
  0xea   :  { %v1577_v25 = vld [vmem:[%s3325_s3 + $0x360] sm:$0xff] }
  0xeb   :  { %v446_v33 = vadd.f32 %v1666_v29, %v376_v28  ;;  %v1545_v28 = vld [vmem:[%s3325_s3 + $0x260] sm:$0xff]  ;;  %v1575_v29 = vld [vmem:[%s3325_s3 + $0x350] sm:$0xff] }
 0x106   :  { %v1699_v22 = vpop.f32.mrf.mxu0 }
 0x108   :  { %v1734_v26 = vpop.f32.mrf.mxu1  ;;  %v1700_v27 = vpop.f32.mrf.mxu0 }
 0x109   :  { %v1701_v31 = vadd.f32 %v1700_v27, %v1699_v22  ;;  %v1548_v22 = vld [vmem:[%s3325_s3 + $0x278] sm:$0xff] }
 0x10a   :  { %v1735_v32 = vpop.f32.mrf.mxu1  ;;  %v1576_v27 = vld [vmem:[%s3325_s3 + $0x358] sm:$0xff] }
 0x10b   :  { %v516_v36 = vadd.f32 %v1701_v31, %v446_v33  ;;  %v1736_v37 = vadd.f32 %v1735_v32, %v1734_v26  ;;  %v1546_v26 = vld [vmem:[%s3325_s3 + $0x268] sm:$0xff]  ;;  %v1543_v32 = vld [vmem:[%s3325_s3 + $0x250] sm:$0xff]  ;;  %v1573_v33 = vld [vmem:[%s3325_s3 + $0x340] sm:$0xff] }
 0x10c   :  { %v1574_v31 = vld [vmem:[%s3325_s3 + $0x348] sm:$0xff] }
 0x10d   :  { %v586_v40 = vadd.f32 %v1736_v37, %v516_v36  ;;  %v1541_v36 = vld [vmem:[%s3325_s3 + $0x240] sm:$0xff]  ;;  %v1571_v37 = vld [vmem:[%s3325_s3 + $0x330] sm:$0xff] }
 0x128   :  { %v1769_v30 = vpop.f32.mrf.mxu0 }
 0x12a   :  { %v1804_v34 = vpop.f32.mrf.mxu1  ;;  %v1770_v35 = vpop.f32.mrf.mxu0 }
 0x12b   :  { %v1771_v38 = vadd.f32 %v1770_v35, %v1769_v30  ;;  %v1544_v30 = vld [vmem:[%s3325_s3 + $0x258] sm:$0xff] }
 0x12c   :  { %v1805_v39 = vpop.f32.mrf.mxu1  ;;  %v1572_v35 = vld [vmem:[%s3325_s3 + $0x338] sm:$0xff] }
 0x12d   :  { %v656_v41 = vadd.f32 %v1771_v38, %v586_v40  ;;  %v1806_v42 = vadd.f32 %v1805_v39, %v1804_v34  ;;  %v1542_v34 = vld [vmem:[%s3325_s3 + $0x248] sm:$0xff]  ;;  %v1540_v38 = vld [vmem:[%s3325_s3 + $0x238] sm:$0xff]  ;;  %v1539_v40 = vld [vmem:[%s3325_s3 + $0x230] sm:$0xff] }
 0x12e   :  { %v1570_v39 = vld [vmem:[%s3325_s3 + $0x328] sm:$0xff] }
 0x12f   :  { %v726_v47 = vadd.f32 %v1806_v42, %v656_v41  ;;  %v1569_v41 = vld [vmem:[%s3325_s3 + $0x320] sm:$0xff]  ;;  %v1538_v42 = vld [vmem:[%s3325_s3 + $0x228] sm:$0xff] }
 0x14b   :  { %v1839_v43 = vpop.f32.mrf.mxu0  ;;  %v1874_v44 = vpop.f32.mrf.mxu1 }
 0x14d   :  { %v1840_v45 = vpop.f32.mrf.mxu0  ;;  %v1875_v46 = vpop.f32.mrf.mxu1 }
 0x14e   :  { %v1841_v48 = vadd.f32 %v1840_v45, %v1839_v43  ;;  %v1876_v50 = vadd.f32 %v1875_v46, %v1874_v44  ;;  %v1568_v43 = vld [vmem:[%s3325_s3 + $0x318] sm:$0xff]  ;;  %v1537_v44 = vld [vmem:[%s3325_s3 + $0x220] sm:$0xff]  ;;  %v1567_v45 = vld [vmem:[%s3325_s3 + $0x310] sm:$0xff] }
 0x14f   :  { %v1536_v46 = vld [vmem:[%s3325_s3 + $0x218] sm:$0xff] }
 0x150   :  { %v796_v49 = vadd.f32 %v1841_v48, %v726_v47  ;;  %v1566_v47 = vld [vmem:[%s3325_s3 + $0x308] sm:$0xff]  ;;  %v1535_v48 = vld [vmem:[%s3325_s3 + $0x210] sm:$0xff] }
 0x152   :  { %v3006_v51 = vadd.f32 %v1876_v50, %v796_v49  ;;  %v1565_v49 = vld [vmem:[%s3325_s3 + $0x300] sm:$0xff]  ;;  %v1534_v50 = vld [vmem:[%s3325_s3 + $0x208] sm:$0xff] }
 0x154   :  { %1073 = vmatmul.mubr.f32.vlgmr.msra.gmra.mxu1 %v3006_v51  ;;  %v935_v54 = vrot.slane %v3006_v51, 2 }
 0x155   :  { %1223 = vmatpush1.msra.mxu1 %v1595_v52  ;;  %1286 = vmatprep.mubr.f32.mxu1 %v1940_v17  ;;  %v1220_v52 = vrot.slane %v3006_v51, 6 }
 0x156   :  { %1224 = vmatprep.subr.mxu1 %v1594_v53  ;;  %1002 = vmatmul.mubr.f32.vlgmr.msra.gmra.mxu0 %v935_v54  ;;  %v1533_v53 = vld [vmem:[%s3325_s3 + $0x200] sm:$0xff]  ;;  %v1112_v54 = vrot.slane %v3006_v51, 4  ;;  %v1412_v51 = vld [vmem:[%s3329_s7 + $0xe8] sm:$0xff] }
 0x157   :  { %1115 = vmatpush1.msra.mxu0 %v1563_v55  ;;  %1225 = vmatpush1.msra.mxu1 %v1593_v56  ;;  %v1414_v55 = vld [vmem:[%s3329_s7 + $0xf8] sm:$0xff] }
 0x158   :  { %1116 = vmatprep.subr.mxu0 %v1562_v57  ;;  %1226 = vmatprep.subr.mxu1 %v1592_v58  ;;  %v1398_v56 = vld [vmem:[%s3329_s7 + $0x78] sm:$0xff]  ;;  %v1413_v57 = vld [vmem:[%s3329_s7 + $0xf0] sm:$0xff]  ;;  %v1396_v58 = vld [vmem:[%s3329_s7 + $0x68] sm:$0xff] }
 0x159   :  { %1117 = vmatpush1.msra.mxu0 %v1561_v59  ;;  %1227 = vmatpush1.msra.mxu1 %v1591_v60  ;;  %v1411_v59 = vld [vmem:[%s3329_s7 + $0xe0] sm:$0xff] }
 0x15a   :  { %1118 = vmatprep.subr.mxu0 %v1560_v61  ;;  %1228 = vmatprep.subr.mxu1 %v1590_v62  ;;  %v1395_v60 = vld [vmem:[%s3329_s7 + $0x60] sm:$0xff]  ;;  %v1410_v61 = vld [vmem:[%s3329_s7 + $0xd8] sm:$0xff] }
 0x15b   :  { %1119 = vmatpush1.msra.mxu0 %v1559_v63  ;;  %1229 = vmatpush1.msra.mxu1 %v1589_v0  ;;  %v1394_v62 = vld [vmem:[%s3329_s7 + $0x58] sm:$0xff]  ;;  %v1409_v63 = vld [vmem:[%s3329_s7 + $0xd0] sm:$0xff] }
 0x15c   :  { %1120 = vmatprep.subr.mxu0 %v1558_v1  ;;  %1230 = vmatprep.subr.mxu1 %v1588_v2  ;;  %v1393_v0 = vld [vmem:[%s3329_s7 + $0x50] sm:$0xff]  ;;  %v1408_v1 = vld [vmem:[%s3329_s7 + $0xc8] sm:$0xff] }
 0x15d   :  { %1121 = vmatpush1.msra.mxu0 %v1557_v3  ;;  %1231 = vmatpush1.msra.mxu1 %v1587_v4  ;;  %v1392_v2 = vld [vmem:[%s3329_s7 + $0x48] sm:$0xff]  ;;  %v1407_v3 = vld [vmem:[%s3329_s7 + $0xc0] sm:$0xff] }
 0x15e   :  { %1122 = vmatprep.subr.mxu0 %v1556_v5  ;;  %1232 = vmatprep.subr.mxu1 %v1586_v6  ;;  %v1391_v4 = vld [vmem:[%s3329_s7 + $0x40] sm:$0xff]  ;;  %v1406_v5 = vld [vmem:[%s3329_s7 + $0xb8] sm:$0xff] }
 0x15f   :  { %1123 = vmatpush1.msra.mxu0 %v1555_v7  ;;  %1233 = vmatpush1.msra.mxu1 %v1585_v8  ;;  %v1390_v6 = vld [vmem:[%s3329_s7 + $0x38] sm:$0xff]  ;;  %v1405_v7 = vld [vmem:[%s3329_s7 + $0xb0] sm:$0xff] }
 0x160   :  { %1124 = vmatprep.subr.mxu0 %v1554_v9  ;;  %1234 = vmatprep.subr.mxu1 %v1584_v10  ;;  %v1389_v8 = vld [vmem:[%s3329_s7 + $0x30] sm:$0xff]  ;;  %v1404_v9 = vld [vmem:[%s3329_s7 + $0xa8] sm:$0xff] }
 0x161   :  { %1125 = vmatpush1.msra.mxu0 %v1553_v11  ;;  %1235 = vmatpush1.msra.mxu1 %v1583_v12  ;;  %v1388_v10 = vld [vmem:[%s3329_s7 + $0x28] sm:$0xff]  ;;  %v1403_v11 = vld [vmem:[%s3329_s7 + $0xa0] sm:$0xff] }
 0x162   :  { %1126 = vmatprep.subr.mxu0 %v1552_v13  ;;  %1236 = vmatprep.subr.mxu1 %v1582_v14  ;;  %v1387_v12 = vld [vmem:[%s3329_s7 + $0x20] sm:$0xff]  ;;  %v1402_v13 = vld [vmem:[%s3329_s7 + $0x98] sm:$0xff] }
 0x163   :  { %1127 = vmatpush1.msra.mxu0 %v1551_v15  ;;  %1237 = vmatpush1.msra.mxu1 %v1581_v16  ;;  %v1386_v14 = vld [vmem:[%s3329_s7 + $0x18] sm:$0xff]  ;;  %v1401_v15 = vld [vmem:[%s3329_s7 + $0x90] sm:$0xff] }
 0x164   :  { %1128 = vmatprep.subr.mxu0 %v1550_v18  ;;  %1238 = vmatprep.subr.mxu1 %v1580_v19  ;;  %v1385_v16 = vld [vmem:[%s3329_s7 + $0x10] sm:$0xff]  ;;  %v1400_v18 = vld [vmem:[%s3329_s7 + $0x88] sm:$0xff] }
 0x165   :  { %1129 = vmatpush1.msra.mxu0 %v1549_v20  ;;  %1239 = vmatpush1.msra.mxu1 %v1579_v21  ;;  %v1384_v19 = vld [vmem:[%s3329_s7 + $0x8] sm:$0xff]  ;;  %v1399_v20 = vld [vmem:[%s3329_s7 + $0x80] sm:$0xff] }
 0x166   :  { %1130 = vmatprep.subr.mxu0 %v1548_v22  ;;  %1240 = vmatprep.subr.mxu1 %v1578_v23  ;;  %v1383_v21 = vld [vmem:[%s3329_s7] sm:$0xff]  ;;  %v1297_v22 = vlaneseq }
 0x167   :  { %1131 = vmatpush1.msra.mxu0 %v1547_v24  ;;  %1241 = vmatpush1.msra.mxu1 %v1577_v25 }
 0x168   :  { %1132 = vmatprep.subr.mxu0 %v1546_v26  ;;  %1242 = vmatprep.subr.mxu1 %v1576_v27  ;;  %v1298_v23 = vshrl.u32 %v1297_v22, 7 }
 0x169   :  { %1133 = vmatpush1.msra.mxu0 %v1545_v28  ;;  %1243 = vmatpush1.msra.mxu1 %v1575_v29  ;;  %v1295_v29 = vld [vmem:[%s3326_s4] sm:$0x3] }
 0x16a   :  { %1134 = vmatprep.subr.mxu0 %v1544_v30  ;;  %1244 = vmatprep.subr.mxu1 %v1574_v31  ;;  %v3296_v26 = vsub.s32 0, %v1298_v23  ;;  %v3301_v31 = vsub.s32 1, %v1298_v23 }
 0x16b   :  { %1135 = vmatpush1.msra.mxu0 %v1543_v32  ;;  %1245 = vmatpush1.msra.mxu1 %v1573_v33 }
 0x16c   :  { %1136 = vmatprep.subr.mxu0 %v1542_v34  ;;  %1246 = vmatprep.subr.mxu1 %v1572_v35 }
 0x16d   :  { %1137 = vmatpush1.msra.mxu0 %v1541_v36  ;;  %1247 = vmatpush1.msra.mxu1 %v1571_v37  ;;  %v1300_v36 = vrot.slane %v1295_v29, %v3296_v26 }
 0x16e   :  { %1138 = vmatprep.subr.mxu0 %v1540_v38  ;;  %1248 = vmatprep.subr.mxu1 %v1570_v39 }
 0x16f   :  { %1139 = vmatpush1.msra.mxu0 %v1539_v40  ;;  %1249 = vmatpush1.msra.mxu1 %v1569_v41  ;;  %v1304_v40 = vrot.slane %v1295_v29, %v3301_v31 }
 0x170   :  { %1140 = vmatprep.subr.mxu0 %v1538_v42  ;;  %1250 = vmatprep.subr.mxu1 %v1568_v43 }
 0x171   :  { %1141 = vmatpush1.msra.mxu0 %v1537_v44  ;;  %1251 = vmatpush1.msra.mxu1 %v1567_v45 }
 0x172   :  { %1142 = vmatprep.subr.mxu0 %v1536_v46  ;;  %1252 = vmatprep.subr.mxu1 %v1566_v47 }
 0x173   :  { %1143 = vmatpush1.msra.mxu0 %v1535_v48  ;;  %1253 = vmatpush1.msra.mxu1 %v1565_v49 }
 0x174   :  { %1144 = vmatprep.subr.mxu0 %v1534_v50  ;;  %1287 = vmatmul.mubr.f32.vlgmr.msra.gmra.mxu1 %v1220_v52 }
 0x175   :  { %1145 = vmatpush1.msra.mxu0 %v1533_v53  ;;  %1178 = vmatprep.mubr.f32.mxu0 %v1940_v17  ;;  %v1397_v17 = vld [vmem:[%s3329_s7 + $0x70] sm:$0xff] }
 0x176   :  { %1179 = vmatmul.mubr.f32.vlgmr.msra.gmra.mxu0 %v1112_v54  ;;  %1877 = vmatprep.subr.mxu0 %v1414_v55 }
 0x177   :  { %1878 = vmatpush3.msra.mxu0 %v1398_v56 }
 0x178   :  { %1879 = vmatprep.subr.mxu0 %v1413_v57 }
 0x179   :  { %1880 = vmatpush3.msra.mxu0 %v1397_v17 }
 0x17a   :  { %1881 = vmatprep.subr.mxu0 %v1412_v51 }
 0x17b   :  { %1882 = vmatpush3.msra.mxu0 %v1396_v58 }
 0x17c   :  { %1883 = vmatprep.subr.mxu0 %v1411_v59 }
 0x17d   :  { %1884 = vmatpush3.msra.mxu0 %v1395_v60 }
 0x17e   :  { %1885 = vmatprep.subr.mxu0 %v1410_v61 }
 0x17f   :  { %1886 = vmatpush3.msra.mxu0 %v1394_v62 }
 0x180   :  { %1887 = vmatprep.subr.mxu0 %v1409_v63 }
 0x181   :  { %1888 = vmatpush3.msra.mxu0 %v1393_v0 }
 0x182   :  { %1889 = vmatprep.subr.mxu0 %v1408_v1 }
 0x183   :  { %1890 = vmatpush3.msra.mxu0 %v1392_v2 }
 0x184   :  { %1891 = vmatprep.subr.mxu0 %v1407_v3 }
 0x185   :  { %1892 = vmatpush3.msra.mxu0 %v1391_v4 }
 0x186   :  { %1893 = vmatprep.subr.mxu0 %v1406_v5 }
 0x187   :  { %1894 = vmatpush3.msra.mxu0 %v1390_v6 }
 0x188   :  { %1895 = vmatprep.subr.mxu0 %v1405_v7 }
 0x189   :  { %1896 = vmatpush3.msra.mxu0 %v1389_v8 }
 0x18a   :  { %1897 = vmatprep.subr.mxu0 %v1404_v9 }
 0x18b   :  { %1898 = vmatpush3.msra.mxu0 %v1388_v10 }
 0x18c   :  { %1899 = vmatprep.subr.mxu0 %v1403_v11 }
 0x18d   :  { %1900 = vmatpush3.msra.mxu0 %v1387_v12 }
 0x18e   :  { %1901 = vmatprep.subr.mxu0 %v1402_v13 }
 0x18f   :  { %1902 = vmatpush3.msra.mxu0 %v1386_v14 }
 0x190   :  { %1903 = vmatprep.subr.mxu0 %v1401_v15 }
 0x191   :  { %1904 = vmatpush3.msra.mxu0 %v1385_v16 }
 0x192   :  { %1905 = vmatprep.subr.mxu0 %v1400_v18 }
 0x193   :  { %1906 = vmatpush3.msra.mxu0 %v1384_v19  ;;  %v1353_v19 = vld [vmem:[%s3327_s5] sm:$0x3]  ;;  %s1941_s5 = smov [#allocation2]  }
 0x194   :  { %1907 = vmatprep.subr.mxu0 %v1399_v20  ;;  %v1358_v20 = vrot.slane %v1353_v19, %v3296_v26 }
 0x195   :  { %1908 = vmatpush3.msra.mxu0 %v1383_v21  ;;  %v1367_v21 = vld [vmem:[%s3328_s6] sm:$0x3]  ;;  %s1492_s6 = sshll.u32 %s1941_s5, 4  ;;  %s1493_s6 = int_to_ptr.vmem [resolvable:$true] %s1492_s6 }
 0x196   :  { %v1376_v29 = vrot.slane %v1367_v21, %v3301_v31  ;;  %s1918_s23 = scalar_lea.vmem %s1493_s6, 32  ;;  %p1923_p1 = scmp.lt.s32.totalorder %s1493_s6, %s1493_s6 }
 0x197   :  { %p1919_p0 = scmp.ne.s32.totalorder %s1493_s6, %s1918_s23  ;;  %p1924_p2 = scmp.lt.s32.totalorder %s1918_s23, %s1918_s23 }
 0x199   :  { %p1925_p3 = por %p1924_p2, %p1923_p1 }
 0x19b   :  { %p1926_p4 = pnand %p1925_p3, %p1919_p0 }
 0x214   :  { %v1074_v24 = vpop.f32.mrf.mxu1 }
 0x216   :  { %v1003_v25 = vpop.f32.mrf.mxu0  ;;  %v1076_v27 = vpop.f32.mrf.mxu1 }
 0x217   :  { %v1075_v30 = vadd.f32 %v1074_v24, %v1003_v25  ;;  %v1362_v24 = vrot.slane %v1353_v19, %v3301_v31 }
 0x218   :  { %v1005_v28 = vpop.f32.mrf.mxu0 }
 0x219   :  { %v1077_v34 = vadd.f32 %v1076_v27, %v1005_v28  ;;  %v1372_v27 = vrot.slane %v1367_v21, %v3296_v26 }
 0x234   :  { %v1288_v32 = vpop.f32.mrf.mxu1 }
 0x236   :  { %v1180_v33 = vpop.f32.mrf.mxu0  ;;  %v1290_v41 = vpop.f32.mrf.mxu1 }
 0x237   :  { %v1185_v35 = vadd.f32 %v1180_v33, %v1075_v30 }
 0x238   :  { %v1182_v37 = vpop.f32.mrf.mxu0 }
 0x239   :  { %v1293_v38 = vadd.f32 %v1288_v32, %v1185_v35  ;;  %v1186_v39 = vadd.f32 %v1182_v37, %v1077_v34 }
 0x23b   :  { %v1307_v42 = vadd.f32 %v1300_v36, %v1293_v38  ;;  %v1294_v43 = vadd.f32 %v1290_v41, %v1186_v39 }
 0x23d   :  { %v1310_v44 = vsel %vm1309_vm0, %v1307_v42, 0.0  ;;  %v1308_v45 = vadd.f32 %v1304_v40, %v1294_v43 }
 0x23e   :  { %v1311_v46 = vrot.slane %v1310_v44, 4 }
 0x23f   :  { %v1317_v47 = vsel %vm1309_vm0, %v1308_v45, 0.0 }
 0x240   :  { %v1312_v48 = vadd.f32 %v1311_v46, %v1310_v44  ;;  %v1318_v49 = vrot.slane %v1317_v47, 4 }
 0x242   :  { %v1313_v50 = vrot.slane %v1312_v48, 2  ;;  %v1319_v52 = vadd.f32 %v1318_v49, %v1317_v47 }
 0x244   :  { %v1314_v53 = vadd.f32 %v1313_v50, %v1312_v48  ;;  %v1320_v54 = vrot.slane %v1319_v52, 2 }
 0x246   :  { %v1315_v55 = vrot.slane %v1314_v53, 1  ;;  %v1321_v56 = vadd.f32 %v1320_v54, %v1319_v52 }
 0x248   :  { %v1316_v57 = vadd.f32 %v1315_v55, %v1314_v53  ;;  %v1322_v17 = vrot.slane %v1321_v56, 1 }
 0x24a   :  { %v1325_v51 = vmul.f32 0.5, %v1316_v57  ;;  %v1323_v58 = vadd.f32 %v1322_v17, %v1321_v56 }
 0x24c   :  { %v1327_v59 = vsub.f32 %v1307_v42, %v1325_v51  ;;  %v1326_v60 = vmul.f32 0.5, %v1323_v58 }
 0x24e   :  { %v1329_v61 = vmul.f32 %v1327_v59, %v1327_v59  ;;  %v1328_v62 = vsub.f32 %v1308_v45, %v1326_v60 }
 0x250   :  { %v1331_v63 = vsel %vm1309_vm0, %v1329_v61, 0.0  ;;  %v1330_v0 = vmul.f32 %v1328_v62, %v1328_v62 }
 0x251   :  { %v1332_v1 = vrot.slane %v1331_v63, 4 }
 0x252   :  { %v1338_v2 = vsel %vm1309_vm0, %v1330_v0, 0.0 }
 0x253   :  { %v1333_v3 = vadd.f32 %v1332_v1, %v1331_v63  ;;  %v1339_v4 = vrot.slane %v1338_v2, 4 }
 0x255   :  { %v1334_v5 = vrot.slane %v1333_v3, 2  ;;  %v1340_v6 = vadd.f32 %v1339_v4, %v1338_v2 }
 0x257   :  { %v1335_v7 = vadd.f32 %v1334_v5, %v1333_v3  ;;  %v1341_v8 = vrot.slane %v1340_v6, 2 }
 0x259   :  { %v1336_v9 = vrot.slane %v1335_v7, 1  ;;  %v1342_v10 = vadd.f32 %v1341_v8, %v1340_v6 }
 0x25b   :  { %v1337_v11 = vadd.f32 %v1336_v9, %v1335_v7  ;;  %v1343_v12 = vrot.slane %v1342_v10, 1 }
 0x25d   :  { %v1345_v13 = vmul.f32 0.5, %v1337_v11  ;;  %v1344_v14 = vadd.f32 %v1343_v12, %v1342_v10 }
 0x25f   :  { %v1347_v15 = vadd.f32 1e-05, %v1345_v13  ;;  %v1346_v16 = vmul.f32 0.5, %v1344_v14 }
 0x261   :  { %1914 = vrsqrt.f32 %v1347_v15  ;;  %v1348_v18 = vadd.f32 1e-05, %v1346_v16 }
 0x263   :  { %1916 = vrsqrt.f32 %v1348_v18 }
 0x26e   :  { %v1915_v22 = vpop.eup %1914 }
 0x26f   :  { %v1351_v23 = vmul.f32 %v1915_v22, %v1327_v59 }
 0x270   :  { %v1917_v25 = vpop.eup %1916 }
 0x271   :  { %v1352_v28 = vmul.f32 %v1917_v25, %v1328_v62  ;;  %v1365_v30 = vmul.f32 %v1358_v20, %v1351_v23 }
 0x273   :  { %v1366_v32 = vmul.f32 %v1362_v24, %v1352_v28  ;;  %v1379_v33 = vadd.f32 %v1372_v27, %v1365_v30 }
 0x275   :  { %v1380_v34 = vadd.f32 %v1376_v29, %v1366_v32  ;;  %v1381_v36 = vmax.f32 %v1379_v33, 0.0 }
 0x277   :  { %v1382_v35 = vmax.f32 %v1380_v34, 0.0 }
 0x279   :  { %1479 = vmatprep.mubr.f32.mxu0 %v1382_v35 }
 0x27a   :  { %1480 = vmatmul.mubr.f32.vlgmr.msra.gmra.mxu0 %v1381_v36 }
 0x33a   :  { %v1909_v37 = vpop.f32.mrf.mxu0 }
 0x33c   :  { %v1910_v38 = vpop.f32.mrf.mxu0 }
 0x33d   :  { %v1911_v39 = vadd.f32 %v1910_v38, %v1909_v37 }
 0x33f   :  { %1485 = vst [vmem:[#allocation2] sm:$0x3] %v1911_v39 }
 0x340   :  { %1929 = shalt.err (!%p1926_p4)
}
 0x341   :  { %1495 = dma.vmem_to_hbm [thread:$0]  %s1493_s6, 32, %s3330_s8, [#allocation3]  }
 0x342   :  { %1938 = dma.done.wait [#allocation3], 32  }
 0x343   :  { %1939 = vsyncadd [#allocation3], 4294967264 }
 0x344   :  { %1499 = vsyncpa [#allocation3], 1 }

</bundles_post_ra>
